<compile_context>
chip_gen: v5e
topology: v5e:2x2
jax: 0.10.0
libtpu: 0.0.40
codegen_flags: <defaults>
</compile_context>

<pallas_src>
import functools

import jax
import jax.numpy as jnp
from jax.experimental import pallas as pl
from jax.experimental.pallas import tpu as pltpu


def conv3x3_triple_add_kernel(H, W, x_ref, w_ref, b_ref, u_ref, o_ref, acc_ref):
    # x_ref : (1, (H+2)*W, 3*Cin) bf16  dx-concatenated, zero-padded flattened rows
    # w_ref : (3, 3*Cin, CB)      bf16  per-dy weight slabs (dx folded into K)
    # b_ref : (1, CB)             f32
    # u_ref : (1, H*W, CB)        f32
    # o_ref : (1, H*W, CB)        f32
    # acc_ref: (H*W, CB)          f32 VMEM scratch
    L = H * W
    for dy in range(3):
        # Offset dy*W is a multiple of 16 -> free (aligned) view for bf16 tiles.
        patch = x_ref[0, dy * W:dy * W + L, :]                     # (L, 3*Cin) contiguous
        d = jnp.dot(patch, w_ref[dy], preferred_element_type=jnp.float32)  # (L, CB) f32
        if dy == 0:
            acc_ref[...] = d
        else:
            acc_ref[...] += d

    # ((u+t1)+(u+t2))+(u+t3) with t1==t2==t3  ==  3*(u + conv + bias)
    o_ref[...] = (3.0 * (u_ref[...] + acc_ref[...] + b_ref[...])).astype(o_ref.dtype)


def model_forward(u_nchw, key_nchw, w_oihw, bias):
    N, Cin, H, W = key_nchw.shape
    Cout = w_oihw.shape[0]
    # Full-Cout tile fills the 256-wide MXU (v6e/v7x); falls back cleanly.
    CB = 256 if Cout % 256 == 0 else (128 if Cout % 128 == 0 else Cout)
    HP = H + 2
    L = H * W

    # NCHW -> NHWC (channels land on the 128-lane axis).
    # TODO(synk): these boundary transposes are plain XLA ops; keeping the
    # surrounding model NHWC end-to-end would remove them entirely.
    u = jnp.transpose(u_nchw, (0, 2, 3, 1)).astype(jnp.float32).reshape(N, L, Cout)
    x = jnp.transpose(key_nchw, (0, 2, 3, 1)).astype(jnp.bfloat16)

    # Zero pad 1 on each spatial side, then hoist the dx shift: concatenate the
    # 3 horizontal taps along channels so K = 3*Cin and the in-kernel dy slices
    # are contiguous, sublane-aligned views (row pitch = W, no junk columns).
    x_pad = jnp.pad(x, ((0, 0), (1, 1), (1, 1), (0, 0)))            # (N, H+2, W+2, Cin)
    xcat = jnp.concatenate([x_pad[:, :, dx:dx + W, :] for dx in range(3)], axis=-1)
    x_flat = xcat.reshape(N, HP * W, 3 * Cin)                        # (N, (H+2)*W, 3*Cin)

    # OIHW -> HWIO -> (dy, dx*Cin + ci, Cout), matching xcat's channel order.
    w_cat = jnp.transpose(w_oihw, (2, 3, 1, 0)).reshape(3, 3 * Cin, Cout).astype(jnp.bfloat16)
    b = bias.reshape(1, Cout).astype(jnp.float32)

    kernel = functools.partial(conv3x3_triple_add_kernel, H, W)

    out_flat = pl.pallas_call(
        kernel,
        out_shape=jax.ShapeDtypeStruct((N, L, Cout), jnp.float32),
        grid_spec=pltpu.PrefetchScalarGridSpec(
            num_scalar_prefetch=0,
            grid=(N, Cout // CB),
            in_specs=[
                pl.BlockSpec((1, HP * W, 3 * Cin), lambda n, j: (n, 0, 0)),
                pl.BlockSpec((3, 3 * Cin, CB),     lambda n, j: (0, 0, j)),
                pl.BlockSpec((1, CB),              lambda n, j: (0, j)),
                pl.BlockSpec((1, L, CB),           lambda n, j: (n, 0, j)),
            ],
            out_specs=pl.BlockSpec((1, L, CB), lambda n, j: (n, 0, j)),
            scratch_shapes=[pltpu.VMEM((L, CB), jnp.float32)],
        ),
        compiler_params=pltpu.CompilerParams(
            dimension_semantics=("parallel", "parallel")),
    )(x_flat, w_cat, b, u)

    # (N, H*W, Cout) -> NCHW
    out_nhwc = out_flat.reshape(N, H, W, Cout)
    return jnp.transpose(out_nhwc, (0, 3, 1, 2))


if __name__ == "__main__":
    # Small-but-consistent shapes: channels must be 256 (Conv2d(256,256,3));
    # stride=1 / padding=1 preserves spatial dims so u matches conv(key).
    N, C, H, W = 2, 256, 16, 16

    k0, k1, k2, k3 = jax.random.split(jax.random.PRNGKey(0), 4)
    key_nchw = jax.random.normal(k0, (N, C, H, W), dtype=jnp.float32)
    u_nchw = jax.random.normal(k1, (N, C, H, W), dtype=jnp.float32)

    # Deterministic Conv2d(256, 256, 3) params (PyTorch-style uniform init).
    fan_in = C * 3 * 3
    bound = 1.0 / (fan_in ** 0.5)
    w_oihw = jax.random.uniform(k2, (C, C, 3, 3), jnp.float32, -bound, bound)
    bias = jax.random.uniform(k3, (C,), jnp.float32, -bound, bound)

    out = jax.block_until_ready(model_forward(u_nchw, key_nchw, w_oihw, bias))

    # Pure-JAX reference.  The kernel feeds bf16 operands to the MXU (f32
    # accumulation), so the reference uses the same operand precision.
    conv_ref = jax.lax.conv_general_dilated(
        key_nchw.astype(jnp.bfloat16), w_oihw.astype(jnp.bfloat16),
        window_strides=(1, 1), padding=((1, 1), (1, 1)),
        dimension_numbers=("NCHW", "OIHW", "NCHW"),
        preferred_element_type=jnp.float32,
    ) + bias[None, :, None, None]
    t4 = u_nchw + conv_ref
    ref = (t4 + t4) + t4

    assert out.shape == (N, C, H, W)
    max_err = float(jnp.max(jnp.abs(out - ref)))
    assert jnp.allclose(out, ref, rtol=1e-2, atol=1e-2), f"max abs err {max_err}"
    print("KERNEL_OK")
</pallas_src>

<mosaic_0001>
module attributes {stable_mosaic.version = 11 : i64} {
  func.func @conv3x3_triple_add_kernel(%arg0: i32, %arg1: i32, %arg2: memref<1x288x768xbf16, #tpu.memory_space<vmem>>, %arg3: memref<3x768x256xbf16, #tpu.memory_space<vmem>>, %arg4: memref<1x256xf32, #tpu.memory_space<vmem>>, %arg5: memref<1x256x256xf32, #tpu.memory_space<vmem>>, %arg6: memref<1x256x256xf32, #tpu.memory_space<vmem>>, %arg7: memref<256x256xf32, #tpu.memory_space<vmem>>) attributes {dimension_semantics = [#tpu.dimension_semantics<parallel>, #tpu.dimension_semantics<parallel>], iteration_bounds = array<i64: 2, 1>, scalar_prefetch = 0 : i64, scratch_operands = 1 : i64, tpu.core_type = #tpu.core_type<tc>, window_params = [{transform_indices = @transform_0, window_bounds = array<i64: 1, 288, 768>}, {transform_indices = @transform_1, window_bounds = array<i64: 3, 768, 256>}, {transform_indices = @transform_2, window_bounds = array<i64: 1, 256>}, {transform_indices = @transform_3, window_bounds = array<i64: 1, 256, 256>}, {transform_indices = @transform_4, window_bounds = array<i64: 1, 256, 256>}]} {
    %c0 = arith.constant 0 : index
    %c0_0 = arith.constant 0 : index
    %c0_1 = arith.constant 0 : index
    %0 = vector.load %arg2[%c0, %c0_0, %c0_1] : memref<1x288x768xbf16, #tpu.memory_space<vmem>>, vector<1x256x768xbf16>
    %1 = vector.shape_cast %0 : vector<1x256x768xbf16> to vector<256x768xbf16>
    %c0_2 = arith.constant 0 : index
    %c0_3 = arith.constant 0 : index
    %c0_4 = arith.constant 0 : index
    %2 = vector.load %arg3[%c0_2, %c0_3, %c0_4] : memref<3x768x256xbf16, #tpu.memory_space<vmem>>, vector<1x768x256xbf16>
    %3 = vector.shape_cast %2 : vector<1x768x256xbf16> to vector<768x256xbf16>
    %cst = arith.constant dense<0.000000e+00> : vector<256x256xf32>
    %4 = tpu.matmul %1, %3, %cst {dimension_numbers = #tpu.dot_dimension_numbers<[1], [0], [0], [1], [0, 0, 1, 1], [], []>} : vector<256x768xbf16>, vector<768x256xbf16>, vector<256x256xf32> -> vector<256x256xf32>
    %c0_5 = arith.constant 0 : index
    %c0_6 = arith.constant 0 : index
    %5 = vector.load %arg7[%c0_5, %c0_6] : memref<256x256xf32, #tpu.memory_space<vmem>>, vector<256x256xf32>
    tpu.vector_store %arg7[%c0_5, %c0_6], %4 {strides = array<i32>} : memref<256x256xf32, #tpu.memory_space<vmem>>, vector<256x256xf32>,
    %c0_7 = arith.constant 0 : index
    %c16 = arith.constant 16 : index
    %c0_8 = arith.constant 0 : index
    %6 = vector.load %arg2[%c0_7, %c16, %c0_8] : memref<1x288x768xbf16, #tpu.memory_space<vmem>>, vector<1x256x768xbf16>
    %7 = vector.shape_cast %6 : vector<1x256x768xbf16> to vector<256x768xbf16>
    %c1 = arith.constant 1 : index
    %c0_9 = arith.constant 0 : index
    %c0_10 = arith.constant 0 : index
    %8 = vector.load %arg3[%c1, %c0_9, %c0_10] : memref<3x768x256xbf16, #tpu.memory_space<vmem>>, vector<1x768x256xbf16>
    %9 = vector.shape_cast %8 : vector<1x768x256xbf16> to vector<768x256xbf16>
    %cst_11 = arith.constant dense<0.000000e+00> : vector<256x256xf32>
    %10 = tpu.matmul %7, %9, %cst_11 {dimension_numbers = #tpu.dot_dimension_numbers<[1], [0], [0], [1], [0, 0, 1, 1], [], []>} : vector<256x768xbf16>, vector<768x256xbf16>, vector<256x256xf32> -> vector<256x256xf32>
    %c0_12 = arith.constant 0 : index
    %c0_13 = arith.constant 0 : index
    %11 = vector.load %arg7[%c0_12, %c0_13] : memref<256x256xf32, #tpu.memory_space<vmem>>, vector<256x256xf32>
    %12 = arith.addf %11, %10 : vector<256x256xf32>
    %c0_14 = arith.constant 0 : index
    %c0_15 = arith.constant 0 : index
    %13 = vector.load %arg7[%c0_14, %c0_15] : memref<256x256xf32, #tpu.memory_space<vmem>>, vector<256x256xf32>
    tpu.vector_store %arg7[%c0_14, %c0_15], %12 {strides = array<i32>} : memref<256x256xf32, #tpu.memory_space<vmem>>, vector<256x256xf32>,
    %c0_16 = arith.constant 0 : index
    %c32 = arith.constant 32 : index
    %c0_17 = arith.constant 0 : index
    %14 = vector.load %arg2[%c0_16, %c32, %c0_17] : memref<1x288x768xbf16, #tpu.memory_space<vmem>>, vector<1x256x768xbf16>
    %15 = vector.shape_cast %14 : vector<1x256x768xbf16> to vector<256x768xbf16>
    %c2 = arith.constant 2 : index
    %c0_18 = arith.constant 0 : index
    %c0_19 = arith.constant 0 : index
    %16 = vector.load %arg3[%c2, %c0_18, %c0_19] : memref<3x768x256xbf16, #tpu.memory_space<vmem>>, vector<1x768x256xbf16>
    %17 = vector.shape_cast %16 : vector<1x768x256xbf16> to vector<768x256xbf16>
    %cst_20 = arith.constant dense<0.000000e+00> : vector<256x256xf32>
    %18 = tpu.matmul %15, %17, %cst_20 {dimension_numbers = #tpu.dot_dimension_numbers<[1], [0], [0], [1], [0, 0, 1, 1], [], []>} : vector<256x768xbf16>, vector<768x256xbf16>, vector<256x256xf32> -> vector<256x256xf32>
    %c0_21 = arith.constant 0 : index
    %c0_22 = arith.constant 0 : index
    %19 = vector.load %arg7[%c0_21, %c0_22] : memref<256x256xf32, #tpu.memory_space<vmem>>, vector<256x256xf32>
    %20 = arith.addf %19, %18 : vector<256x256xf32>
    %c0_23 = arith.constant 0 : index
    %c0_24 = arith.constant 0 : index
    %21 = vector.load %arg7[%c0_23, %c0_24] : memref<256x256xf32, #tpu.memory_space<vmem>>, vector<256x256xf32>
    tpu.vector_store %arg7[%c0_23, %c0_24], %20 {strides = array<i32>} : memref<256x256xf32, #tpu.memory_space<vmem>>, vector<256x256xf32>,
    %c0_25 = arith.constant 0 : index
    %c0_26 = arith.constant 0 : index
    %c0_27 = arith.constant 0 : index
    %22 = vector.load %arg5[%c0_25, %c0_26, %c0_27] : memref<1x256x256xf32, #tpu.memory_space<vmem>>, vector<1x256x256xf32>
    %c0_28 = arith.constant 0 : index
    %c0_29 = arith.constant 0 : index
    %23 = vector.load %arg7[%c0_28, %c0_29] : memref<256x256xf32, #tpu.memory_space<vmem>>, vector<256x256xf32>
    %24 = vector.shape_cast %23 : vector<256x256xf32> to vector<1x256x256xf32>
    %25 = arith.addf %22, %24 : vector<1x256x256xf32>
    %c0_30 = arith.constant 0 : index
    %c0_31 = arith.constant 0 : index
    %26 = vector.load %arg4[%c0_30, %c0_31] : memref<1x256xf32, #tpu.memory_space<vmem>>, vector<1x256xf32>
    %27 = vector.shape_cast %26 : vector<1x256xf32> to vector<1x1x256xf32>
    %28 = vector.broadcast %27 : vector<1x1x256xf32> to vector<1x256x256xf32>
    %29 = arith.addf %25, %28 : vector<1x256x256xf32>
    %cst_32 = arith.constant 3.000000e+00 : f32
    %30 = vector.broadcast %cst_32 : f32 to vector<1x256x256xf32>
    %31 = arith.mulf %30, %29 : vector<1x256x256xf32>
    %c0_33 = arith.constant 0 : index
    %c0_34 = arith.constant 0 : index
    %c0_35 = arith.constant 0 : index
    %32 = vector.load %arg6[%c0_33, %c0_34, %c0_35] : memref<1x256x256xf32, #tpu.memory_space<vmem>>, vector<1x256x256xf32>
    tpu.vector_store %arg6[%c0_33, %c0_34, %c0_35], %31 {strides = array<i32>} : memref<1x256x256xf32, #tpu.memory_space<vmem>>, vector<1x256x256xf32>,
    return
  }
  func.func @transform_0(%arg0: i32, %arg1: i32) -> (i32, i32, i32) {
    %c0_i32 = arith.constant 0 : i32
    %c0_i32_0 = arith.constant 0 : i32
    %c0_i32_1 = arith.constant 0 : i32
    return %arg0, %c0_i32, %c0_i32_0 : i32, i32, i32
  }
  func.func @transform_1(%arg0: i32, %arg1: i32) -> (i32, i32, i32) {
    %c0_i32 = arith.constant 0 : i32
    %c0_i32_0 = arith.constant 0 : i32
    %c0_i32_1 = arith.constant 0 : i32
    return %c0_i32, %c0_i32_0, %arg1 : i32, i32, i32
  }
  func.func @transform_2(%arg0: i32, %arg1: i32) -> (i32, i32) {
    %c0_i32 = arith.constant 0 : i32
    %c0_i32_0 = arith.constant 0 : i32
    return %c0_i32, %arg1 : i32, i32
  }
  func.func @transform_3(%arg0: i32, %arg1: i32) -> (i32, i32, i32) {
    %c0_i32 = arith.constant 0 : i32
    %c0_i32_0 = arith.constant 0 : i32
    return %arg0, %c0_i32, %arg1 : i32, i32, i32
  }
  func.func @transform_4(%arg0: i32, %arg1: i32) -> (i32, i32, i32) {
    %c0_i32 = arith.constant 0 : i32
    %c0_i32_0 = arith.constant 0 : i32
    return %arg0, %c0_i32, %arg1 : i32, i32, i32
  }
}

</mosaic_0001>

<bundles_post_ra>
// kernel: tpu_custom_call.1
= control target key start
LH: loop header
LB: loop body
LE: loop exit
PB: predicated region body
PF: predicated region fallthrough
CT: control target
= control target key end

     0   :  { %s14293_s0 = inlined_call_operand.hbm [shape: bf16[2,288,768], index: 0, kind: input, shape index: {}]   ;;  %s14294_s1 = inlined_call_operand.hbm [shape: bf16[3,768,256], index: 1, kind: input, shape index: {}]   ;;  %s14295_s2 = inlined_call_operand.hbm [shape: f32[1,256], index: 2, kind: input, shape index: {}]   ;;  %s14296_s3 = inlined_call_operand.hbm [shape: f32[2,256,256], index: 3, kind: input, shape index: {}]   ;;  %s14297_s4 = inlined_call_operand.hbm [shape: f32[2,256,256], index: 4, kind: output, shape index: {}]  }
   0x1   :  { %14444 = sst [smem:[#allocation139_spill]] %s14294_s1 }
   0x2   :  { %14445 = sst [smem:[#allocation140_spill]] %s14295_s2 }
   0x3   :  { %9 = vsyncpa [#allocation4], 0 }
   0x4   :  { %11 = vsyncpa [#allocation4 + $0x1], 0 }
   0x5   :  { %12 = vsyncpa [#allocation7], 0 }
   0x6   :  { %13 = vsyncpa [#allocation10], 0 }
   0x7   :  { %15 = vsyncpa [#allocation10 + $0x1], 0 }
   0x8   :  { %16 = vsyncpa [#allocation5], 0 }
   0x9   :  { %18 = vsyncpa [#allocation5 + $0x1], 0  ;;  %s11228_s15 = smov 0   ;;  %s11230_s16 = smov 0  }
   0xa   :  { %s11232_s17 = smov 0   ;;  %s11234_s18 = smov 0  }
   0xb   :  { %s11236_s19 = smov 0   ;;  %s11238_s20 = smov 0  }
   0xc LB: > { %14446 = sst [smem:[#allocation16_spill]] %s11179_s17  ;;  %s7979_s21 = sadd.s32 4294967295, %s11191_s20   ;;  %s11191_s20 = sphi %s11238_s20, %s24_s20   ;;  %s11187_s19 = sphi %s11236_s19, %s15049_s19   ;;  %s11183_s18 = sphi %s11234_s18, %s15048_s18   ;;  %s11179_s17 = sphi %s11232_s17, %s15047_s17   ;;  %s11175_s16 = sphi %s11230_s16, %s15046_s16   ;;  %s11171_s15 = sphi %s11228_s15, %s15045_s15  }
   0xd   : > { %s7980_s22 = sadd.s32 4294967294, %s11191_s20   ;;  %p56_p0 = scmp.ne.s32.totalorder %s11175_s16, %s11171_s15 }
   0xe   : > { %p11262_p1 = scmp.eq.s32.totalorder %s7979_s21, 0  ;;  %p11266_p2 = scmp.eq.s32.totalorder %s7979_s21, 1 }
   0xf   : > { %p168_p3 = scmp.eq.s32.totalorder %s7980_s22, 1  ;;  %p7981_p5 = scmp.ge.s32.totalorder %s11191_s20, 1 }
  0x10   : > { %p11272_p4 = por %p11262_p1, %p56_p0  ;;  %p175_p7 = scmp.lt.s32.totalorder %s11191_s20, 3 }
  0x11   : > { %p11277_p6 = por %p168_p3, %p56_p0  ;;  %s14451_s1 = sld [smem:[#allocation139_spill]] }
  0x12   : > { %p11285_p8 = pnand %p7981_p5, %p175_p7  ;;  %s11193_s5 = smov [#allocation6]  }
  0x13   : > { %s191_s6 = sshll.u32 %s11193_s5, 4  ;;  %p7984_p11 = scmp.ge.s32.totalorder %s11191_s20, 2  ;;  %s192_s6 = int_to_ptr.vmem [resolvable:$true] %s191_s6 }
  0x14   : > { %p10898_p9 = pneg %p11285_p8  ;;  %s14453_s2 = sld [smem:[#allocation140_spill]] }
  0x15   : > { %s11194_s10 = smov 128   ;;  %s11195_s11 = smov 8  }
  0x16   : > { %p10899_p10 = pnand %p10898_p9, %p11262_p1  ;;  %s11196_s12 = smov [#allocation8]  }
  0x17   : > { %s189_s29 = sshll.u32 %s14451_s1, 4  ;;  %s208_s13 = sshll.u32 %s11196_s12, 4  ;;  %s190_s29 = int_to_ptr.hbm [resolvable:$true] %s189_s29  ;;  %s209_s13 = int_to_ptr.vmem [resolvable:$true] %s208_s13 }
  0x18   : > { %10901 = dma.hbm_to_vmem [thread:$0]  (!%p10899_p10), %s190_s29, 36864, %s192_s6, [#allocation7], %s11194_s10, %s11194_s10, %s11195_s11  }
  0x19   : > { %s36_s14 = sadd.s32 1, %s11187_s19  ;;  %s43_s21 = sadd.s32 1, %s11179_s17 }
  0x1a   : > { %s206_s9 = sshll.u32 %s14453_s2, 4  ;;  %p38_p12 = scmp.ge.s32.totalorder %s36_s14, 2  ;;  %s207_s9 = int_to_ptr.hbm [resolvable:$true] %s206_s9 }
  0x1b   : > { %10904 = dma.hbm_to_vmem [thread:$0]  (!%p10899_p10), %s207_s9, 32, %s209_s13, [#allocation7]  }
  0x1c   : > { %p50_p13 = scmp.ne.s32.totalorder %s11179_s17, %s11175_s16  ;;  %p51_p0 = scmp.eq.s32.totalorder %s11191_s20, 0 }
  0x1d   : > { %p10918_p3 = scmp.lt.s32.totalorder %s11191_s20, 2  ;;  %s15051_s14 = smov (%p38_p12, %s36_s14), 0 }
  0x1e   : > { %14454 = sst [smem:[#allocation17_spill]] %s15051_s14  ;;  %p52_p5 = por %p51_p0, %p50_p13 }
  0x1f   : > { %p11307_p7 = por %p11266_p2, %p50_p13  ;;  %s40_s27 = ssub.s32 %s11187_s19, %s15051_s14 }
  0x20   : > { %s11314_s28 = sand.u32 1, %s11179_s17   ;;  %p41_p9 = scmp.eq.s32.totalorder %s40_s27, 0 }
  0x21   : > { %s10881_s29 = smul.u32 864, %s11314_s28  ;;  %p11317_p10 = pnand %p10918_p3, %p52_p5 }
  0x22   : > { %s11322_s6 = scalar_select %p41_p9, %s11179_s17, %s43_s21  }
  0x23   : > { %s10882_s24 = smul.u32 864, %s11187_s19  ;;  %s223_s7 = scalar_lea.vmem [#allocation3], %s10881_s29 }
  0x24   : > { %14457 = sst [smem:[#allocation18_spill]] %s11322_s6  ;;  %s231_s8 = sshll.u32 %s223_s7, 4  ;;  %s232_s8 = int_to_ptr.vmem [resolvable:$true] %s231_s8 }
  0x25   : > { %s228_s11 = scalar_lea.hbm %s14293_s0, %s10882_s24  ;;  %s220_s13 = scalar_lea.sflag [#allocation4], %s11314_s28 }
  0x26   : > { %s229_s12 = sshll.u32 %s228_s11, 4  ;;  %s11197_s27 = smov 384   ;;  %s230_s12 = int_to_ptr.hbm [resolvable:$true] %s229_s12 }
  0x27   : > { %s11198_s1 = smov 24   ;;  %s7986_s2 = sshll.u32 %s11314_s28, 9 }
  0x28   : > { %10908 = dma.hbm_to_vmem [thread:$0]  (!%p11317_p10), %s230_s12, 13824, %s232_s8, %s220_s13, %s11197_s27, %s11197_s27, %s11198_s1  }
  0x29   : > { %s10303_s21 = sshll.u32 %s11187_s19, 9  ;;  %s245_s7 = scalar_lea.vmem [#allocation9], %s7986_s2 }
  0x2a   : > { %s252_s29 = scalar_lea.hbm %s14296_s3, %s10303_s21  ;;  %s255_s17 = sshll.u32 %s245_s7, 4  ;;  %s256_s17 = int_to_ptr.vmem [resolvable:$true] %s255_s17 }
  0x2b   : > { %s253_s9 = sshll.u32 %s252_s29, 4  ;;  %s242_s24 = scalar_lea.sflag [#allocation10], %s11314_s28  ;;  %s254_s9 = int_to_ptr.hbm [resolvable:$true] %s253_s9 }
  0x2c   : > { %s11199_s10 = smov 256   ;;  %s11200_s11 = smov 16  }
  0x2d   : > { %10911 = dma.hbm_to_vmem [thread:$0]  (!%p11317_p10), %s254_s9, 8192, %s256_s17, %s242_s24, %s11199_s10, %s11199_s10, %s11200_s11  }
  0x2e   : > { %267 = sbr.rel (%p11285_p8) target bundleno = 2541 (0x9ed), region = 36 }
  0x33   : > { %s11342_s1 = sand.u32 1, %s11175_s16  }
  0x34   : > { %s10883_s14 = smul.u32 864, %s11342_s1  ;;  %s270_s2 = scalar_lea.sflag [#allocation4], %s11342_s1 }
  0x36   : > { %s11346_s6 = scalar_lea.vmem [#allocation3], %s10883_s14 }
  0x37   : > { %11154 = dma.done.wait (%p11272_p4), %s270_s2, 13824  }
  0x38   : > { %11156 = vsyncadd (%p11272_p4), %s270_s2, 4294953472 }
  0x39   : > { %11158 = dma.done.wait (%p11262_p1), [#allocation7], 36896  }
  0x3a   : > { %11160 = vsyncadd (%p11262_p1), [#allocation7], 4294930400  ;;  %s7992_s17 = sshll.u32 %s11342_s1, 9  ;;  %s290_s30 = scalar_lea.sflag [#allocation10], %s11342_s1 }
  0x3b   : > { %s11360_s28 = scalar_lea.vmem [#allocation9], %s7992_s17 }
  0x3c   : > { %11162 = dma.done.wait (%p11272_p4), %s290_s30, 8192  }
  0x3d   : > { %11164 = vsyncadd (%p11272_p4), %s290_s30, 4294959104  ;;  %v8436_v0 = vld [vmem:[#allocation6 + $0x70] sm:$0xf]  ;;  %v10415_v1 = vld [vmem:[#allocation6 + $0x74] sm:$0xf0]  ;;  %s13730_s23 = scalar_lea.vmem [#allocation11], %s7992_s17 }
  0x3e   : > { %v8500_v2 = vld [vmem:[#allocation6 + $0xf0] sm:$0xf]  ;;  %v8437_v3 = vor.u32 %v10415_v1, %v8436_v0  ;;  %v10431_v4 = vld [vmem:[#allocation6 + $0xf4] sm:$0xf0]  ;;  %v8428_v11 = vld [vmem:[#allocation6 + $0x60] sm:$0xf] }
  0x3f   : > { %v8564_v5 = vld [vmem:[#allocation6 + $0x170] sm:$0xf]  ;;  %v10447_v6 = vld [vmem:[#allocation6 + $0x174] sm:$0xf0]  ;;  %v8501_v7 = vor.u32 %v10431_v4, %v8500_v2  ;;  %v10413_v13 = vld [vmem:[#allocation6 + $0x64] sm:$0xf0] }
  0x40   : > { %v8565_v8 = vor.u32 %v10447_v6, %v8564_v5  ;;  %v8628_v9 = vld [vmem:[#allocation6 + $0x1f0] sm:$0xf]  ;;  %v10463_v10 = vld [vmem:[#allocation6 + $0x1f4] sm:$0xf0]  ;;  %1480 = vmatpush.bf16.msra.mxu0 %v8437_v3  ;;  %v8492_v14 = vld [vmem:[#allocation6 + $0xe0] sm:$0xf]  ;;  %v8429_v16 = vor.u32 %v10413_v13, %v8428_v11 }
  0x41   : > { %v8629_v12 = vor.u32 %v10463_v10, %v8628_v9  ;;  %v10429_v15 = vld [vmem:[#allocation6 + $0xe4] sm:$0xf0]  ;;  %1569 = vmatpush.bf16.msra.mxu1 %v8501_v7  ;;  %v8556_v18 = vld [vmem:[#allocation6 + $0x160] sm:$0xf]  ;;  %v8420_v23 = vld [vmem:[#allocation6 + $0x50] sm:$0xf] }
  0x42   : > { %1658 = vmatpush.bf16.msra.mxu2 %v8565_v8  ;;  %v8493_v17 = vor.u32 %v10429_v15, %v8492_v14  ;;  %v10445_v19 = vld [vmem:[#allocation6 + $0x164] sm:$0xf0]  ;;  %v8620_v20 = vld [vmem:[#allocation6 + $0x1e0] sm:$0xf]  ;;  %v10411_v24 = vld [vmem:[#allocation6 + $0x54] sm:$0xf0] }
  0x43   : > { %1747 = vmatpush.bf16.msra.mxu3 %v8629_v12  ;;  %v8557_v21 = vor.u32 %v10445_v19, %v8556_v18  ;;  %v10461_v22 = vld [vmem:[#allocation6 + $0x1e4] sm:$0xf0]  ;;  %v8484_v26 = vld [vmem:[#allocation6 + $0xd0] sm:$0xf]  ;;  %v10427_v27 = vld [vmem:[#allocation6 + $0xd4] sm:$0xf0]  ;;  %v8421_v29 = vor.u32 %v10411_v24, %v8420_v23 }
  0x44   : > { %v8621_v25 = vor.u32 %v10461_v22, %v8620_v20  ;;  %v8548_v28 = vld [vmem:[#allocation6 + $0x150] sm:$0xf]  ;;  %1481 = vmatpush.bf16.msra.mxu0 %v8429_v16  ;;  %v10443_v30 = vld [vmem:[#allocation6 + $0x154] sm:$0xf0]  ;;  %v8485_v33 = vor.u32 %v10427_v27, %v8484_v26  ;;  %v8412_v35 = vld [vmem:[#allocation6 + $0x40] sm:$0xf] }
  0x45   : > { %v8612_v31 = vld [vmem:[#allocation6 + $0x1d0] sm:$0xf]  ;;  %v10459_v32 = vld [vmem:[#allocation6 + $0x1d4] sm:$0xf0]  ;;  %1570 = vmatpush.bf16.msra.mxu1 %v8493_v17  ;;  %v8549_v34 = vor.u32 %v10443_v30, %v8548_v28  ;;  %v10409_v36 = vld [vmem:[#allocation6 + $0x44] sm:$0xf0] }
  0x46   : > { %1659 = vmatpush.bf16.msra.mxu2 %v8557_v21  ;;  %v8476_v37 = vld [vmem:[#allocation6 + $0xc0] sm:$0xf]  ;;  %v8613_v38 = vor.u32 %v10459_v32, %v8612_v31  ;;  %v10425_v39 = vld [vmem:[#allocation6 + $0xc4] sm:$0xf0]  ;;  %v8413_v44 = vor.u32 %v10409_v36, %v8412_v35  ;;  %v8404_v47 = vld [vmem:[#allocation6 + $0x30] sm:$0xf] }
  0x47   : > { %1748 = vmatpush.bf16.msra.mxu3 %v8621_v25  ;;  %v8540_v40 = vld [vmem:[#allocation6 + $0x140] sm:$0xf]  ;;  %v10441_v41 = vld [vmem:[#allocation6 + $0x144] sm:$0xf0]  ;;  %v8477_v45 = vor.u32 %v10425_v39, %v8476_v37  ;;  %v10407_v48 = vld [vmem:[#allocation6 + $0x34] sm:$0xf0] }
  0x48   : > { %v8604_v42 = vld [vmem:[#allocation6 + $0x1c0] sm:$0xf]  ;;  %v10457_v43 = vld [vmem:[#allocation6 + $0x1c4] sm:$0xf0]  ;;  %1482 = vmatpush.bf16.msra.mxu0 %v8421_v29  ;;  %v8541_v46 = vor.u32 %v10441_v41, %v8540_v40  ;;  %v8468_v49 = vld [vmem:[#allocation6 + $0xb0] sm:$0xf]  ;;  %v8405_v56 = vor.u32 %v10407_v48, %v8404_v47 }
  0x49   : > { %1571 = vmatpush.bf16.msra.mxu1 %v8485_v33  ;;  %v8605_v50 = vor.u32 %v10457_v43, %v8604_v42  ;;  %v10423_v51 = vld [vmem:[#allocation6 + $0xb4] sm:$0xf0]  ;;  %v8532_v52 = vld [vmem:[#allocation6 + $0x130] sm:$0xf]  ;;  %v8396_v59 = vld [vmem:[#allocation6 + $0x20] sm:$0xf] }
  0x4a   : > { %1660 = vmatpush.bf16.msra.mxu2 %v8549_v34  ;;  %v10439_v53 = vld [vmem:[#allocation6 + $0x134] sm:$0xf0]  ;;  %v8596_v54 = vld [vmem:[#allocation6 + $0x1b0] sm:$0xf]  ;;  %v8469_v57 = vor.u32 %v10423_v51, %v8468_v49  ;;  %v10405_v60 = vld [vmem:[#allocation6 + $0x24] sm:$0xf0] }
  0x4b   : > { %1749 = vmatpush.bf16.msra.mxu3 %v8613_v38  ;;  %v10455_v55 = vld [vmem:[#allocation6 + $0x1b4] sm:$0xf0]  ;;  %v8533_v58 = vor.u32 %v10439_v53, %v8532_v52  ;;  %v8460_v61 = vld [vmem:[#allocation6 + $0xa0] sm:$0xf]  ;;  %v10421_v63 = vld [vmem:[#allocation6 + $0xa4] sm:$0xf0]  ;;  %v8397_v4 = vor.u32 %v10405_v60, %v8396_v59 }
  0x4c   : > { %1483 = vmatpush.bf16.msra.mxu0 %v8413_v44  ;;  %v8597_v62 = vor.u32 %v10455_v55, %v8596_v54  ;;  %v8524_v0 = vld [vmem:[#allocation6 + $0x120] sm:$0xf]  ;;  %v10437_v1 = vld [vmem:[#allocation6 + $0x124] sm:$0xf0]  ;;  %v8461_v5 = vor.u32 %v10421_v63, %v8460_v61  ;;  %v8388_v7 = vld [vmem:[#allocation6 + $0x10] sm:$0xf] }
  0x4d   : > { %1572 = vmatpush.bf16.msra.mxu1 %v8477_v45  ;;  %v8588_v2 = vld [vmem:[#allocation6 + $0x1a0] sm:$0xf]  ;;  %v10453_v3 = vld [vmem:[#allocation6 + $0x1a4] sm:$0xf0]  ;;  %v8525_v6 = vor.u32 %v10437_v1, %v8524_v0  ;;  %v10403_v8 = vld [vmem:[#allocation6 + $0x14] sm:$0xf0] }
  0x4e   : > { %1661 = vmatpush.bf16.msra.mxu2 %v8541_v46  ;;  %v8452_v9 = vld [vmem:[#allocation6 + $0x90] sm:$0xf]  ;;  %v8589_v10 = vor.u32 %v10453_v3, %v8588_v2  ;;  %v10419_v11 = vld [vmem:[#allocation6 + $0x94] sm:$0xf0]  ;;  %v8380_v16 = vld [vmem:[#allocation6] sm:$0xf]  ;;  %v8389_v17 = vor.u32 %v10403_v8, %v8388_v7 }
  0x4f   : > { %1750 = vmatpush.bf16.msra.mxu3 %v8605_v50  ;;  %v8516_v12 = vld [vmem:[#allocation6 + $0x110] sm:$0xf]  ;;  %v10435_v13 = vld [vmem:[#allocation6 + $0x114] sm:$0xf0]  ;;  %v10401_v18 = vld [vmem:[#allocation6 + $0x4] sm:$0xf0]  ;;  %v8453_v21 = vor.u32 %v10419_v11, %v8452_v9 }
  0x50   : > { %1484 = vmatpush.bf16.msra.mxu0 %v8405_v56  ;;  %v8580_v14 = vld [vmem:[#allocation6 + $0x190] sm:$0xf]  ;;  %v10451_v15 = vld [vmem:[#allocation6 + $0x194] sm:$0xf0]  ;;  %v8444_v19 = vld [vmem:[#allocation6 + $0x80] sm:$0xf]  ;;  %v8517_v22 = vor.u32 %v10435_v13, %v8516_v12  ;;  %v8381_v33 = vor.u32 %v10401_v18, %v8380_v16 }
  0x51   : > { %1573 = vmatpush.bf16.msra.mxu1 %v8469_v57  ;;  %v10417_v20 = vld [vmem:[#allocation6 + $0x84] sm:$0xf0]  ;;  %v8508_v23 = vld [vmem:[#allocation6 + $0x100] sm:$0xf]  ;;  %v8581_v26 = vor.u32 %v10451_v15, %v8580_v14  ;;  %v10307_v29 = vld [vmem:[%s11346_s6 + $0x14] sm:$0xf0] }
  0x52   : > { %1662 = vmatpush.bf16.msra.mxu2 %v8533_v58  ;;  %v10433_v24 = vld [vmem:[#allocation6 + $0x104] sm:$0xf0]  ;;  %v8572_v25 = vld [vmem:[#allocation6 + $0x180] sm:$0xf]  ;;  %v10304_v30 = vld [vmem:[%s11346_s6 + $0x4] sm:$0xf]  ;;  %v8445_v37 = vor.u32 %v10417_v20, %v8444_v19 }
  0x53   : > { %1751 = vmatpush.bf16.msra.mxu3 %v8597_v62  ;;  %v10449_v27 = vld [vmem:[#allocation6 + $0x184] sm:$0xf0]  ;;  %v7996_v28 = vld [vmem:[%s11346_s6] sm:$0xf]  ;;  %v10414_v31 = vld [vmem:[#allocation6 + $0x74] sm:$0xf]  ;;  %v8509_v38 = vor.u32 %v10433_v24, %v8508_v23 }
  0x54   : > { %1485 = vmatpush.bf16.msra.mxu0 %v8397_v4  ;;  %v8438_v32 = vld [vmem:[#allocation6 + $0x78] sm:$0xf0]  ;;  %v10430_v35 = vld [vmem:[#allocation6 + $0xf4] sm:$0xf]  ;;  %v8004_v39 = vld [vmem:[%s11346_s6 + $0x8] sm:$0xf]  ;;  %v8573_v42 = vor.u32 %v10449_v27, %v8572_v25  ;;  %v11374_v47 = vor.u32 %v10307_v29, %v7996_v28 }
  0x55   : > { %1574 = vmatpush.bf16.msra.mxu1 %v8461_v5  ;;  %v7998_v34 = vld [vmem:[%s11346_s6 + $0x18] sm:$0xf0]  ;;  %v10308_v40 = vld [vmem:[%s11346_s6 + $0x1c] sm:$0xf0]  ;;  %v10305_v41 = vld [vmem:[%s11346_s6 + $0xc] sm:$0xf]  ;;  %v8441_v44 = vor.u32 %v10414_v31, %v8438_v32 }
  0x56   : > { %1663 = vmatpush.bf16.msra.mxu2 %v8525_v6  ;;  %v8502_v36 = vld [vmem:[#allocation6 + $0xf8] sm:$0xf0]  ;;  %v8006_v43 = vld [vmem:[%s11346_s6 + $0x20] sm:$0xf0]  ;;  %v8692_v45 = vld [vmem:[#allocation6 + $0x270] sm:$0xf]  ;;  %v11376_v51 = vor.u32 %v10304_v30, %v7998_v34  ;;  %v11378_v52 = vor.u32 %v10308_v40, %v8004_v39 }
  0x57   : > { %1752 = vmatpush.bf16.msra.mxu3 %v8589_v10  ;;  %v10479_v46 = vld [vmem:[#allocation6 + $0x274] sm:$0xf0]  ;;  %v8505_v48 = vor.u32 %v10430_v35, %v8502_v36  ;;  %v8756_v49 = vld [vmem:[#allocation6 + $0x2f0] sm:$0xf]  ;;  %v11380_v53 = vor.u32 %v10305_v41, %v8006_v43  ;;  %v10412_v56 = vld [vmem:[#allocation6 + $0x64] sm:$0xf] }
  0x58   : > { %1486 = vmatpush.bf16.msra.mxu0 %v8389_v17  ;;  %v10495_v50 = vld [vmem:[#allocation6 + $0x2f4] sm:$0xf0]  ;;  %14458 = vst [vmem:[#allocation19_spill] sm:$0xff] %v11378_v52  ;;  %v8693_v54 = vor.u32 %v10479_v46, %v8692_v45  ;;  %v8430_v57 = vld [vmem:[#allocation6 + $0x68] sm:$0xf0]  ;;  %s10880_s25 = sshll.u32 %s11183_s18, 9 }
  0x59   : > { %1575 = vmatpush.bf16.msra.mxu1 %v8453_v21  ;;  %14459 = vst [vmem:[#allocation20_spill] sm:$0xff] %v11380_v53  ;;  %v8757_v55 = vor.u32 %v10495_v50, %v8756_v49  ;;  %v8684_v58 = vld [vmem:[#allocation6 + $0x260] sm:$0xf]  ;;  %v8433_v59 = vor.u32 %v10412_v56, %v8430_v57  ;;  %v10477_v60 = vld [vmem:[#allocation6 + $0x264] sm:$0xf0]  ;;  %s7842_s12 = scalar_lea.hbm %s14297_s4, %s10880_s25  ;;  %s7843_s13 = sshll.u32 %s13730_s23, 4  ;;  %s7844_s13 = int_to_ptr.vmem [resolvable:$true] %s7843_s13 }
  0x5a   : > { %1664 = vmatpush.bf16.msra.mxu2 %v8517_v22  ;;  %v10428_v61 = vld [vmem:[#allocation6 + $0xe4] sm:$0xf]  ;;  %v8494_v62 = vld [vmem:[#allocation6 + $0xe8] sm:$0xf0]  ;;  %v8685_v63 = vor.u32 %v10477_v60, %v8684_v58  ;;  %v8748_v1 = vld [vmem:[#allocation6 + $0x2e0] sm:$0xf] }
  0x5b   : > { %1753 = vmatpush.bf16.msra.mxu3 %v8581_v26  ;;  %v8497_v0 = vor.u32 %v10428_v61, %v8494_v62  ;;  %v10493_v2 = vld [vmem:[#allocation6 + $0x2e4] sm:$0xf0]  ;;  %v8020_v4 = vld [vmem:[%s11346_s6 + $0x30] sm:$0xf]  ;;  %v10310_v6 = vld [vmem:[%s11346_s6 + $0x34] sm:$0xf] }
  0x5c   : > { %1487 = vmatpush.bf16.msra.mxu0 %v8381_v33  ;;  %v8749_v3 = vor.u32 %v10493_v2, %v8748_v1  ;;  %v10313_v5 = vld [vmem:[%s11346_s6 + $0x44] sm:$0xf0]  ;;  %v8022_v7 = vld [vmem:[%s11346_s6 + $0x48] sm:$0xf0]  ;;  %v8028_v8 = vld [vmem:[%s11346_s6 + $0x38] sm:$0xf] }
  0x5d   : > { %1576 = vmatpush.bf16.msra.mxu1 %v8445_v37  ;;  %v10314_v9 = vld [vmem:[%s11346_s6 + $0x4c] sm:$0xf0]  ;;  %v10311_v10 = vld [vmem:[%s11346_s6 + $0x3c] sm:$0xf]  ;;  %v8030_v11 = vld [vmem:[%s11346_s6 + $0x50] sm:$0xf0]  ;;  %v11394_v12 = vor.u32 %v10313_v5, %v8020_v4  ;;  %v11396_v13 = vor.u32 %v10310_v6, %v8022_v7 }
  0x5e   : > { %1665 = vmatpush.bf16.msra.mxu2 %v8509_v38  ;;  %v11398_v14 = vor.u32 %v10314_v9, %v8028_v8  ;;  %v11400_v15 = vor.u32 %v10311_v10, %v8030_v11  ;;  %v8044_v16 = vld [vmem:[%s11346_s6 + $0x60] sm:$0xf]  ;;  %v10319_v17 = vld [vmem:[%s11346_s6 + $0x74] sm:$0xf0]  ;;  %v10316_v18 = vld [vmem:[%s11346_s6 + $0x64] sm:$0xf] }
  0x5f   : > { %1754 = vmatpush.bf16.msra.mxu3 %v8573_v42  ;;  %1488 = vmatmul.bf16.vlgmr.msra.gmra.mxu0 %v11374_v47  ;;  %v8046_v19 = vld [vmem:[%s11346_s6 + $0x78] sm:$0xf0]  ;;  %v8052_v20 = vld [vmem:[%s11346_s6 + $0x68] sm:$0xf]  ;;  %v10320_v21 = vld [vmem:[%s11346_s6 + $0x7c] sm:$0xf0]  ;;  %v11414_v24 = vor.u32 %v10319_v17, %v8044_v16 }
  0x60   : > { %1577 = vmatmul.bf16.vlgmr.msra.gmra.mxu1 %v11376_v51  ;;  %1836 = vmatpush.bf16.msrb.mxu0 %v8693_v54  ;;  %14460 = vst [vmem:[#allocation21_spill] sm:$0xff] %v11398_v14  ;;  %v10317_v22 = vld [vmem:[%s11346_s6 + $0x6c] sm:$0xf]  ;;  %v8054_v23 = vld [vmem:[%s11346_s6 + $0x80] sm:$0xf0]  ;;  %v11416_v25 = vor.u32 %v10316_v18, %v8046_v19  ;;  %v11418_v26 = vor.u32 %v10320_v21, %v8052_v20  ;;  %s7845_s27 = sshll.u32 %s7842_s12, 4  ;;  %s7846_s27 = int_to_ptr.hbm [resolvable:$true] %s7845_s27 }
  0x61   : > { %1666 = vmatmul.bf16.vlgmr.msra.gmra.mxu2 %v11378_v52  ;;  %1925 = vmatpush.bf16.msrb.mxu1 %v8757_v55  ;;  %14461 = vst [vmem:[#allocation22_spill] sm:$0xff] %v11400_v15  ;;  %v11420_v27 = vor.u32 %v10317_v22, %v8054_v23  ;;  %v10410_v28 = vld [vmem:[#allocation6 + $0x54] sm:$0xf]  ;;  %v8422_v29 = vld [vmem:[#allocation6 + $0x58] sm:$0xf0]  ;;  %s7829_s18 = scalar_lea.sflag [#allocation5], %s11342_s1 }
  0x62   : > { %2014 = vmatpush.bf16.msrb.mxu2 %v8441_v44  ;;  %1755 = vmatmul.bf16.vlgmr.msra.gmra.mxu3 %v11380_v53  ;;  %14462 = vst [vmem:[#allocation23_spill] sm:$0xff] %v11418_v26  ;;  %v8676_v30 = vld [vmem:[#allocation6 + $0x250] sm:$0xf]  ;;  %v8425_v31 = vor.u32 %v10410_v28, %v8422_v29  ;;  %v10475_v32 = vld [vmem:[#allocation6 + $0x254] sm:$0xf0]  ;;  %s11115_s21 = sshra.s32 %s7846_s27, 4  ;;  %s11116_s21 = int_to_ptr.hbm [resolvable:$true] %s11115_s21 }
  0x63   : > { %2103 = vmatpush.bf16.msrb.mxu3 %v8505_v48  ;;  %14463 = vst [vmem:[#allocation24_spill] sm:$0xff] %v11420_v27  ;;  %v10426_v33 = vld [vmem:[#allocation6 + $0xd4] sm:$0xf]  ;;  %v8486_v34 = vld [vmem:[#allocation6 + $0xd8] sm:$0xf0]  ;;  %v8677_v35 = vor.u32 %v10475_v32, %v8676_v30  ;;  %s11117_s29 = scalar_lea.hbm %s11116_s21, 512  ;;  %p11122_p8 = scmp.lt.s32.totalorder %s11116_s21, %s14297_s4 }
  0x64   : > { %1837 = vmatpush.bf16.msrb.mxu0 %v8685_v63  ;;  %v8489_v36 = vor.u32 %v10426_v33, %v8486_v34  ;;  %v8740_v37 = vld [vmem:[#allocation6 + $0x2d0] sm:$0xf]  ;;  %v10491_v38 = vld [vmem:[#allocation6 + $0x2d4] sm:$0xf0]  ;;  %v10325_v41 = vld [vmem:[%s11346_s6 + $0xa4] sm:$0xf0]  ;;  %p11118_p1 = scmp.ne.s32.totalorder %s11116_s21, %s11117_s29 }
  0x65   : > { %1926 = vmatpush.bf16.msrb.mxu1 %v8749_v3  ;;  %v8741_v39 = vor.u32 %v10491_v38, %v8740_v37  ;;  %v8068_v40 = vld [vmem:[%s11346_s6 + $0x90] sm:$0xf]  ;;  %v10322_v42 = vld [vmem:[%s11346_s6 + $0x94] sm:$0xf]  ;;  %v8070_v43 = vld [vmem:[%s11346_s6 + $0xa8] sm:$0xf0] }
  0x66   : > { %2015 = vmatpush.bf16.msrb.mxu2 %v8433_v59  ;;  %v8076_v44 = vld [vmem:[%s11346_s6 + $0x98] sm:$0xf]  ;;  %v10326_v45 = vld [vmem:[%s11346_s6 + $0xac] sm:$0xf0]  ;;  %v10323_v46 = vld [vmem:[%s11346_s6 + $0x9c] sm:$0xf]  ;;  %v11434_v49 = vor.u32 %v10325_v41, %v8068_v40  ;;  %v11436_v50 = vor.u32 %v10322_v42, %v8070_v43  ;;  %p11119_p2 = pnand %p11118_p1, %p11307_p7 }
  0x67   : > { %2104 = vmatpush.bf16.msrb.mxu3 %v8497_v0  ;;  %v8078_v48 = vld [vmem:[%s11346_s6 + $0xb0] sm:$0xf0]  ;;  %v11438_v54 = vor.u32 %v10326_v45, %v8076_v44  ;;  %v8092_v56 = vld [vmem:[%s11346_s6 + $0xc0] sm:$0xf]  ;;  %v10331_v57 = vld [vmem:[%s11346_s6 + $0xd4] sm:$0xf0] }
  0x68   : > { %1838 = vmatpush.bf16.msrb.mxu0 %v8677_v35  ;;  %v11440_v55 = vor.u32 %v10323_v46, %v8078_v48  ;;  %v10328_v58 = vld [vmem:[%s11346_s6 + $0xc4] sm:$0xf]  ;;  %v8094_v59 = vld [vmem:[%s11346_s6 + $0xd8] sm:$0xf0]  ;;  %v8100_v60 = vld [vmem:[%s11346_s6 + $0xc8] sm:$0xf]  ;;  %v11454_v0 = vor.u32 %v10331_v57, %v8092_v56  ;;  %p11120_p4 = pneg %p11119_p2 }
  0x69   : > { %1927 = vmatpush.bf16.msrb.mxu1 %v8741_v39  ;;  %14464 = vst [vmem:[#allocation25_spill] sm:$0xff] %v11438_v54  ;;  %v10332_v61 = vld [vmem:[%s11346_s6 + $0xdc] sm:$0xf0]  ;;  %v10329_v62 = vld [vmem:[%s11346_s6 + $0xcc] sm:$0xf]  ;;  %v11456_v1 = vor.u32 %v10328_v58, %v8094_v59  ;;  %s11121_s24 = scalar_lea.hbm %s14297_s4, 1024 }
  0x6a   : > { %2016 = vmatpush.bf16.msrb.mxu2 %v8425_v31  ;;  %14465 = vst [vmem:[#allocation26_spill] sm:$0xff] %v11440_v55  ;;  %v8102_v63 = vld [vmem:[%s11346_s6 + $0xe0] sm:$0xf0]  ;;  %v11458_v2 = vor.u32 %v10332_v61, %v8100_v60  ;;  %v8414_v5 = vld [vmem:[#allocation6 + $0x48] sm:$0xf0]  ;;  %p11123_p12 = scmp.lt.s32.totalorder %s11121_s24, %s11117_s29 }
  0x6b   : > { %2105 = vmatpush.bf16.msrb.mxu3 %v8489_v36  ;;  %v11460_v3 = vor.u32 %v10329_v62, %v8102_v63  ;;  %v10408_v4 = vld [vmem:[#allocation6 + $0x44] sm:$0xf]  ;;  %v8668_v6 = vld [vmem:[#allocation6 + $0x240] sm:$0xf]  ;;  %v10473_v8 = vld [vmem:[#allocation6 + $0x244] sm:$0xf0] }
  0x6c   : > { %14466 = vst [vmem:[#allocation27_spill] sm:$0xff] %v11458_v2  ;;  %v8417_v7 = vor.u32 %v10408_v4, %v8414_v5  ;;  %v10424_v9 = vld [vmem:[#allocation6 + $0xc4] sm:$0xf]  ;;  %v8478_v10 = vld [vmem:[#allocation6 + $0xc8] sm:$0xf0]  ;;  %v8669_v11 = vor.u32 %v10473_v8, %v8668_v6  ;;  %p11124_p13 = por %p11123_p12, %p11122_p8 }
  0x6d   : > { %14467 = vst [vmem:[#allocation28_spill] sm:$0xff] %v11460_v3  ;;  %v8481_v16 = vor.u32 %v10424_v9, %v8478_v10  ;;  %v8732_v17 = vld [vmem:[#allocation6 + $0x2c0] sm:$0xf]  ;;  %v10489_v18 = vld [vmem:[#allocation6 + $0x2c4] sm:$0xf0] }
  0x6e   : > { %2017 = vmatpush.bf16.msrb.mxu2 %v8417_v7  ;;  %v8733_v19 = vor.u32 %v10489_v18, %v8732_v17  ;;  %1839 = vmatpush.bf16.msrb.mxu0 %v8669_v11  ;;  %v8116_v20 = vld [vmem:[%s11346_s6 + $0xf0] sm:$0xf]  ;;  %v10337_v21 = vld [vmem:[%s11346_s6 + $0x104] sm:$0xf0]  ;;  %v10334_v22 = vld [vmem:[%s11346_s6 + $0xf4] sm:$0xf]  ;;  %p11125_p0 = pnand %p11124_p13, %p11120_p4 }
  0x6f   : > { %1493 = vmatmul.bf16.gmra.mxu0 %v11394_v12  ;;  %2106 = vmatpush.bf16.msrb.mxu3 %v8481_v16  ;;  %v8118_v23 = vld [vmem:[%s11346_s6 + $0x108] sm:$0xf0]  ;;  %v8124_v28 = vld [vmem:[%s11346_s6 + $0xf8] sm:$0xf]  ;;  %v10338_v29 = vld [vmem:[%s11346_s6 + $0x10c] sm:$0xf0]  ;;  %v11474_v32 = vor.u32 %v10337_v21, %v8116_v20 }
  0x70   : > { %1582 = vmatmul.bf16.gmra.mxu1 %v11396_v13  ;;  %v10335_v30 = vld [vmem:[%s11346_s6 + $0xfc] sm:$0xf]  ;;  %v8126_v31 = vld [vmem:[%s11346_s6 + $0x110] sm:$0xf0]  ;;  %v11476_v33 = vor.u32 %v10334_v22, %v8118_v23  ;;  %v11478_v34 = vor.u32 %v10338_v29, %v8124_v28  ;;  %v8140_v36 = vld [vmem:[%s11346_s6 + $0x120] sm:$0xf] }
  0x71   : > { %1671 = vmatmul.bf16.gmra.mxu2 %v11398_v14  ;;  %1928 = vmatpush.bf16.msrb.mxu1 %v8733_v19  ;;  %v11480_v35 = vor.u32 %v10335_v30, %v8126_v31  ;;  %v10343_v37 = vld [vmem:[%s11346_s6 + $0x134] sm:$0xf0]  ;;  %v10340_v38 = vld [vmem:[%s11346_s6 + $0x124] sm:$0xf]  ;;  %v8142_v39 = vld [vmem:[%s11346_s6 + $0x138] sm:$0xf0] }
  0x72   : > { %1760 = vmatmul.bf16.gmra.mxu3 %v11400_v15  ;;  %14468 = vst [vmem:[#allocation29_spill] sm:$0xff] %v11478_v34  ;;  %v8148_v40 = vld [vmem:[%s11346_s6 + $0x128] sm:$0xf]  ;;  %v10344_v41 = vld [vmem:[%s11346_s6 + $0x13c] sm:$0xf0]  ;;  %v11494_v44 = vor.u32 %v10343_v37, %v8140_v36  ;;  %v11496_v45 = vor.u32 %v10340_v38, %v8142_v39 }
  0x73   : > { %14469 = vst [vmem:[#allocation30_spill] sm:$0xff] %v11480_v35  ;;  %v10341_v42 = vld [vmem:[%s11346_s6 + $0x12c] sm:$0xf]  ;;  %v8150_v43 = vld [vmem:[%s11346_s6 + $0x140] sm:$0xf0]  ;;  %v11498_v46 = vor.u32 %v10344_v41, %v8148_v40 }
  0x74   : > { %v11500_v48 = vor.u32 %v10341_v42, %v8150_v43  ;;  %v10406_v56 = vld [vmem:[#allocation6 + $0x34] sm:$0xf]  ;;  %v8406_v57 = vld [vmem:[#allocation6 + $0x38] sm:$0xf0]  ;;  %v8660_v58 = vld [vmem:[#allocation6 + $0x230] sm:$0xf] }
  0x75   : > { %14470 = vst [vmem:[#allocation31_spill] sm:$0xff] %v11498_v46  ;;  %v8409_v59 = vor.u32 %v10406_v56, %v8406_v57  ;;  %v10471_v60 = vld [vmem:[#allocation6 + $0x234] sm:$0xf0]  ;;  %v10422_v61 = vld [vmem:[#allocation6 + $0xb4] sm:$0xf] }
  0x76   : > { %14471 = vst [vmem:[#allocation32_spill] sm:$0xff] %v11500_v48  ;;  %v8470_v62 = vld [vmem:[#allocation6 + $0xb8] sm:$0xf0]  ;;  %v8661_v63 = vor.u32 %v10471_v60, %v8660_v58  ;;  %v8724_v5 = vld [vmem:[#allocation6 + $0x2b0] sm:$0xf] }
  0x77   : > { %v8473_v4 = vor.u32 %v10422_v61, %v8470_v62  ;;  %2018 = vmatpush.bf16.msrb.mxu2 %v8409_v59  ;;  %v10487_v6 = vld [vmem:[#allocation6 + $0x2b4] sm:$0xf0]  ;;  %v8164_v8 = vld [vmem:[%s11346_s6 + $0x150] sm:$0xf]  ;;  %v10349_v9 = vld [vmem:[%s11346_s6 + $0x164] sm:$0xf0] }
  0x78   : > { %1840 = vmatpush.bf16.msrb.mxu0 %v8661_v63  ;;  %v8725_v7 = vor.u32 %v10487_v6, %v8724_v5  ;;  %v10346_v10 = vld [vmem:[%s11346_s6 + $0x154] sm:$0xf]  ;;  %v8166_v11 = vld [vmem:[%s11346_s6 + $0x168] sm:$0xf0]  ;;  %v8172_v16 = vld [vmem:[%s11346_s6 + $0x158] sm:$0xf]  ;;  %v11514_v20 = vor.u32 %v10349_v9, %v8164_v8 }
  0x79   : > { %2107 = vmatpush.bf16.msrb.mxu3 %v8473_v4  ;;  %v10350_v17 = vld [vmem:[%s11346_s6 + $0x16c] sm:$0xf0]  ;;  %v10347_v18 = vld [vmem:[%s11346_s6 + $0x15c] sm:$0xf]  ;;  %v8174_v19 = vld [vmem:[%s11346_s6 + $0x170] sm:$0xf0]  ;;  %v11516_v21 = vor.u32 %v10346_v10, %v8166_v11 }
  0x7a   : > { %1929 = vmatpush.bf16.msrb.mxu1 %v8725_v7  ;;  %v11518_v22 = vor.u32 %v10350_v17, %v8172_v16  ;;  %v11520_v23 = vor.u32 %v10347_v18, %v8174_v19  ;;  %v8188_v28 = vld [vmem:[%s11346_s6 + $0x180] sm:$0xf]  ;;  %v10355_v29 = vld [vmem:[%s11346_s6 + $0x194] sm:$0xf0]  ;;  %v10352_v30 = vld [vmem:[%s11346_s6 + $0x184] sm:$0xf] }
  0x7b   : > { %v8190_v31 = vld [vmem:[%s11346_s6 + $0x198] sm:$0xf0]  ;;  %v8196_v36 = vld [vmem:[%s11346_s6 + $0x188] sm:$0xf]  ;;  %v10356_v37 = vld [vmem:[%s11346_s6 + $0x19c] sm:$0xf0]  ;;  %v11534_v40 = vor.u32 %v10355_v29, %v8188_v28 }
  0x7c   : > { %14472 = vst [vmem:[#allocation33_spill] sm:$0xff] %v11518_v22  ;;  %v10353_v38 = vld [vmem:[%s11346_s6 + $0x18c] sm:$0xf]  ;;  %v8198_v39 = vld [vmem:[%s11346_s6 + $0x1a0] sm:$0xf0]  ;;  %v11536_v42 = vor.u32 %v10352_v30, %v8190_v31  ;;  %v11538_v43 = vor.u32 %v10356_v37, %v8196_v36 }
  0x7d   : > { %14473 = vst [vmem:[#allocation34_spill] sm:$0xff] %v11520_v23  ;;  %v11540_v57 = vor.u32 %v10353_v38, %v8198_v39  ;;  %v10404_v59 = vld [vmem:[#allocation6 + $0x24] sm:$0xf]  ;;  %v8398_v60 = vld [vmem:[#allocation6 + $0x28] sm:$0xf0] }
  0x7e   : > { %14474 = vst [vmem:[#allocation35_spill] sm:$0xff] %v11538_v43  ;;  %v8652_v61 = vld [vmem:[#allocation6 + $0x220] sm:$0xf]  ;;  %v8401_v62 = vor.u32 %v10404_v59, %v8398_v60  ;;  %v10469_v63 = vld [vmem:[#allocation6 + $0x224] sm:$0xf0] }
  0x7f   : > { %1498 = vmatmul.bf16.gmra.mxu0 %v11414_v24  ;;  %14475 = vst [vmem:[#allocation36_spill] sm:$0xff] %v11540_v57  ;;  %v10420_v4 = vld [vmem:[#allocation6 + $0xa4] sm:$0xf]  ;;  %v8462_v5 = vld [vmem:[#allocation6 + $0xa8] sm:$0xf0]  ;;  %v8653_v7 = vor.u32 %v10469_v63, %v8652_v61 }
  0x80   : > { %1587 = vmatmul.bf16.gmra.mxu1 %v11416_v25  ;;  %v8465_v8 = vor.u32 %v10420_v4, %v8462_v5  ;;  %2019 = vmatpush.bf16.msrb.mxu2 %v8401_v62  ;;  %v8716_v19 = vld [vmem:[#allocation6 + $0x2a0] sm:$0xf]  ;;  %v10485_v28 = vld [vmem:[#allocation6 + $0x2a4] sm:$0xf0]  ;;  %v8212_v30 = vld [vmem:[%s11346_s6 + $0x1b0] sm:$0xf] }
  0x81   : > { %1676 = vmatmul.bf16.gmra.mxu2 %v11418_v26  ;;  %1841 = vmatpush.bf16.msrb.mxu0 %v8653_v7  ;;  %v8717_v29 = vor.u32 %v10485_v28, %v8716_v19  ;;  %v10361_v31 = vld [vmem:[%s11346_s6 + $0x1c4] sm:$0xf0]  ;;  %v10358_v36 = vld [vmem:[%s11346_s6 + $0x1b4] sm:$0xf]  ;;  %v8214_v37 = vld [vmem:[%s11346_s6 + $0x1c8] sm:$0xf0] }
  0x82   : > { %1765 = vmatmul.bf16.gmra.mxu3 %v11420_v27  ;;  %v8220_v38 = vld [vmem:[%s11346_s6 + $0x1b8] sm:$0xf]  ;;  %v10362_v39 = vld [vmem:[%s11346_s6 + $0x1cc] sm:$0xf0]  ;;  %v11556_v59 = vor.u32 %v10361_v31, %v8212_v30  ;;  %v11558_v63 = vor.u32 %v10358_v36, %v8214_v37  ;;  %v10364_v31 = vld [vmem:[%s11346_s6 + $0x1e4] sm:$0xf] }
  0x83   : > { %2108 = vmatpush.bf16.msrb.mxu3 %v8465_v8  ;;  %1930 = vmatpush.bf16.msrb.mxu1 %v8717_v29  ;;  %v11560_v4 = vor.u32 %v10362_v39, %v8220_v38  ;;  %v8236_v29 = vld [vmem:[%s11346_s6 + $0x1e0] sm:$0xf]  ;;  %v10367_v30 = vld [vmem:[%s11346_s6 + $0x1f4] sm:$0xf0]  ;;  %v8238_v36 = vld [vmem:[%s11346_s6 + $0x1f8] sm:$0xf0] }
  0x84   : > { %v8244_v37 = vld [vmem:[%s11346_s6 + $0x1e8] sm:$0xf]  ;;  %v10368_v38 = vld [vmem:[%s11346_s6 + $0x1fc] sm:$0xf0]  ;;  %v10365_v39 = vld [vmem:[%s11346_s6 + $0x1ec] sm:$0xf] }
  0x85   : > { %14476 = vst [vmem:[#allocation37_spill] sm:$0xff] %v11560_v4  ;;  %v10398_v26 = vld [vmem:[%s11346_s6 + $0x2ec] sm:$0xf0]  ;;  %v10395_v15 = vld [vmem:[%s11346_s6 + $0x2dc] sm:$0xf] }
  0x8f   : > { %1503 = vmatmul.bf16.gmra.mxu0 %v11434_v49 }
  0x90   : > { %1592 = vmatmul.bf16.gmra.mxu1 %v11436_v50 }
  0x91   : > { %1681 = vmatmul.bf16.gmra.mxu2 %v11438_v54 }
  0x92   : > { %1770 = vmatmul.bf16.gmra.mxu3 %v11440_v55 }
  0x9f   : > { %1508 = vmatmul.bf16.gmra.mxu0 %v11454_v0 }
  0xa0   : > { %1597 = vmatmul.bf16.gmra.mxu1 %v11456_v1 }
  0xa1   : > { %1686 = vmatmul.bf16.gmra.mxu2 %v11458_v2  ;;  %v8342_v2 = vld [vmem:[%s11346_s6 + $0x2c0] sm:$0xf0] }
  0xa2   : > { %1775 = vmatmul.bf16.gmra.mxu3 %v11460_v3 }
  0xaf   : > { %1513 = vmatmul.bf16.gmra.mxu0 %v11474_v32 }
  0xb0   : > { %1602 = vmatmul.bf16.gmra.mxu1 %v11476_v33 }
  0xb1   : > { %1691 = vmatmul.bf16.gmra.mxu2 %v11478_v34 }
  0xb2   : > { %1780 = vmatmul.bf16.gmra.mxu3 %v11480_v35  ;;  %v10383_v35 = vld [vmem:[%s11346_s6 + $0x27c] sm:$0xf] }
  0xbf   : > { %1518 = vmatmul.bf16.gmra.mxu0 %v11494_v44 }
  0xc0   : > { %1607 = vmatmul.bf16.gmra.mxu1 %v11496_v45 }
  0xc1   : > { %1696 = vmatmul.bf16.gmra.mxu2 %v11498_v46  ;;  %v10386_v46 = vld [vmem:[%s11346_s6 + $0x28c] sm:$0xf0] }
  0xc2   : > { %1785 = vmatmul.bf16.gmra.mxu3 %v11500_v48 }
  0xcf   : > { %1523 = vmatmul.bf16.gmra.mxu0 %v11514_v20 }
  0xd0   : > { %1612 = vmatmul.bf16.gmra.mxu1 %v11516_v21 }
  0xd1   : > { %1701 = vmatmul.bf16.gmra.mxu2 %v11518_v22 }
  0xd2   : > { %1790 = vmatmul.bf16.gmra.mxu3 %v11520_v23 }
  0xdc   : > { %v1489_v41 = vpop.f32.mrf.mxu0 }
  0xdd   : > { %v1578_v56 = vpop.f32.mrf.mxu1 }
  0xde   : > { %v1579_v58 = vadd.f32 %v1578_v56, %v1489_v41  ;;  %v10359_v41 = vld [vmem:[%s11346_s6 + $0x1bc] sm:$0xf]  ;;  %v8222_v56 = vld [vmem:[%s11346_s6 + $0x1d0] sm:$0xf0] }
  0xdf   : > { %1528 = vmatmul.bf16.gmra.mxu0 %v11534_v40 }
  0xe0   : > { %1617 = vmatmul.bf16.gmra.mxu1 %v11536_v42 }
  0xe1   : > { %1706 = vmatmul.bf16.gmra.mxu2 %v11538_v43  ;;  %v8294_v43 = vld [vmem:[%s11346_s6 + $0x260] sm:$0xf0] }
  0xe2   : > { %1795 = vmatmul.bf16.gmra.mxu3 %v11540_v57 }
  0xe4   : > { %v1667_v6 = vpop.f32.mrf.mxu2  ;;  %v1491_v11 = vpop.f32.mrf.mxu0 }
  0xe5   : > { %v1668_v9 = vadd.f32 %v1667_v6, %v1579_v58  ;;  %v1756_v10 = vpop.f32.mrf.mxu3  ;;  %v1580_v16 = vpop.f32.mrf.mxu1  ;;  %v11562_v6 = vor.u32 %v10359_v41, %v8222_v56  ;;  %v8246_v41 = vld [vmem:[%s11346_s6 + $0x200] sm:$0xf0] }
  0xe6   : > { %v1581_v18 = vadd.f32 %v1580_v16, %v1491_v11 }
  0xe7   : > { %v11546_v17 = vadd.f32 %v1756_v10, %v1668_v9  ;;  %14477 = vst [vmem:[#allocation38_spill] sm:$0xff] %v11562_v6 }
  0xec   : > { %v1669_v58 = vpop.f32.mrf.mxu2  ;;  %v1494_v62 = vpop.f32.mrf.mxu0 }
  0xed   : > { %v1670_v60 = vadd.f32 %v1669_v58, %v1581_v18  ;;  %v1758_v61 = vpop.f32.mrf.mxu3  ;;  %v1583_v5 = vpop.f32.mrf.mxu1  ;;  %v11580_v58 = vor.u32 %v10367_v30, %v8236_v29  ;;  %v8644_v29 = vld [vmem:[#allocation6 + $0x210] sm:$0xf] }
  0xee   : > { %v1584_v8 = vadd.f32 %v1583_v5, %v1494_v62  ;;  %v11582_v5 = vor.u32 %v10364_v31, %v8238_v36  ;;  %v10467_v31 = vld [vmem:[#allocation6 + $0x214] sm:$0xf0]  ;;  %v10418_v36 = vld [vmem:[#allocation6 + $0x94] sm:$0xf] }
  0xef   : > { %v11564_v7 = vadd.f32 %v1758_v61, %v1670_v60  ;;  %1533 = vmatmul.bf16.gmra.mxu0 %v11556_v59 }
  0xf0   : > { %1622 = vmatmul.bf16.gmra.mxu1 %v11558_v63 }
  0xf1   : > { %1711 = vmatmul.bf16.gmra.mxu2 %v11560_v4 }
  0xf2   : > { %1800 = vmatmul.bf16.gmra.mxu3 %v11562_v6  ;;  %v10371_v6 = vld [vmem:[%s11346_s6 + $0x21c] sm:$0xf] }
  0xf4   : > { %v1672_v9 = vpop.f32.mrf.mxu2  ;;  %v1496_v16 = vpop.f32.mrf.mxu0 }
  0xf5   : > { %v1673_v10 = vadd.f32 %v1672_v9, %v1584_v8  ;;  %v1761_v11 = vpop.f32.mrf.mxu3  ;;  %v1585_v18 = vpop.f32.mrf.mxu1  ;;  %v11584_v8 = vor.u32 %v10368_v38, %v8244_v37  ;;  %v8454_v37 = vld [vmem:[#allocation6 + $0x98] sm:$0xf0] }
  0xf6   : > { %v1586_v28 = vadd.f32 %v1585_v18, %v1496_v16  ;;  %v10402_v18 = vld [vmem:[#allocation6 + $0x14] sm:$0xf] }
  0xf7   : > { %v11570_v19 = vadd.f32 %v1761_v11, %v1673_v10  ;;  %14478 = vst [vmem:[#allocation39_spill] sm:$0xff] %v11584_v8  ;;  %v11586_v10 = vor.u32 %v10365_v39, %v8246_v41  ;;  %v8645_v39 = vor.u32 %v10467_v31, %v8644_v29  ;;  %v8457_v41 = vor.u32 %v10418_v36, %v8454_v37  ;;  %v8260_v31 = vld [vmem:[%s11346_s6 + $0x210] sm:$0xf]  ;;  %v10373_v36 = vld [vmem:[%s11346_s6 + $0x224] sm:$0xf0] }
  0xf8   : > { %v10370_v37 = vld [vmem:[%s11346_s6 + $0x214] sm:$0xf]  ;;  %v11604_v57 = vor.u32 %v10373_v36, %v8260_v31 }
  0xf9   : > { %14479 = vst [vmem:[#allocation40_spill] sm:$0xff] %v11586_v10  ;;  %1842 = vmatpush.bf16.msrb.mxu0 %v8645_v39  ;;  %2109 = vmatpush.bf16.msrb.mxu3 %v8457_v41 }
  0xfc   : > { %v1674_v56 = vpop.f32.mrf.mxu2  ;;  %v1499_v62 = vpop.f32.mrf.mxu0 }
  0xfd   : > { %v1675_v60 = vadd.f32 %v1674_v56, %v1586_v28  ;;  %v1763_v61 = vpop.f32.mrf.mxu3  ;;  %v1588_v9 = vpop.f32.mrf.mxu1  ;;  %v8390_v28 = vld [vmem:[#allocation6 + $0x18] sm:$0xf0] }
  0xfe   : > { %v1589_v16 = vadd.f32 %v1588_v9, %v1499_v62  ;;  %v8393_v30 = vor.u32 %v10402_v18, %v8390_v28  ;;  %v8708_v28 = vld [vmem:[#allocation6 + $0x290] sm:$0xf] }
  0xff   : > { %v11588_v11 = vadd.f32 %v1763_v61, %v1675_v60  ;;  %1538 = vmatmul.bf16.gmra.mxu0 %v11580_v58 }
 0x100   : > { %1627 = vmatmul.bf16.gmra.mxu1 %v11582_v5  ;;  %2020 = vmatpush.bf16.msrb.mxu2 %v8393_v30  ;;  %v8270_v30 = vld [vmem:[%s11346_s6 + $0x230] sm:$0xf0] }
 0x101   : > { %1716 = vmatmul.bf16.gmra.mxu2 %v11584_v8  ;;  %v10374_v8 = vld [vmem:[%s11346_s6 + $0x22c] sm:$0xf0] }
 0x102   : > { %1805 = vmatmul.bf16.gmra.mxu3 %v11586_v10  ;;  %v10483_v10 = vld [vmem:[#allocation6 + $0x294] sm:$0xf0] }
 0x103   : > { %v8709_v29 = vor.u32 %v10483_v10, %v8708_v28 }
 0x104   : > { %v1677_v38 = vpop.f32.mrf.mxu2  ;;  %v1501_v61 = vpop.f32.mrf.mxu0 }
 0x105   : > { %v1678_v56 = vadd.f32 %v1677_v38, %v1589_v16  ;;  %v1766_v60 = vpop.f32.mrf.mxu3  ;;  %v1590_v62 = vpop.f32.mrf.mxu1  ;;  %v8262_v16 = vld [vmem:[%s11346_s6 + $0x228] sm:$0xf0]  ;;  %v8268_v38 = vld [vmem:[%s11346_s6 + $0x218] sm:$0xf]  ;;  %1931 = vmatpush.bf16.msrb.mxu1 %v8709_v29 }
 0x106   : > { %v1591_v18 = vadd.f32 %v1590_v62, %v1501_v61  ;;  %v11608_v61 = vor.u32 %v10374_v8, %v8268_v38  ;;  %v11610_v62 = vor.u32 %v10371_v6, %v8270_v30  ;;  %v10379_v38 = vld [vmem:[%s11346_s6 + $0x254] sm:$0xf0]  ;;  %v10376_v30 = vld [vmem:[%s11346_s6 + $0x244] sm:$0xf] }
 0x107   : > { %v11594_v9 = vadd.f32 %v1766_v60, %v1678_v56  ;;  %v11606_v60 = vor.u32 %v10370_v37, %v8262_v16  ;;  %v8284_v16 = vld [vmem:[%s11346_s6 + $0x240] sm:$0xf] }
 0x108   : > { %14480 = vst [vmem:[#allocation41_spill] sm:$0xff] %v11608_v61  ;;  %v11628_v23 = vor.u32 %v10379_v38, %v8284_v16  ;;  %v8636_v16 = vld [vmem:[#allocation6 + $0x200] sm:$0xf] }
 0x109   : > { %14481 = vst [vmem:[#allocation42_spill] sm:$0xff] %v11610_v62 }
 0x10c   : > { %v1679_v4 = vpop.f32.mrf.mxu2  ;;  %v1504_v56 = vpop.f32.mrf.mxu0 }
 0x10d   : > { %v1680_v39 = vadd.f32 %v1679_v4, %v1591_v18  ;;  %v1768_v41 = vpop.f32.mrf.mxu3  ;;  %v1593_v10 = vpop.f32.mrf.mxu1 }
 0x10e   : > { %v1594_v29 = vadd.f32 %v1593_v10, %v1504_v56  ;;  %v10380_v56 = vld [vmem:[%s11346_s6 + $0x25c] sm:$0xf0]  ;;  %v10377_v10 = vld [vmem:[%s11346_s6 + $0x24c] sm:$0xf] }
 0x10f   : > { %v11612_v28 = vadd.f32 %v1768_v41, %v1680_v39  ;;  %1543 = vmatmul.bf16.gmra.mxu0 %v11604_v57  ;;  %v8286_v39 = vld [vmem:[%s11346_s6 + $0x258] sm:$0xf0]  ;;  %v8292_v41 = vld [vmem:[%s11346_s6 + $0x248] sm:$0xf] }
 0x110   : > { %1632 = vmatmul.bf16.gmra.mxu1 %v11606_v60  ;;  %v11632_v48 = vor.u32 %v10380_v56, %v8292_v41  ;;  %v8446_v41 = vld [vmem:[#allocation6 + $0x88] sm:$0xf0] }
 0x111   : > { %1721 = vmatmul.bf16.gmra.mxu2 %v11608_v61 }
 0x112   : > { %1810 = vmatmul.bf16.gmra.mxu3 %v11610_v62  ;;  %14482 = vst [vmem:[#allocation43_spill] sm:$0xff] %v11632_v48 }
 0x114   : > { %v1682_v4 = vpop.f32.mrf.mxu2  ;;  %v1506_v18 = vpop.f32.mrf.mxu0 }
 0x115   : > { %v1683_v6 = vadd.f32 %v1682_v4, %v1594_v29  ;;  %v1771_v8 = vpop.f32.mrf.mxu3  ;;  %v1595_v31 = vpop.f32.mrf.mxu1  ;;  %v11630_v4 = vor.u32 %v10376_v30, %v8286_v39  ;;  %v10465_v30 = vld [vmem:[#allocation6 + $0x204] sm:$0xf0]  ;;  %v10416_v39 = vld [vmem:[#allocation6 + $0x84] sm:$0xf] }
 0x116   : > { %v1596_v37 = vadd.f32 %v1595_v31, %v1506_v18 }
 0x117   : > { %v11618_v36 = vadd.f32 %v1771_v8, %v1683_v6  ;;  %v11634_v8 = vor.u32 %v10377_v10, %v8294_v43 }
 0x119   : > { %14483 = vst [vmem:[#allocation44_spill] sm:$0xff] %v11634_v8 }
 0x11c   : > { %v1684_v61 = vpop.f32.mrf.mxu2  ;;  %v1509_v29 = vpop.f32.mrf.mxu0 }
 0x11d   : > { %v1685_v62 = vadd.f32 %v1684_v61, %v1596_v37  ;;  %v1773_v22 = vpop.f32.mrf.mxu3  ;;  %v1598_v6 = vpop.f32.mrf.mxu1  ;;  %v10400_v61 = vld [vmem:[#allocation6 + $0x4] sm:$0xf]  ;;  %v8382_v37 = vld [vmem:[#allocation6 + $0x8] sm:$0xf0] }
 0x11e   : > { %v1599_v31 = vadd.f32 %v1598_v6, %v1509_v29  ;;  %v8385_v38 = vor.u32 %v10400_v61, %v8382_v37 }
 0x11f   : > { %v11636_v18 = vadd.f32 %v1773_v22, %v1685_v62  ;;  %1548 = vmatmul.bf16.gmra.mxu0 %v11628_v23  ;;  %v8637_v22 = vor.u32 %v10465_v30, %v8636_v16  ;;  %v8449_v62 = vor.u32 %v10416_v39, %v8446_v41  ;;  %v8308_v30 = vld [vmem:[%s11346_s6 + $0x270] sm:$0xf]  ;;  %v10385_v39 = vld [vmem:[%s11346_s6 + $0x284] sm:$0xf0]  ;;  %v10382_v41 = vld [vmem:[%s11346_s6 + $0x274] sm:$0xf] }
 0x120   : > { %1637 = vmatmul.bf16.gmra.mxu1 %v11630_v4  ;;  %2021 = vmatpush.bf16.msrb.mxu2 %v8385_v38  ;;  %v8318_v38 = vld [vmem:[%s11346_s6 + $0x290] sm:$0xf0]  ;;  %v11652_v3 = vor.u32 %v10385_v39, %v8308_v30 }
 0x121   : > { %1726 = vmatmul.bf16.gmra.mxu2 %v11632_v48  ;;  %1843 = vmatpush.bf16.msrb.mxu0 %v8637_v22  ;;  %v10481_v48 = vld [vmem:[#allocation6 + $0x284] sm:$0xf0] }
 0x122   : > { %1815 = vmatmul.bf16.gmra.mxu3 %v11634_v8  ;;  %v8700_v8 = vld [vmem:[#allocation6 + $0x280] sm:$0xf] }
 0x123   : > { %2110 = vmatpush.bf16.msrb.mxu3 %v8449_v62  ;;  %v8701_v16 = vor.u32 %v10481_v48, %v8700_v8  ;;  %v11658_v8 = vor.u32 %v10383_v35, %v8318_v38  ;;  %v10388_v38 = vld [vmem:[%s11346_s6 + $0x2a4] sm:$0xf] }
 0x124   : > { %v1687_v43 = vpop.f32.mrf.mxu2  ;;  %v1511_v29 = vpop.f32.mrf.mxu0 }
 0x125   : > { %v1688_v56 = vadd.f32 %v1687_v43, %v1599_v31  ;;  %v1776_v10 = vpop.f32.mrf.mxu3  ;;  %v1600_v6 = vpop.f32.mrf.mxu1  ;;  %v8310_v31 = vld [vmem:[%s11346_s6 + $0x288] sm:$0xf0]  ;;  %v8316_v43 = vld [vmem:[%s11346_s6 + $0x278] sm:$0xf]  ;;  %1932 = vmatpush.bf16.msrb.mxu1 %v8701_v16  ;;  %14485 = vst [vmem:[#allocation46_spill] sm:$0xff] %v11658_v8 }
 0x126   : > { %v1601_v37 = vadd.f32 %v1600_v6, %v1511_v29  ;;  %v11656_v29 = vor.u32 %v10386_v46, %v8316_v43  ;;  %v10391_v43 = vld [vmem:[%s11346_s6 + $0x2b4] sm:$0xf0] }
 0x127   : > { %v11642_v61 = vadd.f32 %v1776_v10, %v1688_v56  ;;  %v11654_v10 = vor.u32 %v10382_v41, %v8310_v31  ;;  %v8332_v31 = vld [vmem:[%s11346_s6 + $0x2a0] sm:$0xf] }
 0x128   : > { %14484 = vst [vmem:[#allocation45_spill] sm:$0xff] %v11656_v29  ;;  %v11676_v55 = vor.u32 %v10391_v43, %v8332_v31  ;;  %v10446_v31 = vld [vmem:[#allocation6 + $0x174] sm:$0xf] }
 0x12c   : > { %v1689_v34 = vpop.f32.mrf.mxu2  ;;  %v1514_v56 = vpop.f32.mrf.mxu0 }
 0x12d   : > { %v1690_v22 = vadd.f32 %v1689_v34, %v1601_v37  ;;  %v1778_v62 = vpop.f32.mrf.mxu3  ;;  %v1603_v48 = vpop.f32.mrf.mxu1 }
 0x12e   : > { %v1604_v16 = vadd.f32 %v1603_v48, %v1514_v56  ;;  %v10392_v56 = vld [vmem:[%s11346_s6 + $0x2bc] sm:$0xf0]  ;;  %v10389_v48 = vld [vmem:[%s11346_s6 + $0x2ac] sm:$0xf] }
 0x12f   : > { %v11660_v6 = vadd.f32 %v1778_v62, %v1690_v22  ;;  %1553 = vmatmul.bf16.gmra.mxu0 %v11652_v3  ;;  %v8334_v22 = vld [vmem:[%s11346_s6 + $0x2b8] sm:$0xf0]  ;;  %v8340_v62 = vld [vmem:[%s11346_s6 + $0x2a8] sm:$0xf] }
 0x130   : > { %1642 = vmatmul.bf16.gmra.mxu1 %v11654_v10  ;;  %v11680_v27 = vor.u32 %v10392_v56, %v8340_v62  ;;  %v8758_v62 = vld [vmem:[#allocation6 + $0x2f8] sm:$0xf0] }
 0x131   : > { %1731 = vmatmul.bf16.gmra.mxu2 %v11656_v29 }
 0x132   : > { %1820 = vmatmul.bf16.gmra.mxu3 %v11658_v8  ;;  %14486 = vst [vmem:[#allocation47_spill] sm:$0xff] %v11680_v27 }
 0x134   : > { %v1692_v34 = vpop.f32.mrf.mxu2  ;;  %v1516_v37 = vpop.f32.mrf.mxu0 }
 0x135   : > { %v1693_v35 = vadd.f32 %v1692_v34, %v1604_v16  ;;  %v1781_v46 = vpop.f32.mrf.mxu3  ;;  %v1605_v30 = vpop.f32.mrf.mxu1  ;;  %v11678_v34 = vor.u32 %v10388_v38, %v8334_v22  ;;  %v8566_v38 = vld [vmem:[#allocation6 + $0x178] sm:$0xf0]  ;;  %v10494_v22 = vld [vmem:[#allocation6 + $0x2f4] sm:$0xf] }
 0x136   : > { %v1606_v41 = vadd.f32 %v1605_v30, %v1516_v37 }
 0x137   : > { %v11666_v39 = vadd.f32 %v1781_v46, %v1693_v35  ;;  %v11682_v46 = vor.u32 %v10389_v48, %v8342_v2 }
 0x139   : > { %14487 = vst [vmem:[#allocation48_spill] sm:$0xff] %v11682_v46 }
 0x13c   : > { %v1694_v29 = vpop.f32.mrf.mxu2  ;;  %v1519_v16 = vpop.f32.mrf.mxu0 }
 0x13d   : > { %v1695_v8 = vadd.f32 %v1694_v29, %v1606_v41  ;;  %v1783_v54 = vpop.f32.mrf.mxu3  ;;  %v1608_v35 = vpop.f32.mrf.mxu1  ;;  %v10478_v29 = vld [vmem:[#allocation6 + $0x274] sm:$0xf]  ;;  %v8694_v41 = vld [vmem:[#allocation6 + $0x278] sm:$0xf0] }
 0x13e   : > { %v1609_v30 = vadd.f32 %v1608_v35, %v1519_v16  ;;  %v8697_v43 = vor.u32 %v10478_v29, %v8694_v41 }
 0x13f   : > { %v11684_v37 = vadd.f32 %v1783_v54, %v1695_v8  ;;  %1558 = vmatmul.bf16.gmra.mxu0 %v11676_v55  ;;  %v8569_v54 = vor.u32 %v10446_v31, %v8566_v38  ;;  %v8761_v8 = vor.u32 %v10494_v22, %v8758_v62  ;;  %v8356_v38 = vld [vmem:[%s11346_s6 + $0x2d0] sm:$0xf]  ;;  %v10397_v22 = vld [vmem:[%s11346_s6 + $0x2e4] sm:$0xf0]  ;;  %v10394_v62 = vld [vmem:[%s11346_s6 + $0x2d4] sm:$0xf] }
 0x140   : > { %1647 = vmatmul.bf16.gmra.mxu1 %v11678_v34  ;;  %2370 = vmatpush.bf16.msra.mxu2 %v8697_v43  ;;  %v8366_v43 = vld [vmem:[%s11346_s6 + $0x2f0] sm:$0xf0]  ;;  %v11700_v53 = vor.u32 %v10397_v22, %v8356_v38 }
 0x141   : > { %1736 = vmatmul.bf16.gmra.mxu2 %v11680_v27  ;;  %2192 = vmatpush.bf16.msra.mxu0 %v8569_v54  ;;  %v8630_v27 = vld [vmem:[#allocation6 + $0x1f8] sm:$0xf0] }
 0x142   : > { %1825 = vmatmul.bf16.gmra.mxu3 %v11682_v46  ;;  %v10462_v46 = vld [vmem:[#allocation6 + $0x1f4] sm:$0xf]  ;;  %14488 = vst [vmem:[#allocation49_spill] sm:$0xff] %v11700_v53 }
 0x143   : > { %2459 = vmatpush.bf16.msra.mxu3 %v8761_v8  ;;  %v8633_v31 = vor.u32 %v10462_v46, %v8630_v27  ;;  %v11706_v46 = vor.u32 %v10395_v15, %v8366_v43  ;;  %v10306_v43 = vld [vmem:[%s11346_s6 + $0x14] sm:$0xf] }
 0x144   : > { %v1697_v2 = vpop.f32.mrf.mxu2  ;;  %v1521_v16 = vpop.f32.mrf.mxu0 }
 0x145   : > { %v1698_v56 = vadd.f32 %v1697_v2, %v1609_v30  ;;  %v1786_v48 = vpop.f32.mrf.mxu3  ;;  %v1610_v35 = vpop.f32.mrf.mxu1  ;;  %v8358_v30 = vld [vmem:[%s11346_s6 + $0x2e8] sm:$0xf0]  ;;  %v8364_v2 = vld [vmem:[%s11346_s6 + $0x2d8] sm:$0xf]  ;;  %2281 = vmatpush.bf16.msra.mxu1 %v8633_v31  ;;  %14491 = vst [vmem:[#allocation52_spill] sm:$0xff] %v11706_v46 }
 0x146   : > { %v1611_v41 = vadd.f32 %v1610_v35, %v1521_v16  ;;  %v11704_v16 = vor.u32 %v10398_v26, %v8364_v2  ;;  %v10309_v2 = vld [vmem:[%s11346_s6 + $0x24] sm:$0xf0] }
 0x147   : > { %v11690_v29 = vadd.f32 %v1786_v48, %v1698_v56  ;;  %v11702_v48 = vor.u32 %v10394_v62, %v8358_v30  ;;  %v8012_v30 = vld [vmem:[%s11346_s6 + $0x10] sm:$0xf] }
 0x148   : > { %14490 = vst [vmem:[#allocation51_spill] sm:$0xff] %v11704_v16 }
 0x149   : > { %14489 = vst [vmem:[#allocation50_spill] sm:$0xff] %v11702_v48 }
 0x14c   : > { %v1699_v14 = vpop.f32.mrf.mxu2  ;;  %v1524_v56 = vpop.f32.mrf.mxu0 }
 0x14d   : > { %v1700_v54 = vadd.f32 %v1699_v14, %v1611_v41  ;;  %v1788_v8 = vpop.f32.mrf.mxu3  ;;  %v1613_v27 = vpop.f32.mrf.mxu1 }
 0x14e   : > { %v1614_v31 = vadd.f32 %v1613_v27, %v1524_v56  ;;  %v11720_v56 = vor.u32 %v10309_v2, %v8012_v30  ;;  %v10492_v30 = vld [vmem:[#allocation6 + $0x2e4] sm:$0xf]  ;;  %v8750_v2 = vld [vmem:[#allocation6 + $0x2e8] sm:$0xf0] }
 0x14f   : > { %v11708_v35 = vadd.f32 %v1788_v8, %v1700_v54  ;;  %1563 = vmatmul.bf16.gmra.mxu0 %v11700_v53  ;;  %v8014_v54 = vld [vmem:[%s11346_s6 + $0x28] sm:$0xf0]  ;;  %v10312_v53 = vld [vmem:[%s11346_s6 + $0x44] sm:$0xf] }
 0x150   : > { %1652 = vmatmul.bf16.gmra.mxu1 %v11702_v48  ;;  %14492 = vst [vmem:[#allocation53_spill] sm:$0xff] %v11720_v56  ;;  %v11722_v48 = vor.u32 %v10306_v43, %v8014_v54 }
 0x151   : > { %1741 = vmatmul.bf16.gmra.mxu2 %v11704_v16 }
 0x152   : > { %1830 = vmatmul.bf16.gmra.mxu3 %v11706_v46  ;;  %14493 = vst [vmem:[#allocation54_spill] sm:$0xff] %v11722_v48 }
 0x154   : > { %v1702_v14 = vpop.f32.mrf.mxu2  ;;  %v1526_v38 = vpop.f32.mrf.mxu0 }
 0x155   : > { %v1703_v26 = vadd.f32 %v1702_v14, %v1614_v31  ;;  %v1791_v41 = vpop.f32.mrf.mxu3  ;;  %v1615_v22 = vpop.f32.mrf.mxu1 }
 0x156   : > { %v1616_v62 = vadd.f32 %v1615_v22, %v1526_v38  ;;  %v10444_v38 = vld [vmem:[#allocation6 + $0x164] sm:$0xf] }
 0x157   : > { %v11714_v15 = vadd.f32 %v1791_v41, %v1703_v26  ;;  %v10476_v26 = vld [vmem:[#allocation6 + $0x264] sm:$0xf]  ;;  %v8686_v41 = vld [vmem:[#allocation6 + $0x268] sm:$0xf0] }
 0x158   : > { %v8689_v22 = vor.u32 %v10476_v26, %v8686_v41  ;;  %v10460_v26 = vld [vmem:[#allocation6 + $0x1e4] sm:$0xf]  ;;  %v8622_v41 = vld [vmem:[#allocation6 + $0x1e8] sm:$0xf0] }
 0x15a   : > { %2371 = vmatpush.bf16.msra.mxu2 %v8689_v22 }
 0x15c   : > { %v1704_v8 = vpop.f32.mrf.mxu2  ;;  %v1529_v16 = vpop.f32.mrf.mxu0 }
 0x15d   : > { %v1705_v27 = vadd.f32 %v1704_v8, %v1616_v62  ;;  %v1793_v52 = vpop.f32.mrf.mxu3  ;;  %v1618_v46 = vpop.f32.mrf.mxu1  ;;  %v8558_v62 = vld [vmem:[#allocation6 + $0x168] sm:$0xf0] }
 0x15e   : > { %v1619_v14 = vadd.f32 %v1618_v46, %v1529_v16  ;;  %v8753_v16 = vor.u32 %v10492_v30, %v8750_v2 }
 0x15f   : > { %v11724_v31 = vadd.f32 %v1793_v52, %v1705_v27  ;;  %1844 = vmatmul.bf16.vlgmr.msrb.gmra.mxu0 %v11720_v56  ;;  %v8561_v52 = vor.u32 %v10444_v38, %v8558_v62  ;;  %v8036_v56 = vld [vmem:[%s11346_s6 + $0x40] sm:$0xf]  ;;  %v8038_v38 = vld [vmem:[%s11346_s6 + $0x58] sm:$0xf0] }
 0x160   : > { %1933 = vmatmul.bf16.vlgmr.msrb.gmra.mxu1 %v11722_v48  ;;  %2460 = vmatpush.bf16.msra.mxu3 %v8753_v16  ;;  %v8625_v48 = vor.u32 %v10460_v26, %v8622_v41  ;;  %v10321_v26 = vld [vmem:[%s11346_s6 + $0x84] sm:$0xf0]  ;;  %v10318_v41 = vld [vmem:[%s11346_s6 + $0x74] sm:$0xf] }
 0x161   : > { %14494 = vst [vmem:[#allocation55_spill] sm:$0xff] %v11724_v31  ;;  %2022 = vmatmul.bf16.vlgmr.msrb.gmra.mxu2 %v11374_v47  ;;  %2193 = vmatpush.bf16.msra.mxu0 %v8561_v52  ;;  %v10315_v31 = vld [vmem:[%s11346_s6 + $0x54] sm:$0xf0] }
 0x162   : > { %2111 = vmatmul.bf16.vlgmr.msrb.gmra.mxu3 %v11376_v51  ;;  %2282 = vmatpush.bf16.msra.mxu1 %v8625_v48  ;;  %v11736_v30 = vor.u32 %v10315_v31, %v8036_v56 }
 0x164   : > { %v1707_v43 = vpop.f32.mrf.mxu2  ;;  %v1531_v8 = vpop.f32.mrf.mxu0 }
 0x165   : > { %v1708_v46 = vadd.f32 %v1707_v43, %v1619_v14  ;;  %v1796_v54 = vpop.f32.mrf.mxu3  ;;  %v1620_v47 = vpop.f32.mrf.mxu1  ;;  %v11738_v43 = vor.u32 %v10312_v53, %v8038_v38  ;;  %v8062_v38 = vld [vmem:[%s11346_s6 + $0x88] sm:$0xf0] }
 0x166   : > { %v1621_v27 = vadd.f32 %v1620_v47, %v1531_v8 }
 0x167   : > { %v11730_v51 = vadd.f32 %v1796_v54, %v1708_v46  ;;  %14495 = vst [vmem:[#allocation56_spill] sm:$0xff] %v11738_v43 }
 0x16c   : > { %v1709_v62 = vpop.f32.mrf.mxu2  ;;  %v1534_v22 = vpop.f32.mrf.mxu0 }
 0x16d   : > { %v1710_v14 = vadd.f32 %v1709_v62, %v1621_v27  ;;  %v1798_v2 = vpop.f32.mrf.mxu3  ;;  %v1623_v52 = vpop.f32.mrf.mxu1  ;;  %v8060_v27 = vld [vmem:[%s11346_s6 + $0x70] sm:$0xf] }
 0x16e   : > { %v1624_v46 = vadd.f32 %v1623_v52, %v1534_v22  ;;  %v11754_v52 = vor.u32 %v10318_v41, %v8062_v38 }
 0x16f   : > { %v11740_v16 = vadd.f32 %v1798_v2, %v1710_v14  ;;  %1849 = vmatmul.bf16.gmra.mxu0 %v11736_v30  ;;  %v11752_v14 = vor.u32 %v10321_v26, %v8060_v27  ;;  %v10490_v27 = vld [vmem:[#allocation6 + $0x2d4] sm:$0xf]  ;;  %v8742_v26 = vld [vmem:[#allocation6 + $0x2d8] sm:$0xf0] }
 0x170   : > { %1938 = vmatmul.bf16.gmra.mxu1 %v11738_v43  ;;  %14497 = vst [vmem:[#allocation58_spill] sm:$0xff] %v11754_v52  ;;  %v10324_v43 = vld [vmem:[%s11346_s6 + $0xa4] sm:$0xf] }
 0x171   : > { %2027 = vmatmul.bf16.gmra.mxu2 %v11394_v12  ;;  %14496 = vst [vmem:[#allocation57_spill] sm:$0xff] %v11752_v14 }
 0x172   : > { %2116 = vmatmul.bf16.gmra.mxu3 %v11396_v13 }
 0x174   : > { %v1712_v48 = vpop.f32.mrf.mxu2  ;;  %v1536_v53 = vpop.f32.mrf.mxu0 }
 0x175   : > { %v1713_v56 = vadd.f32 %v1712_v48, %v1624_v46  ;;  %v1801_v31 = vpop.f32.mrf.mxu3  ;;  %v1625_v54 = vpop.f32.mrf.mxu1 }
 0x176   : > { %v1626_v47 = vadd.f32 %v1625_v54, %v1536_v53  ;;  %v10442_v53 = vld [vmem:[#allocation6 + $0x154] sm:$0xf] }
 0x177   : > { %v11746_v8 = vadd.f32 %v1801_v31, %v1713_v56  ;;  %v10474_v56 = vld [vmem:[#allocation6 + $0x254] sm:$0xf]  ;;  %v8678_v31 = vld [vmem:[#allocation6 + $0x258] sm:$0xf0] }
 0x178   : > { %v8681_v54 = vor.u32 %v10474_v56, %v8678_v31  ;;  %v10458_v56 = vld [vmem:[#allocation6 + $0x1d4] sm:$0xf]  ;;  %v8614_v31 = vld [vmem:[#allocation6 + $0x1d8] sm:$0xf0] }
 0x17a   : > { %2372 = vmatpush.bf16.msra.mxu2 %v8681_v54 }
 0x17c   : > { %v1714_v62 = vpop.f32.mrf.mxu2  ;;  %v1539_v12 = vpop.f32.mrf.mxu0 }
 0x17d   : > { %v1715_v2 = vadd.f32 %v1714_v62, %v1626_v47  ;;  %v1803_v22 = vpop.f32.mrf.mxu3  ;;  %v1628_v13 = vpop.f32.mrf.mxu1  ;;  %v8550_v47 = vld [vmem:[#allocation6 + $0x158] sm:$0xf0]  ;;  %v8745_v62 = vor.u32 %v10490_v27, %v8742_v26 }
 0x17e   : > { %v1629_v48 = vadd.f32 %v1628_v13, %v1539_v12  ;;  %v8553_v38 = vor.u32 %v10442_v53, %v8550_v47  ;;  %v8086_v53 = vld [vmem:[%s11346_s6 + $0xb8] sm:$0xf0] }
 0x17f   : > { %v11756_v46 = vadd.f32 %v1803_v22, %v1715_v2  ;;  %1854 = vmatmul.bf16.gmra.mxu0 %v11752_v14  ;;  %2461 = vmatpush.bf16.msra.mxu3 %v8745_v62  ;;  %v8084_v14 = vld [vmem:[%s11346_s6 + $0xa0] sm:$0xf] }
 0x180   : > { %1943 = vmatmul.bf16.gmra.mxu1 %v11754_v52  ;;  %2194 = vmatpush.bf16.msra.mxu0 %v8553_v38  ;;  %v8617_v52 = vor.u32 %v10458_v56, %v8614_v31  ;;  %v10333_v56 = vld [vmem:[%s11346_s6 + $0xe4] sm:$0xf0]  ;;  %v10330_v31 = vld [vmem:[%s11346_s6 + $0xd4] sm:$0xf] }
 0x181   : > { %14498 = vst [vmem:[#allocation59_spill] sm:$0xff] %v11756_v46  ;;  %2032 = vmatmul.bf16.gmra.mxu2 %v11414_v24  ;;  %v10327_v46 = vld [vmem:[%s11346_s6 + $0xb4] sm:$0xf0] }
 0x182   : > { %2121 = vmatmul.bf16.gmra.mxu3 %v11416_v25  ;;  %2283 = vmatpush.bf16.msra.mxu1 %v8617_v52  ;;  %v11768_v27 = vor.u32 %v10327_v46, %v8084_v14 }
 0x184   : > { %v1717_v41 = vpop.f32.mrf.mxu2  ;;  %v1541_v12 = vpop.f32.mrf.mxu0 }
 0x185   : > { %v1718_v2 = vadd.f32 %v1717_v41, %v1629_v48  ;;  %v1806_v22 = vpop.f32.mrf.mxu3  ;;  %v1630_v24 = vpop.f32.mrf.mxu1  ;;  %v11770_v41 = vor.u32 %v10324_v43, %v8086_v53  ;;  %v8110_v53 = vld [vmem:[%s11346_s6 + $0xe8] sm:$0xf0] }
 0x186   : > { %v1631_v13 = vadd.f32 %v1630_v24, %v1541_v12 }
 0x187   : > { %v11762_v25 = vadd.f32 %v1806_v22, %v1718_v2  ;;  %14499 = vst [vmem:[#allocation60_spill] sm:$0xff] %v11770_v41 }
 0x18c   : > { %v1719_v47 = vpop.f32.mrf.mxu2  ;;  %v1544_v54 = vpop.f32.mrf.mxu0 }
 0x18d   : > { %v1720_v48 = vadd.f32 %v1719_v47, %v1631_v13  ;;  %v1808_v26 = vpop.f32.mrf.mxu3  ;;  %v1633_v38 = vpop.f32.mrf.mxu1  ;;  %v8108_v13 = vld [vmem:[%s11346_s6 + $0xd0] sm:$0xf] }
 0x18e   : > { %v1634_v2 = vadd.f32 %v1633_v38, %v1544_v54  ;;  %v11786_v38 = vor.u32 %v10330_v31, %v8110_v53 }
 0x18f   : > { %v11772_v62 = vadd.f32 %v1808_v26, %v1720_v48  ;;  %1859 = vmatmul.bf16.gmra.mxu0 %v11768_v27  ;;  %v11784_v48 = vor.u32 %v10333_v56, %v8108_v13  ;;  %v10488_v13 = vld [vmem:[#allocation6 + $0x2c4] sm:$0xf]  ;;  %v8734_v56 = vld [vmem:[#allocation6 + $0x2c8] sm:$0xf0] }
 0x190   : > { %1948 = vmatmul.bf16.gmra.mxu1 %v11770_v41  ;;  %14501 = vst [vmem:[#allocation62_spill] sm:$0xff] %v11786_v38  ;;  %v10336_v41 = vld [vmem:[%s11346_s6 + $0x104] sm:$0xf] }
 0x191   : > { %2037 = vmatmul.bf16.gmra.mxu2 %v11434_v49  ;;  %14500 = vst [vmem:[#allocation61_spill] sm:$0xff] %v11784_v48 }
 0x192   : > { %2126 = vmatmul.bf16.gmra.mxu3 %v11436_v50 }
 0x194   : > { %v1722_v14 = vpop.f32.mrf.mxu2  ;;  %v1546_v43 = vpop.f32.mrf.mxu0 }
 0x195   : > { %v1723_v52 = vadd.f32 %v1722_v14, %v1634_v2  ;;  %v1811_v46 = vpop.f32.mrf.mxu3  ;;  %v1635_v22 = vpop.f32.mrf.mxu1 }
 0x196   : > { %v1636_v24 = vadd.f32 %v1635_v22, %v1546_v43  ;;  %v10440_v43 = vld [vmem:[#allocation6 + $0x144] sm:$0xf] }
 0x197   : > { %v11778_v12 = vadd.f32 %v1811_v46, %v1723_v52  ;;  %v10472_v52 = vld [vmem:[#allocation6 + $0x244] sm:$0xf]  ;;  %v8670_v46 = vld [vmem:[#allocation6 + $0x248] sm:$0xf0] }
 0x198   : > { %v8673_v22 = vor.u32 %v10472_v52, %v8670_v46  ;;  %v10456_v52 = vld [vmem:[#allocation6 + $0x1c4] sm:$0xf]  ;;  %v8606_v46 = vld [vmem:[#allocation6 + $0x1c8] sm:$0xf0] }
 0x19a   : > { %2373 = vmatpush.bf16.msra.mxu2 %v8673_v22 }
 0x19c   : > { %v1724_v47 = vpop.f32.mrf.mxu2  ;;  %v1549_v49 = vpop.f32.mrf.mxu0 }
 0x19d   : > { %v1725_v26 = vadd.f32 %v1724_v47, %v1636_v24  ;;  %v1813_v54 = vpop.f32.mrf.mxu3  ;;  %v1638_v50 = vpop.f32.mrf.mxu1  ;;  %v8542_v24 = vld [vmem:[#allocation6 + $0x148] sm:$0xf0]  ;;  %v8737_v47 = vor.u32 %v10488_v13, %v8734_v56 }
 0x19e   : > { %v1639_v14 = vadd.f32 %v1638_v50, %v1549_v49  ;;  %v8545_v53 = vor.u32 %v10440_v43, %v8542_v24  ;;  %v8134_v43 = vld [vmem:[%s11346_s6 + $0x118] sm:$0xf0] }
 0x19f   : > { %v11788_v2 = vadd.f32 %v1813_v54, %v1725_v26  ;;  %1864 = vmatmul.bf16.gmra.mxu0 %v11784_v48  ;;  %2462 = vmatpush.bf16.msra.mxu3 %v8737_v47  ;;  %v8132_v48 = vld [vmem:[%s11346_s6 + $0x100] sm:$0xf] }
 0x1a0   : > { %1953 = vmatmul.bf16.gmra.mxu1 %v11786_v38  ;;  %2195 = vmatpush.bf16.msra.mxu0 %v8545_v53  ;;  %v8609_v38 = vor.u32 %v10456_v52, %v8606_v46  ;;  %v10345_v52 = vld [vmem:[%s11346_s6 + $0x144] sm:$0xf0]  ;;  %v10342_v46 = vld [vmem:[%s11346_s6 + $0x134] sm:$0xf] }
 0x1a1   : > { %14502 = vst [vmem:[#allocation63_spill] sm:$0xff] %v11788_v2  ;;  %2042 = vmatmul.bf16.gmra.mxu2 %v11454_v0  ;;  %v10339_v2 = vld [vmem:[%s11346_s6 + $0x114] sm:$0xf0] }
 0x1a2   : > { %2131 = vmatmul.bf16.gmra.mxu3 %v11456_v1  ;;  %2284 = vmatpush.bf16.msra.mxu1 %v8609_v38  ;;  %v11800_v13 = vor.u32 %v10339_v2, %v8132_v48 }
 0x1a4   : > { %v1727_v31 = vpop.f32.mrf.mxu2  ;;  %v1551_v49 = vpop.f32.mrf.mxu0 }
 0x1a5   : > { %v1728_v26 = vadd.f32 %v1727_v31, %v1639_v14  ;;  %v1816_v54 = vpop.f32.mrf.mxu3  ;;  %v1640_v0 = vpop.f32.mrf.mxu1  ;;  %v11802_v31 = vor.u32 %v10336_v41, %v8134_v43  ;;  %v8158_v43 = vld [vmem:[%s11346_s6 + $0x148] sm:$0xf0] }
 0x1a6   : > { %v1641_v50 = vadd.f32 %v1640_v0, %v1551_v49 }
 0x1a7   : > { %v11794_v1 = vadd.f32 %v1816_v54, %v1728_v26 }
 0x1ac   : > { %v1729_v24 = vpop.f32.mrf.mxu2  ;;  %v1554_v22 = vpop.f32.mrf.mxu0 }
 0x1ad   : > { %v1730_v14 = vadd.f32 %v1729_v24, %v1641_v50  ;;  %v1818_v56 = vpop.f32.mrf.mxu3  ;;  %v1643_v53 = vpop.f32.mrf.mxu1  ;;  %v8156_v50 = vld [vmem:[%s11346_s6 + $0x130] sm:$0xf] }
 0x1ae   : > { %v1644_v26 = vadd.f32 %v1643_v53, %v1554_v22  ;;  %v11818_v53 = vor.u32 %v10342_v46, %v8158_v43 }
 0x1af   : > { %v11804_v47 = vadd.f32 %v1818_v56, %v1730_v14  ;;  %1869 = vmatmul.bf16.gmra.mxu0 %v11800_v13  ;;  %v11816_v14 = vor.u32 %v10345_v52, %v8156_v50  ;;  %v10486_v50 = vld [vmem:[#allocation6 + $0x2b4] sm:$0xf]  ;;  %v8726_v52 = vld [vmem:[#allocation6 + $0x2b8] sm:$0xf0] }
 0x1b0   : > { %1958 = vmatmul.bf16.gmra.mxu1 %v11802_v31  ;;  %14504 = vst [vmem:[#allocation65_spill] sm:$0xff] %v11818_v53 }
 0x1b1   : > { %2047 = vmatmul.bf16.gmra.mxu2 %v11474_v32  ;;  %14503 = vst [vmem:[#allocation64_spill] sm:$0xff] %v11816_v14 }
 0x1b2   : > { %2136 = vmatmul.bf16.gmra.mxu3 %v11476_v33 }
 0x1b4   : > { %v1732_v48 = vpop.f32.mrf.mxu2  ;;  %v1556_v41 = vpop.f32.mrf.mxu0 }
 0x1b5   : > { %v1733_v38 = vadd.f32 %v1732_v48, %v1644_v26  ;;  %v1821_v2 = vpop.f32.mrf.mxu3  ;;  %v1645_v54 = vpop.f32.mrf.mxu1 }
 0x1b6   : > { %v1646_v0 = vadd.f32 %v1645_v54, %v1556_v41  ;;  %v10438_v41 = vld [vmem:[#allocation6 + $0x134] sm:$0xf] }
 0x1b7   : > { %v11810_v49 = vadd.f32 %v1821_v2, %v1733_v38  ;;  %v10470_v38 = vld [vmem:[#allocation6 + $0x234] sm:$0xf]  ;;  %v8662_v2 = vld [vmem:[#allocation6 + $0x238] sm:$0xf0] }
 0x1b8   : > { %v8665_v54 = vor.u32 %v10470_v38, %v8662_v2 }
 0x1ba   : > { %2374 = vmatpush.bf16.msra.mxu2 %v8665_v54 }
 0x1bc   : > { %v1734_v24 = vpop.f32.mrf.mxu2  ;;  %v1559_v32 = vpop.f32.mrf.mxu0 }
 0x1bd   : > { %v1735_v56 = vadd.f32 %v1734_v24, %v1646_v0  ;;  %v1823_v22 = vpop.f32.mrf.mxu3  ;;  %v1648_v33 = vpop.f32.mrf.mxu1  ;;  %v8534_v0 = vld [vmem:[#allocation6 + $0x138] sm:$0xf0]  ;;  %v8729_v24 = vor.u32 %v10486_v50, %v8726_v52 }
 0x1be   : > { %v1649_v48 = vadd.f32 %v1648_v33, %v1559_v32  ;;  %v8537_v43 = vor.u32 %v10438_v41, %v8534_v0  ;;  %v8598_v33 = vld [vmem:[#allocation6 + $0x1b8] sm:$0xf0]  ;;  %v10348_v41 = vld [vmem:[%s11346_s6 + $0x164] sm:$0xf] }
 0x1bf   : > { %v11820_v26 = vadd.f32 %v1823_v22, %v1735_v56  ;;  %1874 = vmatmul.bf16.gmra.mxu0 %v11816_v14  ;;  %2463 = vmatpush.bf16.msra.mxu3 %v8729_v24  ;;  %v8180_v14 = vld [vmem:[%s11346_s6 + $0x160] sm:$0xf]  ;;  %v8182_v0 = vld [vmem:[%s11346_s6 + $0x178] sm:$0xf0] }
 0x1c0   : > { %1963 = vmatmul.bf16.gmra.mxu1 %v11818_v53  ;;  %2196 = vmatpush.bf16.msra.mxu0 %v8537_v43  ;;  %v11834_v43 = vor.u32 %v10348_v41, %v8182_v0  ;;  %v10357_v41 = vld [vmem:[%s11346_s6 + $0x1a4] sm:$0xf0]  ;;  %v10354_v0 = vld [vmem:[%s11346_s6 + $0x194] sm:$0xf] }
 0x1c1   : > { %14505 = vst [vmem:[#allocation66_spill] sm:$0xff] %v11820_v26  ;;  %2052 = vmatmul.bf16.gmra.mxu2 %v11494_v44  ;;  %v10351_v26 = vld [vmem:[%s11346_s6 + $0x174] sm:$0xf0] }
 0x1c2   : > { %2141 = vmatmul.bf16.gmra.mxu3 %v11496_v45  ;;  %v10454_v45 = vld [vmem:[#allocation6 + $0x1b4] sm:$0xf]  ;;  %14506 = vst [vmem:[#allocation67_spill] sm:$0xff] %v11834_v43 }
 0x1c3   : > { %v8601_v53 = vor.u32 %v10454_v45, %v8598_v33 }
 0x1c4   : > { %v1737_v46 = vpop.f32.mrf.mxu2  ;;  %v1561_v32 = vpop.f32.mrf.mxu0 }
 0x1c5   : > { %v1738_v56 = vadd.f32 %v1737_v46, %v1649_v48  ;;  %v1826_v22 = vpop.f32.mrf.mxu3  ;;  %v1650_v44 = vpop.f32.mrf.mxu1  ;;  %2285 = vmatpush.bf16.msra.mxu1 %v8601_v53  ;;  %v11832_v48 = vor.u32 %v10351_v26, %v8180_v14 }
 0x1c6   : > { %v1651_v2 = vadd.f32 %v1650_v44, %v1561_v32 }
 0x1c7   : > { %v11826_v38 = vadd.f32 %v1826_v22, %v1738_v56 }
 0x1cc   : > { %v1739_v50 = vpop.f32.mrf.mxu2  ;;  %v1564_v54 = vpop.f32.mrf.mxu0 }
 0x1cd   : > { %v1740_v52 = vadd.f32 %v1739_v50, %v1651_v2  ;;  %v1828_v46 = vpop.f32.mrf.mxu3  ;;  %v1653_v24 = vpop.f32.mrf.mxu1  ;;  %v8204_v2 = vld [vmem:[%s11346_s6 + $0x190] sm:$0xf]  ;;  %v8206_v50 = vld [vmem:[%s11346_s6 + $0x1a8] sm:$0xf0] }
 0x1ce   : > { %v1654_v22 = vadd.f32 %v1653_v24, %v1564_v54 }
 0x1cf   : > { %v11836_v56 = vadd.f32 %v1828_v46, %v1740_v52  ;;  %1879 = vmatmul.bf16.gmra.mxu0 %v11832_v48  ;;  %v11848_v46 = vor.u32 %v10357_v41, %v8204_v2  ;;  %v8526_v2 = vld [vmem:[#allocation6 + $0x128] sm:$0xf0]  ;;  %v10484_v41 = vld [vmem:[#allocation6 + $0x2a4] sm:$0xf] }
 0x1d0   : > { %1968 = vmatmul.bf16.gmra.mxu1 %v11834_v43  ;;  %v11850_v43 = vor.u32 %v10354_v0, %v8206_v50 }
 0x1d1   : > { %2057 = vmatmul.bf16.gmra.mxu2 %v11514_v20 }
 0x1d2   : > { %2146 = vmatmul.bf16.gmra.mxu3 %v11516_v21  ;;  %14507 = vst [vmem:[#allocation68_spill] sm:$0xff] %v11850_v43 }
 0x1d4   : > { %v1742_v14 = vpop.f32.mrf.mxu2  ;;  %v1566_v32 = vpop.f32.mrf.mxu0 }
 0x1d5   : > { %v1743_v53 = vadd.f32 %v1742_v14, %v1654_v22  ;;  %v1831_v26 = vpop.f32.mrf.mxu3  ;;  %v1655_v44 = vpop.f32.mrf.mxu1 }
 0x1d6   : > { %v1656_v33 = vadd.f32 %v1655_v44, %v1566_v32  ;;  %v8654_v32 = vld [vmem:[#allocation6 + $0x228] sm:$0xf0]  ;;  %v10436_v44 = vld [vmem:[#allocation6 + $0x124] sm:$0xf] }
 0x1d7   : > { %v11842_v45 = vadd.f32 %v1831_v26, %v1743_v53  ;;  %v10468_v26 = vld [vmem:[#allocation6 + $0x224] sm:$0xf]  ;;  %v8529_v50 = vor.u32 %v10436_v44, %v8526_v2  ;;  %v10363_v44 = vld [vmem:[%s11346_s6 + $0x1d4] sm:$0xf0] }
 0x1d8   : > { %v10360_v2 = vld [vmem:[%s11346_s6 + $0x1c4] sm:$0xf] }
 0x1d9   : > { %2197 = vmatpush.bf16.msra.mxu0 %v8529_v50 }
 0x1dc   : > { %v1744_v52 = vpop.f32.mrf.mxu2  ;;  %v1845_v20 = vpop.f32.mrf.mxu0 }
 0x1dd   : > { %v1745_v54 = vadd.f32 %v1744_v52, %v1656_v33  ;;  %v1833_v24 = vpop.f32.mrf.mxu3  ;;  %v1846_v21 = vadd.f32 %v1845_v20, %v11546_v17  ;;  %v1934_v22 = vpop.f32.mrf.mxu1  ;;  %v8657_v33 = vor.u32 %v10468_v26, %v8654_v32  ;;  %v8718_v17 = vld [vmem:[#allocation6 + $0x2a8] sm:$0xf0] }
 0x1de   : > { %v8721_v52 = vor.u32 %v10484_v41, %v8718_v17  ;;  %v8230_v41 = vld [vmem:[%s11346_s6 + $0x1d8] sm:$0xf0] }
 0x1df   : > { %v11853_v14 = vadd.f32 %v1833_v24, %v1745_v54  ;;  %v11855_v53 = vadd.f32 %v1934_v22, %v1846_v21  ;;  %1884 = vmatmul.bf16.gmra.mxu0 %v11848_v46  ;;  %2375 = vmatpush.bf16.msra.mxu2 %v8657_v33  ;;  %v10452_v21 = vld [vmem:[#allocation6 + $0x1a4] sm:$0xf]  ;;  %v8590_v22 = vld [vmem:[#allocation6 + $0x1a8] sm:$0xf0] }
 0x1e0   : > { %1973 = vmatmul.bf16.gmra.mxu1 %v11850_v43  ;;  %2464 = vmatpush.bf16.msra.mxu3 %v8721_v52  ;;  %v8593_v26 = vor.u32 %v10452_v21, %v8590_v22 }
 0x1e1   : > { %14508 = vst [vmem:[#allocation69_spill] sm:$0xff] %v11855_v53  ;;  %2062 = vmatmul.bf16.gmra.mxu2 %v11534_v40  ;;  %v8228_v53 = vld [vmem:[%s11346_s6 + $0x1c0] sm:$0xf] }
 0x1e2   : > { %2151 = vmatmul.bf16.gmra.mxu3 %v11536_v42  ;;  %2286 = vmatpush.bf16.msra.mxu1 %v8593_v26  ;;  %v11870_v43 = vor.u32 %v10363_v44, %v8228_v53  ;;  %v8252_v44 = vld [vmem:[%s11346_s6 + $0x1f0] sm:$0xf] }
 0x1e4   : > { %v2023_v0 = vpop.f32.mrf.mxu2  ;;  %v1847_v24 = vpop.f32.mrf.mxu0 }
 0x1e5   : > { %v2112_v54 = vpop.f32.mrf.mxu3  ;;  %v1848_v42 = vadd.f32 %v1847_v24, %v11564_v7  ;;  %v1936_v20 = vpop.f32.mrf.mxu1 }
 0x1e6   : > { %v11861_v40 = vadd.f32 %v2112_v54, %v2023_v0  ;;  %v11872_v54 = vor.u32 %v10360_v2, %v8230_v41  ;;  %v10369_v2 = vld [vmem:[%s11346_s6 + $0x204] sm:$0xf0]  ;;  %v10366_v41 = vld [vmem:[%s11346_s6 + $0x1f4] sm:$0xf] }
 0x1e7   : > { %v11864_v32 = vadd.f32 %v1936_v20, %v1848_v42 }
 0x1e9   : > { %14509 = vst [vmem:[#allocation70_spill] sm:$0xff] %v11864_v32 }
 0x1ec   : > { %v2025_v17 = vpop.f32.mrf.mxu2  ;;  %v1850_v0 = vpop.f32.mrf.mxu0 }
 0x1ed   : > { %v2114_v33 = vpop.f32.mrf.mxu3  ;;  %v1851_v50 = vadd.f32 %v1850_v0, %v11570_v19  ;;  %v1939_v52 = vpop.f32.mrf.mxu1  ;;  %v11892_v0 = vor.u32 %v10369_v2, %v8252_v44  ;;  %v8518_v2 = vld [vmem:[#allocation6 + $0x118] sm:$0xf0] }
 0x1ee   : > { %v11874_v7 = vadd.f32 %v2114_v33, %v2025_v17  ;;  %v8254_v17 = vld [vmem:[%s11346_s6 + $0x208] sm:$0xf0] }
 0x1ef   : > { %v11877_v24 = vadd.f32 %v1939_v52, %v1851_v50  ;;  %1889 = vmatmul.bf16.gmra.mxu0 %v11870_v43 }
 0x1f0   : > { %1978 = vmatmul.bf16.gmra.mxu1 %v11872_v54 }
 0x1f1   : > { %14510 = vst [vmem:[#allocation71_spill] sm:$0xff] %v11877_v24  ;;  %2067 = vmatmul.bf16.gmra.mxu2 %v11556_v59  ;;  %v8276_v24 = vld [vmem:[%s11346_s6 + $0x220] sm:$0xf] }
 0x1f2   : > { %2156 = vmatmul.bf16.gmra.mxu3 %v11558_v63  ;;  %v11894_v63 = vor.u32 %v10366_v41, %v8254_v17  ;;  %v10482_v41 = vld [vmem:[#allocation6 + $0x294] sm:$0xf]  ;;  %v8710_v17 = vld [vmem:[#allocation6 + $0x298] sm:$0xf0] }
 0x1f4   : > { %v2028_v53 = vpop.f32.mrf.mxu2  ;;  %v1852_v20 = vpop.f32.mrf.mxu0 }
 0x1f5   : > { %v2117_v42 = vpop.f32.mrf.mxu3  ;;  %v1853_v19 = vadd.f32 %v1852_v20, %v11588_v11  ;;  %v1941_v22 = vpop.f32.mrf.mxu1  ;;  %v10466_v20 = vld [vmem:[#allocation6 + $0x214] sm:$0xf] }
 0x1f6   : > { %v11883_v21 = vadd.f32 %v2117_v42, %v2028_v53 }
 0x1f7   : > { %v11886_v26 = vadd.f32 %v1941_v22, %v1853_v19  ;;  %v8646_v19 = vld [vmem:[#allocation6 + $0x218] sm:$0xf0]  ;;  %v10434_v22 = vld [vmem:[#allocation6 + $0x114] sm:$0xf] }
 0x1f8   : > { %v8649_v44 = vor.u32 %v10466_v20, %v8646_v19  ;;  %v10450_v20 = vld [vmem:[#allocation6 + $0x194] sm:$0xf]  ;;  %v8582_v19 = vld [vmem:[#allocation6 + $0x198] sm:$0xf0] }
 0x1f9   : > { %14511 = vst [vmem:[#allocation72_spill] sm:$0xff] %v11886_v26 }
 0x1fa   : > { %2376 = vmatpush.bf16.msra.mxu2 %v8649_v44 }
 0x1fc   : > { %v2030_v33 = vpop.f32.mrf.mxu2  ;;  %v1855_v50 = vpop.f32.mrf.mxu0 }
 0x1fd   : > { %v2119_v59 = vpop.f32.mrf.mxu3  ;;  %v1856_v53 = vadd.f32 %v1855_v50, %v11594_v9  ;;  %v1944_v42 = vpop.f32.mrf.mxu1 }
 0x1fe   : > { %v11896_v52 = vadd.f32 %v2119_v59, %v2030_v33  ;;  %v8521_v33 = vor.u32 %v10434_v22, %v8518_v2  ;;  %v8713_v59 = vor.u32 %v10482_v41, %v8710_v17  ;;  %v10375_v22 = vld [vmem:[%s11346_s6 + $0x234] sm:$0xf0]  ;;  %v10372_v2 = vld [vmem:[%s11346_s6 + $0x224] sm:$0xf]  ;;  %v8278_v41 = vld [vmem:[%s11346_s6 + $0x238] sm:$0xf0] }
 0x1ff   : > { %v11899_v11 = vadd.f32 %v1944_v42, %v1856_v53  ;;  %1894 = vmatmul.bf16.gmra.mxu0 %v11892_v0  ;;  %v11914_v32 = vor.u32 %v10375_v22, %v8276_v24  ;;  %v8300_v22 = vld [vmem:[%s11346_s6 + $0x250] sm:$0xf] }
 0x200   : > { %1983 = vmatmul.bf16.gmra.mxu1 %v11894_v63  ;;  %2198 = vmatpush.bf16.msra.mxu0 %v8521_v33 }
 0x201   : > { %14512 = vst [vmem:[#allocation73_spill] sm:$0xff] %v11899_v11  ;;  %2072 = vmatmul.bf16.gmra.mxu2 %v11580_v58  ;;  %2465 = vmatpush.bf16.msra.mxu3 %v8713_v59  ;;  %v8585_v11 = vor.u32 %v10450_v20, %v8582_v19 }
 0x202   : > { %2161 = vmatmul.bf16.gmra.mxu3 %v11582_v5 }
 0x203   : > { %2287 = vmatpush.bf16.msra.mxu1 %v8585_v11 }
 0x204   : > { %v2033_v9 = vpop.f32.mrf.mxu2  ;;  %v1857_v53 = vpop.f32.mrf.mxu0 }
 0x205   : > { %v2122_v50 = vpop.f32.mrf.mxu3  ;;  %v1858_v5 = vadd.f32 %v1857_v53, %v11612_v28  ;;  %v1946_v42 = vpop.f32.mrf.mxu1 }
 0x206   : > { %v11905_v58 = vadd.f32 %v2122_v50, %v2033_v9  ;;  %v11916_v50 = vor.u32 %v10372_v2, %v8278_v41  ;;  %v10381_v2 = vld [vmem:[%s11346_s6 + $0x264] sm:$0xf0]  ;;  %v10378_v41 = vld [vmem:[%s11346_s6 + $0x254] sm:$0xf] }
 0x207   : > { %v11908_v26 = vadd.f32 %v1946_v42, %v1858_v5 }
 0x209   : > { %14513 = vst [vmem:[#allocation74_spill] sm:$0xff] %v11908_v26 }
 0x20c   : > { %v2035_v17 = vpop.f32.mrf.mxu2  ;;  %v1860_v9 = vpop.f32.mrf.mxu0 }
 0x20d   : > { %v2124_v44 = vpop.f32.mrf.mxu3  ;;  %v1861_v33 = vadd.f32 %v1860_v9, %v11618_v36  ;;  %v1949_v59 = vpop.f32.mrf.mxu1  ;;  %v11936_v9 = vor.u32 %v10381_v2, %v8300_v22  ;;  %v8510_v2 = vld [vmem:[#allocation6 + $0x108] sm:$0xf0] }
 0x20e   : > { %v11918_v28 = vadd.f32 %v2124_v44, %v2035_v17  ;;  %v8302_v17 = vld [vmem:[%s11346_s6 + $0x268] sm:$0xf0] }
 0x20f   : > { %v11921_v53 = vadd.f32 %v1949_v59, %v1861_v33  ;;  %1899 = vmatmul.bf16.gmra.mxu0 %v11914_v32 }
 0x210   : > { %1988 = vmatmul.bf16.gmra.mxu1 %v11916_v50 }
 0x211   : > { %14514 = vst [vmem:[#allocation75_spill] sm:$0xff] %v11921_v53  ;;  %2077 = vmatmul.bf16.gmra.mxu2 %v11604_v57  ;;  %v8324_v53 = vld [vmem:[%s11346_s6 + $0x280] sm:$0xf] }
 0x212   : > { %2166 = vmatmul.bf16.gmra.mxu3 %v11606_v60  ;;  %v11938_v60 = vor.u32 %v10378_v41, %v8302_v17  ;;  %v10480_v41 = vld [vmem:[#allocation6 + $0x284] sm:$0xf]  ;;  %v8702_v17 = vld [vmem:[#allocation6 + $0x288] sm:$0xf0] }
 0x214   : > { %v2038_v24 = vpop.f32.mrf.mxu2  ;;  %v1862_v5 = vpop.f32.mrf.mxu0 }
 0x215   : > { %v2127_v11 = vpop.f32.mrf.mxu3  ;;  %v1863_v36 = vadd.f32 %v1862_v5, %v11636_v18  ;;  %v1951_v20 = vpop.f32.mrf.mxu1  ;;  %v10464_v5 = vld [vmem:[#allocation6 + $0x204] sm:$0xf] }
 0x216   : > { %v11927_v42 = vadd.f32 %v2127_v11, %v2038_v24 }
 0x217   : > { %v11930_v19 = vadd.f32 %v1951_v20, %v1863_v36  ;;  %v8638_v36 = vld [vmem:[#allocation6 + $0x208] sm:$0xf0]  ;;  %v10432_v20 = vld [vmem:[#allocation6 + $0x104] sm:$0xf] }
 0x218   : > { %v8641_v22 = vor.u32 %v10464_v5, %v8638_v36  ;;  %v10448_v5 = vld [vmem:[#allocation6 + $0x184] sm:$0xf]  ;;  %v8574_v36 = vld [vmem:[#allocation6 + $0x188] sm:$0xf0] }
 0x219   : > { %14515 = vst [vmem:[#allocation76_spill] sm:$0xff] %v11930_v19 }
 0x21a   : > { %2377 = vmatpush.bf16.msra.mxu2 %v8641_v22 }
 0x21c   : > { %v2040_v44 = vpop.f32.mrf.mxu2  ;;  %v1865_v33 = vpop.f32.mrf.mxu0 }
 0x21d   : > { %v2129_v57 = vpop.f32.mrf.mxu3  ;;  %v1866_v24 = vadd.f32 %v1865_v33, %v11642_v61  ;;  %v1954_v11 = vpop.f32.mrf.mxu1 }
 0x21e   : > { %v11940_v59 = vadd.f32 %v2129_v57, %v2040_v44  ;;  %v8513_v44 = vor.u32 %v10432_v20, %v8510_v2  ;;  %v8705_v57 = vor.u32 %v10480_v41, %v8702_v17  ;;  %v10387_v20 = vld [vmem:[%s11346_s6 + $0x294] sm:$0xf0]  ;;  %v10384_v2 = vld [vmem:[%s11346_s6 + $0x284] sm:$0xf]  ;;  %v8326_v41 = vld [vmem:[%s11346_s6 + $0x298] sm:$0xf0] }
 0x21f   : > { %v11943_v18 = vadd.f32 %v1954_v11, %v1866_v24  ;;  %1904 = vmatmul.bf16.gmra.mxu0 %v11936_v9  ;;  %v11958_v26 = vor.u32 %v10387_v20, %v8324_v53  ;;  %v8348_v20 = vld [vmem:[%s11346_s6 + $0x2b0] sm:$0xf] }
 0x220   : > { %1993 = vmatmul.bf16.gmra.mxu1 %v11938_v60  ;;  %2199 = vmatpush.bf16.msra.mxu0 %v8513_v44 }
 0x221   : > { %14516 = vst [vmem:[#allocation77_spill] sm:$0xff] %v11943_v18  ;;  %2082 = vmatmul.bf16.gmra.mxu2 %v11628_v23  ;;  %2466 = vmatpush.bf16.msra.mxu3 %v8705_v57  ;;  %v8577_v18 = vor.u32 %v10448_v5, %v8574_v36 }
 0x222   : > { %2171 = vmatmul.bf16.gmra.mxu3 %v11630_v4 }
 0x223   : > { %2288 = vmatpush.bf16.msra.mxu1 %v8577_v18 }
 0x224   : > { %v2043_v61 = vpop.f32.mrf.mxu2  ;;  %v1867_v24 = vpop.f32.mrf.mxu0 }
 0x225   : > { %v2132_v33 = vpop.f32.mrf.mxu3  ;;  %v1868_v4 = vadd.f32 %v1867_v24, %v11660_v6  ;;  %v1956_v11 = vpop.f32.mrf.mxu1 }
 0x226   : > { %v11949_v23 = vadd.f32 %v2132_v33, %v2043_v61  ;;  %v11960_v33 = vor.u32 %v10384_v2, %v8326_v41  ;;  %v10393_v2 = vld [vmem:[%s11346_s6 + $0x2c4] sm:$0xf0]  ;;  %v10390_v41 = vld [vmem:[%s11346_s6 + $0x2b4] sm:$0xf] }
 0x227   : > { %v11952_v19 = vadd.f32 %v1956_v11, %v1868_v4 }
 0x229   : > { %14517 = vst [vmem:[#allocation78_spill] sm:$0xff] %v11952_v19 }
 0x22c   : > { %v2045_v17 = vpop.f32.mrf.mxu2  ;;  %v1870_v61 = vpop.f32.mrf.mxu0 }
 0x22d   : > { %v2134_v22 = vpop.f32.mrf.mxu3  ;;  %v1871_v44 = vadd.f32 %v1870_v61, %v11666_v39  ;;  %v1959_v57 = vpop.f32.mrf.mxu1  ;;  %v11980_v61 = vor.u32 %v10393_v2, %v8348_v20  ;;  %v10607_v2 = vld [vmem:[#allocation6 + $0x374] sm:$0xf0] }
 0x22e   : > { %v11962_v6 = vadd.f32 %v2134_v22, %v2045_v17  ;;  %v8350_v17 = vld [vmem:[%s11346_s6 + $0x2c8] sm:$0xf0] }
 0x22f   : > { %v11965_v24 = vadd.f32 %v1959_v57, %v1871_v44  ;;  %1909 = vmatmul.bf16.gmra.mxu0 %v11958_v26 }
 0x230   : > { %1998 = vmatmul.bf16.gmra.mxu1 %v11960_v33 }
 0x231   : > { %14518 = vst [vmem:[#allocation79_spill] sm:$0xff] %v11965_v24  ;;  %2087 = vmatmul.bf16.gmra.mxu2 %v11652_v3  ;;  %v8372_v24 = vld [vmem:[%s11346_s6 + $0x2e0] sm:$0xf] }
 0x232   : > { %2176 = vmatmul.bf16.gmra.mxu3 %v11654_v10  ;;  %v11982_v10 = vor.u32 %v10390_v41, %v8350_v17  ;;  %v9396_v41 = vld [vmem:[#allocation6 + $0x4f0] sm:$0xf]  ;;  %v10655_v17 = vld [vmem:[#allocation6 + $0x4f4] sm:$0xf0] }
 0x234   : > { %v2048_v53 = vpop.f32.mrf.mxu2  ;;  %v1872_v4 = vpop.f32.mrf.mxu0 }
 0x235   : > { %v2137_v18 = vpop.f32.mrf.mxu3  ;;  %v1873_v39 = vadd.f32 %v1872_v4, %v11684_v37  ;;  %v1961_v5 = vpop.f32.mrf.mxu1  ;;  %v9332_v4 = vld [vmem:[#allocation6 + $0x470] sm:$0xf] }
 0x236   : > { %v11971_v11 = vadd.f32 %v2137_v18, %v2048_v53 }
 0x237   : > { %v11974_v36 = vadd.f32 %v1961_v5, %v1873_v39  ;;  %v10639_v39 = vld [vmem:[#allocation6 + $0x474] sm:$0xf0]  ;;  %v9204_v5 = vld [vmem:[#allocation6 + $0x370] sm:$0xf] }
 0x238   : > { %v9333_v20 = vor.u32 %v10639_v39, %v9332_v4  ;;  %v9268_v4 = vld [vmem:[#allocation6 + $0x3f0] sm:$0xf]  ;;  %v10623_v39 = vld [vmem:[#allocation6 + $0x3f4] sm:$0xf0] }
 0x239   : > { %14519 = vst [vmem:[#allocation80_spill] sm:$0xff] %v11974_v36 }
 0x23a   : > { %3943 = vmatpush.bf16.msrb.mxu2 %v9333_v20 }
 0x23c   : > { %v2050_v22 = vpop.f32.mrf.mxu2  ;;  %v1875_v44 = vpop.f32.mrf.mxu0 }
 0x23d   : > { %v2139_v3 = vpop.f32.mrf.mxu3  ;;  %v1876_v53 = vadd.f32 %v1875_v44, %v11690_v29  ;;  %v1964_v18 = vpop.f32.mrf.mxu1 }
 0x23e   : > { %v11984_v57 = vadd.f32 %v2139_v3, %v2050_v22  ;;  %v9205_v22 = vor.u32 %v10607_v2, %v9204_v5  ;;  %v9397_v3 = vor.u32 %v10655_v17, %v9396_v41  ;;  %v10399_v5 = vld [vmem:[%s11346_s6 + $0x2f4] sm:$0xf0]  ;;  %v10396_v2 = vld [vmem:[%s11346_s6 + $0x2e4] sm:$0xf]  ;;  %v8374_v41 = vld [vmem:[%s11346_s6 + $0x2f8] sm:$0xf0] }
 0x23f   : > { %v11987_v37 = vadd.f32 %v1964_v18, %v1876_v53  ;;  %1914 = vmatmul.bf16.gmra.mxu0 %v11980_v61  ;;  %v12002_v19 = vor.u32 %v10399_v5, %v8372_v24  ;;  %v14527_v5 = vld [vmem:[#allocation55_spill] sm:$0xff] }
 0x240   : > { %2003 = vmatmul.bf16.gmra.mxu1 %v11982_v10  ;;  %3765 = vmatpush.bf16.msrb.mxu0 %v9205_v22 }
 0x241   : > { %14520 = vst [vmem:[#allocation81_spill] sm:$0xff] %v11987_v37  ;;  %2092 = vmatmul.bf16.gmra.mxu2 %v11676_v55  ;;  %4032 = vmatpush.bf16.msrb.mxu3 %v9397_v3  ;;  %v9269_v37 = vor.u32 %v10623_v39, %v9268_v4 }
 0x242   : > { %2181 = vmatmul.bf16.gmra.mxu3 %v11678_v34  ;;  %14522 = vst [vmem:[#allocation83_spill] sm:$0xff] %v12002_v19 }
 0x243   : > { %3854 = vmatpush.bf16.msrb.mxu1 %v9269_v37  ;;  %v14525_v37 = vld [vmem:[#allocation49_spill] sm:$0xff] }
 0x244   : > { %v2053_v29 = vpop.f32.mrf.mxu2  ;;  %v1877_v53 = vpop.f32.mrf.mxu0 }
 0x245   : > { %v2142_v44 = vpop.f32.mrf.mxu3  ;;  %v1878_v34 = vadd.f32 %v1877_v53, %v11708_v35  ;;  %v1966_v18 = vpop.f32.mrf.mxu1 }
 0x246   : > { %v11993_v55 = vadd.f32 %v2142_v44, %v2053_v29  ;;  %v12004_v44 = vor.u32 %v10396_v2, %v8374_v41 }
 0x247   : > { %v11996_v36 = vadd.f32 %v1966_v18, %v1878_v34  ;;  %v14526_v34 = vld [vmem:[#allocation50_spill] sm:$0xff] }
 0x248   : > { %14523 = vst [vmem:[#allocation84_spill] sm:$0xff] %v12004_v44 }
 0x249   : > { %14521 = vst [vmem:[#allocation82_spill] sm:$0xff] %v11996_v36  ;;  %v14532_v36 = vld [vmem:[#allocation20_spill] sm:$0xff] }
 0x24c   : > { %v2055_v17 = vpop.f32.mrf.mxu2  ;;  %v1880_v29 = vpop.f32.mrf.mxu0 }
 0x24d   : > { %v2144_v20 = vpop.f32.mrf.mxu3  ;;  %v1881_v22 = vadd.f32 %v1880_v29, %v11714_v15  ;;  %v1969_v3 = vpop.f32.mrf.mxu1 }
 0x24e   : > { %v12006_v35 = vadd.f32 %v2144_v20, %v2055_v17 }
 0x24f   : > { %v12009_v53 = vadd.f32 %v1969_v3, %v1881_v22  ;;  %1919 = vmatmul.bf16.gmra.mxu0 %v12002_v19 }
 0x250   : > { %2008 = vmatmul.bf16.gmra.mxu1 %v12004_v44 }
 0x251   : > { %14524 = vst [vmem:[#allocation85_spill] sm:$0xff] %v12009_v53  ;;  %2097 = vmatmul.bf16.gmra.mxu2 %v14525_v37 }
 0x252   : > { %2186 = vmatmul.bf16.gmra.mxu3 %v14526_v34  ;;  %v14531_v34 = vld [vmem:[#allocation19_spill] sm:$0xff] }
 0x254   : > { %v2058_v24 = vpop.f32.mrf.mxu2  ;;  %v1882_v4 = vpop.f32.mrf.mxu0 }
 0x255   : > { %v2147_v18 = vpop.f32.mrf.mxu3  ;;  %v1883_v2 = vadd.f32 %v1882_v4, %v14527_v5  ;;  %v1971_v41 = vpop.f32.mrf.mxu1  ;;  %v9324_v4 = vld [vmem:[#allocation6 + $0x460] sm:$0xf]  ;;  %v10637_v5 = vld [vmem:[#allocation6 + $0x464] sm:$0xf0] }
 0x256   : > { %v12015_v39 = vadd.f32 %v2147_v18, %v2058_v24  ;;  %v14533_v24 = vld [vmem:[#allocation53_spill] sm:$0xff]  ;;  %v14534_v18 = vld [vmem:[#allocation54_spill] sm:$0xff] }
 0x257   : > { %v12018_v15 = vadd.f32 %v1971_v41, %v1883_v2  ;;  %v9196_v2 = vld [vmem:[#allocation6 + $0x360] sm:$0xf]  ;;  %v9325_v41 = vor.u32 %v10637_v5, %v9324_v4 }
 0x259   : > { %14528 = vst [vmem:[#allocation49_spill] sm:$0xff] %v12018_v15  ;;  %v10605_v15 = vld [vmem:[#allocation6 + $0x364] sm:$0xf0]  ;;  %3944 = vmatpush.bf16.msrb.mxu2 %v9325_v41 }
 0x25c   : > { %v2060_v17 = vpop.f32.mrf.mxu2  ;;  %v1885_v29 = vpop.f32.mrf.mxu0 }
 0x25d   : > { %v2149_v20 = vpop.f32.mrf.mxu3  ;;  %v1886_v3 = vadd.f32 %v1885_v29, %v11730_v51  ;;  %v1974_v37 = vpop.f32.mrf.mxu1  ;;  %v9197_v51 = vor.u32 %v10605_v15, %v9196_v2 }
 0x25e   : > { %v12020_v22 = vadd.f32 %v2149_v20, %v2060_v17  ;;  %v9388_v17 = vld [vmem:[#allocation6 + $0x4e0] sm:$0xf]  ;;  %v10653_v20 = vld [vmem:[#allocation6 + $0x4e4] sm:$0xf0] }
 0x25f   : > { %v12023_v53 = vadd.f32 %v1974_v37, %v1886_v3  ;;  %2200 = vmatmul.bf16.vlgmr.msra.gmra.mxu0 %v14531_v34  ;;  %v9389_v29 = vor.u32 %v10653_v20, %v9388_v17  ;;  %v14538_v20 = vld [vmem:[#allocation22_spill] sm:$0xff] }
 0x260   : > { %14529 = vst [vmem:[#allocation50_spill] sm:$0xff] %v12020_v22  ;;  %2289 = vmatmul.bf16.vlgmr.msra.gmra.mxu1 %v14532_v36  ;;  %3766 = vmatpush.bf16.msrb.mxu0 %v9197_v51 }
 0x261   : > { %14530 = vst [vmem:[#allocation55_spill] sm:$0xff] %v12023_v53  ;;  %2378 = vmatmul.bf16.vlgmr.msra.gmra.mxu2 %v14533_v24  ;;  %4033 = vmatpush.bf16.msrb.mxu3 %v9389_v29  ;;  %v10621_v53 = vld [vmem:[#allocation6 + $0x3e4] sm:$0xf0] }
 0x262   : > { %2467 = vmatmul.bf16.vlgmr.msra.gmra.mxu3 %v14534_v18  ;;  %v9260_v18 = vld [vmem:[#allocation6 + $0x3e0] sm:$0xf] }
 0x263   : > { %v9261_v44 = vor.u32 %v10621_v53, %v9260_v18  ;;  %v14539_v53 = vld [vmem:[#allocation56_spill] sm:$0xff] }
 0x264   : > { %v2063_v22 = vpop.f32.mrf.mxu2  ;;  %v1887_v37 = vpop.f32.mrf.mxu0 }
 0x265   : > { %v2152_v3 = vpop.f32.mrf.mxu3  ;;  %v1888_v36 = vadd.f32 %v1887_v37, %v11740_v16  ;;  %v1976_v24 = vpop.f32.mrf.mxu1  ;;  %3855 = vmatpush.bf16.msrb.mxu1 %v9261_v44  ;;  %v14537_v16 = vld [vmem:[#allocation21_spill] sm:$0xff] }
 0x266   : > { %v12029_v34 = vadd.f32 %v2152_v3, %v2063_v22 }
 0x267   : > { %v12032_v4 = vadd.f32 %v1976_v24, %v1888_v36 }
 0x269   : > { %14535 = vst [vmem:[#allocation19_spill] sm:$0xff] %v12032_v4 }
 0x26c   : > { %v2065_v5 = vpop.f32.mrf.mxu2  ;;  %v1890_v15 = vpop.f32.mrf.mxu0 }
 0x26d   : > { %v2154_v19 = vpop.f32.mrf.mxu3  ;;  %v1891_v41 = vadd.f32 %v1890_v15, %v11746_v8  ;;  %v1979_v22 = vpop.f32.mrf.mxu1 }
 0x26e   : > { %v12034_v2 = vadd.f32 %v2154_v19, %v2065_v5  ;;  %v14540_v19 = vld [vmem:[#allocation59_spill] sm:$0xff] }
 0x26f   : > { %v12037_v17 = vadd.f32 %v1979_v22, %v1891_v41  ;;  %2205 = vmatmul.bf16.gmra.mxu0 %v14537_v16  ;;  %v14543_v16 = vld [vmem:[#allocation23_spill] sm:$0xff] }
 0x270   : > { %2294 = vmatmul.bf16.gmra.mxu1 %v14538_v20  ;;  %v14544_v20 = vld [vmem:[#allocation24_spill] sm:$0xff] }
 0x271   : > { %14536 = vst [vmem:[#allocation20_spill] sm:$0xff] %v12037_v17  ;;  %2383 = vmatmul.bf16.gmra.mxu2 %v11736_v30 }
 0x272   : > { %2472 = vmatmul.bf16.gmra.mxu3 %v14539_v53  ;;  %v14545_v53 = vld [vmem:[#allocation57_spill] sm:$0xff] }
 0x274   : > { %v2068_v51 = vpop.f32.mrf.mxu2  ;;  %v1892_v29 = vpop.f32.mrf.mxu0 }
 0x275   : > { %v2157_v44 = vpop.f32.mrf.mxu3  ;;  %v1893_v37 = vadd.f32 %v1892_v29, %v14540_v19  ;;  %v1981_v36 = vpop.f32.mrf.mxu1  ;;  %v10635_v29 = vld [vmem:[#allocation6 + $0x454] sm:$0xf0]  ;;  %v9188_v19 = vld [vmem:[#allocation6 + $0x350] sm:$0xf] }
 0x276   : > { %v12043_v3 = vadd.f32 %v2157_v44, %v2068_v51  ;;  %v14546_v51 = vld [vmem:[#allocation58_spill] sm:$0xff]  ;;  %v9316_v44 = vld [vmem:[#allocation6 + $0x450] sm:$0xf] }
 0x277   : > { %v12046_v8 = vadd.f32 %v1981_v36, %v1893_v37  ;;  %v9317_v37 = vor.u32 %v10635_v29, %v9316_v44  ;;  %v10603_v36 = vld [vmem:[#allocation6 + $0x354] sm:$0xf0] }
 0x279   : > { %14541 = vst [vmem:[#allocation53_spill] sm:$0xff] %v12046_v8  ;;  %3945 = vmatpush.bf16.msrb.mxu2 %v9317_v37 }
 0x27c   : > { %v2070_v24 = vpop.f32.mrf.mxu2  ;;  %v1895_v5 = vpop.f32.mrf.mxu0 }
 0x27d   : > { %v2159_v18 = vpop.f32.mrf.mxu3  ;;  %v1896_v41 = vadd.f32 %v1895_v5, %v11762_v25  ;;  %v1984_v30 = vpop.f32.mrf.mxu1  ;;  %v9189_v25 = vor.u32 %v10603_v36, %v9188_v19 }
 0x27e   : > { %v12048_v15 = vadd.f32 %v2159_v18, %v2070_v24  ;;  %v9380_v24 = vld [vmem:[#allocation6 + $0x4d0] sm:$0xf]  ;;  %v10651_v18 = vld [vmem:[#allocation6 + $0x4d4] sm:$0xf0] }
 0x27f   : > { %v12051_v22 = vadd.f32 %v1984_v30, %v1896_v41  ;;  %2210 = vmatmul.bf16.gmra.mxu0 %v14543_v16  ;;  %v9381_v5 = vor.u32 %v10651_v18, %v9380_v24  ;;  %v14550_v18 = vld [vmem:[#allocation26_spill] sm:$0xff] }
 0x280   : > { %2299 = vmatmul.bf16.gmra.mxu1 %v14544_v20  ;;  %3767 = vmatpush.bf16.msrb.mxu0 %v9189_v25 }
 0x281   : > { %14542 = vst [vmem:[#allocation54_spill] sm:$0xff] %v12051_v22  ;;  %2388 = vmatmul.bf16.gmra.mxu2 %v14545_v53  ;;  %4034 = vmatpush.bf16.msrb.mxu3 %v9381_v5  ;;  %v10619_v22 = vld [vmem:[#allocation6 + $0x3d4] sm:$0xf0] }
 0x282   : > { %2477 = vmatmul.bf16.gmra.mxu3 %v14546_v51  ;;  %v9252_v51 = vld [vmem:[#allocation6 + $0x3d0] sm:$0xf] }
 0x283   : > { %v9253_v17 = vor.u32 %v10619_v22, %v9252_v51  ;;  %v14551_v22 = vld [vmem:[#allocation60_spill] sm:$0xff] }
 0x284   : > { %v2073_v8 = vpop.f32.mrf.mxu2  ;;  %v1897_v30 = vpop.f32.mrf.mxu0 }
 0x285   : > { %v2162_v41 = vpop.f32.mrf.mxu3  ;;  %v1898_v20 = vadd.f32 %v1897_v30, %v11772_v62  ;;  %v1986_v53 = vpop.f32.mrf.mxu1  ;;  %3856 = vmatpush.bf16.msrb.mxu1 %v9253_v17  ;;  %v14549_v62 = vld [vmem:[#allocation25_spill] sm:$0xff] }
 0x286   : > { %v12057_v16 = vadd.f32 %v2162_v41, %v2073_v8 }
 0x287   : > { %v12060_v44 = vadd.f32 %v1986_v53, %v1898_v20 }
 0x289   : > { %14547 = vst [vmem:[#allocation21_spill] sm:$0xff] %v12060_v44 }
 0x28c   : > { %v2075_v29 = vpop.f32.mrf.mxu2  ;;  %v1900_v19 = vpop.f32.mrf.mxu0 }
 0x28d   : > { %v2164_v4 = vpop.f32.mrf.mxu3  ;;  %v1901_v37 = vadd.f32 %v1900_v19, %v11778_v12  ;;  %v1989_v8 = vpop.f32.mrf.mxu1 }
 0x28e   : > { %v12062_v36 = vadd.f32 %v2164_v4, %v2075_v29  ;;  %v14552_v4 = vld [vmem:[#allocation63_spill] sm:$0xff] }
 0x28f   : > { %v12065_v24 = vadd.f32 %v1989_v8, %v1901_v37  ;;  %2215 = vmatmul.bf16.gmra.mxu0 %v14549_v62  ;;  %v14555_v62 = vld [vmem:[#allocation27_spill] sm:$0xff] }
 0x290   : > { %2304 = vmatmul.bf16.gmra.mxu1 %v14550_v18  ;;  %v14556_v18 = vld [vmem:[#allocation28_spill] sm:$0xff] }
 0x291   : > { %14548 = vst [vmem:[#allocation22_spill] sm:$0xff] %v12065_v24  ;;  %2393 = vmatmul.bf16.gmra.mxu2 %v11768_v27 }
 0x292   : > { %2482 = vmatmul.bf16.gmra.mxu3 %v14551_v22  ;;  %v14557_v22 = vld [vmem:[#allocation61_spill] sm:$0xff] }
 0x294   : > { %v2078_v25 = vpop.f32.mrf.mxu2  ;;  %v1902_v5 = vpop.f32.mrf.mxu0 }
 0x295   : > { %v2167_v17 = vpop.f32.mrf.mxu3  ;;  %v1903_v30 = vadd.f32 %v1902_v5, %v14552_v4  ;;  %v1991_v20 = vpop.f32.mrf.mxu1  ;;  %v10633_v5 = vld [vmem:[#allocation6 + $0x444] sm:$0xf0]  ;;  %v9180_v4 = vld [vmem:[#allocation6 + $0x340] sm:$0xf] }
 0x296   : > { %v12071_v41 = vadd.f32 %v2167_v17, %v2078_v25  ;;  %v14558_v25 = vld [vmem:[#allocation62_spill] sm:$0xff] }
 0x297   : > { %v12074_v12 = vadd.f32 %v1991_v20, %v1903_v30  ;;  %v9308_v17 = vld [vmem:[#allocation6 + $0x440] sm:$0xf]  ;;  %v10601_v20 = vld [vmem:[#allocation6 + $0x344] sm:$0xf0] }
 0x298   : > { %v9309_v30 = vor.u32 %v10633_v5, %v9308_v17 }
 0x299   : > { %14553 = vst [vmem:[#allocation56_spill] sm:$0xff] %v12074_v12 }
 0x29a   : > { %3946 = vmatpush.bf16.msrb.mxu2 %v9309_v30 }
 0x29c   : > { %v2080_v53 = vpop.f32.mrf.mxu2  ;;  %v1905_v29 = vpop.f32.mrf.mxu0 }
 0x29d   : > { %v2169_v51 = vpop.f32.mrf.mxu3  ;;  %v1906_v37 = vadd.f32 %v1905_v29, %v11794_v1  ;;  %v1994_v27 = vpop.f32.mrf.mxu1  ;;  %v9181_v1 = vor.u32 %v10601_v20, %v9180_v4 }
 0x29e   : > { %v12076_v19 = vadd.f32 %v2169_v51, %v2080_v53  ;;  %v9372_v53 = vld [vmem:[#allocation6 + $0x4c0] sm:$0xf]  ;;  %v10649_v51 = vld [vmem:[#allocation6 + $0x4c4] sm:$0xf0] }
 0x29f   : > { %v12079_v8 = vadd.f32 %v1994_v27, %v1906_v37  ;;  %2220 = vmatmul.bf16.gmra.mxu0 %v14555_v62  ;;  %v9373_v29 = vor.u32 %v10649_v51, %v9372_v53  ;;  %v14562_v51 = vld [vmem:[#allocation30_spill] sm:$0xff] }
 0x2a0   : > { %2309 = vmatmul.bf16.gmra.mxu1 %v14556_v18  ;;  %3768 = vmatpush.bf16.msrb.mxu0 %v9181_v1 }
 0x2a1   : > { %14554 = vst [vmem:[#allocation59_spill] sm:$0xff] %v12079_v8  ;;  %2398 = vmatmul.bf16.gmra.mxu2 %v14557_v22  ;;  %4035 = vmatpush.bf16.msrb.mxu3 %v9373_v29  ;;  %v10617_v8 = vld [vmem:[#allocation6 + $0x3c4] sm:$0xf0] }
 0x2a2   : > { %2487 = vmatmul.bf16.gmra.mxu3 %v14558_v25  ;;  %v9244_v25 = vld [vmem:[#allocation6 + $0x3c0] sm:$0xf] }
 0x2a3   : > { %v9245_v24 = vor.u32 %v10617_v8, %v9244_v25 }
 0x2a4   : > { %v2083_v12 = vpop.f32.mrf.mxu2  ;;  %v1907_v27 = vpop.f32.mrf.mxu0 }
 0x2a5   : > { %v2172_v37 = vpop.f32.mrf.mxu3  ;;  %v1908_v18 = vadd.f32 %v1907_v27, %v11804_v47  ;;  %v1996_v22 = vpop.f32.mrf.mxu1  ;;  %3857 = vmatpush.bf16.msrb.mxu1 %v9245_v24  ;;  %v14561_v47 = vld [vmem:[#allocation29_spill] sm:$0xff] }
 0x2a6   : > { %v12085_v62 = vadd.f32 %v2172_v37, %v2083_v12 }
 0x2a7   : > { %v12088_v17 = vadd.f32 %v1996_v22, %v1908_v18 }
 0x2a9   : > { %14559 = vst [vmem:[#allocation23_spill] sm:$0xff] %v12088_v17 }
 0x2ac   : > { %v2085_v5 = vpop.f32.mrf.mxu2  ;;  %v1910_v4 = vpop.f32.mrf.mxu0 }
 0x2ad   : > { %v2174_v44 = vpop.f32.mrf.mxu3  ;;  %v1911_v30 = vadd.f32 %v1910_v4, %v11810_v49  ;;  %v1999_v12 = vpop.f32.mrf.mxu1 }
 0x2ae   : > { %v12090_v20 = vadd.f32 %v2174_v44, %v2085_v5  ;;  %v14563_v44 = vld [vmem:[#allocation66_spill] sm:$0xff] }
 0x2af   : > { %v12093_v53 = vadd.f32 %v1999_v12, %v1911_v30  ;;  %2225 = vmatmul.bf16.gmra.mxu0 %v14561_v47  ;;  %v14567_v12 = vld [vmem:[#allocation32_spill] sm:$0xff] }
 0x2b0   : > { %2314 = vmatmul.bf16.gmra.mxu1 %v14562_v51  ;;  %v14568_v47 = vld [vmem:[#allocation64_spill] sm:$0xff]  ;;  %v14569_v51 = vld [vmem:[#allocation65_spill] sm:$0xff] }
 0x2b1   : > { %14560 = vst [vmem:[#allocation24_spill] sm:$0xff] %v12093_v53  ;;  %2403 = vmatmul.bf16.gmra.mxu2 %v11800_v13 }
 0x2b2   : > { %2492 = vmatmul.bf16.gmra.mxu3 %v11802_v31  ;;  %v14566_v31 = vld [vmem:[#allocation31_spill] sm:$0xff] }
 0x2b4   : > { %v2088_v8 = vpop.f32.mrf.mxu2  ;;  %v1912_v1 = vpop.f32.mrf.mxu0 }
 0x2b5   : > { %v2177_v24 = vpop.f32.mrf.mxu3  ;;  %v1913_v37 = vadd.f32 %v1912_v1, %v14563_v44  ;;  %v2001_v27 = vpop.f32.mrf.mxu1  ;;  %v9172_v1 = vld [vmem:[#allocation6 + $0x330] sm:$0xf] }
 0x2b6   : > { %v12099_v29 = vadd.f32 %v2177_v24, %v2088_v8  ;;  %v9300_v8 = vld [vmem:[#allocation6 + $0x430] sm:$0xf]  ;;  %v10631_v24 = vld [vmem:[#allocation6 + $0x434] sm:$0xf0] }
 0x2b7   : > { %v12102_v49 = vadd.f32 %v2001_v27, %v1913_v37  ;;  %v9301_v44 = vor.u32 %v10631_v24, %v9300_v8  ;;  %v10599_v37 = vld [vmem:[#allocation6 + $0x334] sm:$0xf0]  ;;  %v9364_v27 = vld [vmem:[#allocation6 + $0x4b0] sm:$0xf] }
 0x2b9   : > { %14564 = vst [vmem:[#allocation57_spill] sm:$0xff] %v12102_v49  ;;  %3947 = vmatpush.bf16.msrb.mxu2 %v9301_v44 }
 0x2bc   : > { %v2090_v18 = vpop.f32.mrf.mxu2  ;;  %v1915_v25 = vpop.f32.mrf.mxu0 }
 0x2bd   : > { %v2179_v22 = vpop.f32.mrf.mxu3  ;;  %v1916_v4 = vadd.f32 %v1915_v25, %v11826_v38  ;;  %v2004_v13 = vpop.f32.mrf.mxu1  ;;  %v9173_v38 = vor.u32 %v10599_v37, %v9172_v1 }
 0x2be   : > { %v12104_v5 = vadd.f32 %v2179_v22, %v2090_v18  ;;  %v10647_v18 = vld [vmem:[#allocation6 + $0x4b4] sm:$0xf0] }
 0x2bf   : > { %v12107_v30 = vadd.f32 %v2004_v13, %v1916_v4  ;;  %2230 = vmatmul.bf16.gmra.mxu0 %v14566_v31  ;;  %v9365_v25 = vor.u32 %v10647_v18, %v9364_v27 }
 0x2c0   : > { %2319 = vmatmul.bf16.gmra.mxu1 %v14567_v12  ;;  %3769 = vmatpush.bf16.msrb.mxu0 %v9173_v38  ;;  %v14574_v38 = vld [vmem:[#allocation67_spill] sm:$0xff] }
 0x2c1   : > { %14565 = vst [vmem:[#allocation58_spill] sm:$0xff] %v12107_v30  ;;  %2408 = vmatmul.bf16.gmra.mxu2 %v14568_v47  ;;  %4036 = vmatpush.bf16.msrb.mxu3 %v9365_v25  ;;  %v10615_v30 = vld [vmem:[#allocation6 + $0x3b4] sm:$0xf0] }
 0x2c2   : > { %2497 = vmatmul.bf16.gmra.mxu3 %v14569_v51  ;;  %v9236_v51 = vld [vmem:[#allocation6 + $0x3b0] sm:$0xf] }
 0x2c3   : > { %v9237_v8 = vor.u32 %v10615_v30, %v9236_v51 }
 0x2c4   : > { %v2093_v22 = vpop.f32.mrf.mxu2  ;;  %v1917_v13 = vpop.f32.mrf.mxu0 }
 0x2c5   : > { %v2182_v4 = vpop.f32.mrf.mxu3  ;;  %v1918_v12 = vadd.f32 %v1917_v13, %v11836_v56  ;;  %v2006_v47 = vpop.f32.mrf.mxu1  ;;  %3858 = vmatpush.bf16.msrb.mxu1 %v9237_v8  ;;  %v14572_v56 = vld [vmem:[#allocation33_spill] sm:$0xff] }
 0x2c6   : > { %v12113_v31 = vadd.f32 %v2182_v4, %v2093_v22  ;;  %v14573_v22 = vld [vmem:[#allocation34_spill] sm:$0xff] }
 0x2c7   : > { %v12116_v49 = vadd.f32 %v2006_v47, %v1918_v12 }
 0x2c9   : > { %14570 = vst [vmem:[#allocation25_spill] sm:$0xff] %v12116_v49 }
 0x2cc   : > { %v2095_v24 = vpop.f32.mrf.mxu2  ;;  %v1920_v1 = vpop.f32.mrf.mxu0 }
 0x2cd   : > { %v2184_v53 = vpop.f32.mrf.mxu3  ;;  %v1921_v44 = vadd.f32 %v1920_v1, %v11842_v45  ;;  %v2009_v27 = vpop.f32.mrf.mxu1 }
 0x2ce   : > { %v12118_v37 = vadd.f32 %v2184_v53, %v2095_v24 }
 0x2cf   : > { %v12121_v18 = vadd.f32 %v2009_v27, %v1921_v44  ;;  %2235 = vmatmul.bf16.gmra.mxu0 %v14572_v56  ;;  %v14576_v27 = vld [vmem:[#allocation35_spill] sm:$0xff]  ;;  %v14577_v56 = vld [vmem:[#allocation36_spill] sm:$0xff] }
 0x2d0   : > { %2324 = vmatmul.bf16.gmra.mxu1 %v14573_v22  ;;  %v14578_v22 = vld [vmem:[#allocation68_spill] sm:$0xff] }
 0x2d1   : > { %14571 = vst [vmem:[#allocation26_spill] sm:$0xff] %v12121_v18  ;;  %2413 = vmatmul.bf16.gmra.mxu2 %v11832_v48 }
 0x2d2   : > { %2502 = vmatmul.bf16.gmra.mxu3 %v14574_v38  ;;  %v10629_v38 = vld [vmem:[#allocation6 + $0x424] sm:$0xf0] }
 0x2d4   : > { %v2098_v30 = vpop.f32.mrf.mxu2  ;;  %v1922_v4 = vpop.f32.mrf.mxu0 }
 0x2d5   : > { %v2187_v25 = vpop.f32.mrf.mxu3  ;;  %v1923_v53 = vadd.f32 %v1922_v4, %v11853_v14  ;;  %v2011_v12 = vpop.f32.mrf.mxu1  ;;  %v9292_v14 = vld [vmem:[#allocation6 + $0x420] sm:$0xf]  ;;  %v10597_v4 = vld [vmem:[#allocation6 + $0x324] sm:$0xf0] }
 0x2d6   : > { %v12127_v13 = vadd.f32 %v2187_v25, %v2098_v30  ;;  %v9164_v30 = vld [vmem:[#allocation6 + $0x320] sm:$0xf]  ;;  %v9293_v25 = vor.u32 %v10629_v38, %v9292_v14 }
 0x2d7   : > { %v12130_v45 = vadd.f32 %v2011_v12, %v1923_v53  ;;  %v9356_v53 = vld [vmem:[#allocation6 + $0x4a0] sm:$0xf]  ;;  %v10645_v12 = vld [vmem:[#allocation6 + $0x4a4] sm:$0xf0] }
 0x2d8   : > { %3948 = vmatpush.bf16.msrb.mxu2 %v9293_v25 }
 0x2d9   : > { %14575 = vst [vmem:[#allocation60_spill] sm:$0xff] %v12130_v45  ;;  %v10613_v45 = vld [vmem:[#allocation6 + $0x3a4] sm:$0xf0] }
 0x2dc   : > { %v2100_v47 = vpop.f32.mrf.mxu2  ;;  %v2201_v8 = vpop.f32.mrf.mxu0 }
 0x2dd   : > { %v2189_v51 = vpop.f32.mrf.mxu3  ;;  %v2202_v1 = vadd.f32 %v2201_v8, %v11861_v40  ;;  %v2290_v48 = vpop.f32.mrf.mxu1  ;;  %v9357_v40 = vor.u32 %v10645_v12, %v9356_v53  ;;  %v14581_v12 = vld [vmem:[#allocation37_spill] sm:$0xff] }
 0x2de   : > { %v12132_v24 = vadd.f32 %v2189_v51, %v2100_v47  ;;  %v9165_v51 = vor.u32 %v10597_v4, %v9164_v30 }
 0x2df   : > { %v2291_v44 = vadd.f32 %v2290_v48, %v2202_v1  ;;  %2240 = vmatmul.bf16.gmra.mxu0 %v14576_v27  ;;  %4037 = vmatpush.bf16.msrb.mxu3 %v9357_v40 }
 0x2e0   : > { %2329 = vmatmul.bf16.gmra.mxu1 %v14577_v56  ;;  %3770 = vmatpush.bf16.msrb.mxu0 %v9165_v51 }
 0x2e1   : > { %2418 = vmatmul.bf16.gmra.mxu2 %v11848_v46 }
 0x2e2   : > { %2507 = vmatmul.bf16.gmra.mxu3 %v14578_v22  ;;  %v9228_v22 = vld [vmem:[#allocation6 + $0x3a0] sm:$0xf] }
 0x2e3   : > { %v9229_v38 = vor.u32 %v10613_v45, %v9228_v22 }
 0x2e4   : > { %v2379_v47 = vpop.f32.mrf.mxu2  ;;  %v2203_v48 = vpop.f32.mrf.mxu0 }
 0x2e5   : > { %v2380_v8 = vadd.f32 %v2379_v47, %v2291_v44  ;;  %v2468_v1 = vpop.f32.mrf.mxu3  ;;  %v2204_v27 = vadd.f32 %v2203_v48, %v11874_v7  ;;  %v2292_v56 = vpop.f32.mrf.mxu1  ;;  %3859 = vmatpush.bf16.msrb.mxu1 %v9229_v38  ;;  %v14582_v47 = vld [vmem:[#allocation38_spill] sm:$0xff] }
 0x2e7   : > { %v12140_v46 = vadd.f32 %v2468_v1, %v2380_v8  ;;  %v2293_v14 = vadd.f32 %v2292_v56, %v2204_v27 }
 0x2e9   : > { %14579 = vst [vmem:[#allocation63_spill] sm:$0xff] %v12140_v46  ;;  %v10563_v46 = vld [vmem:[%s11346_s6 + $0x24c] sm:$0xf] }
 0x2ec   : > { %v2381_v18 = vpop.f32.mrf.mxu2  ;;  %v2206_v4 = vpop.f32.mrf.mxu0 }
 0x2ed   : > { %v2382_v49 = vadd.f32 %v2381_v18, %v2293_v14  ;;  %v2470_v30 = vpop.f32.mrf.mxu3  ;;  %v2207_v44 = vadd.f32 %v2206_v4, %v11883_v21  ;;  %v2295_v53 = vpop.f32.mrf.mxu1  ;;  %v14586_v4 = vld [vmem:[#allocation40_spill] sm:$0xff] }
 0x2ef   : > { %v12143_v25 = vadd.f32 %v2470_v30, %v2382_v49  ;;  %v2296_v7 = vadd.f32 %v2295_v53, %v2207_v44  ;;  %2245 = vmatmul.bf16.gmra.mxu0 %v14581_v12  ;;  %v14585_v30 = vld [vmem:[#allocation39_spill] sm:$0xff]  ;;  %v10627_v44 = vld [vmem:[#allocation6 + $0x414] sm:$0xf0]  ;;  %v9156_v53 = vld [vmem:[#allocation6 + $0x310] sm:$0xf] }
 0x2f0   : > { %2334 = vmatmul.bf16.gmra.mxu1 %v14582_v47  ;;  %v10595_v12 = vld [vmem:[#allocation6 + $0x314] sm:$0xf0]  ;;  %v9348_v47 = vld [vmem:[#allocation6 + $0x490] sm:$0xf] }
 0x2f1   : > { %14580 = vst [vmem:[#allocation27_spill] sm:$0xff] %v12143_v25  ;;  %2423 = vmatmul.bf16.gmra.mxu2 %v11870_v43 }
 0x2f2   : > { %2512 = vmatmul.bf16.gmra.mxu3 %v11872_v54 }
 0x2f4   : > { %v2384_v45 = vpop.f32.mrf.mxu2  ;;  %v2208_v18 = vpop.f32.mrf.mxu0 }
 0x2f5   : > { %v2385_v51 = vadd.f32 %v2384_v45, %v2296_v7  ;;  %v2473_v40 = vpop.f32.mrf.mxu3  ;;  %v2209_v8 = vadd.f32 %v2208_v18, %v11896_v52  ;;  %v2297_v1 = vpop.f32.mrf.mxu1  ;;  %v9284_v52 = vld [vmem:[#allocation6 + $0x410] sm:$0xf]  ;;  %v10643_v45 = vld [vmem:[#allocation6 + $0x494] sm:$0xf0] }
 0x2f6   : > { %v9285_v7 = vor.u32 %v10627_v44, %v9284_v52 }
 0x2f7   : > { %v12150_v21 = vadd.f32 %v2473_v40, %v2385_v51  ;;  %v2298_v49 = vadd.f32 %v2297_v1, %v2209_v8  ;;  %v9157_v51 = vor.u32 %v10595_v12, %v9156_v53  ;;  %v9349_v40 = vor.u32 %v10643_v45, %v9348_v47  ;;  %v14589_v53 = vld [vmem:[#allocation41_spill] sm:$0xff] }
 0x2f8   : > { %3949 = vmatpush.bf16.msrb.mxu2 %v9285_v7  ;;  %v14590_v7 = vld [vmem:[#allocation42_spill] sm:$0xff] }
 0x2f9   : > { %14583 = vst [vmem:[#allocation28_spill] sm:$0xff] %v12150_v21  ;;  %3771 = vmatpush.bf16.msrb.mxu0 %v9157_v51  ;;  %4038 = vmatpush.bf16.msrb.mxu3 %v9349_v40 }
 0x2fc   : > { %v2386_v48 = vpop.f32.mrf.mxu2  ;;  %v2211_v22 = vpop.f32.mrf.mxu0 }
 0x2fd   : > { %v2387_v27 = vadd.f32 %v2386_v48, %v2298_v49  ;;  %v2475_v56 = vpop.f32.mrf.mxu3  ;;  %v2212_v14 = vadd.f32 %v2211_v22, %v11905_v58  ;;  %v2300_v38 = vpop.f32.mrf.mxu1 }
 0x2ff   : > { %v12153_v43 = vadd.f32 %v2475_v56, %v2387_v27  ;;  %v2301_v54 = vadd.f32 %v2300_v38, %v2212_v14  ;;  %2250 = vmatmul.bf16.gmra.mxu0 %v14585_v30  ;;  %v10611_v27 = vld [vmem:[#allocation6 + $0x394] sm:$0xf0] }
 0x300   : > { %2339 = vmatmul.bf16.gmra.mxu1 %v14586_v4 }
 0x301   : > { %14584 = vst [vmem:[#allocation61_spill] sm:$0xff] %v12153_v43  ;;  %2428 = vmatmul.bf16.gmra.mxu2 %v11892_v0 }
 0x302   : > { %2517 = vmatmul.bf16.gmra.mxu3 %v11894_v63  ;;  %v9220_v63 = vld [vmem:[#allocation6 + $0x390] sm:$0xf] }
 0x303   : > { %v9221_v22 = vor.u32 %v10611_v27, %v9220_v63 }
 0x304   : > { %v2389_v58 = vpop.f32.mrf.mxu2  ;;  %v2213_v1 = vpop.f32.mrf.mxu0 }
 0x305   : > { %v2390_v18 = vadd.f32 %v2389_v58, %v2301_v54  ;;  %v2478_v8 = vpop.f32.mrf.mxu3  ;;  %v2214_v49 = vadd.f32 %v2213_v1, %v11918_v28  ;;  %v2302_v48 = vpop.f32.mrf.mxu1  ;;  %3860 = vmatpush.bf16.msrb.mxu1 %v9221_v22  ;;  %v14594_v22 = vld [vmem:[#allocation44_spill] sm:$0xff] }
 0x307   : > { %v12160_v0 = vadd.f32 %v2478_v8, %v2390_v18  ;;  %v2303_v56 = vadd.f32 %v2302_v48, %v2214_v49 }
 0x309   : > { %14587 = vst [vmem:[#allocation62_spill] sm:$0xff] %v12160_v0 }
 0x30c   : > { %v2391_v14 = vpop.f32.mrf.mxu2  ;;  %v2216_v4 = vpop.f32.mrf.mxu0 }
 0x30d   : > { %v2392_v38 = vadd.f32 %v2391_v14, %v2303_v56  ;;  %v2480_v30 = vpop.f32.mrf.mxu3  ;;  %v2217_v54 = vadd.f32 %v2216_v4, %v11927_v42  ;;  %v2305_v52 = vpop.f32.mrf.mxu1  ;;  %v14593_v56 = vld [vmem:[#allocation43_spill] sm:$0xff] }
 0x30e   : > { %v10625_v14 = vld [vmem:[#allocation6 + $0x404] sm:$0xf0] }
 0x30f   : > { %v12163_v44 = vadd.f32 %v2480_v30, %v2392_v38  ;;  %v2306_v28 = vadd.f32 %v2305_v52, %v2217_v54  ;;  %2255 = vmatmul.bf16.gmra.mxu0 %v14589_v53  ;;  %v9148_v38 = vld [vmem:[#allocation6 + $0x300] sm:$0xf]  ;;  %v10593_v4 = vld [vmem:[#allocation6 + $0x304] sm:$0xf0] }
 0x310   : > { %2344 = vmatmul.bf16.gmra.mxu1 %v14590_v7  ;;  %v9340_v54 = vld [vmem:[#allocation6 + $0x480] sm:$0xf]  ;;  %v10641_v52 = vld [vmem:[#allocation6 + $0x484] sm:$0xf0] }
 0x311   : > { %14588 = vst [vmem:[#allocation29_spill] sm:$0xff] %v12163_v44  ;;  %2433 = vmatmul.bf16.gmra.mxu2 %v11914_v32  ;;  %v9341_v53 = vor.u32 %v10641_v52, %v9340_v54  ;;  %v9014_v44 = vld [vmem:[%s11346_s6 + $0x230] sm:$0xf0] }
 0x312   : > { %2522 = vmatmul.bf16.gmra.mxu3 %v11916_v50 }
 0x313   : > { %4039 = vmatpush.bf16.msrb.mxu3 %v9341_v53 }
 0x314   : > { %v2394_v12 = vpop.f32.mrf.mxu2  ;;  %v2218_v58 = vpop.f32.mrf.mxu0 }
 0x315   : > { %v2395_v47 = vadd.f32 %v2394_v12, %v2306_v28  ;;  %v2483_v45 = vpop.f32.mrf.mxu3  ;;  %v2219_v51 = vadd.f32 %v2218_v58, %v11940_v59  ;;  %v2307_v40 = vpop.f32.mrf.mxu1  ;;  %v9276_v59 = vld [vmem:[#allocation6 + $0x400] sm:$0xf]  ;;  %v9149_v28 = vor.u32 %v10593_v4, %v9148_v38 }
 0x316   : > { %v9277_v30 = vor.u32 %v10625_v14, %v9276_v59 }
 0x317   : > { %v12170_v42 = vadd.f32 %v2483_v45, %v2395_v47  ;;  %v2308_v18 = vadd.f32 %v2307_v40, %v2219_v51  ;;  %3772 = vmatpush.bf16.msrb.mxu0 %v9149_v28  ;;  %v10609_v51 = vld [vmem:[#allocation6 + $0x384] sm:$0xf0] }
 0x318   : > { %3950 = vmatpush.bf16.msrb.mxu2 %v9277_v30 }
 0x319   : > { %14591 = vst [vmem:[#allocation30_spill] sm:$0xff] %v12170_v42 }
 0x31c   : > { %v2396_v8 = vpop.f32.mrf.mxu2  ;;  %v2221_v48 = vpop.f32.mrf.mxu0 }
 0x31d   : > { %v2397_v1 = vadd.f32 %v2396_v8, %v2308_v18  ;;  %v2485_v49 = vpop.f32.mrf.mxu3  ;;  %v2222_v63 = vadd.f32 %v2221_v48, %v11949_v23  ;;  %v2310_v27 = vpop.f32.mrf.mxu1 }
 0x31f   : > { %v12173_v32 = vadd.f32 %v2485_v49, %v2397_v1  ;;  %v2311_v50 = vadd.f32 %v2310_v27, %v2222_v63  ;;  %2260 = vmatmul.bf16.gmra.mxu0 %v14593_v56  ;;  %v14597_v56 = vld [vmem:[#allocation45_spill] sm:$0xff] }
 0x320   : > { %2349 = vmatmul.bf16.gmra.mxu1 %v14594_v22  ;;  %v14598_v22 = vld [vmem:[#allocation46_spill] sm:$0xff] }
 0x321   : > { %14592 = vst [vmem:[#allocation66_spill] sm:$0xff] %v12173_v32  ;;  %2438 = vmatmul.bf16.gmra.mxu2 %v11936_v9 }
 0x322   : > { %2527 = vmatmul.bf16.gmra.mxu3 %v11938_v60  ;;  %v9212_v60 = vld [vmem:[#allocation6 + $0x380] sm:$0xf] }
 0x323   : > { %v9213_v18 = vor.u32 %v10609_v51, %v9212_v60  ;;  %v9206_v60 = vld [vmem:[#allocation6 + $0x378] sm:$0xf0]  ;;  %v9460_v51 = vld [vmem:[#allocation6 + $0x570] sm:$0xf] }
 0x324   : > { %v2399_v23 = vpop.f32.mrf.mxu2  ;;  %v2223_v47 = vpop.f32.mrf.mxu0 }
 0x325   : > { %v2400_v7 = vadd.f32 %v2399_v23, %v2311_v50  ;;  %v2488_v12 = vpop.f32.mrf.mxu3  ;;  %v2224_v45 = vadd.f32 %v2223_v47, %v11962_v6  ;;  %v2312_v58 = vpop.f32.mrf.mxu1  ;;  %3861 = vmatpush.bf16.msrb.mxu1 %v9213_v18  ;;  %v10671_v18 = vld [vmem:[#allocation6 + $0x574] sm:$0xf0] }
 0x327   : > { %v12180_v9 = vadd.f32 %v2488_v12, %v2400_v7  ;;  %v2313_v40 = vadd.f32 %v2312_v58, %v2224_v45  ;;  %v14601_v45 = vld [vmem:[#allocation47_spill] sm:$0xff]  ;;  %v14602_v58 = vld [vmem:[#allocation48_spill] sm:$0xff] }
 0x329   : > { %14595 = vst [vmem:[#allocation31_spill] sm:$0xff] %v12180_v9  ;;  %v10551_v9 = vld [vmem:[%s11346_s6 + $0x1ec] sm:$0xf] }
 0x32c   : > { %v2401_v8 = vpop.f32.mrf.mxu2  ;;  %v2226_v48 = vpop.f32.mrf.mxu0 }
 0x32d   : > { %v2402_v1 = vadd.f32 %v2401_v8, %v2313_v40  ;;  %v2490_v49 = vpop.f32.mrf.mxu3  ;;  %v2227_v63 = vadd.f32 %v2226_v48, %v11971_v11  ;;  %v2315_v27 = vpop.f32.mrf.mxu1  ;;  %v10622_v8 = vld [vmem:[#allocation6 + $0x3f4] sm:$0xf] }
 0x32f   : > { %v12183_v50 = vadd.f32 %v2490_v49, %v2402_v1  ;;  %v2316_v6 = vadd.f32 %v2315_v27, %v2227_v63  ;;  %2265 = vmatmul.bf16.gmra.mxu0 %v14597_v56  ;;  %v9270_v1 = vld [vmem:[#allocation6 + $0x3f8] sm:$0xf0]  ;;  %v9461_v49 = vor.u32 %v10671_v18, %v9460_v51 }
 0x330   : > { %2354 = vmatmul.bf16.gmra.mxu1 %v14598_v22  ;;  %v9273_v48 = vor.u32 %v10622_v8, %v9270_v1  ;;  %v8764_v1 = vld [vmem:[%s11346_s6 + $0x30] sm:$0xf] }
 0x331   : > { %14596 = vst [vmem:[#allocation32_spill] sm:$0xff] %v12183_v50  ;;  %2443 = vmatmul.bf16.gmra.mxu2 %v11958_v26  ;;  %4121 = vmatpush.bf16.msra.mxu0 %v9461_v49  ;;  %v10496_v49 = vld [vmem:[%s11346_s6 + $0x34] sm:$0xf] }
 0x332   : > { %2532 = vmatmul.bf16.gmra.mxu3 %v11960_v33 }
 0x333   : > { %4388 = vmatpush.bf16.msra.mxu3 %v9273_v48  ;;  %v8766_v48 = vld [vmem:[%s11346_s6 + $0x48] sm:$0xf0] }
 0x334   : > { %v2404_v59 = vpop.f32.mrf.mxu2  ;;  %v2228_v30 = vpop.f32.mrf.mxu0 }
 0x335   : > { %v2405_v14 = vadd.f32 %v2404_v59, %v2316_v6  ;;  %v2493_v38 = vpop.f32.mrf.mxu3  ;;  %v2229_v4 = vadd.f32 %v2228_v30, %v11984_v57  ;;  %v2317_v54 = vpop.f32.mrf.mxu1  ;;  %v10606_v57 = vld [vmem:[#allocation6 + $0x374] sm:$0xf]  ;;  %v10687_v59 = vld [vmem:[#allocation6 + $0x5f4] sm:$0xf0] }
 0x336   : > { %v9209_v40 = vor.u32 %v10606_v57, %v9206_v60  ;;  %v14609_v60 = vld [vmem:[#allocation50_spill] sm:$0xff] }
 0x337   : > { %v12190_v11 = vadd.f32 %v2493_v38, %v2405_v14  ;;  %v2318_v52 = vadd.f32 %v2317_v54, %v2229_v4 }
 0x338   : > { %4299 = vmatpush.bf16.msra.mxu2 %v9209_v40 }
 0x339   : > { %14599 = vst [vmem:[#allocation64_spill] sm:$0xff] %v12190_v11 }
 0x33c   : > { %v2406_v23 = vpop.f32.mrf.mxu2  ;;  %v2231_v7 = vpop.f32.mrf.mxu0 }
 0x33d   : > { %v2407_v28 = vadd.f32 %v2406_v23, %v2318_v52  ;;  %v2495_v53 = vpop.f32.mrf.mxu3  ;;  %v2232_v12 = vadd.f32 %v2231_v7, %v11993_v55  ;;  %v2320_v47 = vpop.f32.mrf.mxu1  ;;  %v14605_v7 = vld [vmem:[#allocation51_spill] sm:$0xff] }
 0x33f   : > { %v12193_v26 = vadd.f32 %v2495_v53, %v2407_v28  ;;  %v2321_v33 = vadd.f32 %v2320_v47, %v2232_v12  ;;  %2270 = vmatmul.bf16.gmra.mxu0 %v14601_v45  ;;  %v14606_v12 = vld [vmem:[#allocation52_spill] sm:$0xff]  ;;  %v14607_v47 = vld [vmem:[#allocation83_spill] sm:$0xff] }
 0x340   : > { %2359 = vmatmul.bf16.gmra.mxu1 %v14602_v58 }
 0x341   : > { %14600 = vst [vmem:[#allocation65_spill] sm:$0xff] %v12193_v26  ;;  %2448 = vmatmul.bf16.gmra.mxu2 %v11980_v61 }
 0x342   : > { %2537 = vmatmul.bf16.gmra.mxu3 %v11982_v10  ;;  %v9524_v10 = vld [vmem:[#allocation6 + $0x5f0] sm:$0xf] }
 0x343   : > { %v9525_v38 = vor.u32 %v10687_v59, %v9524_v10 }
 0x344   : > { %v2409_v55 = vpop.f32.mrf.mxu2  ;;  %v2233_v6 = vpop.f32.mrf.mxu0 }
 0x345   : > { %v2410_v63 = vadd.f32 %v2409_v55, %v2321_v33  ;;  %v2498_v27 = vpop.f32.mrf.mxu3  ;;  %v2234_v56 = vadd.f32 %v2233_v6, %v12006_v35  ;;  %v2322_v22 = vpop.f32.mrf.mxu1  ;;  %4210 = vmatpush.bf16.msra.mxu1 %v9525_v38  ;;  %v14608_v33 = vld [vmem:[#allocation84_spill] sm:$0xff]  ;;  %v10497_v6 = vld [vmem:[%s11346_s6 + $0x3c] sm:$0xf] }
 0x346   : > { %v10499_v55 = vld [vmem:[%s11346_s6 + $0x44] sm:$0xf0] }
 0x347   : > { %v12200_v61 = vadd.f32 %v2498_v27, %v2410_v63  ;;  %v2323_v14 = vadd.f32 %v2322_v22, %v2234_v56  ;;  %v8772_v63 = vld [vmem:[%s11346_s6 + $0x38] sm:$0xf]  ;;  %v10500_v27 = vld [vmem:[%s11346_s6 + $0x4c] sm:$0xf0]  ;;  %v8774_v56 = vld [vmem:[%s11346_s6 + $0x50] sm:$0xf0]  ;;  %v12220_v10 = vor.u32 %v10499_v55, %v8764_v1 }
 0x349   : > { %14603 = vst [vmem:[#allocation33_spill] sm:$0xff] %v12200_v61 }
 0x34c   : > { %v2411_v30 = vpop.f32.mrf.mxu2  ;;  %v2236_v52 = vpop.f32.mrf.mxu0 }
 0x34d   : > { %v2412_v4 = vadd.f32 %v2411_v30, %v2323_v14  ;;  %v2500_v54 = vpop.f32.mrf.mxu3  ;;  %v2237_v23 = vadd.f32 %v2236_v52, %v12015_v39  ;;  %v2325_v28 = vpop.f32.mrf.mxu1  ;;  %v12222_v30 = vor.u32 %v10496_v49, %v8766_v48  ;;  %v9516_v48 = vld [vmem:[#allocation6 + $0x5e0] sm:$0xf] }
 0x34f   : > { %v12203_v35 = vadd.f32 %v2500_v54, %v2412_v4  ;;  %v2326_v53 = vadd.f32 %v2325_v28, %v2237_v23  ;;  %2275 = vmatmul.bf16.gmra.mxu0 %v14605_v7  ;;  %v12224_v4 = vor.u32 %v10500_v27, %v8772_v63  ;;  %v12227_v23 = vor.u32 %v10497_v6, %v8774_v56  ;;  %v10604_v7 = vld [vmem:[#allocation6 + $0x364] sm:$0xf]  ;;  %v10685_v63 = vld [vmem:[#allocation6 + $0x5e4] sm:$0xf0]  ;;  %v8788_v56 = vld [vmem:[%s11346_s6 + $0x60] sm:$0xf] }
 0x350   : > { %2364 = vmatmul.bf16.gmra.mxu1 %v14606_v12  ;;  %v9198_v12 = vld [vmem:[#allocation6 + $0x368] sm:$0xf0]  ;;  %v9517_v6 = vor.u32 %v10685_v63, %v9516_v48 }
 0x351   : > { %14604 = vst [vmem:[#allocation34_spill] sm:$0xff] %v12203_v35  ;;  %2453 = vmatmul.bf16.gmra.mxu2 %v14607_v47  ;;  %v9452_v47 = vld [vmem:[#allocation6 + $0x560] sm:$0xf] }
 0x352   : > { %2542 = vmatmul.bf16.gmra.mxu3 %v14608_v33  ;;  %14611 = vst [vmem:[#allocation35_spill] sm:$0xff] %v12224_v4  ;;  %v9201_v33 = vor.u32 %v10604_v7, %v9198_v12  ;;  %4211 = vmatpush.bf16.msra.mxu1 %v9517_v6  ;;  %v8812_v6 = vld [vmem:[%s11346_s6 + $0x90] sm:$0xf] }
 0x353   : > { %14612 = vst [vmem:[#allocation36_spill] sm:$0xff] %v12227_v23 }
 0x354   : > { %v2414_v39 = vpop.f32.mrf.mxu2  ;;  %v2238_v57 = vpop.f32.mrf.mxu0  ;;  %4300 = vmatpush.bf16.msra.mxu2 %v9201_v33 }
 0x355   : > { %v2415_v45 = vadd.f32 %v2414_v39, %v2326_v53  ;;  %v2503_v58 = vpop.f32.mrf.mxu3  ;;  %v2239_v51 = vadd.f32 %v2238_v57, %v14609_v60  ;;  %v2327_v40 = vpop.f32.mrf.mxu1  ;;  %v10669_v39 = vld [vmem:[#allocation6 + $0x564] sm:$0xf0] }
 0x356   : > { %v9453_v57 = vor.u32 %v10669_v39, %v9452_v47 }
 0x357   : > { %v12210_v18 = vadd.f32 %v2503_v58, %v2415_v45  ;;  %v2328_v8 = vadd.f32 %v2327_v40, %v2239_v51  ;;  %v9262_v45 = vld [vmem:[#allocation6 + $0x3e8] sm:$0xf0] }
 0x358   : > { %4122 = vmatpush.bf16.msra.mxu0 %v9453_v57 }
 0x359   : > { %14610 = vst [vmem:[#allocation67_spill] sm:$0xff] %v12210_v18 }
 0x35c   : > { %v2416_v22 = vpop.f32.mrf.mxu2  ;;  %v2241_v38 = vpop.f32.mrf.mxu0 }
 0x35d   : > { %v2417_v59 = vadd.f32 %v2416_v22, %v2328_v8  ;;  %v2505_v14 = vpop.f32.mrf.mxu3  ;;  %v2242_v54 = vadd.f32 %v2241_v38, %v12029_v34  ;;  %v2330_v52 = vpop.f32.mrf.mxu1  ;;  %v10620_v34 = vld [vmem:[#allocation6 + $0x3e4] sm:$0xf]  ;;  %v10505_v22 = vld [vmem:[%s11346_s6 + $0x74] sm:$0xf0]  ;;  %v8796_v38 = vld [vmem:[%s11346_s6 + $0x68] sm:$0xf] }
 0x35e   : > { %v9265_v60 = vor.u32 %v10620_v34, %v9262_v45  ;;  %v12246_v7 = vor.u32 %v10505_v22, %v8788_v56  ;;  %v10511_v56 = vld [vmem:[%s11346_s6 + $0xa4] sm:$0xf0]  ;;  %v10508_v22 = vld [vmem:[%s11346_s6 + $0x94] sm:$0xf] }
 0x35f   : > { %v12229_v28 = vadd.f32 %v2505_v14, %v2417_v59  ;;  %v2331_v53 = vadd.f32 %v2330_v52, %v2242_v54  ;;  %3773 = vmatmul.bf16.vlgmr.msrb.gmra.mxu0 %v12220_v10  ;;  %v10502_v59 = vld [vmem:[%s11346_s6 + $0x64] sm:$0xf]  ;;  %v8790_v14 = vld [vmem:[%s11346_s6 + $0x78] sm:$0xf0]  ;;  %v10506_v54 = vld [vmem:[%s11346_s6 + $0x7c] sm:$0xf0] }
 0x360   : > { %3862 = vmatmul.bf16.vlgmr.msrb.gmra.mxu1 %v12222_v30  ;;  %4389 = vmatpush.bf16.msra.mxu3 %v9265_v60  ;;  %v10503_v52 = vld [vmem:[%s11346_s6 + $0x6c] sm:$0xf]  ;;  %v12248_v39 = vor.u32 %v10502_v59, %v8790_v14  ;;  %v12250_v34 = vor.u32 %v10506_v54, %v8796_v38  ;;  %v8820_v14 = vld [vmem:[%s11346_s6 + $0x98] sm:$0xf]  ;;  %v10512_v38 = vld [vmem:[%s11346_s6 + $0xac] sm:$0xf0] }
 0x361   : > { %14613 = vst [vmem:[#allocation68_spill] sm:$0xff] %v12229_v28  ;;  %3951 = vmatmul.bf16.vlgmr.msrb.gmra.mxu2 %v12224_v4  ;;  %v8814_v59 = vld [vmem:[%s11346_s6 + $0xa8] sm:$0xf0]  ;;  %v10509_v54 = vld [vmem:[%s11346_s6 + $0x9c] sm:$0xf] }
 0x362   : > { %4040 = vmatmul.bf16.vlgmr.msrb.gmra.mxu3 %v12227_v23  ;;  %14615 = vst [vmem:[#allocation38_spill] sm:$0xff] %v12250_v34 }
 0x364   : > { %v2419_v58 = vpop.f32.mrf.mxu2  ;;  %v2243_v8 = vpop.f32.mrf.mxu0 }
 0x365   : > { %v2420_v51 = vadd.f32 %v2419_v58, %v2331_v53  ;;  %v2508_v40 = vpop.f32.mrf.mxu3  ;;  %v2244_v1 = vadd.f32 %v2243_v8, %v12034_v2  ;;  %v2332_v55 = vpop.f32.mrf.mxu1  ;;  %v8798_v2 = vld [vmem:[%s11346_s6 + $0x80] sm:$0xf0] }
 0x366   : > { %v12253_v57 = vor.u32 %v10503_v52, %v8798_v2  ;;  %v8822_v52 = vld [vmem:[%s11346_s6 + $0xb0] sm:$0xf0] }
 0x367   : > { %v12236_v49 = vadd.f32 %v2508_v40, %v2420_v51  ;;  %v2333_v27 = vadd.f32 %v2332_v55, %v2244_v1 }
 0x368   : > { %14616 = vst [vmem:[#allocation39_spill] sm:$0xff] %v12253_v57 }
 0x369   : > { %14614 = vst [vmem:[#allocation37_spill] sm:$0xff] %v12236_v49 }
 0x36c   : > { %v2421_v53 = vpop.f32.mrf.mxu2  ;;  %v2246_v33 = vpop.f32.mrf.mxu0 }
 0x36d   : > { %v2422_v12 = vadd.f32 %v2421_v53, %v2333_v27  ;;  %v2510_v47 = vpop.f32.mrf.mxu3  ;;  %v2247_v45 = vadd.f32 %v2246_v33, %v12043_v3  ;;  %v2335_v58 = vpop.f32.mrf.mxu1  ;;  %v12272_v53 = vor.u32 %v10511_v56, %v8812_v6  ;;  %v10667_v6 = vld [vmem:[#allocation6 + $0x554] sm:$0xf0]  ;;  %v9254_v56 = vld [vmem:[#allocation6 + $0x3d8] sm:$0xf0] }
 0x36f   : > { %v12255_v60 = vadd.f32 %v2510_v47, %v2422_v12  ;;  %v2336_v51 = vadd.f32 %v2335_v58, %v2247_v45  ;;  %3778 = vmatmul.bf16.gmra.mxu0 %v12246_v7  ;;  %v12274_v45 = vor.u32 %v10508_v22, %v8814_v59 }
 0x370   : > { %3867 = vmatmul.bf16.gmra.mxu1 %v12248_v39 }
 0x371   : > { %14617 = vst [vmem:[#allocation40_spill] sm:$0xff] %v12255_v60  ;;  %3956 = vmatmul.bf16.gmra.mxu2 %v12250_v34 }
 0x372   : > { %4045 = vmatmul.bf16.gmra.mxu3 %v12253_v57  ;;  %v10587_v57 = vld [vmem:[%s11346_s6 + $0x30c] sm:$0xf] }
 0x374   : > { %v2424_v3 = vpop.f32.mrf.mxu2  ;;  %v2248_v1 = vpop.f32.mrf.mxu0 }
 0x375   : > { %v2425_v40 = vadd.f32 %v2424_v3, %v2336_v51  ;;  %v2513_v8 = vpop.f32.mrf.mxu3  ;;  %v2249_v55 = vadd.f32 %v2248_v1, %v12048_v15  ;;  %v2337_v48 = vpop.f32.mrf.mxu1  ;;  %v12276_v15 = vor.u32 %v10512_v38, %v8820_v14  ;;  %v12279_v3 = vor.u32 %v10509_v54, %v8822_v52  ;;  %v10602_v1 = vld [vmem:[#allocation6 + $0x354] sm:$0xf] }
 0x377   : > { %v12262_v63 = vadd.f32 %v2513_v8, %v2425_v40  ;;  %v2338_v27 = vadd.f32 %v2337_v48, %v2249_v55  ;;  %14619 = vst [vmem:[#allocation42_spill] sm:$0xff] %v12276_v15  ;;  %v9190_v55 = vld [vmem:[#allocation6 + $0x358] sm:$0xf0]  ;;  %v9444_v48 = vld [vmem:[#allocation6 + $0x550] sm:$0xf] }
 0x378   : > { %14620 = vst [vmem:[#allocation43_spill] sm:$0xff] %v12279_v3  ;;  %v9445_v59 = vor.u32 %v10667_v6, %v9444_v48  ;;  %v10514_v48 = vld [vmem:[%s11346_s6 + $0xc4] sm:$0xf]  ;;  %v8838_v6 = vld [vmem:[%s11346_s6 + $0xd8] sm:$0xf0] }
 0x379   : > { %14618 = vst [vmem:[#allocation41_spill] sm:$0xff] %v12262_v63 }
 0x37a   : > { %4123 = vmatpush.bf16.msra.mxu0 %v9445_v59 }
 0x37c   : > { %v2426_v2 = vpop.f32.mrf.mxu2  ;;  %v2251_v33 = vpop.f32.mrf.mxu0 }
 0x37d   : > { %v2427_v12 = vadd.f32 %v2426_v2, %v2338_v27  ;;  %v2515_v47 = vpop.f32.mrf.mxu3  ;;  %v2252_v58 = vadd.f32 %v2251_v33, %v12057_v16  ;;  %v2340_v51 = vpop.f32.mrf.mxu1  ;;  %v9193_v27 = vor.u32 %v10602_v1, %v9190_v55  ;;  %v10618_v16 = vld [vmem:[#allocation6 + $0x3d4] sm:$0xf]  ;;  %v9508_v33 = vld [vmem:[#allocation6 + $0x5d0] sm:$0xf]  ;;  %v10517_v55 = vld [vmem:[%s11346_s6 + $0xd4] sm:$0xf0] }
 0x37e   : > { %v9257_v14 = vor.u32 %v10618_v16, %v9254_v56  ;;  %v8844_v16 = vld [vmem:[%s11346_s6 + $0xc8] sm:$0xf]  ;;  %v10518_v56 = vld [vmem:[%s11346_s6 + $0xdc] sm:$0xf0] }
 0x37f   : > { %v12281_v40 = vadd.f32 %v2515_v47, %v2427_v12  ;;  %v2341_v8 = vadd.f32 %v2340_v51, %v2252_v58  ;;  %3783 = vmatmul.bf16.gmra.mxu0 %v12272_v53  ;;  %4301 = vmatpush.bf16.msra.mxu2 %v9193_v27  ;;  %v10683_v58 = vld [vmem:[#allocation6 + $0x5d4] sm:$0xf0]  ;;  %v10515_v27 = vld [vmem:[%s11346_s6 + $0xcc] sm:$0xf] }
 0x380   : > { %3872 = vmatmul.bf16.gmra.mxu1 %v12274_v45  ;;  %4390 = vmatpush.bf16.msra.mxu3 %v9257_v14  ;;  %v9509_v1 = vor.u32 %v10683_v58, %v9508_v33 }
 0x381   : > { %14621 = vst [vmem:[#allocation44_spill] sm:$0xff] %v12281_v40  ;;  %3961 = vmatmul.bf16.gmra.mxu2 %v12276_v15  ;;  %v10590_v15 = vld [vmem:[%s11346_s6 + $0x31c] sm:$0xf0] }
 0x382   : > { %4050 = vmatmul.bf16.gmra.mxu3 %v12279_v3  ;;  %4212 = vmatpush.bf16.msra.mxu1 %v9509_v1 }
 0x384   : > { %v2429_v22 = vpop.f32.mrf.mxu2  ;;  %v2253_v52 = vpop.f32.mrf.mxu0 }
 0x385   : > { %v2430_v38 = vadd.f32 %v2429_v22, %v2341_v8  ;;  %v2518_v54 = vpop.f32.mrf.mxu3  ;;  %v2254_v2 = vadd.f32 %v2253_v52, %v12062_v36  ;;  %v2342_v12 = vpop.f32.mrf.mxu1  ;;  %v8836_v8 = vld [vmem:[%s11346_s6 + $0xc0] sm:$0xf]  ;;  %v8846_v36 = vld [vmem:[%s11346_s6 + $0xe0] sm:$0xf0] }
 0x386   : > { %v12298_v52 = vor.u32 %v10517_v55, %v8836_v8  ;;  %v12305_v33 = vor.u32 %v10515_v27, %v8846_v36  ;;  %v8860_v27 = vld [vmem:[%s11346_s6 + $0xf0] sm:$0xf]  ;;  %v10523_v36 = vld [vmem:[%s11346_s6 + $0x104] sm:$0xf0] }
 0x387   : > { %v12288_v47 = vadd.f32 %v2518_v54, %v2430_v38  ;;  %v2343_v51 = vadd.f32 %v2342_v12, %v2254_v2  ;;  %v12300_v54 = vor.u32 %v10514_v48, %v8838_v6  ;;  %v12324_v40 = vor.u32 %v10523_v36, %v8860_v27  ;;  %v9436_v27 = vld [vmem:[#allocation6 + $0x540] sm:$0xf] }
 0x388   : > { %14624 = vst [vmem:[#allocation47_spill] sm:$0xff] %v12305_v33 }
 0x389   : > { %14622 = vst [vmem:[#allocation45_spill] sm:$0xff] %v12288_v47  ;;  %v12302_v47 = vor.u32 %v10518_v56, %v8844_v16 }
 0x38b   : > { %14623 = vst [vmem:[#allocation46_spill] sm:$0xff] %v12302_v47 }
 0x38c   : > { %v2431_v22 = vpop.f32.mrf.mxu2  ;;  %v2256_v38 = vpop.f32.mrf.mxu0 }
 0x38d   : > { %v2432_v59 = vadd.f32 %v2431_v22, %v2343_v51  ;;  %v2520_v14 = vpop.f32.mrf.mxu3  ;;  %v2257_v2 = vadd.f32 %v2256_v38, %v12071_v41  ;;  %v2345_v12 = vpop.f32.mrf.mxu1  ;;  %v10520_v22 = vld [vmem:[%s11346_s6 + $0xf4] sm:$0xf]  ;;  %v10524_v38 = vld [vmem:[%s11346_s6 + $0x10c] sm:$0xf0] }
 0x38f   : > { %v12307_v58 = vadd.f32 %v2520_v14, %v2432_v59  ;;  %v2346_v1 = vadd.f32 %v2345_v12, %v2257_v2  ;;  %3788 = vmatmul.bf16.gmra.mxu0 %v12298_v52  ;;  %v8862_v59 = vld [vmem:[%s11346_s6 + $0x108] sm:$0xf0]  ;;  %v8868_v14 = vld [vmem:[%s11346_s6 + $0xf8] sm:$0xf]  ;;  %v10521_v2 = vld [vmem:[%s11346_s6 + $0xfc] sm:$0xf] }
 0x390   : > { %3877 = vmatmul.bf16.gmra.mxu1 %v12300_v54  ;;  %v8870_v12 = vld [vmem:[%s11346_s6 + $0x110] sm:$0xf0]  ;;  %v12326_v60 = vor.u32 %v10520_v22, %v8862_v59  ;;  %v10665_v22 = vld [vmem:[#allocation6 + $0x544] sm:$0xf0] }
 0x391   : > { %14625 = vst [vmem:[#allocation48_spill] sm:$0xff] %v12307_v58  ;;  %3966 = vmatmul.bf16.gmra.mxu2 %v12302_v47 }
 0x392   : > { %4055 = vmatmul.bf16.gmra.mxu3 %v12305_v33 }
 0x394   : > { %v2434_v41 = vpop.f32.mrf.mxu2  ;;  %v2258_v55 = vpop.f32.mrf.mxu0 }
 0x395   : > { %v2435_v51 = vadd.f32 %v2434_v41, %v2346_v1  ;;  %v2523_v8 = vpop.f32.mrf.mxu3  ;;  %v2259_v48 = vadd.f32 %v2258_v55, %v12076_v19  ;;  %v2347_v6 = vpop.f32.mrf.mxu1  ;;  %v12328_v19 = vor.u32 %v10524_v38, %v8868_v14  ;;  %v12331_v55 = vor.u32 %v10521_v2, %v8870_v12 }
 0x396   : > { %v9437_v14 = vor.u32 %v10665_v22, %v9436_v27 }
 0x397   : > { %v12314_v16 = vadd.f32 %v2523_v8, %v2435_v51  ;;  %v2348_v56 = vadd.f32 %v2347_v6, %v2259_v48  ;;  %14627 = vst [vmem:[#allocation52_spill] sm:$0xff] %v12328_v19 }
 0x398   : > { %14628 = vst [vmem:[#allocation83_spill] sm:$0xff] %v12331_v55  ;;  %4124 = vmatpush.bf16.msra.mxu0 %v9437_v14 }
 0x399   : > { %14626 = vst [vmem:[#allocation51_spill] sm:$0xff] %v12314_v16  ;;  %v10530_v16 = vld [vmem:[%s11346_s6 + $0x13c] sm:$0xf0] }
 0x39c   : > { %v2436_v58 = vpop.f32.mrf.mxu2  ;;  %v2261_v63 = vpop.f32.mrf.mxu0 }
 0x39d   : > { %v2437_v1 = vadd.f32 %v2436_v58, %v2348_v56  ;;  %v2525_v41 = vpop.f32.mrf.mxu3  ;;  %v2262_v51 = vadd.f32 %v2261_v63, %v12085_v62  ;;  %v2350_v8 = vpop.f32.mrf.mxu1  ;;  %v10600_v58 = vld [vmem:[#allocation6 + $0x344] sm:$0xf]  ;;  %v9182_v56 = vld [vmem:[#allocation6 + $0x348] sm:$0xf0] }
 0x39e   : > { %v9185_v36 = vor.u32 %v10600_v58, %v9182_v56  ;;  %v10616_v62 = vld [vmem:[#allocation6 + $0x3c4] sm:$0xf]  ;;  %v9246_v63 = vld [vmem:[#allocation6 + $0x3c8] sm:$0xf0]  ;;  %v9500_v58 = vld [vmem:[#allocation6 + $0x5c0] sm:$0xf] }
 0x39f   : > { %v12333_v48 = vadd.f32 %v2525_v41, %v2437_v1  ;;  %v2351_v6 = vadd.f32 %v2350_v8, %v2262_v51  ;;  %3793 = vmatmul.bf16.gmra.mxu0 %v12324_v40  ;;  %v9249_v38 = vor.u32 %v10616_v62, %v9246_v63  ;;  %v10681_v56 = vld [vmem:[#allocation6 + $0x5c4] sm:$0xf0]  ;;  %v10529_v62 = vld [vmem:[%s11346_s6 + $0x134] sm:$0xf0]  ;;  %v10526_v63 = vld [vmem:[%s11346_s6 + $0x124] sm:$0xf] }
 0x3a0   : > { %3882 = vmatmul.bf16.gmra.mxu1 %v12326_v60  ;;  %4302 = vmatpush.bf16.msra.mxu2 %v9185_v36  ;;  %v9501_v22 = vor.u32 %v10681_v56, %v9500_v58  ;;  %v10527_v36 = vld [vmem:[%s11346_s6 + $0x12c] sm:$0xf] }
 0x3a1   : > { %14629 = vst [vmem:[#allocation84_spill] sm:$0xff] %v12333_v48  ;;  %3971 = vmatmul.bf16.gmra.mxu2 %v12328_v19  ;;  %4391 = vmatpush.bf16.msra.mxu3 %v9249_v38  ;;  %v8892_v48 = vld [vmem:[%s11346_s6 + $0x128] sm:$0xf]  ;;  %v9110_v19 = vld [vmem:[%s11346_s6 + $0x2f0] sm:$0xf0] }
 0x3a2   : > { %4060 = vmatmul.bf16.gmra.mxu3 %v12331_v55  ;;  %4213 = vmatpush.bf16.msra.mxu1 %v9501_v22 }
 0x3a4   : > { %v2439_v59 = vpop.f32.mrf.mxu2  ;;  %v2263_v1 = vpop.f32.mrf.mxu0 }
 0x3a5   : > { %v2440_v2 = vadd.f32 %v2439_v59, %v2351_v6  ;;  %v2528_v12 = vpop.f32.mrf.mxu3  ;;  %v2264_v41 = vadd.f32 %v2263_v1, %v12090_v20  ;;  %v2352_v51 = vpop.f32.mrf.mxu1  ;;  %v8884_v6 = vld [vmem:[%s11346_s6 + $0x120] sm:$0xf]  ;;  %v8886_v59 = vld [vmem:[%s11346_s6 + $0x138] sm:$0xf0]  ;;  %v8894_v20 = vld [vmem:[%s11346_s6 + $0x140] sm:$0xf0] }
 0x3a6   : > { %v12350_v49 = vor.u32 %v10529_v62, %v8884_v6  ;;  %v12357_v58 = vor.u32 %v10527_v36, %v8894_v20  ;;  %v8908_v36 = vld [vmem:[%s11346_s6 + $0x150] sm:$0xf]  ;;  %v10535_v20 = vld [vmem:[%s11346_s6 + $0x164] sm:$0xf0] }
 0x3a7   : > { %v12340_v8 = vadd.f32 %v2528_v12, %v2440_v2  ;;  %v2353_v27 = vadd.f32 %v2352_v51, %v2264_v41  ;;  %v12352_v12 = vor.u32 %v10526_v63, %v8886_v59  ;;  %v12376_v28 = vor.u32 %v10535_v20, %v8908_v36  ;;  %v9428_v36 = vld [vmem:[#allocation6 + $0x530] sm:$0xf] }
 0x3a8   : > { %14632 = vst [vmem:[#allocation87_spill] sm:$0xff] %v12357_v58 }
 0x3a9   : > { %14630 = vst [vmem:[#allocation50_spill] sm:$0xff] %v12340_v8  ;;  %v12354_v8 = vor.u32 %v10530_v16, %v8892_v48 }
 0x3ab   : > { %14631 = vst [vmem:[#allocation86_spill] sm:$0xff] %v12354_v8 }
 0x3ac   : > { %v2441_v1 = vpop.f32.mrf.mxu2  ;;  %v2266_v2 = vpop.f32.mrf.mxu0 }
 0x3ad   : > { %v2442_v14 = vadd.f32 %v2441_v1, %v2353_v27  ;;  %v2530_v38 = vpop.f32.mrf.mxu3  ;;  %v2267_v41 = vadd.f32 %v2266_v2, %v12099_v29  ;;  %v2355_v51 = vpop.f32.mrf.mxu1  ;;  %v10532_v1 = vld [vmem:[%s11346_s6 + $0x154] sm:$0xf]  ;;  %v10536_v2 = vld [vmem:[%s11346_s6 + $0x16c] sm:$0xf0] }
 0x3af   : > { %v12359_v56 = vadd.f32 %v2530_v38, %v2442_v14  ;;  %v2356_v22 = vadd.f32 %v2355_v51, %v2267_v41  ;;  %3798 = vmatmul.bf16.gmra.mxu0 %v12350_v49  ;;  %v8910_v14 = vld [vmem:[%s11346_s6 + $0x168] sm:$0xf0]  ;;  %v8916_v38 = vld [vmem:[%s11346_s6 + $0x158] sm:$0xf]  ;;  %v10533_v41 = vld [vmem:[%s11346_s6 + $0x15c] sm:$0xf] }
 0x3b0   : > { %3887 = vmatmul.bf16.gmra.mxu1 %v12352_v12  ;;  %v8918_v51 = vld [vmem:[%s11346_s6 + $0x170] sm:$0xf0]  ;;  %v12378_v35 = vor.u32 %v10532_v1, %v8910_v14  ;;  %v10663_v1 = vld [vmem:[#allocation6 + $0x534] sm:$0xf0] }
 0x3b1   : > { %14633 = vst [vmem:[#allocation88_spill] sm:$0xff] %v12359_v56  ;;  %3976 = vmatmul.bf16.gmra.mxu2 %v12354_v8  ;;  %v10575_v8 = vld [vmem:[%s11346_s6 + $0x2ac] sm:$0xf] }
 0x3b2   : > { %4065 = vmatmul.bf16.gmra.mxu3 %v12357_v58  ;;  %v10578_v58 = vld [vmem:[%s11346_s6 + $0x2bc] sm:$0xf0] }
 0x3b4   : > { %v2444_v29 = vpop.f32.mrf.mxu2  ;;  %v2268_v27 = vpop.f32.mrf.mxu0 }
 0x3b5   : > { %v2445_v16 = vadd.f32 %v2444_v29, %v2356_v22  ;;  %v2533_v48 = vpop.f32.mrf.mxu3  ;;  %v2269_v6 = vadd.f32 %v2268_v27, %v12104_v5  ;;  %v2357_v62 = vpop.f32.mrf.mxu1  ;;  %v12380_v5 = vor.u32 %v10536_v2, %v8916_v38  ;;  %v12383_v27 = vor.u32 %v10533_v41, %v8918_v51 }
 0x3b6   : > { %v9429_v38 = vor.u32 %v10663_v1, %v9428_v36 }
 0x3b7   : > { %v12366_v63 = vadd.f32 %v2533_v48, %v2445_v16  ;;  %v2358_v59 = vadd.f32 %v2357_v62, %v2269_v6  ;;  %14635 = vst [vmem:[#allocation90_spill] sm:$0xff] %v12380_v5 }
 0x3b8   : > { %14636 = vst [vmem:[#allocation91_spill] sm:$0xff] %v12383_v27  ;;  %4125 = vmatpush.bf16.msra.mxu0 %v9429_v38 }
 0x3b9   : > { %14634 = vst [vmem:[#allocation89_spill] sm:$0xff] %v12366_v63  ;;  %v10542_v63 = vld [vmem:[%s11346_s6 + $0x19c] sm:$0xf0] }
 0x3bc   : > { %v2446_v56 = vpop.f32.mrf.mxu2  ;;  %v2271_v18 = vpop.f32.mrf.mxu0 }
 0x3bd   : > { %v2447_v22 = vadd.f32 %v2446_v56, %v2358_v59  ;;  %v2535_v29 = vpop.f32.mrf.mxu3  ;;  %v2272_v16 = vadd.f32 %v2271_v18, %v12113_v31  ;;  %v2360_v48 = vpop.f32.mrf.mxu1  ;;  %v10598_v56 = vld [vmem:[#allocation6 + $0x334] sm:$0xf]  ;;  %v9174_v59 = vld [vmem:[#allocation6 + $0x338] sm:$0xf0] }
 0x3be   : > { %v9177_v20 = vor.u32 %v10598_v56, %v9174_v59  ;;  %v10614_v31 = vld [vmem:[#allocation6 + $0x3b4] sm:$0xf]  ;;  %v9238_v18 = vld [vmem:[#allocation6 + $0x3b8] sm:$0xf0]  ;;  %v9492_v56 = vld [vmem:[#allocation6 + $0x5b0] sm:$0xf] }
 0x3bf   : > { %v12385_v6 = vadd.f32 %v2535_v29, %v2447_v22  ;;  %v2361_v62 = vadd.f32 %v2360_v48, %v2272_v16  ;;  %3803 = vmatmul.bf16.gmra.mxu0 %v12376_v28  ;;  %v9241_v2 = vor.u32 %v10614_v31, %v9238_v18  ;;  %v10679_v59 = vld [vmem:[#allocation6 + $0x5b4] sm:$0xf0]  ;;  %v10538_v18 = vld [vmem:[%s11346_s6 + $0x184] sm:$0xf] }
 0x3c0   : > { %3892 = vmatmul.bf16.gmra.mxu1 %v12378_v35  ;;  %4303 = vmatpush.bf16.msra.mxu2 %v9177_v20  ;;  %v9493_v1 = vor.u32 %v10679_v59, %v9492_v56  ;;  %v10541_v31 = vld [vmem:[%s11346_s6 + $0x194] sm:$0xf0]  ;;  %v10539_v20 = vld [vmem:[%s11346_s6 + $0x18c] sm:$0xf] }
 0x3c1   : > { %14637 = vst [vmem:[#allocation92_spill] sm:$0xff] %v12385_v6  ;;  %3981 = vmatmul.bf16.gmra.mxu2 %v12380_v5  ;;  %4392 = vmatpush.bf16.msra.mxu3 %v9241_v2  ;;  %v8940_v6 = vld [vmem:[%s11346_s6 + $0x188] sm:$0xf] }
 0x3c2   : > { %4070 = vmatmul.bf16.gmra.mxu3 %v12383_v27  ;;  %4214 = vmatpush.bf16.msra.mxu1 %v9493_v1 }
 0x3c4   : > { %v2449_v14 = vpop.f32.mrf.mxu2  ;;  %v2273_v22 = vpop.f32.mrf.mxu0 }
 0x3c5   : > { %v2450_v41 = vadd.f32 %v2449_v14, %v2361_v62  ;;  %v2538_v51 = vpop.f32.mrf.mxu3  ;;  %v2274_v29 = vadd.f32 %v2273_v22, %v12118_v37  ;;  %v2362_v16 = vpop.f32.mrf.mxu1  ;;  %v8932_v62 = vld [vmem:[%s11346_s6 + $0x180] sm:$0xf]  ;;  %v8934_v14 = vld [vmem:[%s11346_s6 + $0x198] sm:$0xf0]  ;;  %v8942_v37 = vld [vmem:[%s11346_s6 + $0x1a0] sm:$0xf0] }
 0x3c6   : > { %v12402_v61 = vor.u32 %v10541_v31, %v8932_v62  ;;  %v12409_v56 = vor.u32 %v10539_v20, %v8942_v37  ;;  %v8956_v20 = vld [vmem:[%s11346_s6 + $0x1b0] sm:$0xf]  ;;  %v10547_v37 = vld [vmem:[%s11346_s6 + $0x1c4] sm:$0xf0] }
 0x3c7   : > { %v12392_v48 = vadd.f32 %v2538_v51, %v2450_v41  ;;  %v2363_v36 = vadd.f32 %v2362_v16, %v2274_v29  ;;  %v12404_v51 = vor.u32 %v10538_v18, %v8934_v14  ;;  %v12428_v26 = vor.u32 %v10547_v37, %v8956_v20  ;;  %v10661_v37 = vld [vmem:[#allocation6 + $0x524] sm:$0xf0] }
 0x3c8   : > { %14640 = vst [vmem:[#allocation95_spill] sm:$0xff] %v12409_v56 }
 0x3c9   : > { %14638 = vst [vmem:[#allocation93_spill] sm:$0xff] %v12392_v48  ;;  %v12406_v48 = vor.u32 %v10542_v63, %v8940_v6 }
 0x3cb   : > { %14639 = vst [vmem:[#allocation94_spill] sm:$0xff] %v12406_v48 }
 0x3cc   : > { %v2451_v22 = vpop.f32.mrf.mxu2  ;;  %v2276_v41 = vpop.f32.mrf.mxu0 }
 0x3cd   : > { %v2452_v38 = vadd.f32 %v2451_v22, %v2363_v36  ;;  %v2540_v2 = vpop.f32.mrf.mxu3  ;;  %v2277_v29 = vadd.f32 %v2276_v41, %v12127_v13  ;;  %v2365_v16 = vpop.f32.mrf.mxu1  ;;  %v10544_v22 = vld [vmem:[%s11346_s6 + $0x1b4] sm:$0xf]  ;;  %v10548_v41 = vld [vmem:[%s11346_s6 + $0x1cc] sm:$0xf0] }
 0x3cf   : > { %v12411_v59 = vadd.f32 %v2540_v2, %v2452_v38  ;;  %v2366_v1 = vadd.f32 %v2365_v16, %v2277_v29  ;;  %3808 = vmatmul.bf16.gmra.mxu0 %v12402_v61  ;;  %v8958_v38 = vld [vmem:[%s11346_s6 + $0x1c8] sm:$0xf0]  ;;  %v8964_v2 = vld [vmem:[%s11346_s6 + $0x1b8] sm:$0xf]  ;;  %v10545_v29 = vld [vmem:[%s11346_s6 + $0x1bc] sm:$0xf] }
 0x3d0   : > { %3897 = vmatmul.bf16.gmra.mxu1 %v12404_v51  ;;  %v8966_v16 = vld [vmem:[%s11346_s6 + $0x1d0] sm:$0xf0]  ;;  %v12430_v50 = vor.u32 %v10544_v22, %v8958_v38  ;;  %v10612_v22 = vld [vmem:[#allocation6 + $0x3a4] sm:$0xf]  ;;  %v9230_v38 = vld [vmem:[#allocation6 + $0x3a8] sm:$0xf0] }
 0x3d1   : > { %14641 = vst [vmem:[#allocation96_spill] sm:$0xff] %v12411_v59  ;;  %3986 = vmatmul.bf16.gmra.mxu2 %v12406_v48 }
 0x3d2   : > { %4075 = vmatmul.bf16.gmra.mxu3 %v12409_v56  ;;  %v9062_v56 = vld [vmem:[%s11346_s6 + $0x290] sm:$0xf0] }
 0x3d4   : > { %v2454_v13 = vpop.f32.mrf.mxu2  ;;  %v2278_v36 = vpop.f32.mrf.mxu0 }
 0x3d5   : > { %v2455_v63 = vadd.f32 %v2454_v13, %v2366_v1  ;;  %v2543_v6 = vpop.f32.mrf.mxu3  ;;  %v2279_v62 = vadd.f32 %v2278_v36, %v12132_v24  ;;  %v2367_v31 = vpop.f32.mrf.mxu1  ;;  %v12432_v24 = vor.u32 %v10548_v41, %v8964_v2 }
 0x3d7   : > { %v12418_v18 = vadd.f32 %v2543_v6, %v2455_v63  ;;  %v2368_v14 = vadd.f32 %v2367_v31, %v2279_v62  ;;  %14643 = vst [vmem:[#allocation98_spill] sm:$0xff] %v12432_v24  ;;  %v12434_v6 = vor.u32 %v10545_v29, %v8966_v16  ;;  %v9166_v31 = vld [vmem:[#allocation6 + $0x328] sm:$0xf0] }
 0x3d9   : > { %14642 = vst [vmem:[#allocation97_spill] sm:$0xff] %v12418_v18  ;;  %v10554_v18 = vld [vmem:[%s11346_s6 + $0x1fc] sm:$0xf0] }
 0x3da   : > { %14644 = vst [vmem:[#allocation99_spill] sm:$0xff] %v12434_v6 }
 0x3dc   : > { %v2456_v59 = vpop.f32.mrf.mxu2  ;;  %v3774_v11 = vpop.f32.mrf.mxu0 }
 0x3dd   : > { %v2457_v1 = vadd.f32 %v2456_v59, %v2368_v14  ;;  %v2545_v13 = vpop.f32.mrf.mxu3  ;;  %v3863_v63 = vpop.f32.mrf.mxu1  ;;  %v10596_v59 = vld [vmem:[#allocation6 + $0x324] sm:$0xf]  ;;  %v9420_v14 = vld [vmem:[#allocation6 + $0x520] sm:$0xf] }
 0x3de   : > { %v3864_v62 = vadd.f32 %v3863_v63, %v3774_v11  ;;  %v9169_v20 = vor.u32 %v10596_v59, %v9166_v31  ;;  %v9421_v41 = vor.u32 %v10661_v37, %v9420_v14  ;;  %v9233_v11 = vor.u32 %v10612_v22, %v9230_v38  ;;  %v9484_v31 = vld [vmem:[#allocation6 + $0x5a0] sm:$0xf]  ;;  %v10553_v22 = vld [vmem:[%s11346_s6 + $0x1f4] sm:$0xf0]  ;;  %v10550_v38 = vld [vmem:[%s11346_s6 + $0x1e4] sm:$0xf] }
 0x3df   : > { %v12436_v36 = vadd.f32 %v2545_v13, %v2457_v1  ;;  %3813 = vmatmul.bf16.gmra.mxu0 %v12428_v26  ;;  %v8980_v37 = vld [vmem:[%s11346_s6 + $0x1e0] sm:$0xf] }
 0x3e0   : > { %3902 = vmatmul.bf16.gmra.mxu1 %v12430_v50  ;;  %4304 = vmatpush.bf16.msra.mxu2 %v9169_v20  ;;  %v8990_v20 = vld [vmem:[%s11346_s6 + $0x200] sm:$0xf0]  ;;  %v12452_v42 = vor.u32 %v10553_v22, %v8980_v37 }
 0x3e1   : > { %14645 = vst [vmem:[#allocation100_spill] sm:$0xff] %v12436_v36  ;;  %3991 = vmatmul.bf16.gmra.mxu2 %v12432_v24  ;;  %4126 = vmatpush.bf16.msra.mxu0 %v9421_v41  ;;  %v10677_v36 = vld [vmem:[#allocation6 + $0x5a4] sm:$0xf0] }
 0x3e2   : > { %4080 = vmatmul.bf16.gmra.mxu3 %v12434_v6  ;;  %v9485_v14 = vor.u32 %v10677_v36, %v9484_v31 }
 0x3e3   : > { %4393 = vmatpush.bf16.msra.mxu3 %v9233_v11 }
 0x3e4   : > { %v3952_v2 = vpop.f32.mrf.mxu2  ;;  %v3776_v1 = vpop.f32.mrf.mxu0  ;;  %4215 = vmatpush.bf16.msra.mxu1 %v9485_v14 }
 0x3e5   : > { %v3953_v29 = vadd.f32 %v3952_v2, %v3864_v62  ;;  %v4041_v16 = vpop.f32.mrf.mxu3  ;;  %v3865_v13 = vpop.f32.mrf.mxu1  ;;  %v8982_v62 = vld [vmem:[%s11346_s6 + $0x1f8] sm:$0xf0]  ;;  %v8988_v2 = vld [vmem:[%s11346_s6 + $0x1e8] sm:$0xf] }
 0x3e6   : > { %v3866_v59 = vadd.f32 %v3865_v13, %v3776_v1  ;;  %v12456_v1 = vor.u32 %v10554_v18, %v8988_v2  ;;  %v12458_v13 = vor.u32 %v10551_v9, %v8990_v20  ;;  %v10559_v2 = vld [vmem:[%s11346_s6 + $0x224] sm:$0xf0]  ;;  %v10556_v20 = vld [vmem:[%s11346_s6 + $0x214] sm:$0xf] }
 0x3e7   : > { %v12442_v63 = vadd.f32 %v4041_v16, %v3953_v29  ;;  %v12454_v16 = vor.u32 %v10550_v38, %v8982_v62  ;;  %v9004_v62 = vld [vmem:[%s11346_s6 + $0x210] sm:$0xf] }
 0x3e8   : > { %14646 = vst [vmem:[#allocation101_spill] sm:$0xff] %v12456_v1  ;;  %v12476_v43 = vor.u32 %v10559_v2, %v9004_v62  ;;  %v9412_v62 = vld [vmem:[#allocation6 + $0x510] sm:$0xf] }
 0x3e9   : > { %14647 = vst [vmem:[#allocation102_spill] sm:$0xff] %v12458_v13 }
 0x3ec   : > { %v3954_v32 = vpop.f32.mrf.mxu2  ;;  %v3779_v29 = vpop.f32.mrf.mxu0 }
 0x3ed   : > { %v3955_v41 = vadd.f32 %v3954_v32, %v3866_v59  ;;  %v4043_v11 = vpop.f32.mrf.mxu3  ;;  %v3868_v36 = vpop.f32.mrf.mxu1 }
 0x3ee   : > { %v3869_v14 = vadd.f32 %v3868_v36, %v3779_v29  ;;  %v10560_v29 = vld [vmem:[%s11346_s6 + $0x22c] sm:$0xf0]  ;;  %v10557_v36 = vld [vmem:[%s11346_s6 + $0x21c] sm:$0xf] }
 0x3ef   : > { %v12460_v31 = vadd.f32 %v4043_v11, %v3955_v41  ;;  %3818 = vmatmul.bf16.gmra.mxu0 %v12452_v42  ;;  %v9006_v41 = vld [vmem:[%s11346_s6 + $0x228] sm:$0xf0]  ;;  %v9012_v11 = vld [vmem:[%s11346_s6 + $0x218] sm:$0xf] }
 0x3f0   : > { %3907 = vmatmul.bf16.gmra.mxu1 %v12454_v16  ;;  %v12480_v25 = vor.u32 %v10560_v29, %v9012_v11  ;;  %v9222_v11 = vld [vmem:[#allocation6 + $0x398] sm:$0xf0] }
 0x3f1   : > { %3996 = vmatmul.bf16.gmra.mxu2 %v12456_v1  ;;  %v10566_v1 = vld [vmem:[%s11346_s6 + $0x25c] sm:$0xf0] }
 0x3f2   : > { %4085 = vmatmul.bf16.gmra.mxu3 %v12458_v13  ;;  %14648 = vst [vmem:[#allocation103_spill] sm:$0xff] %v12480_v25 }
 0x3f4   : > { %v3957_v32 = vpop.f32.mrf.mxu2  ;;  %v3781_v59 = vpop.f32.mrf.mxu0 }
 0x3f5   : > { %v3958_v9 = vadd.f32 %v3957_v32, %v3869_v14  ;;  %v4046_v18 = vpop.f32.mrf.mxu3  ;;  %v3870_v37 = vpop.f32.mrf.mxu1  ;;  %v12478_v32 = vor.u32 %v10556_v20, %v9006_v41  ;;  %v10659_v20 = vld [vmem:[#allocation6 + $0x514] sm:$0xf0]  ;;  %v10610_v41 = vld [vmem:[#allocation6 + $0x394] sm:$0xf] }
 0x3f6   : > { %v3871_v38 = vadd.f32 %v3870_v37, %v3781_v59 }
 0x3f7   : > { %v12466_v22 = vadd.f32 %v4046_v18, %v3958_v9  ;;  %v12482_v18 = vor.u32 %v10557_v36, %v9014_v44 }
 0x3f9   : > { %14649 = vst [vmem:[#allocation104_spill] sm:$0xff] %v12482_v18 }
 0x3fc   : > { %v3959_v0 = vpop.f32.mrf.mxu2  ;;  %v3784_v14 = vpop.f32.mrf.mxu0 }
 0x3fd   : > { %v3960_v21 = vadd.f32 %v3959_v0, %v3871_v38  ;;  %v4048_v13 = vpop.f32.mrf.mxu3  ;;  %v3873_v9 = vpop.f32.mrf.mxu1  ;;  %v10594_v0 = vld [vmem:[#allocation6 + $0x314] sm:$0xf]  ;;  %v9158_v38 = vld [vmem:[#allocation6 + $0x318] sm:$0xf0] }
 0x3fe   : > { %v3874_v37 = vadd.f32 %v3873_v9, %v3784_v14  ;;  %v9161_v2 = vor.u32 %v10594_v0, %v9158_v38 }
 0x3ff   : > { %v12484_v59 = vadd.f32 %v4048_v13, %v3960_v21  ;;  %3823 = vmatmul.bf16.gmra.mxu0 %v12476_v43  ;;  %v9413_v21 = vor.u32 %v10659_v20, %v9412_v62  ;;  %v9225_v13 = vor.u32 %v10610_v41, %v9222_v11  ;;  %v9028_v20 = vld [vmem:[%s11346_s6 + $0x240] sm:$0xf]  ;;  %v10565_v41 = vld [vmem:[%s11346_s6 + $0x254] sm:$0xf0]  ;;  %v10562_v11 = vld [vmem:[%s11346_s6 + $0x244] sm:$0xf] }
 0x400   : > { %3912 = vmatmul.bf16.gmra.mxu1 %v12478_v32  ;;  %4305 = vmatpush.bf16.msra.mxu2 %v9161_v2  ;;  %v9038_v2 = vld [vmem:[%s11346_s6 + $0x260] sm:$0xf0]  ;;  %v12500_v24 = vor.u32 %v10565_v41, %v9028_v20 }
 0x401   : > { %4001 = vmatmul.bf16.gmra.mxu2 %v12480_v25  ;;  %4127 = vmatpush.bf16.msra.mxu0 %v9413_v21  ;;  %v10675_v25 = vld [vmem:[#allocation6 + $0x594] sm:$0xf0] }
 0x402   : > { %4090 = vmatmul.bf16.gmra.mxu3 %v12482_v18  ;;  %v9476_v18 = vld [vmem:[#allocation6 + $0x590] sm:$0xf] }
 0x403   : > { %4394 = vmatpush.bf16.msra.mxu3 %v9225_v13  ;;  %v9477_v62 = vor.u32 %v10675_v25, %v9476_v18  ;;  %v12506_v18 = vor.u32 %v10563_v46, %v9038_v2  ;;  %v10568_v2 = vld [vmem:[%s11346_s6 + $0x274] sm:$0xf] }
 0x404   : > { %v3962_v44 = vpop.f32.mrf.mxu2  ;;  %v3786_v14 = vpop.f32.mrf.mxu0 }
 0x405   : > { %v3963_v29 = vadd.f32 %v3962_v44, %v3874_v37  ;;  %v4051_v36 = vpop.f32.mrf.mxu3  ;;  %v3875_v9 = vpop.f32.mrf.mxu1  ;;  %v9030_v37 = vld [vmem:[%s11346_s6 + $0x258] sm:$0xf0]  ;;  %v9036_v44 = vld [vmem:[%s11346_s6 + $0x248] sm:$0xf]  ;;  %4216 = vmatpush.bf16.msra.mxu1 %v9477_v62  ;;  %14651 = vst [vmem:[#allocation106_spill] sm:$0xff] %v12506_v18 }
 0x406   : > { %v3876_v38 = vadd.f32 %v3875_v9, %v3786_v14  ;;  %v12504_v14 = vor.u32 %v10566_v1, %v9036_v44  ;;  %v10571_v44 = vld [vmem:[%s11346_s6 + $0x284] sm:$0xf0] }
 0x407   : > { %v12490_v0 = vadd.f32 %v4051_v36, %v3963_v29  ;;  %v12502_v36 = vor.u32 %v10562_v11, %v9030_v37  ;;  %v9052_v37 = vld [vmem:[%s11346_s6 + $0x270] sm:$0xf] }
 0x408   : > { %14650 = vst [vmem:[#allocation105_spill] sm:$0xff] %v12504_v14  ;;  %v12524_v48 = vor.u32 %v10571_v44, %v9052_v37  ;;  %v9404_v37 = vld [vmem:[#allocation6 + $0x500] sm:$0xf] }
 0x40c   : > { %v3964_v6 = vpop.f32.mrf.mxu2  ;;  %v3789_v29 = vpop.f32.mrf.mxu0 }
 0x40d   : > { %v3965_v21 = vadd.f32 %v3964_v6, %v3876_v38  ;;  %v4053_v13 = vpop.f32.mrf.mxu3  ;;  %v3878_v25 = vpop.f32.mrf.mxu1 }
 0x40e   : > { %v3879_v62 = vadd.f32 %v3878_v25, %v3789_v29  ;;  %v10572_v29 = vld [vmem:[%s11346_s6 + $0x28c] sm:$0xf0]  ;;  %v10569_v25 = vld [vmem:[%s11346_s6 + $0x27c] sm:$0xf] }
 0x40f   : > { %v12508_v9 = vadd.f32 %v4053_v13, %v3965_v21  ;;  %3828 = vmatmul.bf16.gmra.mxu0 %v12500_v24  ;;  %v9054_v21 = vld [vmem:[%s11346_s6 + $0x288] sm:$0xf0]  ;;  %v9060_v13 = vld [vmem:[%s11346_s6 + $0x278] sm:$0xf] }
 0x410   : > { %3917 = vmatmul.bf16.gmra.mxu1 %v12502_v36  ;;  %v12528_v5 = vor.u32 %v10572_v29, %v9060_v13  ;;  %v9214_v13 = vld [vmem:[#allocation6 + $0x388] sm:$0xf0] }
 0x411   : > { %4006 = vmatmul.bf16.gmra.mxu2 %v12504_v14 }
 0x412   : > { %4095 = vmatmul.bf16.gmra.mxu3 %v12506_v18  ;;  %14652 = vst [vmem:[#allocation107_spill] sm:$0xff] %v12528_v5 }
 0x414   : > { %v3967_v6 = vpop.f32.mrf.mxu2  ;;  %v3791_v38 = vpop.f32.mrf.mxu0 }
 0x415   : > { %v3968_v46 = vadd.f32 %v3967_v6, %v3879_v62  ;;  %v4056_v1 = vpop.f32.mrf.mxu3  ;;  %v3880_v20 = vpop.f32.mrf.mxu1  ;;  %v12526_v6 = vor.u32 %v10568_v2, %v9054_v21  ;;  %v10657_v2 = vld [vmem:[#allocation6 + $0x504] sm:$0xf0]  ;;  %v10608_v21 = vld [vmem:[#allocation6 + $0x384] sm:$0xf] }
 0x416   : > { %v3881_v11 = vadd.f32 %v3880_v20, %v3791_v38 }
 0x417   : > { %v12514_v41 = vadd.f32 %v4056_v1, %v3968_v46  ;;  %v12530_v1 = vor.u32 %v10569_v25, %v9062_v56 }
 0x419   : > { %14653 = vst [vmem:[#allocation108_spill] sm:$0xff] %v12530_v1 }
 0x41c   : > { %v3969_v14 = vpop.f32.mrf.mxu2  ;;  %v3794_v62 = vpop.f32.mrf.mxu0 }
 0x41d   : > { %v3970_v18 = vadd.f32 %v3969_v14, %v3881_v11  ;;  %v4058_v27 = vpop.f32.mrf.mxu3  ;;  %v3883_v46 = vpop.f32.mrf.mxu1  ;;  %v10592_v14 = vld [vmem:[#allocation6 + $0x304] sm:$0xf]  ;;  %v9150_v11 = vld [vmem:[#allocation6 + $0x308] sm:$0xf0] }
 0x41e   : > { %v3884_v20 = vadd.f32 %v3883_v46, %v3794_v62  ;;  %v9153_v44 = vor.u32 %v10592_v14, %v9150_v11 }
 0x41f   : > { %v12532_v38 = vadd.f32 %v4058_v27, %v3970_v18  ;;  %3833 = vmatmul.bf16.gmra.mxu0 %v12524_v48  ;;  %v9405_v27 = vor.u32 %v10657_v2, %v9404_v37  ;;  %v9217_v18 = vor.u32 %v10608_v21, %v9214_v13  ;;  %v9076_v2 = vld [vmem:[%s11346_s6 + $0x2a0] sm:$0xf]  ;;  %v10577_v21 = vld [vmem:[%s11346_s6 + $0x2b4] sm:$0xf0]  ;;  %v10574_v13 = vld [vmem:[%s11346_s6 + $0x2a4] sm:$0xf] }
 0x420   : > { %3922 = vmatmul.bf16.gmra.mxu1 %v12526_v6  ;;  %4306 = vmatpush.bf16.msra.mxu2 %v9153_v44  ;;  %v9086_v44 = vld [vmem:[%s11346_s6 + $0x2c0] sm:$0xf0]  ;;  %v12548_v55 = vor.u32 %v10577_v21, %v9076_v2 }
 0x421   : > { %4011 = vmatmul.bf16.gmra.mxu2 %v12528_v5  ;;  %4128 = vmatpush.bf16.msra.mxu0 %v9405_v27  ;;  %v10673_v5 = vld [vmem:[#allocation6 + $0x584] sm:$0xf0] }
 0x422   : > { %4100 = vmatmul.bf16.gmra.mxu3 %v12530_v1  ;;  %v9468_v1 = vld [vmem:[#allocation6 + $0x580] sm:$0xf] }
 0x423   : > { %4395 = vmatpush.bf16.msra.mxu3 %v9217_v18  ;;  %v9469_v37 = vor.u32 %v10673_v5, %v9468_v1  ;;  %v12554_v1 = vor.u32 %v10575_v8, %v9086_v44  ;;  %v10580_v44 = vld [vmem:[%s11346_s6 + $0x2d4] sm:$0xf] }
 0x424   : > { %v3972_v56 = vpop.f32.mrf.mxu2  ;;  %v3796_v62 = vpop.f32.mrf.mxu0 }
 0x425   : > { %v3973_v29 = vadd.f32 %v3972_v56, %v3884_v20  ;;  %v4061_v25 = vpop.f32.mrf.mxu3  ;;  %v3885_v46 = vpop.f32.mrf.mxu1  ;;  %v9078_v20 = vld [vmem:[%s11346_s6 + $0x2b8] sm:$0xf0]  ;;  %v9084_v56 = vld [vmem:[%s11346_s6 + $0x2a8] sm:$0xf]  ;;  %4217 = vmatpush.bf16.msra.mxu1 %v9469_v37  ;;  %14655 = vst [vmem:[#allocation110_spill] sm:$0xff] %v12554_v1 }
 0x426   : > { %v3886_v11 = vadd.f32 %v3885_v46, %v3796_v62  ;;  %v12552_v62 = vor.u32 %v10578_v58, %v9084_v56  ;;  %v10583_v56 = vld [vmem:[%s11346_s6 + $0x2e4] sm:$0xf0] }
 0x427   : > { %v12538_v14 = vadd.f32 %v4061_v25, %v3973_v29  ;;  %v12550_v25 = vor.u32 %v10574_v13, %v9078_v20  ;;  %v9100_v20 = vld [vmem:[%s11346_s6 + $0x2d0] sm:$0xf] }
 0x428   : > { %14654 = vst [vmem:[#allocation109_spill] sm:$0xff] %v12552_v62  ;;  %v12572_v33 = vor.u32 %v10583_v56, %v9100_v20  ;;  %v10638_v20 = vld [vmem:[#allocation6 + $0x474] sm:$0xf] }
 0x42c   : > { %v3974_v17 = vpop.f32.mrf.mxu2  ;;  %v3799_v29 = vpop.f32.mrf.mxu0 }
 0x42d   : > { %v3975_v27 = vadd.f32 %v3974_v17, %v3886_v11  ;;  %v4063_v18 = vpop.f32.mrf.mxu3  ;;  %v3888_v5 = vpop.f32.mrf.mxu1 }
 0x42e   : > { %v3889_v37 = vadd.f32 %v3888_v5, %v3799_v29  ;;  %v10584_v29 = vld [vmem:[%s11346_s6 + $0x2ec] sm:$0xf0]  ;;  %v10581_v5 = vld [vmem:[%s11346_s6 + $0x2dc] sm:$0xf] }
 0x42f   : > { %v12556_v46 = vadd.f32 %v4063_v18, %v3975_v27  ;;  %3838 = vmatmul.bf16.gmra.mxu0 %v12548_v55  ;;  %v9102_v27 = vld [vmem:[%s11346_s6 + $0x2e8] sm:$0xf0]  ;;  %v9108_v18 = vld [vmem:[%s11346_s6 + $0x2d8] sm:$0xf] }
 0x430   : > { %3927 = vmatmul.bf16.gmra.mxu1 %v12550_v25  ;;  %v12576_v3 = vor.u32 %v10584_v29, %v9108_v18  ;;  %v9526_v18 = vld [vmem:[#allocation6 + $0x5f8] sm:$0xf0] }
 0x431   : > { %4016 = vmatmul.bf16.gmra.mxu2 %v12552_v62 }
 0x432   : > { %4105 = vmatmul.bf16.gmra.mxu3 %v12554_v1  ;;  %14656 = vst [vmem:[#allocation111_spill] sm:$0xff] %v12576_v3 }
 0x434   : > { %v3977_v17 = vpop.f32.mrf.mxu2  ;;  %v3801_v11 = vpop.f32.mrf.mxu0 }
 0x435   : > { %v3978_v8 = vadd.f32 %v3977_v17, %v3889_v37  ;;  %v4066_v58 = vpop.f32.mrf.mxu3  ;;  %v3890_v2 = vpop.f32.mrf.mxu1  ;;  %v12574_v17 = vor.u32 %v10580_v44, %v9102_v27  ;;  %v9334_v44 = vld [vmem:[#allocation6 + $0x478] sm:$0xf0]  ;;  %v10686_v27 = vld [vmem:[#allocation6 + $0x5f4] sm:$0xf] }
 0x436   : > { %v3891_v13 = vadd.f32 %v3890_v2, %v3801_v11 }
 0x437   : > { %v12562_v21 = vadd.f32 %v4066_v58, %v3978_v8  ;;  %v12578_v58 = vor.u32 %v10581_v5, %v9110_v19 }
 0x439   : > { %14657 = vst [vmem:[#allocation112_spill] sm:$0xff] %v12578_v58 }
 0x43c   : > { %v3979_v62 = vpop.f32.mrf.mxu2  ;;  %v3804_v37 = vpop.f32.mrf.mxu0 }
 0x43d   : > { %v3980_v1 = vadd.f32 %v3979_v62, %v3891_v13  ;;  %v4068_v47 = vpop.f32.mrf.mxu3  ;;  %v3893_v8 = vpop.f32.mrf.mxu1  ;;  %v10670_v62 = vld [vmem:[#allocation6 + $0x574] sm:$0xf]  ;;  %v9462_v13 = vld [vmem:[#allocation6 + $0x578] sm:$0xf0] }
 0x43e   : > { %v3894_v2 = vadd.f32 %v3893_v8, %v3804_v37  ;;  %v9465_v56 = vor.u32 %v10670_v62, %v9462_v13 }
 0x43f   : > { %v12580_v11 = vadd.f32 %v4068_v47, %v3980_v1  ;;  %3843 = vmatmul.bf16.gmra.mxu0 %v12572_v33  ;;  %v9337_v47 = vor.u32 %v10638_v20, %v9334_v44  ;;  %v9529_v1 = vor.u32 %v10686_v27, %v9526_v18  ;;  %v9124_v44 = vld [vmem:[%s11346_s6 + $0x300] sm:$0xf]  ;;  %v10589_v27 = vld [vmem:[%s11346_s6 + $0x314] sm:$0xf0]  ;;  %v10586_v18 = vld [vmem:[%s11346_s6 + $0x304] sm:$0xf] }
 0x440   : > { %3932 = vmatmul.bf16.gmra.mxu1 %v12574_v17  ;;  %4655 = vmatpush.bf16.msrb.mxu2 %v9465_v56  ;;  %v9134_v56 = vld [vmem:[%s11346_s6 + $0x320] sm:$0xf0]  ;;  %v12596_v23 = vor.u32 %v10589_v27, %v9124_v44 }
 0x441   : > { %4021 = vmatmul.bf16.gmra.mxu2 %v12576_v3  ;;  %4477 = vmatpush.bf16.msrb.mxu0 %v9337_v47  ;;  %v9398_v3 = vld [vmem:[#allocation6 + $0x4f8] sm:$0xf0] }
 0x442   : > { %4110 = vmatmul.bf16.gmra.mxu3 %v12578_v58  ;;  %v10654_v58 = vld [vmem:[#allocation6 + $0x4f4] sm:$0xf]  ;;  %14658 = vst [vmem:[#allocation113_spill] sm:$0xff] %v12596_v23 }
 0x443   : > { %4744 = vmatpush.bf16.msrb.mxu3 %v9529_v1  ;;  %v9401_v20 = vor.u32 %v10654_v58, %v9398_v3  ;;  %v12602_v58 = vor.u32 %v10587_v57, %v9134_v56  ;;  %v10498_v56 = vld [vmem:[%s11346_s6 + $0x44] sm:$0xf] }
 0x444   : > { %v3982_v19 = vpop.f32.mrf.mxu2  ;;  %v3806_v37 = vpop.f32.mrf.mxu0 }
 0x445   : > { %v3983_v29 = vadd.f32 %v3982_v19, %v3894_v2  ;;  %v4071_v5 = vpop.f32.mrf.mxu3  ;;  %v3895_v8 = vpop.f32.mrf.mxu1  ;;  %v9126_v2 = vld [vmem:[%s11346_s6 + $0x318] sm:$0xf0]  ;;  %v9132_v19 = vld [vmem:[%s11346_s6 + $0x308] sm:$0xf]  ;;  %4566 = vmatpush.bf16.msrb.mxu1 %v9401_v20  ;;  %14661 = vst [vmem:[#allocation116_spill] sm:$0xff] %v12602_v58 }
 0x446   : > { %v3896_v13 = vadd.f32 %v3895_v8, %v3806_v37  ;;  %v12600_v37 = vor.u32 %v10590_v15, %v9132_v19  ;;  %v10501_v19 = vld [vmem:[%s11346_s6 + $0x54] sm:$0xf0] }
 0x447   : > { %v12586_v62 = vadd.f32 %v4071_v5, %v3983_v29  ;;  %v12598_v5 = vor.u32 %v10586_v18, %v9126_v2  ;;  %v8780_v2 = vld [vmem:[%s11346_s6 + $0x40] sm:$0xf] }
 0x448   : > { %14660 = vst [vmem:[#allocation115_spill] sm:$0xff] %v12600_v37 }
 0x449   : > { %14659 = vst [vmem:[#allocation114_spill] sm:$0xff] %v12598_v5 }
 0x44c   : > { %v3984_v34 = vpop.f32.mrf.mxu2  ;;  %v3809_v29 = vpop.f32.mrf.mxu0 }
 0x44d   : > { %v3985_v47 = vadd.f32 %v3984_v34, %v3896_v13  ;;  %v4073_v1 = vpop.f32.mrf.mxu3  ;;  %v3898_v3 = vpop.f32.mrf.mxu1 }
 0x44e   : > { %v3899_v20 = vadd.f32 %v3898_v3, %v3809_v29  ;;  %v12616_v29 = vor.u32 %v10501_v19, %v8780_v2  ;;  %v10684_v2 = vld [vmem:[#allocation6 + $0x5e4] sm:$0xf]  ;;  %v9518_v19 = vld [vmem:[#allocation6 + $0x5e8] sm:$0xf0] }
 0x44f   : > { %v12604_v8 = vadd.f32 %v4073_v1, %v3985_v47  ;;  %3848 = vmatmul.bf16.gmra.mxu0 %v12596_v23  ;;  %v8782_v47 = vld [vmem:[%s11346_s6 + $0x58] sm:$0xf0]  ;;  %v10504_v23 = vld [vmem:[%s11346_s6 + $0x74] sm:$0xf] }
 0x450   : > { %3937 = vmatmul.bf16.gmra.mxu1 %v12598_v5  ;;  %14662 = vst [vmem:[#allocation117_spill] sm:$0xff] %v12616_v29  ;;  %v12618_v5 = vor.u32 %v10498_v56, %v8782_v47 }
 0x451   : > { %4026 = vmatmul.bf16.gmra.mxu2 %v12600_v37 }
 0x452   : > { %4115 = vmatmul.bf16.gmra.mxu3 %v12602_v58  ;;  %14663 = vst [vmem:[#allocation118_spill] sm:$0xff] %v12618_v5 }
 0x454   : > { %v3987_v34 = vpop.f32.mrf.mxu2  ;;  %v3811_v44 = vpop.f32.mrf.mxu0 }
 0x455   : > { %v3988_v15 = vadd.f32 %v3987_v34, %v3899_v20  ;;  %v4076_v13 = vpop.f32.mrf.mxu3  ;;  %v3900_v27 = vpop.f32.mrf.mxu1 }
 0x456   : > { %v3901_v18 = vadd.f32 %v3900_v27, %v3811_v44  ;;  %v10636_v44 = vld [vmem:[#allocation6 + $0x464] sm:$0xf] }
 0x457   : > { %v12610_v57 = vadd.f32 %v4076_v13, %v3988_v15  ;;  %v10668_v15 = vld [vmem:[#allocation6 + $0x564] sm:$0xf]  ;;  %v9454_v13 = vld [vmem:[#allocation6 + $0x568] sm:$0xf0] }
 0x458   : > { %v9457_v27 = vor.u32 %v10668_v15, %v9454_v13  ;;  %v10652_v15 = vld [vmem:[#allocation6 + $0x4e4] sm:$0xf]  ;;  %v9390_v13 = vld [vmem:[#allocation6 + $0x4e8] sm:$0xf0] }
 0x45a   : > { %4656 = vmatpush.bf16.msrb.mxu2 %v9457_v27 }
 0x45c   : > { %v3989_v1 = vpop.f32.mrf.mxu2  ;;  %v3814_v37 = vpop.f32.mrf.mxu0 }
 0x45d   : > { %v3990_v3 = vadd.f32 %v3989_v1, %v3901_v18  ;;  %v4078_v4 = vpop.f32.mrf.mxu3  ;;  %v3903_v58 = vpop.f32.mrf.mxu1  ;;  %v9326_v18 = vld [vmem:[#allocation6 + $0x468] sm:$0xf0] }
 0x45e   : > { %v3904_v34 = vadd.f32 %v3903_v58, %v3814_v37  ;;  %v9521_v37 = vor.u32 %v10684_v2, %v9518_v19 }
 0x45f   : > { %v12620_v20 = vadd.f32 %v4078_v4, %v3990_v3  ;;  %4129 = vmatmul.bf16.vlgmr.msra.gmra.mxu0 %v12616_v29  ;;  %v9329_v4 = vor.u32 %v10636_v44, %v9326_v18  ;;  %v8804_v29 = vld [vmem:[%s11346_s6 + $0x70] sm:$0xf]  ;;  %v8806_v44 = vld [vmem:[%s11346_s6 + $0x88] sm:$0xf0] }
 0x460   : > { %4218 = vmatmul.bf16.vlgmr.msra.gmra.mxu1 %v12618_v5  ;;  %4745 = vmatpush.bf16.msrb.mxu3 %v9521_v37  ;;  %v9393_v5 = vor.u32 %v10652_v15, %v9390_v13  ;;  %v10513_v15 = vld [vmem:[%s11346_s6 + $0xb4] sm:$0xf0]  ;;  %v10510_v13 = vld [vmem:[%s11346_s6 + $0xa4] sm:$0xf] }
 0x461   : > { %14664 = vst [vmem:[#allocation119_spill] sm:$0xff] %v12620_v20  ;;  %4307 = vmatmul.bf16.vlgmr.msra.gmra.mxu2 %v12220_v10  ;;  %4478 = vmatpush.bf16.msrb.mxu0 %v9329_v4  ;;  %v10507_v20 = vld [vmem:[%s11346_s6 + $0x84] sm:$0xf0] }
 0x462   : > { %4396 = vmatmul.bf16.vlgmr.msra.gmra.mxu3 %v12222_v30  ;;  %4567 = vmatpush.bf16.msrb.mxu1 %v9393_v5  ;;  %v12632_v2 = vor.u32 %v10507_v20, %v8804_v29 }
 0x464   : > { %v3992_v56 = vpop.f32.mrf.mxu2  ;;  %v3816_v1 = vpop.f32.mrf.mxu0 }
 0x465   : > { %v3993_v58 = vadd.f32 %v3992_v56, %v3904_v34  ;;  %v4081_v47 = vpop.f32.mrf.mxu3  ;;  %v3905_v10 = vpop.f32.mrf.mxu1  ;;  %v12634_v56 = vor.u32 %v10504_v23, %v8806_v44  ;;  %v8830_v44 = vld [vmem:[%s11346_s6 + $0xb8] sm:$0xf0] }
 0x466   : > { %v3906_v3 = vadd.f32 %v3905_v10, %v3816_v1 }
 0x467   : > { %v12626_v30 = vadd.f32 %v4081_v47, %v3993_v58  ;;  %14665 = vst [vmem:[#allocation120_spill] sm:$0xff] %v12634_v56 }
 0x46c   : > { %v3994_v18 = vpop.f32.mrf.mxu2  ;;  %v3819_v27 = vpop.f32.mrf.mxu0 }
 0x46d   : > { %v3995_v34 = vadd.f32 %v3994_v18, %v3906_v3  ;;  %v4083_v19 = vpop.f32.mrf.mxu3  ;;  %v3908_v4 = vpop.f32.mrf.mxu1  ;;  %v8828_v3 = vld [vmem:[%s11346_s6 + $0xa0] sm:$0xf] }
 0x46e   : > { %v3909_v58 = vadd.f32 %v3908_v4, %v3819_v27  ;;  %v12650_v4 = vor.u32 %v10510_v13, %v8830_v44 }
 0x46f   : > { %v12636_v37 = vadd.f32 %v4083_v19, %v3995_v34  ;;  %4134 = vmatmul.bf16.gmra.mxu0 %v12632_v2  ;;  %v12648_v34 = vor.u32 %v10513_v15, %v8828_v3  ;;  %v10682_v3 = vld [vmem:[#allocation6 + $0x5d4] sm:$0xf]  ;;  %v9510_v15 = vld [vmem:[#allocation6 + $0x5d8] sm:$0xf0] }
 0x470   : > { %4223 = vmatmul.bf16.gmra.mxu1 %v12634_v56  ;;  %14667 = vst [vmem:[#allocation122_spill] sm:$0xff] %v12650_v4  ;;  %v10516_v56 = vld [vmem:[%s11346_s6 + $0xd4] sm:$0xf] }
 0x471   : > { %4312 = vmatmul.bf16.gmra.mxu2 %v12246_v7  ;;  %14666 = vst [vmem:[#allocation121_spill] sm:$0xff] %v12648_v34 }
 0x472   : > { %4401 = vmatmul.bf16.gmra.mxu3 %v12248_v39 }
 0x474   : > { %v3997_v5 = vpop.f32.mrf.mxu2  ;;  %v3821_v23 = vpop.f32.mrf.mxu0 }
 0x475   : > { %v3998_v29 = vadd.f32 %v3997_v5, %v3909_v58  ;;  %v4086_v20 = vpop.f32.mrf.mxu3  ;;  %v3910_v47 = vpop.f32.mrf.mxu1 }
 0x476   : > { %v3911_v10 = vadd.f32 %v3910_v47, %v3821_v23  ;;  %v10634_v23 = vld [vmem:[#allocation6 + $0x454] sm:$0xf] }
 0x477   : > { %v12642_v1 = vadd.f32 %v4086_v20, %v3998_v29  ;;  %v10666_v29 = vld [vmem:[#allocation6 + $0x554] sm:$0xf]  ;;  %v9446_v20 = vld [vmem:[#allocation6 + $0x558] sm:$0xf0] }
 0x478   : > { %v9449_v47 = vor.u32 %v10666_v29, %v9446_v20  ;;  %v10650_v29 = vld [vmem:[#allocation6 + $0x4d4] sm:$0xf]  ;;  %v9382_v20 = vld [vmem:[#allocation6 + $0x4d8] sm:$0xf0] }
 0x47a   : > { %4657 = vmatpush.bf16.msrb.mxu2 %v9449_v47 }
 0x47c   : > { %v3999_v18 = vpop.f32.mrf.mxu2  ;;  %v3824_v7 = vpop.f32.mrf.mxu0 }
 0x47d   : > { %v4000_v19 = vadd.f32 %v3999_v18, %v3911_v10  ;;  %v4088_v27 = vpop.f32.mrf.mxu3  ;;  %v3913_v39 = vpop.f32.mrf.mxu1  ;;  %v9318_v10 = vld [vmem:[#allocation6 + $0x458] sm:$0xf0]  ;;  %v9513_v18 = vor.u32 %v10682_v3, %v9510_v15 }
 0x47e   : > { %v3914_v5 = vadd.f32 %v3913_v39, %v3824_v7  ;;  %v9321_v44 = vor.u32 %v10634_v23, %v9318_v10  ;;  %v8854_v23 = vld [vmem:[%s11346_s6 + $0xe8] sm:$0xf0] }
 0x47f   : > { %v12652_v58 = vadd.f32 %v4088_v27, %v4000_v19  ;;  %4139 = vmatmul.bf16.gmra.mxu0 %v12648_v34  ;;  %4746 = vmatpush.bf16.msrb.mxu3 %v9513_v18  ;;  %v8852_v34 = vld [vmem:[%s11346_s6 + $0xd0] sm:$0xf] }
 0x480   : > { %4228 = vmatmul.bf16.gmra.mxu1 %v12650_v4  ;;  %4479 = vmatpush.bf16.msrb.mxu0 %v9321_v44  ;;  %v9385_v4 = vor.u32 %v10650_v29, %v9382_v20  ;;  %v10525_v29 = vld [vmem:[%s11346_s6 + $0x114] sm:$0xf0]  ;;  %v10522_v20 = vld [vmem:[%s11346_s6 + $0x104] sm:$0xf] }
 0x481   : > { %14668 = vst [vmem:[#allocation123_spill] sm:$0xff] %v12652_v58  ;;  %4317 = vmatmul.bf16.gmra.mxu2 %v12272_v53  ;;  %v10519_v58 = vld [vmem:[%s11346_s6 + $0xe4] sm:$0xf0] }
 0x482   : > { %4406 = vmatmul.bf16.gmra.mxu3 %v12274_v45  ;;  %4568 = vmatpush.bf16.msrb.mxu1 %v9385_v4  ;;  %v12664_v3 = vor.u32 %v10519_v58, %v8852_v34 }
 0x484   : > { %v4002_v13 = vpop.f32.mrf.mxu2  ;;  %v3826_v7 = vpop.f32.mrf.mxu0 }
 0x485   : > { %v4003_v19 = vadd.f32 %v4002_v13, %v3914_v5  ;;  %v4091_v27 = vpop.f32.mrf.mxu3  ;;  %v3915_v53 = vpop.f32.mrf.mxu1  ;;  %v12666_v13 = vor.u32 %v10516_v56, %v8854_v23  ;;  %v8878_v23 = vld [vmem:[%s11346_s6 + $0x118] sm:$0xf0] }
 0x486   : > { %v3916_v39 = vadd.f32 %v3915_v53, %v3826_v7 }
 0x487   : > { %v12658_v45 = vadd.f32 %v4091_v27, %v4003_v19  ;;  %14669 = vst [vmem:[#allocation124_spill] sm:$0xff] %v12666_v13 }
 0x48c   : > { %v4004_v10 = vpop.f32.mrf.mxu2  ;;  %v3829_v47 = vpop.f32.mrf.mxu0 }
 0x48d   : > { %v4005_v5 = vadd.f32 %v4004_v10, %v3916_v39  ;;  %v4093_v15 = vpop.f32.mrf.mxu3  ;;  %v3918_v44 = vpop.f32.mrf.mxu1  ;;  %v8876_v39 = vld [vmem:[%s11346_s6 + $0x100] sm:$0xf] }
 0x48e   : > { %v3919_v19 = vadd.f32 %v3918_v44, %v3829_v47  ;;  %v12682_v44 = vor.u32 %v10522_v20, %v8878_v23 }
 0x48f   : > { %v12668_v18 = vadd.f32 %v4093_v15, %v4005_v5  ;;  %4144 = vmatmul.bf16.gmra.mxu0 %v12664_v3  ;;  %v12680_v5 = vor.u32 %v10525_v29, %v8876_v39  ;;  %v10680_v39 = vld [vmem:[#allocation6 + $0x5c4] sm:$0xf]  ;;  %v9502_v29 = vld [vmem:[#allocation6 + $0x5c8] sm:$0xf0] }
 0x490   : > { %4233 = vmatmul.bf16.gmra.mxu1 %v12666_v13  ;;  %14671 = vst [vmem:[#allocation126_spill] sm:$0xff] %v12682_v44  ;;  %v10528_v13 = vld [vmem:[%s11346_s6 + $0x134] sm:$0xf] }
 0x491   : > { %4322 = vmatmul.bf16.gmra.mxu2 %v12298_v52  ;;  %14670 = vst [vmem:[#allocation125_spill] sm:$0xff] %v12680_v5 }
 0x492   : > { %4411 = vmatmul.bf16.gmra.mxu3 %v12300_v54 }
 0x494   : > { %v4007_v34 = vpop.f32.mrf.mxu2  ;;  %v3831_v56 = vpop.f32.mrf.mxu0 }
 0x495   : > { %v4008_v4 = vadd.f32 %v4007_v34, %v3919_v19  ;;  %v4096_v58 = vpop.f32.mrf.mxu3  ;;  %v3920_v27 = vpop.f32.mrf.mxu1 }
 0x496   : > { %v3921_v53 = vadd.f32 %v3920_v27, %v3831_v56  ;;  %v10632_v56 = vld [vmem:[#allocation6 + $0x444] sm:$0xf] }
 0x497   : > { %v12674_v7 = vadd.f32 %v4096_v58, %v4008_v4  ;;  %v10664_v4 = vld [vmem:[#allocation6 + $0x544] sm:$0xf]  ;;  %v9438_v58 = vld [vmem:[#allocation6 + $0x548] sm:$0xf0] }
 0x498   : > { %v9441_v27 = vor.u32 %v10664_v4, %v9438_v58  ;;  %v10648_v4 = vld [vmem:[#allocation6 + $0x4c4] sm:$0xf]  ;;  %v9374_v58 = vld [vmem:[#allocation6 + $0x4c8] sm:$0xf0] }
 0x49a   : > { %4658 = vmatpush.bf16.msrb.mxu2 %v9441_v27 }
 0x49c   : > { %v4009_v10 = vpop.f32.mrf.mxu2  ;;  %v3834_v52 = vpop.f32.mrf.mxu0 }
 0x49d   : > { %v4010_v15 = vadd.f32 %v4009_v10, %v3921_v53  ;;  %v4098_v47 = vpop.f32.mrf.mxu3  ;;  %v3923_v54 = vpop.f32.mrf.mxu1  ;;  %v9310_v53 = vld [vmem:[#allocation6 + $0x448] sm:$0xf0]  ;;  %v9505_v10 = vor.u32 %v10680_v39, %v9502_v29 }
 0x49e   : > { %v3924_v34 = vadd.f32 %v3923_v54, %v3834_v52  ;;  %v9313_v23 = vor.u32 %v10632_v56, %v9310_v53  ;;  %v8902_v56 = vld [vmem:[%s11346_s6 + $0x148] sm:$0xf0] }
 0x49f   : > { %v12684_v19 = vadd.f32 %v4098_v47, %v4010_v15  ;;  %4149 = vmatmul.bf16.gmra.mxu0 %v12680_v5  ;;  %4747 = vmatpush.bf16.msrb.mxu3 %v9505_v10  ;;  %v8900_v5 = vld [vmem:[%s11346_s6 + $0x130] sm:$0xf] }
 0x4a0   : > { %4238 = vmatmul.bf16.gmra.mxu1 %v12682_v44  ;;  %4480 = vmatpush.bf16.msrb.mxu0 %v9313_v23  ;;  %v9377_v44 = vor.u32 %v10648_v4, %v9374_v58  ;;  %v10537_v4 = vld [vmem:[%s11346_s6 + $0x174] sm:$0xf0]  ;;  %v10534_v58 = vld [vmem:[%s11346_s6 + $0x164] sm:$0xf] }
 0x4a1   : > { %14672 = vst [vmem:[#allocation127_spill] sm:$0xff] %v12684_v19  ;;  %4327 = vmatmul.bf16.gmra.mxu2 %v12324_v40  ;;  %v10531_v19 = vld [vmem:[%s11346_s6 + $0x144] sm:$0xf0] }
 0x4a2   : > { %4416 = vmatmul.bf16.gmra.mxu3 %v12326_v60  ;;  %4569 = vmatpush.bf16.msrb.mxu1 %v9377_v44  ;;  %v12696_v39 = vor.u32 %v10531_v19, %v8900_v5 }
 0x4a4   : > { %v4012_v20 = vpop.f32.mrf.mxu2  ;;  %v3836_v52 = vpop.f32.mrf.mxu0 }
 0x4a5   : > { %v4013_v15 = vadd.f32 %v4012_v20, %v3924_v34  ;;  %v4101_v47 = vpop.f32.mrf.mxu3  ;;  %v3925_v40 = vpop.f32.mrf.mxu1  ;;  %v12698_v20 = vor.u32 %v10528_v13, %v8902_v56  ;;  %v8926_v56 = vld [vmem:[%s11346_s6 + $0x178] sm:$0xf0] }
 0x4a6   : > { %v3926_v54 = vadd.f32 %v3925_v40, %v3836_v52 }
 0x4a7   : > { %v12690_v60 = vadd.f32 %v4101_v47, %v4013_v15 }
 0x4ac   : > { %v4014_v53 = vpop.f32.mrf.mxu2  ;;  %v3839_v27 = vpop.f32.mrf.mxu0 }
 0x4ad   : > { %v4015_v34 = vadd.f32 %v4014_v53, %v3926_v54  ;;  %v4103_v29 = vpop.f32.mrf.mxu3  ;;  %v3928_v23 = vpop.f32.mrf.mxu1  ;;  %v8924_v54 = vld [vmem:[%s11346_s6 + $0x160] sm:$0xf] }
 0x4ae   : > { %v3929_v15 = vadd.f32 %v3928_v23, %v3839_v27  ;;  %v12714_v23 = vor.u32 %v10534_v58, %v8926_v56 }
 0x4af   : > { %v12700_v10 = vadd.f32 %v4103_v29, %v4015_v34  ;;  %4154 = vmatmul.bf16.gmra.mxu0 %v12696_v39  ;;  %v12712_v34 = vor.u32 %v10537_v4, %v8924_v54  ;;  %v10678_v54 = vld [vmem:[#allocation6 + $0x5b4] sm:$0xf]  ;;  %v9494_v4 = vld [vmem:[#allocation6 + $0x5b8] sm:$0xf0] }
 0x4b0   : > { %4243 = vmatmul.bf16.gmra.mxu1 %v12698_v20  ;;  %14674 = vst [vmem:[#allocation129_spill] sm:$0xff] %v12714_v23 }
 0x4b1   : > { %4332 = vmatmul.bf16.gmra.mxu2 %v12350_v49  ;;  %14673 = vst [vmem:[#allocation128_spill] sm:$0xff] %v12712_v34 }
 0x4b2   : > { %4421 = vmatmul.bf16.gmra.mxu3 %v12352_v12 }
 0x4b4   : > { %v4017_v5 = vpop.f32.mrf.mxu2  ;;  %v3841_v13 = vpop.f32.mrf.mxu0 }
 0x4b5   : > { %v4018_v44 = vadd.f32 %v4017_v5, %v3929_v15  ;;  %v4106_v19 = vpop.f32.mrf.mxu3  ;;  %v3930_v47 = vpop.f32.mrf.mxu1 }
 0x4b6   : > { %v3931_v40 = vadd.f32 %v3930_v47, %v3841_v13  ;;  %v10630_v13 = vld [vmem:[#allocation6 + $0x434] sm:$0xf] }
 0x4b7   : > { %v12706_v52 = vadd.f32 %v4106_v19, %v4018_v44  ;;  %v10662_v44 = vld [vmem:[#allocation6 + $0x534] sm:$0xf]  ;;  %v9430_v19 = vld [vmem:[#allocation6 + $0x538] sm:$0xf0] }
 0x4b8   : > { %v9433_v47 = vor.u32 %v10662_v44, %v9430_v19 }
 0x4ba   : > { %4659 = vmatpush.bf16.msrb.mxu2 %v9433_v47 }
 0x4bc   : > { %v4019_v53 = vpop.f32.mrf.mxu2  ;;  %v3844_v49 = vpop.f32.mrf.mxu0 }
 0x4bd   : > { %v4020_v29 = vadd.f32 %v4019_v53, %v3931_v40  ;;  %v4108_v27 = vpop.f32.mrf.mxu3  ;;  %v3933_v12 = vpop.f32.mrf.mxu1  ;;  %v9302_v40 = vld [vmem:[#allocation6 + $0x438] sm:$0xf0]  ;;  %v9497_v53 = vor.u32 %v10678_v54, %v9494_v4 }
 0x4be   : > { %v3934_v5 = vadd.f32 %v3933_v12, %v3844_v49  ;;  %v9305_v56 = vor.u32 %v10630_v13, %v9302_v40  ;;  %v9366_v12 = vld [vmem:[#allocation6 + $0x4b8] sm:$0xf0]  ;;  %v10540_v13 = vld [vmem:[%s11346_s6 + $0x194] sm:$0xf]  ;;  %v8950_v40 = vld [vmem:[%s11346_s6 + $0x1a8] sm:$0xf0] }
 0x4bf   : > { %v12716_v15 = vadd.f32 %v4108_v27, %v4020_v29  ;;  %4159 = vmatmul.bf16.gmra.mxu0 %v12712_v34  ;;  %4748 = vmatpush.bf16.msrb.mxu3 %v9497_v53  ;;  %v8948_v34 = vld [vmem:[%s11346_s6 + $0x190] sm:$0xf] }
 0x4c0   : > { %4248 = vmatmul.bf16.gmra.mxu1 %v12714_v23  ;;  %4481 = vmatpush.bf16.msrb.mxu0 %v9305_v56  ;;  %v12730_v56 = vor.u32 %v10540_v13, %v8950_v40  ;;  %v10549_v13 = vld [vmem:[%s11346_s6 + $0x1d4] sm:$0xf0]  ;;  %v10546_v40 = vld [vmem:[%s11346_s6 + $0x1c4] sm:$0xf] }
 0x4c1   : > { %14675 = vst [vmem:[#allocation130_spill] sm:$0xff] %v12716_v15  ;;  %4337 = vmatmul.bf16.gmra.mxu2 %v12376_v28  ;;  %v10543_v15 = vld [vmem:[%s11346_s6 + $0x1a4] sm:$0xf0] }
 0x4c2   : > { %4426 = vmatmul.bf16.gmra.mxu3 %v12378_v35  ;;  %v10646_v35 = vld [vmem:[#allocation6 + $0x4b4] sm:$0xf]  ;;  %14676 = vst [vmem:[#allocation131_spill] sm:$0xff] %v12730_v56 }
 0x4c3   : > { %v9369_v23 = vor.u32 %v10646_v35, %v9366_v12 }
 0x4c4   : > { %v4022_v58 = vpop.f32.mrf.mxu2  ;;  %v3846_v49 = vpop.f32.mrf.mxu0 }
 0x4c5   : > { %v4023_v29 = vadd.f32 %v4022_v58, %v3934_v5  ;;  %v4111_v27 = vpop.f32.mrf.mxu3  ;;  %v3935_v28 = vpop.f32.mrf.mxu1  ;;  %4570 = vmatpush.bf16.msrb.mxu1 %v9369_v23  ;;  %v12728_v5 = vor.u32 %v10543_v15, %v8948_v34 }
 0x4c6   : > { %v3936_v19 = vadd.f32 %v3935_v28, %v3846_v49 }
 0x4c7   : > { %v12722_v44 = vadd.f32 %v4111_v27, %v4023_v29 }
 0x4cc   : > { %v4024_v54 = vpop.f32.mrf.mxu2  ;;  %v3849_v47 = vpop.f32.mrf.mxu0 }
 0x4cd   : > { %v4025_v4 = vadd.f32 %v4024_v54, %v3936_v19  ;;  %v4113_v58 = vpop.f32.mrf.mxu3  ;;  %v3938_v53 = vpop.f32.mrf.mxu1  ;;  %v8972_v19 = vld [vmem:[%s11346_s6 + $0x1c0] sm:$0xf]  ;;  %v8974_v54 = vld [vmem:[%s11346_s6 + $0x1d8] sm:$0xf0] }
 0x4ce   : > { %v3939_v27 = vadd.f32 %v3938_v53, %v3849_v47 }
 0x4cf   : > { %v12732_v29 = vadd.f32 %v4113_v58, %v4025_v4  ;;  %4164 = vmatmul.bf16.gmra.mxu0 %v12728_v5  ;;  %v12744_v58 = vor.u32 %v10549_v13, %v8972_v19  ;;  %v10628_v19 = vld [vmem:[#allocation6 + $0x424] sm:$0xf] }
 0x4d0   : > { %4253 = vmatmul.bf16.gmra.mxu1 %v12730_v56  ;;  %v12746_v56 = vor.u32 %v10546_v40, %v8974_v54  ;;  %v10676_v40 = vld [vmem:[#allocation6 + $0x5a4] sm:$0xf]  ;;  %v9486_v54 = vld [vmem:[#allocation6 + $0x5a8] sm:$0xf0] }
 0x4d1   : > { %4342 = vmatmul.bf16.gmra.mxu2 %v12402_v61 }
 0x4d2   : > { %4431 = vmatmul.bf16.gmra.mxu3 %v12404_v51  ;;  %14677 = vst [vmem:[#allocation132_spill] sm:$0xff] %v12746_v56 }
 0x4d4   : > { %v4027_v34 = vpop.f32.mrf.mxu2  ;;  %v3851_v49 = vpop.f32.mrf.mxu0 }
 0x4d5   : > { %v4028_v23 = vadd.f32 %v4027_v34, %v3939_v27  ;;  %v4116_v15 = vpop.f32.mrf.mxu3  ;;  %v3940_v28 = vpop.f32.mrf.mxu1 }
 0x4d6   : > { %v3941_v12 = vadd.f32 %v3940_v28, %v3851_v49  ;;  %v10660_v28 = vld [vmem:[#allocation6 + $0x524] sm:$0xf] }
 0x4d7   : > { %v12738_v35 = vadd.f32 %v4116_v15, %v4028_v23  ;;  %v14678_v15 = vld [vmem:[#allocation69_spill] sm:$0xff] }
 0x4dc   : > { %v4029_v4 = vpop.f32.mrf.mxu2  ;;  %v4130_v61 = vpop.f32.mrf.mxu0 }
 0x4dd   : > { %v4030_v47 = vadd.f32 %v4029_v4, %v3941_v12  ;;  %v4118_v53 = vpop.f32.mrf.mxu3  ;;  %v4131_v51 = vadd.f32 %v4130_v61, %v12442_v63  ;;  %v4219_v27 = vpop.f32.mrf.mxu1  ;;  %v9422_v12 = vld [vmem:[#allocation6 + $0x528] sm:$0xf0] }
 0x4de   : > { %v9425_v13 = vor.u32 %v10660_v28, %v9422_v12  ;;  %v9294_v63 = vld [vmem:[#allocation6 + $0x428] sm:$0xf0] }
 0x4df   : > { %v12749_v34 = vadd.f32 %v4118_v53, %v4030_v47  ;;  %v4220_v23 = vadd.f32 %v4219_v27, %v4131_v51  ;;  %4169 = vmatmul.bf16.gmra.mxu0 %v12744_v58  ;;  %v9297_v47 = vor.u32 %v10628_v19, %v9294_v63  ;;  %v9489_v53 = vor.u32 %v10676_v40, %v9486_v54  ;;  %v14680_v19 = vld [vmem:[#allocation70_spill] sm:$0xff]  ;;  %v10552_v40 = vld [vmem:[%s11346_s6 + $0x1f4] sm:$0xf]  ;;  %v8998_v54 = vld [vmem:[%s11346_s6 + $0x208] sm:$0xf0] }
 0x4e0   : > { %4258 = vmatmul.bf16.gmra.mxu1 %v12746_v56  ;;  %4660 = vmatpush.bf16.msrb.mxu2 %v9425_v13  ;;  %v10555_v56 = vld [vmem:[%s11346_s6 + $0x204] sm:$0xf0] }
 0x4e1   : > { %4347 = vmatmul.bf16.gmra.mxu2 %v12428_v26  ;;  %v12755_v49 = vadd.f32 %v4220_v23, %v14678_v15  ;;  %4482 = vmatpush.bf16.msrb.mxu0 %v9297_v47  ;;  %v10644_v23 = vld [vmem:[#allocation6 + $0x4a4] sm:$0xf]  ;;  %v9358_v15 = vld [vmem:[#allocation6 + $0x4a8] sm:$0xf0] }
 0x4e2   : > { %4436 = vmatmul.bf16.gmra.mxu3 %v12430_v50  ;;  %v9361_v28 = vor.u32 %v10644_v23, %v9358_v15 }
 0x4e3   : > { %14679 = vst [vmem:[#allocation69_spill] sm:$0xff] %v12755_v49  ;;  %4749 = vmatpush.bf16.msrb.mxu3 %v9489_v53  ;;  %v8996_v49 = vld [vmem:[%s11346_s6 + $0x1f0] sm:$0xf] }
 0x4e4   : > { %v4308_v4 = vpop.f32.mrf.mxu2  ;;  %v4132_v26 = vpop.f32.mrf.mxu0  ;;  %4571 = vmatpush.bf16.msrb.mxu1 %v9361_v28 }
 0x4e5   : > { %v4397_v61 = vpop.f32.mrf.mxu3  ;;  %v4133_v50 = vadd.f32 %v4132_v26, %v12460_v31  ;;  %v4221_v27 = vpop.f32.mrf.mxu1  ;;  %v12770_v26 = vor.u32 %v10552_v40, %v8998_v54  ;;  %v9020_v54 = vld [vmem:[%s11346_s6 + $0x220] sm:$0xf] }
 0x4e6   : > { %v12758_v51 = vadd.f32 %v4397_v61, %v4308_v4  ;;  %v12768_v4 = vor.u32 %v10555_v56, %v8996_v49  ;;  %v14682_v56 = vld [vmem:[#allocation71_spill] sm:$0xff] }
 0x4e7   : > { %v4222_v12 = vadd.f32 %v4221_v27, %v4133_v50 }
 0x4e9   : > { %v12764_v63 = vadd.f32 %v4222_v12, %v14680_v19 }
 0x4eb   : > { %14681 = vst [vmem:[#allocation70_spill] sm:$0xff] %v12764_v63  ;;  %v10567_v63 = vld [vmem:[%s11346_s6 + $0x264] sm:$0xf0] }
 0x4ec   : > { %v4310_v13 = vpop.f32.mrf.mxu2  ;;  %v4135_v31 = vpop.f32.mrf.mxu0 }
 0x4ed   : > { %v4399_v61 = vpop.f32.mrf.mxu3  ;;  %v4136_v53 = vadd.f32 %v4135_v31, %v12466_v22  ;;  %v4224_v50 = vpop.f32.mrf.mxu1 }
 0x4ee   : > { %v12772_v47 = vadd.f32 %v4399_v61, %v4310_v13  ;;  %v10561_v13 = vld [vmem:[%s11346_s6 + $0x234] sm:$0xf0]  ;;  %v14684_v61 = vld [vmem:[#allocation72_spill] sm:$0xff] }
 0x4ef   : > { %v4225_v27 = vadd.f32 %v4224_v50, %v4136_v53  ;;  %4174 = vmatmul.bf16.gmra.mxu0 %v12768_v4  ;;  %v9022_v53 = vld [vmem:[%s11346_s6 + $0x238] sm:$0xf0] }
 0x4f0   : > { %4263 = vmatmul.bf16.gmra.mxu1 %v12770_v26 }
 0x4f1   : > { %4352 = vmatmul.bf16.gmra.mxu2 %v12452_v42  ;;  %v12779_v49 = vadd.f32 %v4225_v27, %v14682_v56  ;;  %v10558_v42 = vld [vmem:[%s11346_s6 + $0x224] sm:$0xf]  ;;  %v12792_v27 = vor.u32 %v10561_v13, %v9020_v54  ;;  %v9414_v54 = vld [vmem:[#allocation6 + $0x518] sm:$0xf0]  ;;  %v10626_v13 = vld [vmem:[#allocation6 + $0x414] sm:$0xf] }
 0x4f2   : > { %4441 = vmatmul.bf16.gmra.mxu3 %v12454_v16 }
 0x4f3   : > { %14683 = vst [vmem:[#allocation71_spill] sm:$0xff] %v12779_v49  ;;  %v12794_v49 = vor.u32 %v10558_v42, %v9022_v53  ;;  %v9286_v42 = vld [vmem:[#allocation6 + $0x418] sm:$0xf0]  ;;  %v10674_v53 = vld [vmem:[#allocation6 + $0x594] sm:$0xf] }
 0x4f4   : > { %v4313_v23 = vpop.f32.mrf.mxu2  ;;  %v4137_v28 = vpop.f32.mrf.mxu0 }
 0x4f5   : > { %v4402_v15 = vpop.f32.mrf.mxu3  ;;  %v4138_v12 = vadd.f32 %v4137_v28, %v12484_v59  ;;  %v4226_v19 = vpop.f32.mrf.mxu1 }
 0x4f6   : > { %v12782_v22 = vadd.f32 %v4402_v15, %v4313_v23 }
 0x4f7   : > { %v4227_v40 = vadd.f32 %v4226_v19, %v4138_v12  ;;  %v14686_v12 = vld [vmem:[#allocation73_spill] sm:$0xff] }
 0x4f9   : > { %v12788_v31 = vadd.f32 %v4227_v40, %v14684_v61  ;;  %v10658_v40 = vld [vmem:[#allocation6 + $0x514] sm:$0xf] }
 0x4fa   : > { %v9417_v61 = vor.u32 %v10658_v40, %v9414_v54  ;;  %v9350_v40 = vld [vmem:[#allocation6 + $0x498] sm:$0xf0] }
 0x4fb   : > { %14685 = vst [vmem:[#allocation72_spill] sm:$0xff] %v12788_v31  ;;  %v9044_v31 = vld [vmem:[%s11346_s6 + $0x250] sm:$0xf] }
 0x4fc   : > { %v4315_v50 = vpop.f32.mrf.mxu2  ;;  %v4140_v56 = vpop.f32.mrf.mxu0  ;;  %4661 = vmatpush.bf16.msrb.mxu2 %v9417_v61 }
 0x4fd   : > { %v4404_v16 = vpop.f32.mrf.mxu3  ;;  %v4141_v59 = vadd.f32 %v4140_v56, %v12490_v0  ;;  %v4229_v15 = vpop.f32.mrf.mxu1  ;;  %v9478_v0 = vld [vmem:[#allocation6 + $0x598] sm:$0xf0] }
 0x4fe   : > { %v12796_v23 = vadd.f32 %v4404_v16, %v4315_v50  ;;  %v9289_v16 = vor.u32 %v10626_v13, %v9286_v42  ;;  %v9481_v56 = vor.u32 %v10674_v53, %v9478_v0  ;;  %v14688_v13 = vld [vmem:[#allocation74_spill] sm:$0xff]  ;;  %v10564_v53 = vld [vmem:[%s11346_s6 + $0x254] sm:$0xf]  ;;  %v9046_v0 = vld [vmem:[%s11346_s6 + $0x268] sm:$0xf0] }
 0x4ff   : > { %v4230_v28 = vadd.f32 %v4229_v15, %v4141_v59  ;;  %4179 = vmatmul.bf16.gmra.mxu0 %v12792_v27 }
 0x500   : > { %4268 = vmatmul.bf16.gmra.mxu1 %v12794_v49  ;;  %4483 = vmatpush.bf16.msrb.mxu0 %v9289_v16 }
 0x501   : > { %4357 = vmatmul.bf16.gmra.mxu2 %v12476_v43  ;;  %v12803_v19 = vadd.f32 %v4230_v28, %v14686_v12  ;;  %4750 = vmatpush.bf16.msrb.mxu3 %v9481_v56  ;;  %v10642_v12 = vld [vmem:[#allocation6 + $0x494] sm:$0xf] }
 0x502   : > { %4446 = vmatmul.bf16.gmra.mxu3 %v12478_v32  ;;  %v9353_v54 = vor.u32 %v10642_v12, %v9350_v40 }
 0x503   : > { %14687 = vst [vmem:[#allocation73_spill] sm:$0xff] %v12803_v19 }
 0x504   : > { %v4318_v50 = vpop.f32.mrf.mxu2  ;;  %v4142_v43 = vpop.f32.mrf.mxu0  ;;  %4572 = vmatpush.bf16.msrb.mxu1 %v9353_v54 }
 0x505   : > { %v4407_v59 = vpop.f32.mrf.mxu3  ;;  %v4143_v32 = vadd.f32 %v4142_v43, %v12508_v9  ;;  %v4231_v28 = vpop.f32.mrf.mxu1  ;;  %v12818_v43 = vor.u32 %v10564_v53, %v9046_v0  ;;  %v9068_v0 = vld [vmem:[%s11346_s6 + $0x280] sm:$0xf] }
 0x506   : > { %v12806_v15 = vadd.f32 %v4407_v59, %v4318_v50  ;;  %v12816_v50 = vor.u32 %v10567_v63, %v9044_v31  ;;  %v14690_v63 = vld [vmem:[#allocation75_spill] sm:$0xff] }
 0x507   : > { %v4232_v19 = vadd.f32 %v4231_v28, %v4143_v32 }
 0x509   : > { %v12812_v42 = vadd.f32 %v4232_v19, %v14688_v13 }
 0x50b   : > { %14689 = vst [vmem:[#allocation74_spill] sm:$0xff] %v12812_v42  ;;  %v10579_v42 = vld [vmem:[%s11346_s6 + $0x2c4] sm:$0xf0] }
 0x50c   : > { %v4320_v61 = vpop.f32.mrf.mxu2  ;;  %v4145_v9 = vpop.f32.mrf.mxu0 }
 0x50d   : > { %v4409_v59 = vpop.f32.mrf.mxu3  ;;  %v4146_v56 = vadd.f32 %v4145_v9, %v12514_v41  ;;  %v4234_v32 = vpop.f32.mrf.mxu1 }
 0x50e   : > { %v12820_v16 = vadd.f32 %v4409_v59, %v4320_v61  ;;  %v10573_v61 = vld [vmem:[%s11346_s6 + $0x294] sm:$0xf0]  ;;  %v14692_v59 = vld [vmem:[#allocation76_spill] sm:$0xff] }
 0x50f   : > { %v4235_v28 = vadd.f32 %v4234_v32, %v4146_v56  ;;  %4184 = vmatmul.bf16.gmra.mxu0 %v12816_v50  ;;  %v9070_v56 = vld [vmem:[%s11346_s6 + $0x298] sm:$0xf0] }
 0x510   : > { %4273 = vmatmul.bf16.gmra.mxu1 %v12818_v43 }
 0x511   : > { %4362 = vmatmul.bf16.gmra.mxu2 %v12500_v24  ;;  %v12827_v31 = vadd.f32 %v4235_v28, %v14690_v63  ;;  %v10570_v24 = vld [vmem:[%s11346_s6 + $0x284] sm:$0xf]  ;;  %v12840_v28 = vor.u32 %v10573_v61, %v9068_v0  ;;  %v9406_v0 = vld [vmem:[#allocation6 + $0x508] sm:$0xf0] }
 0x512   : > { %4451 = vmatmul.bf16.gmra.mxu3 %v12502_v36  ;;  %v10624_v61 = vld [vmem:[#allocation6 + $0x404] sm:$0xf] }
 0x513   : > { %14691 = vst [vmem:[#allocation75_spill] sm:$0xff] %v12827_v31  ;;  %v12842_v31 = vor.u32 %v10570_v24, %v9070_v56  ;;  %v9278_v24 = vld [vmem:[#allocation6 + $0x408] sm:$0xf0]  ;;  %v10672_v56 = vld [vmem:[#allocation6 + $0x584] sm:$0xf] }
 0x514   : > { %v4323_v19 = vpop.f32.mrf.mxu2  ;;  %v4147_v40 = vpop.f32.mrf.mxu0 }
 0x515   : > { %v4412_v12 = vpop.f32.mrf.mxu3  ;;  %v4148_v54 = vadd.f32 %v4147_v40, %v12532_v38  ;;  %v4236_v13 = vpop.f32.mrf.mxu1 }
 0x516   : > { %v12830_v41 = vadd.f32 %v4412_v12, %v4323_v19 }
 0x517   : > { %v4237_v53 = vadd.f32 %v4236_v13, %v4148_v54  ;;  %v14694_v54 = vld [vmem:[#allocation77_spill] sm:$0xff] }
 0x519   : > { %v12836_v9 = vadd.f32 %v4237_v53, %v14692_v59  ;;  %v10656_v53 = vld [vmem:[#allocation6 + $0x504] sm:$0xf] }
 0x51a   : > { %v9409_v59 = vor.u32 %v10656_v53, %v9406_v0  ;;  %v9342_v53 = vld [vmem:[#allocation6 + $0x488] sm:$0xf0] }
 0x51b   : > { %14693 = vst [vmem:[#allocation76_spill] sm:$0xff] %v12836_v9  ;;  %v9092_v9 = vld [vmem:[%s11346_s6 + $0x2b0] sm:$0xf] }
 0x51c   : > { %v4325_v32 = vpop.f32.mrf.mxu2  ;;  %v4150_v63 = vpop.f32.mrf.mxu0  ;;  %4662 = vmatpush.bf16.msrb.mxu2 %v9409_v59 }
 0x51d   : > { %v4414_v36 = vpop.f32.mrf.mxu3  ;;  %v4151_v38 = vadd.f32 %v4150_v63, %v12538_v14  ;;  %v4239_v12 = vpop.f32.mrf.mxu1  ;;  %v9470_v14 = vld [vmem:[#allocation6 + $0x588] sm:$0xf0] }
 0x51e   : > { %v12844_v19 = vadd.f32 %v4414_v36, %v4325_v32  ;;  %v9281_v36 = vor.u32 %v10624_v61, %v9278_v24  ;;  %v9473_v63 = vor.u32 %v10672_v56, %v9470_v14  ;;  %v14696_v61 = vld [vmem:[#allocation78_spill] sm:$0xff]  ;;  %v10576_v56 = vld [vmem:[%s11346_s6 + $0x2b4] sm:$0xf]  ;;  %v9094_v14 = vld [vmem:[%s11346_s6 + $0x2c8] sm:$0xf0] }
 0x51f   : > { %v4240_v40 = vadd.f32 %v4239_v12, %v4151_v38  ;;  %4189 = vmatmul.bf16.gmra.mxu0 %v12840_v28 }
 0x520   : > { %4278 = vmatmul.bf16.gmra.mxu1 %v12842_v31  ;;  %4484 = vmatpush.bf16.msrb.mxu0 %v9281_v36 }
 0x521   : > { %4367 = vmatmul.bf16.gmra.mxu2 %v12524_v48  ;;  %v12851_v13 = vadd.f32 %v4240_v40, %v14694_v54  ;;  %4751 = vmatpush.bf16.msrb.mxu3 %v9473_v63  ;;  %v10640_v54 = vld [vmem:[#allocation6 + $0x484] sm:$0xf] }
 0x522   : > { %4456 = vmatmul.bf16.gmra.mxu3 %v12526_v6  ;;  %v9345_v0 = vor.u32 %v10640_v54, %v9342_v53 }
 0x523   : > { %14695 = vst [vmem:[#allocation77_spill] sm:$0xff] %v12851_v13 }
 0x524   : > { %v4328_v32 = vpop.f32.mrf.mxu2  ;;  %v4152_v48 = vpop.f32.mrf.mxu0  ;;  %4573 = vmatpush.bf16.msrb.mxu1 %v9345_v0 }
 0x525   : > { %v4417_v38 = vpop.f32.mrf.mxu3  ;;  %v4153_v6 = vadd.f32 %v4152_v48, %v12556_v46  ;;  %v4241_v40 = vpop.f32.mrf.mxu1  ;;  %v12866_v48 = vor.u32 %v10576_v56, %v9094_v14  ;;  %v9116_v14 = vld [vmem:[%s11346_s6 + $0x2e0] sm:$0xf] }
 0x526   : > { %v12854_v12 = vadd.f32 %v4417_v38, %v4328_v32  ;;  %v12864_v32 = vor.u32 %v10579_v42, %v9092_v9  ;;  %v14698_v42 = vld [vmem:[#allocation79_spill] sm:$0xff] }
 0x527   : > { %v4242_v13 = vadd.f32 %v4241_v40, %v4153_v6 }
 0x529   : > { %v12860_v24 = vadd.f32 %v4242_v13, %v14696_v61 }
 0x52b   : > { %14697 = vst [vmem:[#allocation78_spill] sm:$0xff] %v12860_v24  ;;  %v10591_v24 = vld [vmem:[%s11346_s6 + $0x324] sm:$0xf0] }
 0x52c   : > { %v4330_v59 = vpop.f32.mrf.mxu2  ;;  %v4155_v46 = vpop.f32.mrf.mxu0 }
 0x52d   : > { %v4419_v38 = vpop.f32.mrf.mxu3  ;;  %v4156_v63 = vadd.f32 %v4155_v46, %v12562_v21  ;;  %v4244_v6 = vpop.f32.mrf.mxu1 }
 0x52e   : > { %v12868_v36 = vadd.f32 %v4419_v38, %v4330_v59  ;;  %v10585_v59 = vld [vmem:[%s11346_s6 + $0x2f4] sm:$0xf0]  ;;  %v14700_v38 = vld [vmem:[#allocation80_spill] sm:$0xff] }
 0x52f   : > { %v4245_v40 = vadd.f32 %v4244_v6, %v4156_v63  ;;  %4194 = vmatmul.bf16.gmra.mxu0 %v12864_v32  ;;  %v9118_v63 = vld [vmem:[%s11346_s6 + $0x2f8] sm:$0xf0] }
 0x530   : > { %4283 = vmatmul.bf16.gmra.mxu1 %v12866_v48 }
 0x531   : > { %4372 = vmatmul.bf16.gmra.mxu2 %v12548_v55  ;;  %v12875_v9 = vadd.f32 %v4245_v40, %v14698_v42  ;;  %v10582_v55 = vld [vmem:[%s11346_s6 + $0x2e4] sm:$0xf]  ;;  %v12888_v40 = vor.u32 %v10585_v59, %v9116_v14  ;;  %v10831_v14 = vld [vmem:[#allocation6 + $0x774] sm:$0xf0]  ;;  %v9972_v59 = vld [vmem:[#allocation6 + $0x670] sm:$0xf] }
 0x532   : > { %4461 = vmatmul.bf16.gmra.mxu3 %v12550_v25 }
 0x533   : > { %14699 = vst [vmem:[#allocation79_spill] sm:$0xff] %v12875_v9  ;;  %v12890_v9 = vor.u32 %v10582_v55, %v9118_v63  ;;  %v10799_v55 = vld [vmem:[#allocation6 + $0x674] sm:$0xf0]  ;;  %v10164_v63 = vld [vmem:[#allocation6 + $0x7f0] sm:$0xf] }
 0x534   : > { %v4333_v13 = vpop.f32.mrf.mxu2  ;;  %v4157_v53 = vpop.f32.mrf.mxu0 }
 0x535   : > { %v4422_v54 = vpop.f32.mrf.mxu3  ;;  %v4158_v0 = vadd.f32 %v4157_v53, %v12580_v11  ;;  %v4246_v61 = vpop.f32.mrf.mxu1 }
 0x536   : > { %v12878_v21 = vadd.f32 %v4422_v54, %v4333_v13 }
 0x537   : > { %v4247_v56 = vadd.f32 %v4246_v61, %v4158_v0  ;;  %v14702_v0 = vld [vmem:[#allocation81_spill] sm:$0xff] }
 0x539   : > { %v12884_v46 = vadd.f32 %v4247_v56, %v14700_v38  ;;  %v10100_v56 = vld [vmem:[#allocation6 + $0x770] sm:$0xf] }
 0x53a   : > { %v10101_v38 = vor.u32 %v10831_v14, %v10100_v56  ;;  %v10815_v56 = vld [vmem:[#allocation6 + $0x6f4] sm:$0xf0] }
 0x53b   : > { %14701 = vst [vmem:[#allocation80_spill] sm:$0xff] %v12884_v46  ;;  %v9140_v46 = vld [vmem:[%s11346_s6 + $0x310] sm:$0xf] }
 0x53c   : > { %v4335_v6 = vpop.f32.mrf.mxu2  ;;  %v4160_v42 = vpop.f32.mrf.mxu0  ;;  %6356 = vmatpush.bf16.msra.mxu2 %v10101_v38 }
 0x53d   : > { %v4424_v25 = vpop.f32.mrf.mxu3  ;;  %v4161_v11 = vadd.f32 %v4160_v42, %v12586_v62  ;;  %v4249_v54 = vpop.f32.mrf.mxu1  ;;  %v10847_v62 = vld [vmem:[#allocation6 + $0x7f4] sm:$0xf0] }
 0x53e   : > { %v12892_v13 = vadd.f32 %v4424_v25, %v4335_v6  ;;  %v9973_v25 = vor.u32 %v10799_v55, %v9972_v59  ;;  %v10165_v42 = vor.u32 %v10847_v62, %v10164_v63  ;;  %v14704_v59 = vld [vmem:[#allocation82_spill] sm:$0xff]  ;;  %v10588_v63 = vld [vmem:[%s11346_s6 + $0x314] sm:$0xf]  ;;  %v9142_v62 = vld [vmem:[%s11346_s6 + $0x328] sm:$0xf0] }
 0x53f   : > { %v4250_v53 = vadd.f32 %v4249_v54, %v4161_v11  ;;  %4199 = vmatmul.bf16.gmra.mxu0 %v12888_v40 }
 0x540   : > { %4288 = vmatmul.bf16.gmra.mxu1 %v12890_v9  ;;  %6178 = vmatpush.bf16.msra.mxu0 %v9973_v25 }
 0x541   : > { %4377 = vmatmul.bf16.gmra.mxu2 %v12572_v33  ;;  %v12899_v61 = vadd.f32 %v4250_v53, %v14702_v0  ;;  %6445 = vmatpush.bf16.msra.mxu3 %v10165_v42  ;;  %v10036_v0 = vld [vmem:[#allocation6 + $0x6f0] sm:$0xf] }
 0x542   : > { %4466 = vmatmul.bf16.gmra.mxu3 %v12574_v17  ;;  %v10037_v14 = vor.u32 %v10815_v56, %v10036_v0  ;;  %v14709_v0 = vld [vmem:[#allocation85_spill] sm:$0xff] }
 0x543   : > { %14703 = vst [vmem:[#allocation81_spill] sm:$0xff] %v12899_v61 }
 0x544   : > { %v4338_v6 = vpop.f32.mrf.mxu2  ;;  %v4162_v33 = vpop.f32.mrf.mxu0  ;;  %6267 = vmatpush.bf16.msra.mxu1 %v10037_v14 }
 0x545   : > { %v4427_v11 = vpop.f32.mrf.mxu3  ;;  %v4163_v17 = vadd.f32 %v4162_v33, %v12604_v8  ;;  %v4251_v53 = vpop.f32.mrf.mxu1  ;;  %v12914_v33 = vor.u32 %v10588_v63, %v9142_v62  ;;  %v14712_v62 = vld [vmem:[#allocation119_spill] sm:$0xff] }
 0x546   : > { %v12902_v54 = vadd.f32 %v4427_v11, %v4338_v6  ;;  %v12912_v6 = vor.u32 %v10591_v24, %v9140_v46  ;;  %v14711_v24 = vld [vmem:[#allocation114_spill] sm:$0xff] }
 0x547   : > { %v4252_v61 = vadd.f32 %v4251_v53, %v4163_v17  ;;  %14707 = vst [vmem:[#allocation134_spill] sm:$0xff] %v12914_v33 }
 0x548   : > { %14706 = vst [vmem:[#allocation133_spill] sm:$0xff] %v12912_v6 }
 0x549   : > { %v12908_v55 = vadd.f32 %v4252_v61, %v14704_v59  ;;  %v14708_v61 = vld [vmem:[#allocation113_spill] sm:$0xff] }
 0x54b   : > { %14705 = vst [vmem:[#allocation82_spill] sm:$0xff] %v12908_v55 }
 0x54c   : > { %v4340_v38 = vpop.f32.mrf.mxu2  ;;  %v4165_v8 = vpop.f32.mrf.mxu0 }
 0x54d   : > { %v4429_v11 = vpop.f32.mrf.mxu3  ;;  %v4166_v42 = vadd.f32 %v4165_v8, %v12610_v57  ;;  %v4254_v17 = vpop.f32.mrf.mxu1  ;;  %v14713_v8 = vld [vmem:[#allocation49_spill] sm:$0xff] }
 0x54e   : > { %v12916_v25 = vadd.f32 %v4429_v11, %v4340_v38 }
 0x54f   : > { %v4255_v53 = vadd.f32 %v4254_v17, %v4166_v42  ;;  %4204 = vmatmul.bf16.gmra.mxu0 %v12912_v6 }
 0x550   : > { %4293 = vmatmul.bf16.gmra.mxu1 %v12914_v33 }
 0x551   : > { %4382 = vmatmul.bf16.gmra.mxu2 %v14708_v61  ;;  %v12923_v56 = vadd.f32 %v4255_v53, %v14709_v0 }
 0x552   : > { %4471 = vmatmul.bf16.gmra.mxu3 %v14711_v24 }
 0x553   : > { %14710 = vst [vmem:[#allocation113_spill] sm:$0xff] %v12923_v56  ;;  %v14716_v56 = vld [vmem:[#allocation35_spill] sm:$0xff] }
 0x554   : > { %v4343_v46 = vpop.f32.mrf.mxu2  ;;  %v4167_v59 = vpop.f32.mrf.mxu0 }
 0x555   : > { %v4432_v14 = vpop.f32.mrf.mxu3  ;;  %v4168_v57 = vadd.f32 %v4167_v59, %v14712_v62  ;;  %v4256_v38 = vpop.f32.mrf.mxu1  ;;  %v14719_v59 = vld [vmem:[#allocation55_spill] sm:$0xff] }
 0x556   : > { %v12926_v63 = vadd.f32 %v4432_v14, %v4343_v46  ;;  %v14717_v46 = vld [vmem:[#allocation36_spill] sm:$0xff]  ;;  %v14718_v14 = vld [vmem:[#allocation117_spill] sm:$0xff] }
 0x557   : > { %v4257_v11 = vadd.f32 %v4256_v38, %v4168_v57  ;;  %v14721_v57 = vld [vmem:[#allocation118_spill] sm:$0xff] }
 0x558   : > { %v10092_v38 = vld [vmem:[#allocation6 + $0x760] sm:$0xf] }
 0x559   : > { %v12930_v42 = vadd.f32 %v4257_v11, %v14713_v8  ;;  %v10829_v11 = vld [vmem:[#allocation6 + $0x764] sm:$0xf0]  ;;  %v9964_v8 = vld [vmem:[#allocation6 + $0x660] sm:$0xf] }
 0x55b   : > { %14714 = vst [vmem:[#allocation85_spill] sm:$0xff] %v12930_v42  ;;  %v10156_v42 = vld [vmem:[#allocation6 + $0x7e0] sm:$0xf] }
 0x55c   : > { %v4345_v17 = vpop.f32.mrf.mxu2  ;;  %v4170_v61 = vpop.f32.mrf.mxu0 }
 0x55d   : > { %v4434_v55 = vpop.f32.mrf.mxu3  ;;  %v4171_v53 = vadd.f32 %v4170_v61, %v12626_v30  ;;  %v4259_v0 = vpop.f32.mrf.mxu1  ;;  %v10845_v30 = vld [vmem:[#allocation6 + $0x7e4] sm:$0xf0] }
 0x55e   : > { %v12932_v33 = vadd.f32 %v4434_v55, %v4345_v17  ;;  %v10093_v55 = vor.u32 %v10829_v11, %v10092_v38  ;;  %v10797_v17 = vld [vmem:[#allocation6 + $0x664] sm:$0xf0] }
 0x55f   : > { %v4260_v24 = vadd.f32 %v4259_v0, %v4171_v53  ;;  %4485 = vmatmul.bf16.vlgmr.msrb.gmra.mxu0 %v14716_v56  ;;  %v9965_v53 = vor.u32 %v10797_v17, %v9964_v8  ;;  %v10157_v0 = vor.u32 %v10845_v30, %v10156_v42  ;;  %v14722_v11 = vld [vmem:[#allocation19_spill] sm:$0xff] }
 0x560   : > { %14715 = vst [vmem:[#allocation114_spill] sm:$0xff] %v12932_v33  ;;  %4574 = vmatmul.bf16.vlgmr.msrb.gmra.mxu1 %v14717_v46  ;;  %6357 = vmatpush.bf16.msra.mxu2 %v10093_v55 }
 0x561   : > { %4663 = vmatmul.bf16.vlgmr.msrb.gmra.mxu2 %v14718_v14  ;;  %v12939_v62 = vadd.f32 %v4260_v24, %v14719_v59  ;;  %6179 = vmatpush.bf16.msra.mxu0 %v9965_v53  ;;  %v10028_v59 = vld [vmem:[#allocation6 + $0x6e0] sm:$0xf] }
 0x562   : > { %4752 = vmatmul.bf16.vlgmr.msrb.gmra.mxu3 %v14721_v57  ;;  %v10813_v57 = vld [vmem:[#allocation6 + $0x6e4] sm:$0xf0] }
 0x563   : > { %14720 = vst [vmem:[#allocation119_spill] sm:$0xff] %v12939_v62  ;;  %6446 = vmatpush.bf16.msra.mxu3 %v10157_v0  ;;  %v10029_v62 = vor.u32 %v10813_v57, %v10028_v59  ;;  %v14725_v53 = vld [vmem:[#allocation39_spill] sm:$0xff]  ;;  %v14726_v0 = vld [vmem:[#allocation20_spill] sm:$0xff] }
 0x564   : > { %v4348_v61 = vpop.f32.mrf.mxu2  ;;  %v4172_v33 = vpop.f32.mrf.mxu0 }
 0x565   : > { %v4437_v56 = vpop.f32.mrf.mxu3  ;;  %v4173_v24 = vadd.f32 %v4172_v33, %v12636_v37  ;;  %v4261_v14 = vpop.f32.mrf.mxu1  ;;  %6268 = vmatpush.bf16.msra.mxu1 %v10029_v62  ;;  %v14724_v33 = vld [vmem:[#allocation38_spill] sm:$0xff] }
 0x566   : > { %v12942_v46 = vadd.f32 %v4437_v56, %v4348_v61  ;;  %v14728_v56 = vld [vmem:[#allocation120_spill] sm:$0xff] }
 0x567   : > { %v4262_v38 = vadd.f32 %v4261_v14, %v4173_v24 }
 0x569   : > { %v12946_v6 = vadd.f32 %v4262_v38, %v14722_v11  ;;  %v14729_v38 = vld [vmem:[#allocation123_spill] sm:$0xff] }
 0x56b   : > { %14723 = vst [vmem:[#allocation49_spill] sm:$0xff] %v12946_v6 }
 0x56c   : > { %v4350_v8 = vpop.f32.mrf.mxu2  ;;  %v4175_v17 = vpop.f32.mrf.mxu0 }
 0x56d   : > { %v4439_v42 = vpop.f32.mrf.mxu3  ;;  %v4176_v55 = vadd.f32 %v4175_v17, %v12642_v1  ;;  %v4264_v61 = vpop.f32.mrf.mxu1 }
 0x56e   : > { %v12948_v30 = vadd.f32 %v4439_v42, %v4350_v8  ;;  %v14730_v42 = vld [vmem:[#allocation53_spill] sm:$0xff] }
 0x56f   : > { %v4265_v37 = vadd.f32 %v4264_v61, %v4176_v55  ;;  %4490 = vmatmul.bf16.gmra.mxu0 %v14724_v33 }
 0x570   : > { %4579 = vmatmul.bf16.gmra.mxu1 %v14725_v53 }
 0x571   : > { %4668 = vmatmul.bf16.gmra.mxu2 %v12632_v2  ;;  %v12955_v62 = vadd.f32 %v4265_v37, %v14726_v0 }
 0x572   : > { %4757 = vmatmul.bf16.gmra.mxu3 %v14728_v56  ;;  %v14732_v56 = vld [vmem:[#allocation42_spill] sm:$0xff] }
 0x573   : > { %14727 = vst [vmem:[#allocation35_spill] sm:$0xff] %v12955_v62 }
 0x574   : > { %v4353_v24 = vpop.f32.mrf.mxu2  ;;  %v4177_v59 = vpop.f32.mrf.mxu0 }
 0x575   : > { %v4442_v14 = vpop.f32.mrf.mxu3  ;;  %v4178_v1 = vadd.f32 %v4177_v59, %v14729_v38  ;;  %v4266_v11 = vpop.f32.mrf.mxu1  ;;  %v14735_v59 = vld [vmem:[#allocation54_spill] sm:$0xff] }
 0x576   : > { %v12958_v57 = vadd.f32 %v4442_v14, %v4353_v24  ;;  %v14733_v24 = vld [vmem:[#allocation43_spill] sm:$0xff]  ;;  %v14734_v14 = vld [vmem:[#allocation121_spill] sm:$0xff] }
 0x577   : > { %v4267_v8 = vadd.f32 %v4266_v11, %v4178_v1  ;;  %v14737_v1 = vld [vmem:[#allocation122_spill] sm:$0xff]  ;;  %v10084_v11 = vld [vmem:[#allocation6 + $0x750] sm:$0xf] }
 0x579   : > { %v12962_v17 = vadd.f32 %v4267_v8, %v14730_v42  ;;  %v10827_v8 = vld [vmem:[#allocation6 + $0x754] sm:$0xf0]  ;;  %v9956_v42 = vld [vmem:[#allocation6 + $0x650] sm:$0xf] }
 0x57b   : > { %14731 = vst [vmem:[#allocation36_spill] sm:$0xff] %v12962_v17  ;;  %v10148_v17 = vld [vmem:[#allocation6 + $0x7d0] sm:$0xf] }
 0x57c   : > { %v4355_v55 = vpop.f32.mrf.mxu2  ;;  %v4180_v2 = vpop.f32.mrf.mxu0 }
 0x57d   : > { %v4444_v61 = vpop.f32.mrf.mxu3  ;;  %v4181_v37 = vadd.f32 %v4180_v2, %v12658_v45  ;;  %v4269_v53 = vpop.f32.mrf.mxu1  ;;  %v10843_v45 = vld [vmem:[#allocation6 + $0x7d4] sm:$0xf0] }
 0x57e   : > { %v12964_v33 = vadd.f32 %v4444_v61, %v4355_v55  ;;  %v10085_v55 = vor.u32 %v10827_v8, %v10084_v11  ;;  %v10795_v61 = vld [vmem:[#allocation6 + $0x654] sm:$0xf0] }
 0x57f   : > { %v4270_v0 = vadd.f32 %v4269_v53, %v4181_v37  ;;  %4495 = vmatmul.bf16.gmra.mxu0 %v14732_v56  ;;  %v9957_v37 = vor.u32 %v10795_v61, %v9956_v42  ;;  %v10149_v53 = vor.u32 %v10843_v45, %v10148_v17  ;;  %v14738_v8 = vld [vmem:[#allocation21_spill] sm:$0xff] }
 0x580   : > { %4584 = vmatmul.bf16.gmra.mxu1 %v14733_v24  ;;  %6358 = vmatpush.bf16.msra.mxu2 %v10085_v55 }
 0x581   : > { %4673 = vmatmul.bf16.gmra.mxu2 %v14734_v14  ;;  %v12971_v38 = vadd.f32 %v4270_v0, %v14735_v59  ;;  %6180 = vmatpush.bf16.msra.mxu0 %v9957_v37  ;;  %v10020_v59 = vld [vmem:[#allocation6 + $0x6d0] sm:$0xf]  ;;  %v14741_v37 = vld [vmem:[#allocation47_spill] sm:$0xff] }
 0x582   : > { %4762 = vmatmul.bf16.gmra.mxu3 %v14737_v1  ;;  %v10811_v1 = vld [vmem:[#allocation6 + $0x6d4] sm:$0xf0] }
 0x583   : > { %14736 = vst [vmem:[#allocation117_spill] sm:$0xff] %v12971_v38  ;;  %6447 = vmatpush.bf16.msra.mxu3 %v10149_v53  ;;  %v10021_v38 = vor.u32 %v10811_v1, %v10020_v59  ;;  %v14742_v53 = vld [vmem:[#allocation22_spill] sm:$0xff] }
 0x584   : > { %v4358_v2 = vpop.f32.mrf.mxu2  ;;  %v4182_v62 = vpop.f32.mrf.mxu0 }
 0x585   : > { %v4447_v56 = vpop.f32.mrf.mxu3  ;;  %v4183_v0 = vadd.f32 %v4182_v62, %v12668_v18  ;;  %v4271_v14 = vpop.f32.mrf.mxu1  ;;  %6269 = vmatpush.bf16.msra.mxu1 %v10021_v38  ;;  %v14740_v62 = vld [vmem:[#allocation46_spill] sm:$0xff] }
 0x586   : > { %v12974_v24 = vadd.f32 %v4447_v56, %v4358_v2  ;;  %v14744_v56 = vld [vmem:[#allocation124_spill] sm:$0xff] }
 0x587   : > { %v4272_v11 = vadd.f32 %v4271_v14, %v4183_v0 }
 0x589   : > { %v12978_v6 = vadd.f32 %v4272_v11, %v14738_v8  ;;  %v14745_v11 = vld [vmem:[#allocation127_spill] sm:$0xff] }
 0x58b   : > { %14739 = vst [vmem:[#allocation55_spill] sm:$0xff] %v12978_v6 }
 0x58c   : > { %v4360_v42 = vpop.f32.mrf.mxu2  ;;  %v4185_v61 = vpop.f32.mrf.mxu0 }
 0x58d   : > { %v4449_v17 = vpop.f32.mrf.mxu3  ;;  %v4186_v55 = vadd.f32 %v4185_v61, %v12674_v7  ;;  %v4274_v2 = vpop.f32.mrf.mxu1 }
 0x58e   : > { %v12980_v45 = vadd.f32 %v4449_v17, %v4360_v42  ;;  %v14746_v17 = vld [vmem:[#allocation56_spill] sm:$0xff] }
 0x58f   : > { %v4275_v18 = vadd.f32 %v4274_v2, %v4186_v55  ;;  %4500 = vmatmul.bf16.gmra.mxu0 %v14740_v62 }
 0x590   : > { %4589 = vmatmul.bf16.gmra.mxu1 %v14741_v37 }
 0x591   : > { %4678 = vmatmul.bf16.gmra.mxu2 %v12664_v3  ;;  %v12987_v38 = vadd.f32 %v4275_v18, %v14742_v53 }
 0x592   : > { %4767 = vmatmul.bf16.gmra.mxu3 %v14744_v56  ;;  %v14748_v56 = vld [vmem:[#allocation52_spill] sm:$0xff] }
 0x593   : > { %14743 = vst [vmem:[#allocation118_spill] sm:$0xff] %v12987_v38 }
 0x594   : > { %v4363_v0 = vpop.f32.mrf.mxu2  ;;  %v4187_v59 = vpop.f32.mrf.mxu0 }
 0x595   : > { %v4452_v14 = vpop.f32.mrf.mxu3  ;;  %v4188_v7 = vadd.f32 %v4187_v59, %v14745_v11  ;;  %v4276_v8 = vpop.f32.mrf.mxu1  ;;  %v14751_v59 = vld [vmem:[#allocation59_spill] sm:$0xff] }
 0x596   : > { %v12990_v1 = vadd.f32 %v4452_v14, %v4363_v0  ;;  %v14749_v0 = vld [vmem:[#allocation83_spill] sm:$0xff]  ;;  %v14750_v14 = vld [vmem:[#allocation125_spill] sm:$0xff] }
 0x597   : > { %v4277_v42 = vadd.f32 %v4276_v8, %v4188_v7  ;;  %v14753_v7 = vld [vmem:[#allocation126_spill] sm:$0xff] }
 0x598   : > { %v10076_v8 = vld [vmem:[#allocation6 + $0x740] sm:$0xf] }
 0x599   : > { %v12994_v61 = vadd.f32 %v4277_v42, %v14746_v17  ;;  %v10825_v42 = vld [vmem:[#allocation6 + $0x744] sm:$0xf0]  ;;  %v9948_v17 = vld [vmem:[#allocation6 + $0x640] sm:$0xf] }
 0x59b   : > { %14747 = vst [vmem:[#allocation19_spill] sm:$0xff] %v12994_v61  ;;  %v10140_v61 = vld [vmem:[#allocation6 + $0x7c0] sm:$0xf] }
 0x59c   : > { %v4365_v55 = vpop.f32.mrf.mxu2  ;;  %v4190_v3 = vpop.f32.mrf.mxu0 }
 0x59d   : > { %v4454_v2 = vpop.f32.mrf.mxu3  ;;  %v4191_v18 = vadd.f32 %v4190_v3, %v12690_v60  ;;  %v4279_v37 = vpop.f32.mrf.mxu1  ;;  %v10841_v60 = vld [vmem:[#allocation6 + $0x7c4] sm:$0xf0] }
 0x59e   : > { %v12996_v62 = vadd.f32 %v4454_v2, %v4365_v55  ;;  %v10077_v55 = vor.u32 %v10825_v42, %v10076_v8  ;;  %v10793_v2 = vld [vmem:[#allocation6 + $0x644] sm:$0xf0] }
 0x59f   : > { %v4280_v53 = vadd.f32 %v4279_v37, %v4191_v18  ;;  %4505 = vmatmul.bf16.gmra.mxu0 %v14748_v56  ;;  %v9949_v18 = vor.u32 %v10793_v2, %v9948_v17  ;;  %v10141_v37 = vor.u32 %v10841_v60, %v10140_v61  ;;  %v14754_v42 = vld [vmem:[#allocation23_spill] sm:$0xff] }
 0x5a0   : > { %4594 = vmatmul.bf16.gmra.mxu1 %v14749_v0  ;;  %6359 = vmatpush.bf16.msra.mxu2 %v10077_v55 }
 0x5a1   : > { %4683 = vmatmul.bf16.gmra.mxu2 %v14750_v14  ;;  %v13003_v11 = vadd.f32 %v4280_v53, %v14751_v59  ;;  %6181 = vmatpush.bf16.msra.mxu0 %v9949_v18  ;;  %v10012_v59 = vld [vmem:[#allocation6 + $0x6c0] sm:$0xf] }
 0x5a2   : > { %4772 = vmatmul.bf16.gmra.mxu3 %v14753_v7  ;;  %v10809_v7 = vld [vmem:[#allocation6 + $0x6c4] sm:$0xf0] }
 0x5a3   : > { %14752 = vst [vmem:[#allocation38_spill] sm:$0xff] %v13003_v11  ;;  %6448 = vmatpush.bf16.msra.mxu3 %v10141_v37  ;;  %v10013_v11 = vor.u32 %v10809_v7, %v10012_v59  ;;  %v14757_v18 = vld [vmem:[#allocation87_spill] sm:$0xff]  ;;  %v14758_v37 = vld [vmem:[#allocation24_spill] sm:$0xff]  ;;  %v14760_v7 = vld [vmem:[#allocation130_spill] sm:$0xff] }
 0x5a4   : > { %v4368_v3 = vpop.f32.mrf.mxu2  ;;  %v4192_v38 = vpop.f32.mrf.mxu0 }
 0x5a5   : > { %v4457_v56 = vpop.f32.mrf.mxu3  ;;  %v4193_v53 = vadd.f32 %v4192_v38, %v12700_v10  ;;  %v4281_v14 = vpop.f32.mrf.mxu1  ;;  %6270 = vmatpush.bf16.msra.mxu1 %v10013_v11  ;;  %v14756_v38 = vld [vmem:[#allocation86_spill] sm:$0xff] }
 0x5a6   : > { %v13006_v0 = vadd.f32 %v4457_v56, %v4368_v3 }
 0x5a7   : > { %v4282_v8 = vadd.f32 %v4281_v14, %v4193_v53 }
 0x5a9   : > { %v13010_v6 = vadd.f32 %v4282_v8, %v14754_v42 }
 0x5ab   : > { %14755 = vst [vmem:[#allocation39_spill] sm:$0xff] %v13010_v6 }
 0x5ac   : > { %v4370_v17 = vpop.f32.mrf.mxu2  ;;  %v4195_v2 = vpop.f32.mrf.mxu0 }
 0x5ad   : > { %v4459_v61 = vpop.f32.mrf.mxu3  ;;  %v4196_v55 = vadd.f32 %v4195_v2, %v12706_v52  ;;  %v4284_v3 = vpop.f32.mrf.mxu1 }
 0x5ae   : > { %v13012_v60 = vadd.f32 %v4459_v61, %v4370_v17  ;;  %v14761_v17 = vld [vmem:[#allocation57_spill] sm:$0xff] }
 0x5af   : > { %v4285_v10 = vadd.f32 %v4284_v3, %v4196_v55  ;;  %4510 = vmatmul.bf16.gmra.mxu0 %v14756_v38 }
 0x5b0   : > { %4599 = vmatmul.bf16.gmra.mxu1 %v14757_v18  ;;  %v14763_v18 = vld [vmem:[#allocation90_spill] sm:$0xff] }
 0x5b1   : > { %4688 = vmatmul.bf16.gmra.mxu2 %v12696_v39  ;;  %v13019_v11 = vadd.f32 %v4285_v10, %v14758_v37  ;;  %v14764_v37 = vld [vmem:[#allocation91_spill] sm:$0xff] }
 0x5b2   : > { %4777 = vmatmul.bf16.gmra.mxu3 %v12698_v20 }
 0x5b3   : > { %14759 = vst [vmem:[#allocation20_spill] sm:$0xff] %v13019_v11 }
 0x5b4   : > { %v4373_v56 = vpop.f32.mrf.mxu2  ;;  %v4197_v14 = vpop.f32.mrf.mxu0 }
 0x5b5   : > { %v4462_v53 = vpop.f32.mrf.mxu3  ;;  %v4198_v52 = vadd.f32 %v4197_v14, %v14760_v7  ;;  %v4286_v8 = vpop.f32.mrf.mxu1  ;;  %v14768_v7 = vld [vmem:[#allocation129_spill] sm:$0xff] }
 0x5b6   : > { %v13022_v59 = vadd.f32 %v4462_v53, %v4373_v56  ;;  %v14765_v56 = vld [vmem:[#allocation128_spill] sm:$0xff]  ;;  %v14766_v53 = vld [vmem:[#allocation58_spill] sm:$0xff] }
 0x5b7   : > { %v4287_v42 = vadd.f32 %v4286_v8, %v4198_v52  ;;  %v10068_v52 = vld [vmem:[#allocation6 + $0x730] sm:$0xf]  ;;  %v10823_v8 = vld [vmem:[#allocation6 + $0x734] sm:$0xf0] }
 0x5b9   : > { %v13026_v61 = vadd.f32 %v4287_v42, %v14761_v17  ;;  %v9940_v42 = vld [vmem:[#allocation6 + $0x630] sm:$0xf]  ;;  %v10069_v17 = vor.u32 %v10823_v8, %v10068_v52 }
 0x5ba   : > { %v14769_v52 = vld [vmem:[#allocation25_spill] sm:$0xff] }
 0x5bb   : > { %14762 = vst [vmem:[#allocation120_spill] sm:$0xff] %v13026_v61  ;;  %6360 = vmatpush.bf16.msra.mxu2 %v10069_v17 }
 0x5bc   : > { %v4375_v2 = vpop.f32.mrf.mxu2  ;;  %v4200_v39 = vpop.f32.mrf.mxu0 }
 0x5bd   : > { %v4464_v55 = vpop.f32.mrf.mxu3  ;;  %v4201_v10 = vadd.f32 %v4200_v39, %v12722_v44  ;;  %v4289_v20 = vpop.f32.mrf.mxu1  ;;  %v10839_v44 = vld [vmem:[#allocation6 + $0x7b4] sm:$0xf0] }
 0x5be   : > { %v13028_v3 = vadd.f32 %v4464_v55, %v4375_v2  ;;  %v10791_v2 = vld [vmem:[#allocation6 + $0x634] sm:$0xf0]  ;;  %v10132_v55 = vld [vmem:[#allocation6 + $0x7b0] sm:$0xf] }
 0x5bf   : > { %v4290_v38 = vadd.f32 %v4289_v20, %v4201_v10  ;;  %4515 = vmatmul.bf16.gmra.mxu0 %v14763_v18  ;;  %v9941_v10 = vor.u32 %v10791_v2, %v9940_v42  ;;  %v10133_v20 = vor.u32 %v10839_v44, %v10132_v55 }
 0x5c0   : > { %4604 = vmatmul.bf16.gmra.mxu1 %v14764_v37 }
 0x5c1   : > { %4693 = vmatmul.bf16.gmra.mxu2 %v14765_v56  ;;  %v13035_v14 = vadd.f32 %v4290_v38, %v14766_v53  ;;  %6182 = vmatpush.bf16.msra.mxu0 %v9941_v10  ;;  %v14773_v10 = vld [vmem:[#allocation26_spill] sm:$0xff] }
 0x5c2   : > { %4782 = vmatmul.bf16.gmra.mxu3 %v14768_v7  ;;  %v10004_v7 = vld [vmem:[#allocation6 + $0x6b0] sm:$0xf] }
 0x5c3   : > { %14767 = vst [vmem:[#allocation123_spill] sm:$0xff] %v13035_v14  ;;  %6449 = vmatpush.bf16.msra.mxu3 %v10133_v20  ;;  %v10807_v14 = vld [vmem:[#allocation6 + $0x6b4] sm:$0xf0] }
 0x5c4   : > { %v4378_v39 = vpop.f32.mrf.mxu2  ;;  %v4202_v61 = vpop.f32.mrf.mxu0  ;;  %v10005_v11 = vor.u32 %v10807_v14, %v10004_v7  ;;  %v14775_v14 = vld [vmem:[#allocation131_spill] sm:$0xff]  ;;  %v14776_v7 = vld [vmem:[#allocation60_spill] sm:$0xff] }
 0x5c5   : > { %v4467_v18 = vpop.f32.mrf.mxu3  ;;  %v4203_v38 = vadd.f32 %v4202_v61, %v12732_v29  ;;  %v4291_v56 = vpop.f32.mrf.mxu1  ;;  %v14771_v61 = vld [vmem:[#allocation94_spill] sm:$0xff] }
 0x5c6   : > { %v13038_v37 = vadd.f32 %v4467_v18, %v4378_v39  ;;  %6271 = vmatpush.bf16.msra.mxu1 %v10005_v11  ;;  %v14772_v39 = vld [vmem:[#allocation95_spill] sm:$0xff] }
 0x5c7   : > { %v4292_v53 = vadd.f32 %v4291_v56, %v4203_v38 }
 0x5c9   : > { %v13042_v8 = vadd.f32 %v4292_v53, %v14769_v52 }
 0x5cb   : > { %14770 = vst [vmem:[#allocation53_spill] sm:$0xff] %v13042_v8 }
 0x5cc   : > { %v4380_v6 = vpop.f32.mrf.mxu2  ;;  %v4205_v2 = vpop.f32.mrf.mxu0 }
 0x5cd   : > { %v4469_v42 = vpop.f32.mrf.mxu3  ;;  %v4206_v17 = vadd.f32 %v4205_v2, %v12738_v35  ;;  %v4294_v44 = vpop.f32.mrf.mxu1 }
 0x5ce   : > { %v13044_v55 = vadd.f32 %v4469_v42, %v4380_v6 }
 0x5cf   : > { %v4295_v29 = vadd.f32 %v4294_v44, %v4206_v17  ;;  %4520 = vmatmul.bf16.gmra.mxu0 %v14771_v61 }
 0x5d0   : > { %4609 = vmatmul.bf16.gmra.mxu1 %v14772_v39  ;;  %v14778_v39 = vld [vmem:[#allocation98_spill] sm:$0xff] }
 0x5d1   : > { %4698 = vmatmul.bf16.gmra.mxu2 %v12728_v5  ;;  %v13051_v20 = vadd.f32 %v4295_v29, %v14773_v10  ;;  %v14779_v10 = vld [vmem:[#allocation99_spill] sm:$0xff] }
 0x5d2   : > { %4787 = vmatmul.bf16.gmra.mxu3 %v14775_v14  ;;  %v10060_v14 = vld [vmem:[#allocation6 + $0x720] sm:$0xf] }
 0x5d3   : > { %14774 = vst [vmem:[#allocation42_spill] sm:$0xff] %v13051_v20 }
 0x5d4   : > { %v4383_v11 = vpop.f32.mrf.mxu2  ;;  %v4207_v38 = vpop.f32.mrf.mxu0 }
 0x5d5   : > { %v4472_v18 = vpop.f32.mrf.mxu3  ;;  %v4208_v35 = vadd.f32 %v4207_v38, %v12749_v34  ;;  %v4296_v56 = vpop.f32.mrf.mxu1  ;;  %v14780_v34 = vld [vmem:[#allocation132_spill] sm:$0xff] }
 0x5d6   : > { %v13054_v6 = vadd.f32 %v4472_v18, %v4383_v11  ;;  %v10821_v11 = vld [vmem:[#allocation6 + $0x724] sm:$0xf0]  ;;  %v9932_v18 = vld [vmem:[#allocation6 + $0x620] sm:$0xf] }
 0x5d7   : > { %v4297_v53 = vadd.f32 %v4296_v56, %v4208_v35  ;;  %v10061_v38 = vor.u32 %v10821_v11, %v10060_v14  ;;  %v10789_v35 = vld [vmem:[#allocation6 + $0x624] sm:$0xf0]  ;;  %v10124_v56 = vld [vmem:[#allocation6 + $0x7a0] sm:$0xf] }
 0x5d8   : > { %v9996_v14 = vld [vmem:[#allocation6 + $0x6a0] sm:$0xf]  ;;  %v10805_v11 = vld [vmem:[#allocation6 + $0x6a4] sm:$0xf0] }
 0x5d9   : > { %v13058_v52 = vadd.f32 %v4297_v53, %v14776_v7  ;;  %v10837_v53 = vld [vmem:[#allocation6 + $0x7a4] sm:$0xf0]  ;;  %6361 = vmatpush.bf16.msra.mxu2 %v10061_v38  ;;  %v9997_v20 = vor.u32 %v10805_v11, %v9996_v14 }
 0x5db   : > { %14777 = vst [vmem:[#allocation43_spill] sm:$0xff] %v13058_v52  ;;  %6272 = vmatpush.bf16.msra.mxu1 %v9997_v20 }
 0x5dc   : > { %v4385_v42 = vpop.f32.mrf.mxu2  ;;  %v4486_v5 = vpop.f32.mrf.mxu0 }
 0x5dd   : > { %v4474_v2 = vpop.f32.mrf.mxu3  ;;  %v4487_v44 = vadd.f32 %v4486_v5, %v12758_v51  ;;  %v4575_v29 = vpop.f32.mrf.mxu1  ;;  %v10125_v51 = vor.u32 %v10837_v53, %v10124_v56 }
 0x5de   : > { %v13060_v17 = vadd.f32 %v4474_v2, %v4385_v42  ;;  %v9933_v42 = vor.u32 %v10789_v35, %v9932_v18 }
 0x5df   : > { %v4576_v61 = vadd.f32 %v4575_v29, %v4487_v44  ;;  %4525 = vmatmul.bf16.gmra.mxu0 %v14778_v39  ;;  %6450 = vmatpush.bf16.msra.mxu3 %v10125_v51 }
 0x5e0   : > { %4614 = vmatmul.bf16.gmra.mxu1 %v14779_v10  ;;  %6183 = vmatpush.bf16.msra.mxu0 %v9933_v42  ;;  %v14784_v42 = vld [vmem:[#allocation27_spill] sm:$0xff] }
 0x5e1   : > { %4703 = vmatmul.bf16.gmra.mxu2 %v12744_v58 }
 0x5e2   : > { %4792 = vmatmul.bf16.gmra.mxu3 %v14780_v34  ;;  %v14781_v34 = vld [vmem:[#allocation63_spill] sm:$0xff] }
 0x5e4   : > { %v4664_v7 = vpop.f32.mrf.mxu2  ;;  %v4488_v44 = vpop.f32.mrf.mxu0 }
 0x5e5   : > { %v4665_v2 = vadd.f32 %v4664_v7, %v4576_v61  ;;  %v4753_v5 = vpop.f32.mrf.mxu3  ;;  %v4489_v29 = vadd.f32 %v4488_v44, %v12772_v47  ;;  %v4577_v39 = vpop.f32.mrf.mxu1  ;;  %v14783_v7 = vld [vmem:[#allocation101_spill] sm:$0xff] }
 0x5e7   : > { %v4754_v58 = vadd.f32 %v4753_v5, %v4665_v2  ;;  %v4578_v10 = vadd.f32 %v4577_v39, %v4489_v29  ;;  %v14786_v2 = vld [vmem:[#allocation102_spill] sm:$0xff] }
 0x5e9   : > { %v13069_v52 = vadd.f32 %v4754_v58, %v14781_v34 }
 0x5eb   : > { %14782 = vst [vmem:[#allocation121_spill] sm:$0xff] %v13069_v52 }
 0x5ec   : > { %v4666_v8 = vpop.f32.mrf.mxu2  ;;  %v4491_v35 = vpop.f32.mrf.mxu0 }
 0x5ed   : > { %v4667_v18 = vadd.f32 %v4666_v8, %v4578_v10  ;;  %v4755_v61 = vpop.f32.mrf.mxu3  ;;  %v4492_v38 = vadd.f32 %v4491_v35, %v12782_v22  ;;  %v4580_v56 = vpop.f32.mrf.mxu1  ;;  %v14787_v10 = vld [vmem:[#allocation28_spill] sm:$0xff] }
 0x5ef   : > { %v4756_v47 = vadd.f32 %v4755_v61, %v4667_v18  ;;  %v4581_v53 = vadd.f32 %v4580_v56, %v4492_v38  ;;  %4530 = vmatmul.bf16.gmra.mxu0 %v14783_v7  ;;  %v14789_v56 = vld [vmem:[#allocation103_spill] sm:$0xff]  ;;  %v10052_v7 = vld [vmem:[#allocation6 + $0x710] sm:$0xf] }
 0x5f0   : > { %4619 = vmatmul.bf16.gmra.mxu1 %v14786_v2  ;;  %v9924_v2 = vld [vmem:[#allocation6 + $0x610] sm:$0xf] }
 0x5f1   : > { %v13074_v51 = vadd.f32 %v4756_v47, %v14784_v42  ;;  %4708 = vmatmul.bf16.gmra.mxu2 %v12768_v4  ;;  %v14790_v47 = vld [vmem:[#allocation61_spill] sm:$0xff] }
 0x5f2   : > { %4797 = vmatmul.bf16.gmra.mxu3 %v12770_v26  ;;  %v10819_v42 = vld [vmem:[#allocation6 + $0x714] sm:$0xf0] }
 0x5f3   : > { %14785 = vst [vmem:[#allocation54_spill] sm:$0xff] %v13074_v51  ;;  %v10758_v51 = vld [vmem:[%s11346_s6 + $0x28c] sm:$0xf0] }
 0x5f4   : > { %v4669_v20 = vpop.f32.mrf.mxu2  ;;  %v4493_v44 = vpop.f32.mrf.mxu0 }
 0x5f5   : > { %v4670_v8 = vadd.f32 %v4669_v20, %v4581_v53  ;;  %v4758_v5 = vpop.f32.mrf.mxu3  ;;  %v4494_v22 = vadd.f32 %v4493_v44, %v12796_v23  ;;  %v4582_v29 = vpop.f32.mrf.mxu1  ;;  %v14792_v23 = vld [vmem:[#allocation104_spill] sm:$0xff]  ;;  %v10053_v20 = vor.u32 %v10819_v42, %v10052_v7 }
 0x5f7   : > { %v4759_v39 = vadd.f32 %v4758_v5, %v4670_v8  ;;  %v4583_v58 = vadd.f32 %v4582_v29, %v4494_v22  ;;  %v10787_v8 = vld [vmem:[#allocation6 + $0x614] sm:$0xf0]  ;;  %6362 = vmatpush.bf16.msra.mxu2 %v10053_v20 }
 0x5f8   : > { %v10835_v5 = vld [vmem:[#allocation6 + $0x794] sm:$0xf0]  ;;  %v9925_v22 = vor.u32 %v10787_v8, %v9924_v2 }
 0x5f9   : > { %v13081_v34 = vadd.f32 %v4759_v39, %v14787_v10  ;;  %v14795_v20 = vld [vmem:[#allocation105_spill] sm:$0xff] }
 0x5fa   : > { %6184 = vmatpush.bf16.msra.mxu0 %v9925_v22  ;;  %v14796_v8 = vld [vmem:[#allocation29_spill] sm:$0xff] }
 0x5fb   : > { %14788 = vst [vmem:[#allocation122_spill] sm:$0xff] %v13081_v34 }
 0x5fc   : > { %v4671_v14 = vpop.f32.mrf.mxu2  ;;  %v4496_v61 = vpop.f32.mrf.mxu0 }
 0x5fd   : > { %v4672_v11 = vadd.f32 %v4671_v14, %v4583_v58  ;;  %v4760_v18 = vpop.f32.mrf.mxu3  ;;  %v4497_v4 = vadd.f32 %v4496_v61, %v12806_v15  ;;  %v4585_v35 = vpop.f32.mrf.mxu1  ;;  %v10116_v15 = vld [vmem:[#allocation6 + $0x790] sm:$0xf] }
 0x5fe   : > { %v10117_v29 = vor.u32 %v10835_v5, %v10116_v15  ;;  %v14798_v5 = vld [vmem:[#allocation106_spill] sm:$0xff] }
 0x5ff   : > { %v4761_v26 = vadd.f32 %v4760_v18, %v4672_v11  ;;  %v4586_v38 = vadd.f32 %v4585_v35, %v4497_v4  ;;  %4535 = vmatmul.bf16.gmra.mxu0 %v14789_v56  ;;  %v14793_v18 = vld [vmem:[#allocation62_spill] sm:$0xff]  ;;  %v9988_v4 = vld [vmem:[#allocation6 + $0x690] sm:$0xf] }
 0x600   : > { %4624 = vmatmul.bf16.gmra.mxu1 %v14792_v23  ;;  %6451 = vmatpush.bf16.msra.mxu3 %v10117_v29  ;;  %v10803_v35 = vld [vmem:[#allocation6 + $0x694] sm:$0xf0] }
 0x601   : > { %v13086_v53 = vadd.f32 %v4761_v26, %v14790_v47  ;;  %4713 = vmatmul.bf16.gmra.mxu2 %v12792_v27  ;;  %v9989_v26 = vor.u32 %v10803_v35, %v9988_v4 }
 0x602   : > { %4802 = vmatmul.bf16.gmra.mxu3 %v12794_v49 }
 0x603   : > { %14791 = vst [vmem:[#allocation21_spill] sm:$0xff] %v13086_v53  ;;  %6273 = vmatpush.bf16.msra.mxu1 %v9989_v26 }
 0x604   : > { %v4674_v44 = vpop.f32.mrf.mxu2  ;;  %v4498_v10 = vpop.f32.mrf.mxu0 }
 0x605   : > { %v4675_v39 = vadd.f32 %v4674_v44, %v4586_v38  ;;  %v4763_v58 = vpop.f32.mrf.mxu3  ;;  %v4499_v14 = vadd.f32 %v4498_v10, %v12820_v16  ;;  %v4587_v11 = vpop.f32.mrf.mxu1 }
 0x607   : > { %v4764_v49 = vadd.f32 %v4763_v58, %v4675_v39  ;;  %v4588_v27 = vadd.f32 %v4587_v11, %v4499_v14  ;;  %v14799_v11 = vld [vmem:[#allocation30_spill] sm:$0xff] }
 0x609   : > { %v13093_v61 = vadd.f32 %v4764_v49, %v14793_v18 }
 0x60b   : > { %14794 = vst [vmem:[#allocation46_spill] sm:$0xff] %v13093_v61 }
 0x60c   : > { %v4676_v56 = vpop.f32.mrf.mxu2  ;;  %v4501_v23 = vpop.f32.mrf.mxu0 }
 0x60d   : > { %v4677_v47 = vadd.f32 %v4676_v56, %v4588_v27  ;;  %v4765_v38 = vpop.f32.mrf.mxu3  ;;  %v4502_v7 = vadd.f32 %v4501_v23, %v12830_v41  ;;  %v4590_v42 = vpop.f32.mrf.mxu1 }
 0x60f   : > { %v4766_v16 = vadd.f32 %v4765_v38, %v4677_v47  ;;  %v4591_v2 = vadd.f32 %v4590_v42, %v4502_v7  ;;  %4540 = vmatmul.bf16.gmra.mxu0 %v14795_v20  ;;  %v14801_v47 = vld [vmem:[#allocation107_spill] sm:$0xff]  ;;  %v14802_v38 = vld [vmem:[#allocation66_spill] sm:$0xff] }
 0x610   : > { %4629 = vmatmul.bf16.gmra.mxu1 %v14798_v5  ;;  %v10044_v7 = vld [vmem:[#allocation6 + $0x700] sm:$0xf]  ;;  %v10817_v42 = vld [vmem:[#allocation6 + $0x704] sm:$0xf0] }
 0x611   : > { %v13098_v15 = vadd.f32 %v4766_v16, %v14796_v8  ;;  %4718 = vmatmul.bf16.gmra.mxu2 %v12816_v50  ;;  %v9916_v16 = vld [vmem:[#allocation6 + $0x600] sm:$0xf]  ;;  %v10785_v20 = vld [vmem:[#allocation6 + $0x604] sm:$0xf0] }
 0x612   : > { %4807 = vmatmul.bf16.gmra.mxu3 %v12818_v43  ;;  %v10833_v8 = vld [vmem:[#allocation6 + $0x784] sm:$0xf0] }
 0x613   : > { %14797 = vst [vmem:[#allocation47_spill] sm:$0xff] %v13098_v15 }
 0x614   : > { %v4679_v44 = vpop.f32.mrf.mxu2  ;;  %v4503_v39 = vpop.f32.mrf.mxu0 }
 0x615   : > { %v4680_v22 = vadd.f32 %v4679_v44, %v4591_v2  ;;  %v4768_v29 = vpop.f32.mrf.mxu3  ;;  %v4504_v41 = vadd.f32 %v4503_v39, %v12844_v19  ;;  %v4592_v58 = vpop.f32.mrf.mxu1  ;;  %v14804_v19 = vld [vmem:[#allocation108_spill] sm:$0xff]  ;;  %v10045_v2 = vor.u32 %v10817_v42, %v10044_v7  ;;  %v9917_v44 = vor.u32 %v10785_v20, %v9916_v16  ;;  %v14810_v16 = vld [vmem:[#allocation110_spill] sm:$0xff] }
 0x616   : > { %v14808_v7 = vld [vmem:[#allocation32_spill] sm:$0xff] }
 0x617   : > { %v4769_v10 = vadd.f32 %v4768_v29, %v4680_v22  ;;  %v4593_v14 = vadd.f32 %v4592_v58, %v4504_v41  ;;  %6363 = vmatpush.bf16.msra.mxu2 %v10045_v2  ;;  %6185 = vmatpush.bf16.msra.mxu0 %v9917_v44 }
 0x619   : > { %v13105_v49 = vadd.f32 %v4769_v10, %v14799_v11 }
 0x61b   : > { %14800 = vst [vmem:[#allocation22_spill] sm:$0xff] %v13105_v49  ;;  %v9782_v49 = vld [vmem:[%s11346_s6 + $0x260] sm:$0xf0] }
 0x61c   : > { %v4681_v27 = vpop.f32.mrf.mxu2  ;;  %v4506_v35 = vpop.f32.mrf.mxu0 }
 0x61d   : > { %v4682_v18 = vadd.f32 %v4681_v27, %v4593_v14  ;;  %v4770_v4 = vpop.f32.mrf.mxu3  ;;  %v4507_v50 = vadd.f32 %v4506_v35, %v12854_v12  ;;  %v4595_v26 = vpop.f32.mrf.mxu1  ;;  %v10108_v12 = vld [vmem:[#allocation6 + $0x780] sm:$0xf] }
 0x61e   : > { %v10109_v22 = vor.u32 %v10833_v8, %v10108_v12  ;;  %v14805_v14 = vld [vmem:[#allocation31_spill] sm:$0xff] }
 0x61f   : > { %v4771_v43 = vadd.f32 %v4770_v4, %v4682_v18  ;;  %v4596_v56 = vadd.f32 %v4595_v26, %v4507_v50  ;;  %4545 = vmatmul.bf16.gmra.mxu0 %v14801_v47  ;;  %v9980_v27 = vld [vmem:[#allocation6 + $0x680] sm:$0xf]  ;;  %v10801_v18 = vld [vmem:[#allocation6 + $0x684] sm:$0xf0] }
 0x620   : > { %4634 = vmatmul.bf16.gmra.mxu1 %v14804_v19  ;;  %6452 = vmatpush.bf16.msra.mxu3 %v10109_v22  ;;  %v9981_v4 = vor.u32 %v10801_v18, %v9980_v27  ;;  %v14807_v19 = vld [vmem:[#allocation109_spill] sm:$0xff]  ;;  %v14813_v27 = vld [vmem:[#allocation111_spill] sm:$0xff] }
 0x621   : > { %v13110_v23 = vadd.f32 %v4771_v43, %v14802_v38  ;;  %4723 = vmatmul.bf16.gmra.mxu2 %v12840_v28  ;;  %v14814_v18 = vld [vmem:[#allocation65_spill] sm:$0xff] }
 0x622   : > { %4812 = vmatmul.bf16.gmra.mxu3 %v12842_v31  ;;  %6274 = vmatpush.bf16.msra.mxu1 %v9981_v4 }
 0x623   : > { %14803 = vst [vmem:[#allocation124_spill] sm:$0xff] %v13110_v23 }
 0x624   : > { %v4684_v5 = vpop.f32.mrf.mxu2  ;;  %v4508_v41 = vpop.f32.mrf.mxu0 }
 0x625   : > { %v4685_v29 = vadd.f32 %v4684_v5, %v4596_v56  ;;  %v4773_v39 = vpop.f32.mrf.mxu3  ;;  %v4509_v58 = vadd.f32 %v4508_v41, %v12868_v36  ;;  %v4597_v10 = vpop.f32.mrf.mxu1 }
 0x627   : > { %v4774_v31 = vadd.f32 %v4773_v39, %v4685_v29  ;;  %v4598_v28 = vadd.f32 %v4597_v10, %v4509_v58  ;;  %v14811_v29 = vld [vmem:[#allocation64_spill] sm:$0xff] }
 0x629   : > { %v13117_v11 = vadd.f32 %v4774_v31, %v14805_v14 }
 0x62b   : > { %14806 = vst [vmem:[#allocation127_spill] sm:$0xff] %v13117_v11 }
 0x62c   : > { %v4686_v35 = vpop.f32.mrf.mxu2  ;;  %v4511_v43 = vpop.f32.mrf.mxu0 }
 0x62d   : > { %v4687_v50 = vadd.f32 %v4686_v35, %v4598_v28  ;;  %v4775_v26 = vpop.f32.mrf.mxu3  ;;  %v4512_v56 = vadd.f32 %v4511_v43, %v12878_v21  ;;  %v4600_v47 = vpop.f32.mrf.mxu1  ;;  %v10798_v35 = vld [vmem:[#allocation6 + $0x674] sm:$0xf] }
 0x62f   : > { %v4776_v36 = vadd.f32 %v4775_v26, %v4687_v50  ;;  %v4601_v38 = vadd.f32 %v4600_v47, %v4512_v56  ;;  %4550 = vmatmul.bf16.gmra.mxu0 %v14807_v19  ;;  %v9974_v50 = vld [vmem:[#allocation6 + $0x678] sm:$0xf0]  ;;  %v10228_v26 = vld [vmem:[#allocation6 + $0x870] sm:$0xf]  ;;  %v10863_v56 = vld [vmem:[#allocation6 + $0x874] sm:$0xf0] }
 0x630   : > { %4639 = vmatmul.bf16.gmra.mxu1 %v14810_v16  ;;  %v9977_v43 = vor.u32 %v10798_v35, %v9974_v50  ;;  %v10038_v47 = vld [vmem:[#allocation6 + $0x6f8] sm:$0xf0] }
 0x631   : > { %v13122_v42 = vadd.f32 %v4776_v36, %v14808_v7  ;;  %4728 = vmatmul.bf16.gmra.mxu2 %v12864_v32  ;;  %v14824_v35 = vld [vmem:[#allocation134_spill] sm:$0xff] }
 0x632   : > { %4817 = vmatmul.bf16.gmra.mxu3 %v12866_v48  ;;  %6712 = vmatpush.bf16.msrb.mxu2 %v9977_v43 }
 0x633   : > { %14809 = vst [vmem:[#allocation56_spill] sm:$0xff] %v13122_v42  ;;  %v10743_v42 = vld [vmem:[%s11346_s6 + $0x21c] sm:$0xf] }
 0x634   : > { %v4689_v2 = vpop.f32.mrf.mxu2  ;;  %v4513_v8 = vpop.f32.mrf.mxu0 }
 0x635   : > { %v4690_v20 = vadd.f32 %v4689_v2, %v4601_v38  ;;  %v4778_v12 = vpop.f32.mrf.mxu3  ;;  %v4514_v21 = vadd.f32 %v4513_v8, %v12892_v13  ;;  %v4602_v5 = vpop.f32.mrf.mxu1  ;;  %v14816_v13 = vld [vmem:[#allocation112_spill] sm:$0xff]  ;;  %v10229_v38 = vor.u32 %v10863_v56, %v10228_v26  ;;  %v14817_v8 = vld [vmem:[#allocation33_spill] sm:$0xff]  ;;  %v14825_v56 = vld [vmem:[#allocation114_spill] sm:$0xff] }
 0x637   : > { %v4779_v44 = vadd.f32 %v4778_v12, %v4690_v20  ;;  %v4603_v22 = vadd.f32 %v4602_v5, %v4514_v21  ;;  %6534 = vmatpush.bf16.msrb.mxu0 %v10229_v38  ;;  %v10292_v5 = vld [vmem:[#allocation6 + $0x8f0] sm:$0xf] }
 0x639   : > { %v13129_v39 = vadd.f32 %v4779_v44, %v14811_v29  ;;  %v10879_v44 = vld [vmem:[#allocation6 + $0x8f4] sm:$0xf0] }
 0x63b   : > { %14812 = vst [vmem:[#allocation52_spill] sm:$0xff] %v13129_v39 }
 0x63c   : > { %v4691_v41 = vpop.f32.mrf.mxu2  ;;  %v4516_v31 = vpop.f32.mrf.mxu0 }
 0x63d   : > { %v4692_v58 = vadd.f32 %v4691_v41, %v4603_v22  ;;  %v4780_v10 = vpop.f32.mrf.mxu3  ;;  %v4517_v32 = vadd.f32 %v4516_v31, %v12902_v54  ;;  %v4605_v28 = vpop.f32.mrf.mxu1  ;;  %v10814_v54 = vld [vmem:[#allocation6 + $0x6f4] sm:$0xf]  ;;  %v10293_v22 = vor.u32 %v10879_v44, %v10292_v5  ;;  %v9542_v5 = vld [vmem:[%s11346_s6 + $0x80] sm:$0xf0] }
 0x63e   : > { %v10041_v19 = vor.u32 %v10814_v54, %v10038_v47 }
 0x63f   : > { %v4781_v48 = vadd.f32 %v4780_v10, %v4692_v58  ;;  %v4606_v14 = vadd.f32 %v4605_v28, %v4517_v32  ;;  %4555 = vmatmul.bf16.gmra.mxu0 %v14813_v27  ;;  %6623 = vmatpush.bf16.msrb.mxu1 %v10293_v22 }
 0x640   : > { %4644 = vmatmul.bf16.gmra.mxu1 %v14816_v13  ;;  %6801 = vmatpush.bf16.msrb.mxu3 %v10041_v19  ;;  %v14823_v13 = vld [vmem:[#allocation133_spill] sm:$0xff]  ;;  %v14826_v19 = vld [vmem:[#allocation67_spill] sm:$0xff] }
 0x641   : > { %v13134_v4 = vadd.f32 %v4781_v48, %v14814_v18  ;;  %4733 = vmatmul.bf16.gmra.mxu2 %v12888_v40  ;;  %v14819_v48 = vld [vmem:[#allocation115_spill] sm:$0xff]  ;;  %v14822_v18 = vld [vmem:[#allocation116_spill] sm:$0xff] }
 0x642   : > { %4822 = vmatmul.bf16.gmra.mxu3 %v12890_v9 }
 0x643   : > { %14815 = vst [vmem:[#allocation83_spill] sm:$0xff] %v13134_v4 }
 0x644   : > { %v4694_v36 = vpop.f32.mrf.mxu2  ;;  %v4518_v2 = vpop.f32.mrf.mxu0 }
 0x645   : > { %v4695_v7 = vadd.f32 %v4694_v36, %v4606_v14  ;;  %v4783_v16 = vpop.f32.mrf.mxu3  ;;  %v4519_v20 = vadd.f32 %v4518_v2, %v12916_v25  ;;  %v4607_v12 = vpop.f32.mrf.mxu1  ;;  %v14820_v14 = vld [vmem:[#allocation34_spill] sm:$0xff] }
 0x646   : > { %v10691_v2 = vld [vmem:[%s11346_s6 + $0x74] sm:$0xf0] }
 0x647   : > { %v4784_v9 = vadd.f32 %v4783_v16, %v4695_v7  ;;  %v4608_v40 = vadd.f32 %v4607_v12, %v4519_v20  ;;  %v9532_v16 = vld [vmem:[%s11346_s6 + $0x60] sm:$0xf]  ;;  %v10688_v20 = vld [vmem:[%s11346_s6 + $0x64] sm:$0xf]  ;;  %v9534_v12 = vld [vmem:[%s11346_s6 + $0x78] sm:$0xf0] }
 0x648   : > { %v13163_v22 = vor.u32 %v10691_v2, %v9532_v16 }
 0x649   : > { %v13141_v21 = vadd.f32 %v4784_v9, %v14817_v8  ;;  %v9540_v9 = vld [vmem:[%s11346_s6 + $0x68] sm:$0xf]  ;;  %v10689_v8 = vld [vmem:[%s11346_s6 + $0x6c] sm:$0xf] }
 0x64b   : > { %14818 = vst [vmem:[#allocation125_spill] sm:$0xff] %v13141_v21 }
 0x64c   : > { %v4696_v29 = vpop.f32.mrf.mxu2  ;;  %v4521_v10 = vpop.f32.mrf.mxu0 }
 0x64d   : > { %v4697_v41 = vadd.f32 %v4696_v29, %v4608_v40  ;;  %v4785_v58 = vpop.f32.mrf.mxu3  ;;  %v4522_v31 = vadd.f32 %v4521_v10, %v12926_v63  ;;  %v4610_v32 = vpop.f32.mrf.mxu1  ;;  %v10692_v40 = vld [vmem:[%s11346_s6 + $0x7c] sm:$0xf0]  ;;  %v13165_v10 = vor.u32 %v10688_v20, %v9534_v12 }
 0x64f   : > { %v4786_v25 = vadd.f32 %v4785_v58, %v4697_v41  ;;  %v4611_v28 = vadd.f32 %v4610_v32, %v4522_v31  ;;  %4560 = vmatmul.bf16.gmra.mxu0 %v14819_v48  ;;  %v13167_v31 = vor.u32 %v10692_v40, %v9540_v9  ;;  %v9556_v40 = vld [vmem:[%s11346_s6 + $0x90] sm:$0xf] }
 0x650   : > { %4649 = vmatmul.bf16.gmra.mxu1 %v14822_v18  ;;  %v14830_v18 = vld [vmem:[#allocation68_spill] sm:$0xff] }
 0x651   : > { %v13146_v27 = vadd.f32 %v4786_v25, %v14820_v14  ;;  %4738 = vmatmul.bf16.gmra.mxu2 %v14823_v13  ;;  %14828 = vst [vmem:[#allocation23_spill] sm:$0xff] %v13167_v31 }
 0x652   : > { %4827 = vmatmul.bf16.gmra.mxu3 %v14824_v35  ;;  %v10796_v35 = vld [vmem:[#allocation6 + $0x664] sm:$0xf] }
 0x653   : > { %14821 = vst [vmem:[#allocation59_spill] sm:$0xff] %v13146_v27 }
 0x654   : > { %v4699_v63 = vpop.f32.mrf.mxu2  ;;  %v4523_v43 = vpop.f32.mrf.mxu0 }
 0x655   : > { %v4700_v50 = vadd.f32 %v4699_v63, %v4611_v28  ;;  %v4788_v26 = vpop.f32.mrf.mxu3  ;;  %v4524_v54 = vadd.f32 %v4523_v43, %v14825_v56  ;;  %v4612_v47 = vpop.f32.mrf.mxu1  ;;  %v13170_v28 = vor.u32 %v10689_v8, %v9542_v5  ;;  %v9966_v63 = vld [vmem:[#allocation6 + $0x668] sm:$0xf0]  ;;  %v10812_v43 = vld [vmem:[#allocation6 + $0x6e4] sm:$0xf]  ;;  %v10697_v8 = vld [vmem:[%s11346_s6 + $0xa4] sm:$0xf0] }
 0x656   : > { %v10030_v56 = vld [vmem:[#allocation6 + $0x6e8] sm:$0xf0]  ;;  %v14832_v5 = vld [vmem:[#allocation37_spill] sm:$0xff] }
 0x657   : > { %v4789_v36 = vadd.f32 %v4788_v26, %v4700_v50  ;;  %v4613_v38 = vadd.f32 %v4612_v47, %v4524_v54  ;;  %14829 = vst [vmem:[#allocation86_spill] sm:$0xff] %v13170_v28  ;;  %v10220_v50 = vld [vmem:[#allocation6 + $0x860] sm:$0xf]  ;;  %v10861_v26 = vld [vmem:[#allocation6 + $0x864] sm:$0xf0] }
 0x658   : > { %v10221_v47 = vor.u32 %v10861_v26, %v10220_v50 }
 0x659   : > { %v13153_v7 = vadd.f32 %v4789_v36, %v14826_v19  ;;  %v10033_v36 = vor.u32 %v10812_v43, %v10030_v56 }
 0x65a   : > { %6535 = vmatpush.bf16.msrb.mxu0 %v10221_v47 }
 0x65b   : > { %14827 = vst [vmem:[#allocation126_spill] sm:$0xff] %v13153_v7  ;;  %6802 = vmatpush.bf16.msrb.mxu3 %v10033_v36 }
 0x65c   : > { %v4701_v44 = vpop.f32.mrf.mxu2  ;;  %v4526_v58 = vpop.f32.mrf.mxu0 }
 0x65d   : > { %v4702_v29 = vadd.f32 %v4701_v44, %v4613_v38  ;;  %v4790_v41 = vpop.f32.mrf.mxu3  ;;  %v4527_v32 = vadd.f32 %v4526_v58, %v12942_v46  ;;  %v4615_v25 = vpop.f32.mrf.mxu1  ;;  %v9969_v46 = vor.u32 %v10796_v35, %v9966_v63  ;;  %v10877_v58 = vld [vmem:[#allocation6 + $0x8e4] sm:$0xf0]  ;;  %v13191_v63 = vor.u32 %v10697_v8, %v9556_v40 }
 0x65f   : > { %v4791_v48 = vadd.f32 %v4790_v41, %v4702_v29  ;;  %v4616_v14 = vadd.f32 %v4615_v25, %v4527_v32  ;;  %6186 = vmatmul.bf16.vlgmr.msra.gmra.mxu0 %v13163_v22  ;;  %6713 = vmatpush.bf16.msrb.mxu2 %v9969_v46  ;;  %v10694_v29 = vld [vmem:[%s11346_s6 + $0x94] sm:$0xf]  ;;  %v10284_v41 = vld [vmem:[#allocation6 + $0x8e0] sm:$0xf]  ;;  %v9558_v32 = vld [vmem:[%s11346_s6 + $0xa8] sm:$0xf0] }
 0x660   : > { %6275 = vmatmul.bf16.vlgmr.msra.gmra.mxu1 %v13165_v10  ;;  %v9564_v25 = vld [vmem:[%s11346_s6 + $0x98] sm:$0xf]  ;;  %v13193_v43 = vor.u32 %v10694_v29, %v9558_v32  ;;  %v9580_v32 = vld [vmem:[%s11346_s6 + $0xc0] sm:$0xf] }
 0x661   : > { %v13174_v13 = vadd.f32 %v4791_v48, %v14830_v18  ;;  %6364 = vmatmul.bf16.vlgmr.msra.gmra.mxu2 %v13167_v31  ;;  %v10698_v48 = vld [vmem:[%s11346_s6 + $0xac] sm:$0xf0]  ;;  %v9566_v18 = vld [vmem:[%s11346_s6 + $0xb0] sm:$0xf0] }
 0x662   : > { %6453 = vmatmul.bf16.vlgmr.msra.gmra.mxu3 %v13170_v28  ;;  %v13195_v56 = vor.u32 %v10698_v48, %v9564_v25  ;;  %v10703_v25 = vld [vmem:[%s11346_s6 + $0xd4] sm:$0xf0]  ;;  %v10700_v48 = vld [vmem:[%s11346_s6 + $0xc4] sm:$0xf] }
 0x663   : > { %14831 = vst [vmem:[#allocation87_spill] sm:$0xff] %v13174_v13 }
 0x664   : > { %v4704_v54 = vpop.f32.mrf.mxu2  ;;  %v4528_v16 = vpop.f32.mrf.mxu0  ;;  %14834 = vst [vmem:[#allocation130_spill] sm:$0xff] %v13195_v56 }
 0x665   : > { %v4705_v38 = vadd.f32 %v4704_v54, %v4616_v14  ;;  %v4793_v19 = vpop.f32.mrf.mxu3  ;;  %v4529_v2 = vadd.f32 %v4528_v16, %v12948_v30  ;;  %v4617_v20 = vpop.f32.mrf.mxu1  ;;  %v10285_v14 = vor.u32 %v10877_v58, %v10284_v41  ;;  %v10695_v30 = vld [vmem:[%s11346_s6 + $0x9c] sm:$0xf]  ;;  %v14836_v16 = vld [vmem:[#allocation40_spill] sm:$0xff]  ;;  %v14838_v41 = vld [vmem:[#allocation41_spill] sm:$0xff] }
 0x666   : > { %v13198_v36 = vor.u32 %v10695_v30, %v9566_v18  ;;  %v9588_v30 = vld [vmem:[%s11346_s6 + $0xc8] sm:$0xf]  ;;  %v10704_v18 = vld [vmem:[%s11346_s6 + $0xdc] sm:$0xf0] }
 0x667   : > { %v4794_v12 = vadd.f32 %v4793_v19, %v4705_v38  ;;  %v4618_v9 = vadd.f32 %v4617_v20, %v4529_v2  ;;  %6624 = vmatpush.bf16.msrb.mxu1 %v10285_v14  ;;  %v9582_v14 = vld [vmem:[%s11346_s6 + $0xd8] sm:$0xf0] }
 0x668   : > { %14835 = vst [vmem:[#allocation57_spill] sm:$0xff] %v13198_v36 }
 0x669   : > { %v13183_v44 = vadd.f32 %v4794_v12, %v14832_v5 }
 0x66b   : > { %14833 = vst [vmem:[#allocation24_spill] sm:$0xff] %v13183_v44 }
 0x66c   : > { %v4706_v35 = vpop.f32.mrf.mxu2  ;;  %v4531_v26 = vpop.f32.mrf.mxu0 }
 0x66d   : > { %v4707_v50 = vadd.f32 %v4706_v35, %v4618_v9  ;;  %v4795_v46 = vpop.f32.mrf.mxu3  ;;  %v4532_v54 = vadd.f32 %v4531_v26, %v12958_v57  ;;  %v4620_v47 = vpop.f32.mrf.mxu1  ;;  %v10701_v35 = vld [vmem:[%s11346_s6 + $0xcc] sm:$0xf]  ;;  %v13219_v26 = vor.u32 %v10703_v25, %v9580_v32  ;;  %v10859_v32 = vld [vmem:[#allocation6 + $0x854] sm:$0xf0]  ;;  %v10810_v25 = vld [vmem:[#allocation6 + $0x6d4] sm:$0xf] }
 0x66f   : > { %v4796_v38 = vadd.f32 %v4795_v46, %v4707_v50  ;;  %v4621_v19 = vadd.f32 %v4620_v47, %v4532_v54  ;;  %6191 = vmatmul.bf16.gmra.mxu0 %v13191_v63  ;;  %v9590_v50 = vld [vmem:[%s11346_s6 + $0xe0] sm:$0xf0] }
 0x670   : > { %6280 = vmatmul.bf16.gmra.mxu1 %v13193_v43 }
 0x671   : > { %v13202_v2 = vadd.f32 %v4796_v38, %v14836_v16  ;;  %6369 = vmatmul.bf16.gmra.mxu2 %v13195_v56  ;;  %v13221_v38 = vor.u32 %v10700_v48, %v9582_v14  ;;  %v10022_v48 = vld [vmem:[#allocation6 + $0x6d8] sm:$0xf0] }
 0x672   : > { %6458 = vmatmul.bf16.gmra.mxu3 %v13198_v36  ;;  %v10779_v36 = vld [vmem:[%s11346_s6 + $0x33c] sm:$0xf] }
 0x673   : > { %14837 = vst [vmem:[#allocation90_spill] sm:$0xff] %v13202_v2 }
 0x674   : > { %v4709_v57 = vpop.f32.mrf.mxu2  ;;  %v4533_v9 = vpop.f32.mrf.mxu0 }
 0x675   : > { %v4710_v20 = vadd.f32 %v4709_v57, %v4621_v19  ;;  %v4798_v12 = vpop.f32.mrf.mxu3  ;;  %v4534_v40 = vadd.f32 %v4533_v9, %v12964_v33  ;;  %v4622_v8 = vpop.f32.mrf.mxu1  ;;  %v13223_v19 = vor.u32 %v10704_v18, %v9588_v30  ;;  %v10025_v18 = vor.u32 %v10810_v25, %v10022_v48  ;;  %v9612_v25 = vld [vmem:[%s11346_s6 + $0xf8] sm:$0xf] }
 0x677   : > { %v4799_v5 = vadd.f32 %v4798_v12, %v4710_v20  ;;  %v4623_v29 = vadd.f32 %v4622_v8, %v4534_v40  ;;  %14840 = vst [vmem:[#allocation128_spill] sm:$0xff] %v13223_v19  ;;  %v13226_v20 = vor.u32 %v10701_v35, %v9590_v50  ;;  %v14842_v40 = vld [vmem:[#allocation44_spill] sm:$0xff]  ;;  %6803 = vmatpush.bf16.msrb.mxu3 %v10025_v18 }
 0x679   : > { %v13209_v58 = vadd.f32 %v4799_v5, %v14838_v41  ;;  %14841 = vst [vmem:[#allocation58_spill] sm:$0xff] %v13226_v20  ;;  %v10794_v5 = vld [vmem:[#allocation6 + $0x654] sm:$0xf]  ;;  %v10212_v41 = vld [vmem:[#allocation6 + $0x850] sm:$0xf] }
 0x67a   : > { %v10213_v30 = vor.u32 %v10859_v32, %v10212_v41  ;;  %v10875_v41 = vld [vmem:[#allocation6 + $0x8d4] sm:$0xf0]  ;;  %v9606_v32 = vld [vmem:[%s11346_s6 + $0x108] sm:$0xf0] }
 0x67b   : > { %14839 = vst [vmem:[#allocation91_spill] sm:$0xff] %v13209_v58 }
 0x67c   : > { %v4711_v46 = vpop.f32.mrf.mxu2  ;;  %v4536_v33 = vpop.f32.mrf.mxu0  ;;  %6536 = vmatpush.bf16.msrb.mxu0 %v10213_v30 }
 0x67d   : > { %v4712_v54 = vadd.f32 %v4711_v46, %v4623_v29  ;;  %v4800_v47 = vpop.f32.mrf.mxu3  ;;  %v4537_v16 = vadd.f32 %v4536_v33, %v12974_v24  ;;  %v4625_v57 = vpop.f32.mrf.mxu1  ;;  %v9958_v29 = vld [vmem:[#allocation6 + $0x658] sm:$0xf0] }
 0x67e   : > { %v9961_v24 = vor.u32 %v10794_v5, %v9958_v29  ;;  %v10276_v29 = vld [vmem:[#allocation6 + $0x8d0] sm:$0xf] }
 0x67f   : > { %v4801_v12 = vadd.f32 %v4800_v47, %v4712_v54  ;;  %v4626_v9 = vadd.f32 %v4625_v57, %v4537_v16  ;;  %6196 = vmatmul.bf16.gmra.mxu0 %v13219_v26  ;;  %v9604_v57 = vld [vmem:[%s11346_s6 + $0xf0] sm:$0xf]  ;;  %v10277_v48 = vor.u32 %v10875_v41, %v10276_v29 }
 0x680   : > { %6285 = vmatmul.bf16.gmra.mxu1 %v13221_v38  ;;  %6714 = vmatpush.bf16.msrb.mxu2 %v9961_v24  ;;  %v10710_v24 = vld [vmem:[%s11346_s6 + $0x10c] sm:$0xf0] }
 0x681   : > { %v13230_v8 = vadd.f32 %v4801_v12, %v14842_v40  ;;  %6374 = vmatmul.bf16.gmra.mxu2 %v13223_v19  ;;  %v10709_v12 = vld [vmem:[%s11346_s6 + $0x104] sm:$0xf0]  ;;  %v14844_v40 = vld [vmem:[#allocation45_spill] sm:$0xff]  ;;  %6625 = vmatpush.bf16.msrb.mxu1 %v10277_v48 }
 0x682   : > { %6463 = vmatmul.bf16.gmra.mxu3 %v13226_v20  ;;  %v14850_v48 = vld [vmem:[#allocation51_spill] sm:$0xff]  ;;  %v10782_v19 = vld [vmem:[%s11346_s6 + $0x34c] sm:$0xf0] }
 0x683   : > { %14843 = vst [vmem:[#allocation129_spill] sm:$0xff] %v13230_v8  ;;  %v13247_v8 = vor.u32 %v10709_v12, %v9604_v57  ;;  %v14848_v57 = vld [vmem:[#allocation48_spill] sm:$0xff] }
 0x684   : > { %v4714_v14 = vpop.f32.mrf.mxu2  ;;  %v4538_v46 = vpop.f32.mrf.mxu0 }
 0x685   : > { %v4715_v35 = vadd.f32 %v4714_v14, %v4626_v9  ;;  %v4803_v50 = vpop.f32.mrf.mxu3  ;;  %v4539_v54 = vadd.f32 %v4538_v46, %v12980_v45  ;;  %v4627_v47 = vpop.f32.mrf.mxu1  ;;  %v10706_v9 = vld [vmem:[%s11346_s6 + $0xf4] sm:$0xf]  ;;  %v10707_v45 = vld [vmem:[%s11346_s6 + $0xfc] sm:$0xf] }
 0x686   : > { %v9614_v14 = vld [vmem:[%s11346_s6 + $0x110] sm:$0xf0] }
 0x687   : > { %v4804_v33 = vadd.f32 %v4803_v50, %v4715_v35  ;;  %v4628_v16 = vadd.f32 %v4627_v47, %v4539_v54  ;;  %v13249_v50 = vor.u32 %v10706_v9, %v9606_v32  ;;  %v13251_v54 = vor.u32 %v10710_v24, %v9612_v25 }
 0x689   : > { %v13239_v5 = vadd.f32 %v4804_v33, %v14844_v40  ;;  %14846 = vst [vmem:[#allocation94_spill] sm:$0xff] %v13251_v54  ;;  %v13254_v40 = vor.u32 %v10707_v45, %v9614_v14  ;;  %v9628_v14 = vld [vmem:[%s11346_s6 + $0x120] sm:$0xf] }
 0x68b   : > { %14845 = vst [vmem:[#allocation25_spill] sm:$0xff] %v13239_v5 }
 0x68c   : > { %v4716_v46 = vpop.f32.mrf.mxu2  ;;  %v4541_v35 = vpop.f32.mrf.mxu0  ;;  %14847 = vst [vmem:[#allocation95_spill] sm:$0xff] %v13254_v40 }
 0x68d   : > { %v4717_v30 = vadd.f32 %v4716_v46, %v4628_v16  ;;  %v4805_v18 = vpop.f32.mrf.mxu3  ;;  %v4542_v47 = vadd.f32 %v4541_v35, %v12990_v1  ;;  %v4630_v33 = vpop.f32.mrf.mxu1  ;;  %v10715_v46 = vld [vmem:[%s11346_s6 + $0x134] sm:$0xf0]  ;;  %v9636_v35 = vld [vmem:[%s11346_s6 + $0x128] sm:$0xf] }
 0x68f   : > { %v4806_v5 = vadd.f32 %v4805_v18, %v4717_v30  ;;  %v4631_v29 = vadd.f32 %v4630_v33, %v4542_v47  ;;  %6201 = vmatmul.bf16.gmra.mxu0 %v13247_v8  ;;  %v10712_v30 = vld [vmem:[%s11346_s6 + $0x124] sm:$0xf]  ;;  %v9630_v18 = vld [vmem:[%s11346_s6 + $0x138] sm:$0xf0]  ;;  %v10716_v47 = vld [vmem:[%s11346_s6 + $0x13c] sm:$0xf0] }
 0x690   : > { %6290 = vmatmul.bf16.gmra.mxu1 %v13249_v50  ;;  %v10713_v33 = vld [vmem:[%s11346_s6 + $0x12c] sm:$0xf] }
 0x691   : > { %v13258_v16 = vadd.f32 %v4806_v5, %v14848_v57  ;;  %6379 = vmatmul.bf16.gmra.mxu2 %v13251_v54  ;;  %v9638_v57 = vld [vmem:[%s11346_s6 + $0x140] sm:$0xf0] }
 0x692   : > { %6468 = vmatmul.bf16.gmra.mxu3 %v13254_v40 }
 0x693   : > { %14849 = vst [vmem:[#allocation26_spill] sm:$0xff] %v13258_v16 }
 0x694   : > { %v4719_v1 = vpop.f32.mrf.mxu2  ;;  %v4543_v41 = vpop.f32.mrf.mxu0 }
 0x695   : > { %v4720_v12 = vadd.f32 %v4719_v1, %v4631_v29  ;;  %v4808_v9 = vpop.f32.mrf.mxu3  ;;  %v4544_v32 = vadd.f32 %v4543_v41, %v12996_v62  ;;  %v4632_v25 = vpop.f32.mrf.mxu1  ;;  %v13275_v29 = vor.u32 %v10715_v46, %v9628_v14  ;;  %v13277_v41 = vor.u32 %v10712_v30, %v9630_v18  ;;  %v10204_v14 = vld [vmem:[#allocation6 + $0x840] sm:$0xf]  ;;  %v10857_v46 = vld [vmem:[#allocation6 + $0x844] sm:$0xf0]  ;;  %v10808_v30 = vld [vmem:[#allocation6 + $0x6c4] sm:$0xf] }
 0x697   : > { %v4809_v5 = vadd.f32 %v4808_v9, %v4720_v12  ;;  %v4633_v24 = vadd.f32 %v4632_v25, %v4544_v32  ;;  %v13279_v12 = vor.u32 %v10716_v47, %v9636_v35  ;;  %v13282_v25 = vor.u32 %v10713_v33, %v9638_v57 }
 0x698   : > { %v10205_v35 = vor.u32 %v10857_v46, %v10204_v14  ;;  %v10268_v46 = vld [vmem:[#allocation6 + $0x8c0] sm:$0xf] }
 0x699   : > { %v13265_v45 = vadd.f32 %v4809_v5, %v14850_v48  ;;  %14852 = vst [vmem:[#allocation60_spill] sm:$0xff] %v13279_v12 }
 0x69a   : > { %14853 = vst [vmem:[#allocation98_spill] sm:$0xff] %v13282_v25  ;;  %6537 = vmatpush.bf16.msrb.mxu0 %v10205_v35 }
 0x69b   : > { %14851 = vst [vmem:[#allocation131_spill] sm:$0xff] %v13265_v45  ;;  %v14854_v45 = vld [vmem:[#allocation84_spill] sm:$0xff] }
 0x69c   : > { %v4721_v16 = vpop.f32.mrf.mxu2  ;;  %v4546_v62 = vpop.f32.mrf.mxu0 }
 0x69d   : > { %v4722_v1 = vadd.f32 %v4721_v16, %v4633_v24  ;;  %v4810_v58 = vpop.f32.mrf.mxu3  ;;  %v4547_v9 = vadd.f32 %v4546_v62, %v13006_v0  ;;  %v4635_v32 = vpop.f32.mrf.mxu1  ;;  %v10792_v16 = vld [vmem:[#allocation6 + $0x644] sm:$0xf]  ;;  %v9950_v24 = vld [vmem:[#allocation6 + $0x648] sm:$0xf0] }
 0x69e   : > { %v9953_v0 = vor.u32 %v10792_v16, %v9950_v24  ;;  %v10721_v16 = vld [vmem:[%s11346_s6 + $0x164] sm:$0xf0]  ;;  %v14856_v24 = vld [vmem:[#allocation50_spill] sm:$0xff] }
 0x69f   : > { %v4811_v5 = vadd.f32 %v4810_v58, %v4722_v1  ;;  %v4636_v48 = vadd.f32 %v4635_v32, %v4547_v9  ;;  %6206 = vmatmul.bf16.gmra.mxu0 %v13275_v29  ;;  %v10014_v58 = vld [vmem:[#allocation6 + $0x6c8] sm:$0xf0] }
 0x6a0   : > { %6295 = vmatmul.bf16.gmra.mxu1 %v13277_v41  ;;  %6715 = vmatpush.bf16.msrb.mxu2 %v9953_v0  ;;  %v10722_v0 = vld [vmem:[%s11346_s6 + $0x16c] sm:$0xf0] }
 0x6a1   : > { %v13286_v2 = vadd.f32 %v4811_v5, %v14854_v45  ;;  %6384 = vmatmul.bf16.gmra.mxu2 %v13279_v12  ;;  %v10017_v45 = vor.u32 %v10808_v30, %v10014_v58  ;;  %v9652_v5 = vld [vmem:[%s11346_s6 + $0x150] sm:$0xf]  ;;  %v10873_v30 = vld [vmem:[#allocation6 + $0x8c4] sm:$0xf0]  ;;  %v9654_v58 = vld [vmem:[%s11346_s6 + $0x168] sm:$0xf0] }
 0x6a2   : > { %6473 = vmatmul.bf16.gmra.mxu3 %v13282_v25  ;;  %v13303_v13 = vor.u32 %v10721_v16, %v9652_v5  ;;  %v14860_v5 = vld [vmem:[#allocation88_spill] sm:$0xff]  ;;  %v9878_v12 = vld [vmem:[%s11346_s6 + $0x320] sm:$0xf0] }
 0x6a3   : > { %14855 = vst [vmem:[#allocation99_spill] sm:$0xff] %v13286_v2  ;;  %6804 = vmatpush.bf16.msrb.mxu3 %v10017_v45  ;;  %v10269_v2 = vor.u32 %v10873_v30, %v10268_v46 }
 0x6a4   : > { %v4724_v18 = vpop.f32.mrf.mxu2  ;;  %v4548_v57 = vpop.f32.mrf.mxu0 }
 0x6a5   : > { %v4725_v47 = vadd.f32 %v4724_v18, %v4636_v48  ;;  %v4813_v33 = vpop.f32.mrf.mxu3  ;;  %v4549_v1 = vadd.f32 %v4548_v57, %v13012_v60  ;;  %v4637_v62 = vpop.f32.mrf.mxu1  ;;  %v10718_v48 = vld [vmem:[%s11346_s6 + $0x154] sm:$0xf]  ;;  %v9660_v18 = vld [vmem:[%s11346_s6 + $0x158] sm:$0xf]  ;;  %v10719_v60 = vld [vmem:[%s11346_s6 + $0x15c] sm:$0xf]  ;;  %6626 = vmatpush.bf16.msrb.mxu1 %v10269_v2 }
 0x6a6   : > { %v9662_v57 = vld [vmem:[%s11346_s6 + $0x170] sm:$0xf0] }
 0x6a7   : > { %v4814_v9 = vadd.f32 %v4813_v33, %v4725_v47  ;;  %v4638_v32 = vadd.f32 %v4637_v62, %v4549_v1  ;;  %v13305_v33 = vor.u32 %v10718_v48, %v9654_v58  ;;  %v13307_v1 = vor.u32 %v10722_v0, %v9660_v18  ;;  %v14862_v18 = vld [vmem:[#allocation89_spill] sm:$0xff] }
 0x6a9   : > { %v13295_v14 = vadd.f32 %v4814_v9, %v14856_v24  ;;  %14858 = vst [vmem:[#allocation63_spill] sm:$0xff] %v13307_v1  ;;  %v13310_v24 = vor.u32 %v10719_v60, %v9662_v57  ;;  %v9676_v60 = vld [vmem:[%s11346_s6 + $0x180] sm:$0xf]  ;;  %v10727_v57 = vld [vmem:[%s11346_s6 + $0x194] sm:$0xf0] }
 0x6ab   : > { %14857 = vst [vmem:[#allocation132_spill] sm:$0xff] %v13295_v14 }
 0x6ac   : > { %v4726_v44 = vpop.f32.mrf.mxu2  ;;  %v4551_v47 = vpop.f32.mrf.mxu0  ;;  %14859 = vst [vmem:[#allocation101_spill] sm:$0xff] %v13310_v24 }
 0x6ad   : > { %v4727_v35 = vadd.f32 %v4726_v44, %v4638_v32  ;;  %v4815_v45 = vpop.f32.mrf.mxu3  ;;  %v4552_v62 = vadd.f32 %v4551_v47, %v13022_v59  ;;  %v4640_v9 = vpop.f32.mrf.mxu1  ;;  %v9684_v47 = vld [vmem:[%s11346_s6 + $0x188] sm:$0xf] }
 0x6af   : > { %v4816_v14 = vadd.f32 %v4815_v45, %v4727_v35  ;;  %v4641_v46 = vadd.f32 %v4640_v9, %v4552_v62  ;;  %6211 = vmatmul.bf16.gmra.mxu0 %v13303_v13  ;;  %v10724_v35 = vld [vmem:[%s11346_s6 + $0x184] sm:$0xf]  ;;  %v9678_v45 = vld [vmem:[%s11346_s6 + $0x198] sm:$0xf0]  ;;  %v10728_v62 = vld [vmem:[%s11346_s6 + $0x19c] sm:$0xf0] }
 0x6b0   : > { %6300 = vmatmul.bf16.gmra.mxu1 %v13305_v33  ;;  %v10725_v9 = vld [vmem:[%s11346_s6 + $0x18c] sm:$0xf] }
 0x6b1   : > { %v13314_v44 = vadd.f32 %v4816_v14, %v14860_v5  ;;  %6389 = vmatmul.bf16.gmra.mxu2 %v13307_v1  ;;  %v9686_v5 = vld [vmem:[%s11346_s6 + $0x1a0] sm:$0xf0] }
 0x6b2   : > { %6478 = vmatmul.bf16.gmra.mxu3 %v13310_v24  ;;  %v10767_v24 = vld [vmem:[%s11346_s6 + $0x2dc] sm:$0xf] }
 0x6b3   : > { %14861 = vst [vmem:[#allocation27_spill] sm:$0xff] %v13314_v44 }
 0x6b4   : > { %v4729_v59 = vpop.f32.mrf.mxu2  ;;  %v4553_v16 = vpop.f32.mrf.mxu0 }
 0x6b5   : > { %v4730_v2 = vadd.f32 %v4729_v59, %v4641_v46  ;;  %v4818_v32 = vpop.f32.mrf.mxu3  ;;  %v4554_v48 = vadd.f32 %v4553_v16, %v13028_v3  ;;  %v4642_v30 = vpop.f32.mrf.mxu1  ;;  %v13331_v46 = vor.u32 %v10727_v57, %v9676_v60  ;;  %v13333_v16 = vor.u32 %v10724_v35, %v9678_v45  ;;  %v10196_v60 = vld [vmem:[#allocation6 + $0x830] sm:$0xf]  ;;  %v10855_v57 = vld [vmem:[#allocation6 + $0x834] sm:$0xf0]  ;;  %v10806_v35 = vld [vmem:[#allocation6 + $0x6b4] sm:$0xf] }
 0x6b6   : > { %v10006_v45 = vld [vmem:[#allocation6 + $0x6b8] sm:$0xf0] }
 0x6b7   : > { %v4819_v14 = vadd.f32 %v4818_v32, %v4730_v2  ;;  %v4643_v58 = vadd.f32 %v4642_v30, %v4554_v48  ;;  %v13335_v2 = vor.u32 %v10728_v62, %v9684_v47  ;;  %v13338_v30 = vor.u32 %v10725_v9, %v9686_v5 }
 0x6b8   : > { %v10197_v47 = vor.u32 %v10855_v57, %v10196_v60  ;;  %v10009_v62 = vor.u32 %v10806_v35, %v10006_v45  ;;  %v9700_v57 = vld [vmem:[%s11346_s6 + $0x1b0] sm:$0xf]  ;;  %v10733_v35 = vld [vmem:[%s11346_s6 + $0x1c4] sm:$0xf0]  ;;  %v10730_v45 = vld [vmem:[%s11346_s6 + $0x1b4] sm:$0xf] }
 0x6b9   : > { %v13321_v0 = vadd.f32 %v4819_v14, %v14862_v18  ;;  %14864 = vst [vmem:[#allocation28_spill] sm:$0xff] %v13335_v2  ;;  %v13359_v21 = vor.u32 %v10733_v35, %v9700_v57  ;;  %v14872_v57 = vld [vmem:[#allocation96_spill] sm:$0xff] }
 0x6ba   : > { %14865 = vst [vmem:[#allocation103_spill] sm:$0xff] %v13338_v30  ;;  %6538 = vmatpush.bf16.msrb.mxu0 %v10197_v47  ;;  %6805 = vmatpush.bf16.msrb.mxu3 %v10009_v62 }
 0x6bb   : > { %14863 = vst [vmem:[#allocation102_spill] sm:$0xff] %v13321_v0  ;;  %v14866_v0 = vld [vmem:[#allocation92_spill] sm:$0xff] }
 0x6bc   : > { %v4731_v44 = vpop.f32.mrf.mxu2  ;;  %v4556_v3 = vpop.f32.mrf.mxu0 }
 0x6bd   : > { %v4732_v59 = vadd.f32 %v4731_v44, %v4643_v58  ;;  %v4820_v7 = vpop.f32.mrf.mxu3  ;;  %v4557_v32 = vadd.f32 %v4556_v3, %v13038_v37  ;;  %v4645_v48 = vpop.f32.mrf.mxu1  ;;  %v10790_v44 = vld [vmem:[#allocation6 + $0x634] sm:$0xf]  ;;  %v9942_v58 = vld [vmem:[#allocation6 + $0x638] sm:$0xf0] }
 0x6be   : > { %v9945_v37 = vor.u32 %v10790_v44, %v9942_v58 }
 0x6bf   : > { %v4821_v14 = vadd.f32 %v4820_v7, %v4732_v59  ;;  %v4646_v18 = vadd.f32 %v4645_v48, %v4557_v32  ;;  %6216 = vmatmul.bf16.gmra.mxu0 %v13331_v46  ;;  %v10260_v48 = vld [vmem:[#allocation6 + $0x8b0] sm:$0xf] }
 0x6c0   : > { %6305 = vmatmul.bf16.gmra.mxu1 %v13333_v16  ;;  %6716 = vmatpush.bf16.msrb.mxu2 %v9945_v37  ;;  %v9702_v37 = vld [vmem:[%s11346_s6 + $0x1c8] sm:$0xf0] }
 0x6c1   : > { %v13342_v27 = vadd.f32 %v4821_v14, %v14866_v0  ;;  %6394 = vmatmul.bf16.gmra.mxu2 %v13335_v2  ;;  %v10871_v14 = vld [vmem:[#allocation6 + $0x8b4] sm:$0xf0]  ;;  %v10770_v2 = vld [vmem:[%s11346_s6 + $0x2ec] sm:$0xf0] }
 0x6c2   : > { %6483 = vmatmul.bf16.gmra.mxu3 %v13338_v30  ;;  %v10261_v58 = vor.u32 %v10871_v14, %v10260_v48 }
 0x6c3   : > { %14867 = vst [vmem:[#allocation61_spill] sm:$0xff] %v13342_v27  ;;  %v10734_v27 = vld [vmem:[%s11346_s6 + $0x1cc] sm:$0xf0] }
 0x6c4   : > { %v4734_v7 = vpop.f32.mrf.mxu2  ;;  %v4558_v5 = vpop.f32.mrf.mxu0  ;;  %6627 = vmatpush.bf16.msrb.mxu1 %v10261_v58 }
 0x6c5   : > { %v4735_v0 = vadd.f32 %v4734_v7, %v4646_v18  ;;  %v4823_v9 = vpop.f32.mrf.mxu3  ;;  %v4559_v59 = vadd.f32 %v4558_v5, %v13044_v55  ;;  %v4647_v3 = vpop.f32.mrf.mxu1  ;;  %v14868_v18 = vld [vmem:[#allocation93_spill] sm:$0xff]  ;;  %v10731_v55 = vld [vmem:[%s11346_s6 + $0x1bc] sm:$0xf] }
 0x6c6   : > { %v9708_v7 = vld [vmem:[%s11346_s6 + $0x1b8] sm:$0xf]  ;;  %v9710_v5 = vld [vmem:[%s11346_s6 + $0x1d0] sm:$0xf0] }
 0x6c7   : > { %v4824_v32 = vadd.f32 %v4823_v9, %v4735_v0  ;;  %v4648_v44 = vadd.f32 %v4647_v3, %v4559_v59  ;;  %v13361_v59 = vor.u32 %v10730_v45, %v9702_v37  ;;  %v13363_v3 = vor.u32 %v10734_v27, %v9708_v7 }
 0x6c8   : > { %v13366_v14 = vor.u32 %v10731_v55, %v9710_v5 }
 0x6c9   : > { %v13349_v60 = vadd.f32 %v4824_v32, %v14868_v18  ;;  %14870 = vst [vmem:[#allocation62_spill] sm:$0xff] %v13363_v3 }
 0x6ca   : > { %14871 = vst [vmem:[#allocation105_spill] sm:$0xff] %v13366_v14 }
 0x6cb   : > { %14869 = vst [vmem:[#allocation104_spill] sm:$0xff] %v13349_v60  ;;  %v9734_v60 = vld [vmem:[%s11346_s6 + $0x200] sm:$0xf0] }
 0x6cc   : > { %v4736_v47 = vpop.f32.mrf.mxu2  ;;  %v4561_v9 = vpop.f32.mrf.mxu0 }
 0x6cd   : > { %v4737_v62 = vadd.f32 %v4736_v47, %v4648_v44  ;;  %v4825_v0 = vpop.f32.mrf.mxu3  ;;  %v4562_v32 = vadd.f32 %v4561_v9, %v13054_v6  ;;  %v4650_v48 = vpop.f32.mrf.mxu1  ;;  %v14874_v47 = vld [vmem:[#allocation97_spill] sm:$0xff] }
 0x6ce   : > { %v10739_v9 = vld [vmem:[%s11346_s6 + $0x1f4] sm:$0xf0] }
 0x6cf   : > { %v4826_v18 = vadd.f32 %v4825_v0, %v4737_v62  ;;  %v4651_v58 = vadd.f32 %v4650_v48, %v4562_v32  ;;  %6221 = vmatmul.bf16.gmra.mxu0 %v13359_v21  ;;  %v9724_v0 = vld [vmem:[%s11346_s6 + $0x1e0] sm:$0xf]  ;;  %v10736_v32 = vld [vmem:[%s11346_s6 + $0x1e4] sm:$0xf]  ;;  %v9726_v48 = vld [vmem:[%s11346_s6 + $0x1f8] sm:$0xf0] }
 0x6d0   : > { %6310 = vmatmul.bf16.gmra.mxu1 %v13361_v59 }
 0x6d1   : > { %v13370_v44 = vadd.f32 %v4826_v18, %v14872_v57  ;;  %6399 = vmatmul.bf16.gmra.mxu2 %v13363_v3  ;;  %v9732_v18 = vld [vmem:[%s11346_s6 + $0x1e8] sm:$0xf]  ;;  %v10740_v57 = vld [vmem:[%s11346_s6 + $0x1fc] sm:$0xf0] }
 0x6d2   : > { %6488 = vmatmul.bf16.gmra.mxu3 %v13366_v14 }
 0x6d3   : > { %14873 = vst [vmem:[#allocation29_spill] sm:$0xff] %v13370_v44  ;;  %v10737_v44 = vld [vmem:[%s11346_s6 + $0x1ec] sm:$0xf] }
 0x6d4   : > { %v4739_v6 = vpop.f32.mrf.mxu2  ;;  %v4563_v45 = vpop.f32.mrf.mxu0 }
 0x6d5   : > { %v4740_v27 = vadd.f32 %v4739_v6, %v4651_v58  ;;  %v4828_v35 = vpop.f32.mrf.mxu3  ;;  %v4564_v37 = vadd.f32 %v4563_v45, %v13060_v17  ;;  %v4652_v7 = vpop.f32.mrf.mxu1  ;;  %v13387_v58 = vor.u32 %v10739_v9, %v9724_v0  ;;  %v13389_v45 = vor.u32 %v10736_v32, %v9726_v48  ;;  %v10188_v0 = vld [vmem:[#allocation6 + $0x820] sm:$0xf]  ;;  %v10853_v32 = vld [vmem:[#allocation6 + $0x824] sm:$0xf0] }
 0x6d6   : > { %v10189_v48 = vor.u32 %v10853_v32, %v10188_v0  ;;  %v9748_v32 = vld [vmem:[%s11346_s6 + $0x210] sm:$0xf] }
 0x6d7   : > { %v4829_v55 = vadd.f32 %v4828_v35, %v4740_v27  ;;  %v4653_v5 = vadd.f32 %v4652_v7, %v4564_v37  ;;  %v13391_v27 = vor.u32 %v10740_v57, %v9732_v18  ;;  %v13393_v37 = vor.u32 %v10737_v44, %v9734_v60  ;;  %v10804_v60 = vld [vmem:[#allocation6 + $0x6a4] sm:$0xf]  ;;  %v9998_v44 = vld [vmem:[#allocation6 + $0x6a8] sm:$0xf0] }
 0x6d8   : > { %v10001_v18 = vor.u32 %v10804_v60, %v9998_v44  ;;  %6539 = vmatpush.bf16.msrb.mxu0 %v10189_v48  ;;  %v10745_v60 = vld [vmem:[%s11346_s6 + $0x224] sm:$0xf0]  ;;  %v10742_v44 = vld [vmem:[%s11346_s6 + $0x214] sm:$0xf] }
 0x6d9   : > { %v13377_v62 = vadd.f32 %v4829_v55, %v14874_v47  ;;  %14876 = vst [vmem:[#allocation30_spill] sm:$0xff] %v13391_v27  ;;  %v14878_v47 = vld [vmem:[#allocation100_spill] sm:$0xff]  ;;  %v13412_v23 = vor.u32 %v10745_v60, %v9748_v32 }
 0x6da   : > { %14877 = vst [vmem:[#allocation107_spill] sm:$0xff] %v13393_v37  ;;  %6806 = vmatpush.bf16.msrb.mxu3 %v10001_v18 }
 0x6db   : > { %14875 = vst [vmem:[#allocation106_spill] sm:$0xff] %v13377_v62 }
 0x6dc   : > { %v4741_v4 = vpop.f32.mrf.mxu2  ;;  %v6187_v17 = vpop.f32.mrf.mxu0 }
 0x6dd   : > { %v4742_v6 = vadd.f32 %v4741_v4, %v4653_v5  ;;  %v4830_v39 = vpop.f32.mrf.mxu3  ;;  %v6276_v35 = vpop.f32.mrf.mxu1  ;;  %v10788_v4 = vld [vmem:[#allocation6 + $0x624] sm:$0xf]  ;;  %v9934_v5 = vld [vmem:[#allocation6 + $0x628] sm:$0xf0] }
 0x6de   : > { %v6277_v55 = vadd.f32 %v6276_v35, %v6187_v17  ;;  %v9937_v9 = vor.u32 %v10788_v4, %v9934_v5  ;;  %v10252_v4 = vld [vmem:[#allocation6 + $0x8a0] sm:$0xf]  ;;  %v10869_v5 = vld [vmem:[#allocation6 + $0x8a4] sm:$0xf0] }
 0x6df   : > { %v4831_v7 = vadd.f32 %v4830_v39, %v4742_v6  ;;  %6226 = vmatmul.bf16.gmra.mxu0 %v13387_v58  ;;  %v10253_v0 = vor.u32 %v10869_v5, %v10252_v4 }
 0x6e0   : > { %6315 = vmatmul.bf16.gmra.mxu1 %v13389_v45  ;;  %6717 = vmatpush.bf16.msrb.mxu2 %v9937_v9  ;;  %v9758_v9 = vld [vmem:[%s11346_s6 + $0x230] sm:$0xf0] }
 0x6e1   : > { %v13397_v62 = vadd.f32 %v4831_v7, %v14878_v47  ;;  %6404 = vmatmul.bf16.gmra.mxu2 %v13391_v27  ;;  %6628 = vmatpush.bf16.msrb.mxu1 %v10253_v0  ;;  %v13418_v4 = vor.u32 %v10743_v42, %v9758_v9  ;;  %v10748_v9 = vld [vmem:[%s11346_s6 + $0x244] sm:$0xf] }
 0x6e2   : > { %6493 = vmatmul.bf16.gmra.mxu3 %v13393_v37  ;;  %v9830_v27 = vld [vmem:[%s11346_s6 + $0x2c0] sm:$0xf0] }
 0x6e3   : > { %14879 = vst [vmem:[#allocation66_spill] sm:$0xff] %v13397_v62  ;;  %v10746_v62 = vld [vmem:[%s11346_s6 + $0x22c] sm:$0xf0] }
 0x6e4   : > { %v6365_v39 = vpop.f32.mrf.mxu2  ;;  %v6189_v17 = vpop.f32.mrf.mxu0  ;;  %14881 = vst [vmem:[#allocation31_spill] sm:$0xff] %v13418_v4 }
 0x6e5   : > { %v6366_v57 = vadd.f32 %v6365_v39, %v6277_v55  ;;  %v6454_v6 = vpop.f32.mrf.mxu3  ;;  %v6278_v35 = vpop.f32.mrf.mxu1  ;;  %v9750_v55 = vld [vmem:[%s11346_s6 + $0x228] sm:$0xf0]  ;;  %v9756_v39 = vld [vmem:[%s11346_s6 + $0x218] sm:$0xf] }
 0x6e6   : > { %v6279_v47 = vadd.f32 %v6278_v35, %v6189_v17  ;;  %v13416_v17 = vor.u32 %v10746_v62, %v9756_v39  ;;  %v10751_v39 = vld [vmem:[%s11346_s6 + $0x254] sm:$0xf0] }
 0x6e7   : > { %v13402_v7 = vadd.f32 %v6454_v6, %v6366_v57  ;;  %v13414_v6 = vor.u32 %v10742_v44, %v9750_v55  ;;  %v9772_v55 = vld [vmem:[%s11346_s6 + $0x240] sm:$0xf] }
 0x6e8   : > { %14880 = vst [vmem:[#allocation108_spill] sm:$0xff] %v13416_v17  ;;  %v13436_v61 = vor.u32 %v10751_v39, %v9772_v55  ;;  %v10180_v55 = vld [vmem:[#allocation6 + $0x810] sm:$0xf] }
 0x6ec   : > { %v6367_v11 = vpop.f32.mrf.mxu2  ;;  %v6192_v57 = vpop.f32.mrf.mxu0 }
 0x6ed   : > { %v6368_v48 = vadd.f32 %v6367_v11, %v6279_v47  ;;  %v6456_v18 = vpop.f32.mrf.mxu3  ;;  %v6281_v35 = vpop.f32.mrf.mxu1 }
 0x6ee   : > { %v6282_v0 = vadd.f32 %v6281_v35, %v6192_v57  ;;  %v10752_v57 = vld [vmem:[%s11346_s6 + $0x25c] sm:$0xf0]  ;;  %v10749_v35 = vld [vmem:[%s11346_s6 + $0x24c] sm:$0xf] }
 0x6ef   : > { %v13420_v5 = vadd.f32 %v6456_v18, %v6368_v48  ;;  %6231 = vmatmul.bf16.gmra.mxu0 %v13412_v23  ;;  %v9774_v48 = vld [vmem:[%s11346_s6 + $0x258] sm:$0xf0]  ;;  %v9780_v18 = vld [vmem:[%s11346_s6 + $0x248] sm:$0xf] }
 0x6f0   : > { %6320 = vmatmul.bf16.gmra.mxu1 %v13414_v6 }
 0x6f1   : > { %6409 = vmatmul.bf16.gmra.mxu2 %v13416_v17  ;;  %v10755_v17 = vld [vmem:[%s11346_s6 + $0x27c] sm:$0xf] }
 0x6f2   : > { %6498 = vmatmul.bf16.gmra.mxu3 %v13418_v4  ;;  %v13440_v4 = vor.u32 %v10752_v57, %v9780_v18  ;;  %v9990_v18 = vld [vmem:[#allocation6 + $0x698] sm:$0xf0] }
 0x6f4   : > { %v6370_v11 = vpop.f32.mrf.mxu2  ;;  %v6194_v47 = vpop.f32.mrf.mxu0  ;;  %14882 = vst [vmem:[#allocation109_spill] sm:$0xff] %v13440_v4 }
 0x6f5   : > { %v6371_v42 = vadd.f32 %v6370_v11, %v6282_v0  ;;  %v6459_v62 = vpop.f32.mrf.mxu3  ;;  %v6283_v32 = vpop.f32.mrf.mxu1  ;;  %v13438_v11 = vor.u32 %v10748_v9, %v9774_v48  ;;  %v10851_v9 = vld [vmem:[#allocation6 + $0x814] sm:$0xf0]  ;;  %v10802_v48 = vld [vmem:[#allocation6 + $0x694] sm:$0xf] }
 0x6f6   : > { %v6284_v44 = vadd.f32 %v6283_v32, %v6194_v47 }
 0x6f7   : > { %v13426_v60 = vadd.f32 %v6459_v62, %v6371_v42  ;;  %v13442_v62 = vor.u32 %v10749_v35, %v9782_v49 }
 0x6f9   : > { %14883 = vst [vmem:[#allocation32_spill] sm:$0xff] %v13442_v62 }
 0x6fc   : > { %v6372_v15 = vpop.f32.mrf.mxu2  ;;  %v6197_v0 = vpop.f32.mrf.mxu0 }
 0x6fd   : > { %v6373_v53 = vadd.f32 %v6372_v15, %v6284_v44  ;;  %v6461_v34 = vpop.f32.mrf.mxu3  ;;  %v6286_v42 = vpop.f32.mrf.mxu1  ;;  %v10786_v15 = vld [vmem:[#allocation6 + $0x614] sm:$0xf]  ;;  %v9926_v44 = vld [vmem:[#allocation6 + $0x618] sm:$0xf0] }
 0x6fe   : > { %v6287_v32 = vadd.f32 %v6286_v42, %v6197_v0  ;;  %v9929_v39 = vor.u32 %v10786_v15, %v9926_v44 }
 0x6ff   : > { %v13444_v47 = vadd.f32 %v6461_v34, %v6373_v53  ;;  %6236 = vmatmul.bf16.gmra.mxu0 %v13436_v61  ;;  %v10181_v34 = vor.u32 %v10851_v9, %v10180_v55  ;;  %v9993_v53 = vor.u32 %v10802_v48, %v9990_v18  ;;  %v9796_v9 = vld [vmem:[%s11346_s6 + $0x270] sm:$0xf]  ;;  %v10757_v48 = vld [vmem:[%s11346_s6 + $0x284] sm:$0xf0]  ;;  %v10754_v18 = vld [vmem:[%s11346_s6 + $0x274] sm:$0xf] }
 0x700   : > { %6325 = vmatmul.bf16.gmra.mxu1 %v13438_v11  ;;  %6718 = vmatpush.bf16.msrb.mxu2 %v9929_v39  ;;  %v9806_v39 = vld [vmem:[%s11346_s6 + $0x290] sm:$0xf0]  ;;  %v13460_v37 = vor.u32 %v10757_v48, %v9796_v9 }
 0x701   : > { %6414 = vmatmul.bf16.gmra.mxu2 %v13440_v4  ;;  %6540 = vmatpush.bf16.msrb.mxu0 %v10181_v34  ;;  %v10867_v4 = vld [vmem:[#allocation6 + $0x894] sm:$0xf0] }
 0x702   : > { %6503 = vmatmul.bf16.gmra.mxu3 %v13442_v62  ;;  %v10244_v62 = vld [vmem:[#allocation6 + $0x890] sm:$0xf] }
 0x703   : > { %6807 = vmatpush.bf16.msrb.mxu3 %v9993_v53  ;;  %v10245_v55 = vor.u32 %v10867_v4, %v10244_v62  ;;  %v13466_v62 = vor.u32 %v10755_v17, %v9806_v39  ;;  %v10760_v39 = vld [vmem:[%s11346_s6 + $0x2a4] sm:$0xf] }
 0x704   : > { %v6375_v49 = vpop.f32.mrf.mxu2  ;;  %v6199_v0 = vpop.f32.mrf.mxu0 }
 0x705   : > { %v6376_v57 = vadd.f32 %v6375_v49, %v6287_v32  ;;  %v6464_v35 = vpop.f32.mrf.mxu3  ;;  %v6288_v42 = vpop.f32.mrf.mxu1  ;;  %v9798_v32 = vld [vmem:[%s11346_s6 + $0x288] sm:$0xf0]  ;;  %v9804_v49 = vld [vmem:[%s11346_s6 + $0x278] sm:$0xf]  ;;  %6629 = vmatpush.bf16.msrb.mxu1 %v10245_v55  ;;  %14885 = vst [vmem:[#allocation64_spill] sm:$0xff] %v13466_v62 }
 0x706   : > { %v6289_v44 = vadd.f32 %v6288_v42, %v6199_v0  ;;  %v13464_v0 = vor.u32 %v10758_v51, %v9804_v49  ;;  %v10763_v49 = vld [vmem:[%s11346_s6 + $0x2b4] sm:$0xf0] }
 0x707   : > { %v13450_v15 = vadd.f32 %v6464_v35, %v6376_v57  ;;  %v13462_v35 = vor.u32 %v10754_v18, %v9798_v32  ;;  %v9820_v32 = vld [vmem:[%s11346_s6 + $0x2a0] sm:$0xf] }
 0x708   : > { %14884 = vst [vmem:[#allocation110_spill] sm:$0xff] %v13464_v0  ;;  %v13484_v14 = vor.u32 %v10763_v49, %v9820_v32  ;;  %v10172_v32 = vld [vmem:[#allocation6 + $0x800] sm:$0xf] }
 0x70c   : > { %v6377_v52 = vpop.f32.mrf.mxu2  ;;  %v6202_v57 = vpop.f32.mrf.mxu0 }
 0x70d   : > { %v6378_v34 = vadd.f32 %v6377_v52, %v6289_v44  ;;  %v6466_v53 = vpop.f32.mrf.mxu3  ;;  %v6291_v4 = vpop.f32.mrf.mxu1 }
 0x70e   : > { %v6292_v55 = vadd.f32 %v6291_v4, %v6202_v57  ;;  %v10764_v57 = vld [vmem:[%s11346_s6 + $0x2bc] sm:$0xf0]  ;;  %v10761_v4 = vld [vmem:[%s11346_s6 + $0x2ac] sm:$0xf] }
 0x70f   : > { %v13468_v42 = vadd.f32 %v6466_v53, %v6378_v34  ;;  %6241 = vmatmul.bf16.gmra.mxu0 %v13460_v37  ;;  %v9822_v34 = vld [vmem:[%s11346_s6 + $0x2b8] sm:$0xf0]  ;;  %v9828_v53 = vld [vmem:[%s11346_s6 + $0x2a8] sm:$0xf] }
 0x710   : > { %6330 = vmatmul.bf16.gmra.mxu1 %v13462_v35  ;;  %v13488_v30 = vor.u32 %v10764_v57, %v9828_v53  ;;  %v9982_v53 = vld [vmem:[#allocation6 + $0x688] sm:$0xf0] }
 0x711   : > { %6419 = vmatmul.bf16.gmra.mxu2 %v13464_v0 }
 0x712   : > { %6508 = vmatmul.bf16.gmra.mxu3 %v13466_v62  ;;  %14886 = vst [vmem:[#allocation111_spill] sm:$0xff] %v13488_v30 }
 0x714   : > { %v6380_v52 = vpop.f32.mrf.mxu2  ;;  %v6204_v44 = vpop.f32.mrf.mxu0 }
 0x715   : > { %v6381_v51 = vadd.f32 %v6380_v52, %v6292_v55  ;;  %v6469_v17 = vpop.f32.mrf.mxu3  ;;  %v6293_v9 = vpop.f32.mrf.mxu1  ;;  %v13486_v52 = vor.u32 %v10760_v39, %v9822_v34  ;;  %v10849_v39 = vld [vmem:[#allocation6 + $0x804] sm:$0xf0]  ;;  %v10800_v34 = vld [vmem:[#allocation6 + $0x684] sm:$0xf] }
 0x716   : > { %v6294_v18 = vadd.f32 %v6293_v9, %v6204_v44 }
 0x717   : > { %v13474_v48 = vadd.f32 %v6469_v17, %v6381_v51  ;;  %v13490_v17 = vor.u32 %v10761_v4, %v9830_v27 }
 0x719   : > { %14887 = vst [vmem:[#allocation65_spill] sm:$0xff] %v13490_v17 }
 0x71c   : > { %v6382_v0 = vpop.f32.mrf.mxu2  ;;  %v6207_v55 = vpop.f32.mrf.mxu0 }
 0x71d   : > { %v6383_v62 = vadd.f32 %v6382_v0, %v6294_v18  ;;  %v6471_v3 = vpop.f32.mrf.mxu3  ;;  %v6296_v51 = vpop.f32.mrf.mxu1  ;;  %v10784_v0 = vld [vmem:[#allocation6 + $0x604] sm:$0xf]  ;;  %v9918_v18 = vld [vmem:[#allocation6 + $0x608] sm:$0xf0] }
 0x71e   : > { %v6297_v9 = vadd.f32 %v6296_v51, %v6207_v55  ;;  %v9921_v49 = vor.u32 %v10784_v0, %v9918_v18 }
 0x71f   : > { %v13492_v44 = vadd.f32 %v6471_v3, %v6383_v62  ;;  %6246 = vmatmul.bf16.gmra.mxu0 %v13484_v14  ;;  %v10173_v3 = vor.u32 %v10849_v39, %v10172_v32  ;;  %v9985_v62 = vor.u32 %v10800_v34, %v9982_v53  ;;  %v9844_v39 = vld [vmem:[%s11346_s6 + $0x2d0] sm:$0xf]  ;;  %v10769_v34 = vld [vmem:[%s11346_s6 + $0x2e4] sm:$0xf0]  ;;  %v10766_v53 = vld [vmem:[%s11346_s6 + $0x2d4] sm:$0xf] }
 0x720   : > { %6335 = vmatmul.bf16.gmra.mxu1 %v13486_v52  ;;  %6719 = vmatpush.bf16.msrb.mxu2 %v9921_v49  ;;  %v9854_v49 = vld [vmem:[%s11346_s6 + $0x2f0] sm:$0xf0]  ;;  %v13508_v25 = vor.u32 %v10769_v34, %v9844_v39 }
 0x721   : > { %6424 = vmatmul.bf16.gmra.mxu2 %v13488_v30  ;;  %6541 = vmatpush.bf16.msrb.mxu0 %v10173_v3  ;;  %v10865_v30 = vld [vmem:[#allocation6 + $0x884] sm:$0xf0] }
 0x722   : > { %6513 = vmatmul.bf16.gmra.mxu3 %v13490_v17  ;;  %v10236_v17 = vld [vmem:[#allocation6 + $0x880] sm:$0xf] }
 0x723   : > { %6808 = vmatpush.bf16.msrb.mxu3 %v9985_v62  ;;  %v10237_v32 = vor.u32 %v10865_v30, %v10236_v17  ;;  %v13514_v17 = vor.u32 %v10767_v24, %v9854_v49  ;;  %v10772_v49 = vld [vmem:[%s11346_s6 + $0x304] sm:$0xf] }
 0x724   : > { %v6385_v27 = vpop.f32.mrf.mxu2  ;;  %v6209_v55 = vpop.f32.mrf.mxu0 }
 0x725   : > { %v6386_v57 = vadd.f32 %v6385_v27, %v6297_v9  ;;  %v6474_v4 = vpop.f32.mrf.mxu3  ;;  %v6298_v51 = vpop.f32.mrf.mxu1  ;;  %v9846_v9 = vld [vmem:[%s11346_s6 + $0x2e8] sm:$0xf0]  ;;  %v9852_v27 = vld [vmem:[%s11346_s6 + $0x2d8] sm:$0xf]  ;;  %6630 = vmatpush.bf16.msrb.mxu1 %v10237_v32  ;;  %14889 = vst [vmem:[#allocation33_spill] sm:$0xff] %v13514_v17 }
 0x726   : > { %v6299_v18 = vadd.f32 %v6298_v51, %v6209_v55  ;;  %v13512_v55 = vor.u32 %v10770_v2, %v9852_v27  ;;  %v10775_v27 = vld [vmem:[%s11346_s6 + $0x314] sm:$0xf0] }
 0x727   : > { %v13498_v0 = vadd.f32 %v6474_v4, %v6386_v57  ;;  %v13510_v4 = vor.u32 %v10766_v53, %v9846_v9  ;;  %v9868_v9 = vld [vmem:[%s11346_s6 + $0x300] sm:$0xf] }
 0x728   : > { %14888 = vst [vmem:[#allocation112_spill] sm:$0xff] %v13512_v55  ;;  %v13532_v40 = vor.u32 %v10775_v27, %v9868_v9  ;;  %v10830_v9 = vld [vmem:[#allocation6 + $0x774] sm:$0xf] }
 0x72c   : > { %v6387_v1 = vpop.f32.mrf.mxu2  ;;  %v6212_v57 = vpop.f32.mrf.mxu0 }
 0x72d   : > { %v6388_v3 = vadd.f32 %v6387_v1, %v6299_v18  ;;  %v6476_v62 = vpop.f32.mrf.mxu3  ;;  %v6301_v30 = vpop.f32.mrf.mxu1 }
 0x72e   : > { %v6302_v32 = vadd.f32 %v6301_v30, %v6212_v57  ;;  %v10776_v57 = vld [vmem:[%s11346_s6 + $0x31c] sm:$0xf0]  ;;  %v10773_v30 = vld [vmem:[%s11346_s6 + $0x30c] sm:$0xf] }
 0x72f   : > { %v13516_v51 = vadd.f32 %v6476_v62, %v6388_v3  ;;  %6251 = vmatmul.bf16.gmra.mxu0 %v13508_v25  ;;  %v9870_v3 = vld [vmem:[%s11346_s6 + $0x318] sm:$0xf0]  ;;  %v9876_v62 = vld [vmem:[%s11346_s6 + $0x308] sm:$0xf] }
 0x730   : > { %6340 = vmatmul.bf16.gmra.mxu1 %v13510_v4  ;;  %v13536_v20 = vor.u32 %v10776_v57, %v9876_v62  ;;  %v10294_v62 = vld [vmem:[#allocation6 + $0x8f8] sm:$0xf0] }
 0x731   : > { %6429 = vmatmul.bf16.gmra.mxu2 %v13512_v55 }
 0x732   : > { %6518 = vmatmul.bf16.gmra.mxu3 %v13514_v17  ;;  %14890 = vst [vmem:[#allocation115_spill] sm:$0xff] %v13536_v20 }
 0x734   : > { %v6390_v1 = vpop.f32.mrf.mxu2  ;;  %v6214_v18 = vpop.f32.mrf.mxu0 }
 0x735   : > { %v6391_v24 = vadd.f32 %v6390_v1, %v6302_v32  ;;  %v6479_v2 = vpop.f32.mrf.mxu3  ;;  %v6303_v39 = vpop.f32.mrf.mxu1  ;;  %v13534_v1 = vor.u32 %v10772_v49, %v9870_v3  ;;  %v10102_v49 = vld [vmem:[#allocation6 + $0x778] sm:$0xf0]  ;;  %v10878_v3 = vld [vmem:[#allocation6 + $0x8f4] sm:$0xf] }
 0x736   : > { %v6304_v53 = vadd.f32 %v6303_v39, %v6214_v18 }
 0x737   : > { %v13522_v34 = vadd.f32 %v6479_v2, %v6391_v24  ;;  %v13538_v2 = vor.u32 %v10773_v30, %v9878_v12 }
 0x739   : > { %14891 = vst [vmem:[#allocation34_spill] sm:$0xff] %v13538_v2 }
 0x73c   : > { %v6392_v55 = vpop.f32.mrf.mxu2  ;;  %v6217_v32 = vpop.f32.mrf.mxu0 }
 0x73d   : > { %v6393_v17 = vadd.f32 %v6392_v55, %v6304_v53  ;;  %v6481_v54 = vpop.f32.mrf.mxu3  ;;  %v6306_v24 = vpop.f32.mrf.mxu1  ;;  %v10862_v55 = vld [vmem:[#allocation6 + $0x874] sm:$0xf]  ;;  %v10230_v53 = vld [vmem:[#allocation6 + $0x878] sm:$0xf0] }
 0x73e   : > { %v6307_v39 = vadd.f32 %v6306_v24, %v6217_v32  ;;  %v10233_v27 = vor.u32 %v10862_v55, %v10230_v53 }
 0x73f   : > { %v13540_v18 = vadd.f32 %v6481_v54, %v6393_v17  ;;  %6256 = vmatmul.bf16.gmra.mxu0 %v13532_v40  ;;  %v10105_v54 = vor.u32 %v10830_v9, %v10102_v49  ;;  %v10297_v17 = vor.u32 %v10878_v3, %v10294_v62  ;;  %v9892_v49 = vld [vmem:[%s11346_s6 + $0x330] sm:$0xf]  ;;  %v10781_v3 = vld [vmem:[%s11346_s6 + $0x344] sm:$0xf0]  ;;  %v10778_v62 = vld [vmem:[%s11346_s6 + $0x334] sm:$0xf] }
 0x740   : > { %6345 = vmatmul.bf16.gmra.mxu1 %v13534_v1  ;;  %7068 = vmatpush.bf16.msra.mxu2 %v10233_v27  ;;  %v9902_v27 = vld [vmem:[%s11346_s6 + $0x350] sm:$0xf0]  ;;  %v13556_v28 = vor.u32 %v10781_v3, %v9892_v49 }
 0x741   : > { %6434 = vmatmul.bf16.gmra.mxu2 %v13536_v20  ;;  %6890 = vmatpush.bf16.msra.mxu0 %v10105_v54  ;;  %v10166_v20 = vld [vmem:[#allocation6 + $0x7f8] sm:$0xf0] }
 0x742   : > { %6523 = vmatmul.bf16.gmra.mxu3 %v13538_v2  ;;  %v10846_v2 = vld [vmem:[#allocation6 + $0x7f4] sm:$0xf]  ;;  %14892 = vst [vmem:[#allocation116_spill] sm:$0xff] %v13556_v28 }
 0x743   : > { %7157 = vmatpush.bf16.msra.mxu3 %v10297_v17  ;;  %v10169_v9 = vor.u32 %v10846_v2, %v10166_v20  ;;  %v13562_v2 = vor.u32 %v10779_v36, %v9902_v27  ;;  %v10690_v27 = vld [vmem:[%s11346_s6 + $0x74] sm:$0xf] }
 0x744   : > { %v6395_v12 = vpop.f32.mrf.mxu2  ;;  %v6219_v32 = vpop.f32.mrf.mxu0 }
 0x745   : > { %v6396_v57 = vadd.f32 %v6395_v12, %v6307_v39  ;;  %v6484_v30 = vpop.f32.mrf.mxu3  ;;  %v6308_v24 = vpop.f32.mrf.mxu1  ;;  %v9894_v39 = vld [vmem:[%s11346_s6 + $0x348] sm:$0xf0]  ;;  %v9900_v12 = vld [vmem:[%s11346_s6 + $0x338] sm:$0xf]  ;;  %6979 = vmatpush.bf16.msra.mxu1 %v10169_v9  ;;  %14895 = vst [vmem:[#allocation114_spill] sm:$0xff] %v13562_v2 }
 0x746   : > { %v6309_v53 = vadd.f32 %v6308_v24, %v6219_v32  ;;  %v13560_v32 = vor.u32 %v10782_v19, %v9900_v12  ;;  %v10693_v12 = vld [vmem:[%s11346_s6 + $0x84] sm:$0xf0] }
 0x747   : > { %v13546_v55 = vadd.f32 %v6484_v30, %v6396_v57  ;;  %v13558_v30 = vor.u32 %v10778_v62, %v9894_v39  ;;  %v9548_v39 = vld [vmem:[%s11346_s6 + $0x70] sm:$0xf] }
 0x748   : > { %14894 = vst [vmem:[#allocation134_spill] sm:$0xff] %v13560_v32 }
 0x749   : > { %14893 = vst [vmem:[#allocation133_spill] sm:$0xff] %v13558_v30 }
 0x74c   : > { %v6397_v56 = vpop.f32.mrf.mxu2  ;;  %v6222_v57 = vpop.f32.mrf.mxu0 }
 0x74d   : > { %v6398_v54 = vadd.f32 %v6397_v56, %v6309_v53  ;;  %v6486_v17 = vpop.f32.mrf.mxu3  ;;  %v6311_v20 = vpop.f32.mrf.mxu1 }
 0x74e   : > { %v6312_v9 = vadd.f32 %v6311_v20, %v6222_v57  ;;  %v13576_v57 = vor.u32 %v10693_v12, %v9548_v39  ;;  %v10876_v39 = vld [vmem:[#allocation6 + $0x8e4] sm:$0xf]  ;;  %v10286_v12 = vld [vmem:[#allocation6 + $0x8e8] sm:$0xf0] }
 0x74f   : > { %v13564_v24 = vadd.f32 %v6486_v17, %v6398_v54  ;;  %6261 = vmatmul.bf16.gmra.mxu0 %v13556_v28  ;;  %v9550_v54 = vld [vmem:[%s11346_s6 + $0x88] sm:$0xf0]  ;;  %v10696_v28 = vld [vmem:[%s11346_s6 + $0xa4] sm:$0xf] }
 0x750   : > { %6350 = vmatmul.bf16.gmra.mxu1 %v13558_v30  ;;  %14896 = vst [vmem:[#allocation67_spill] sm:$0xff] %v13576_v57  ;;  %v13578_v30 = vor.u32 %v10690_v27, %v9550_v54 }
 0x751   : > { %6439 = vmatmul.bf16.gmra.mxu2 %v13560_v32 }
 0x752   : > { %6528 = vmatmul.bf16.gmra.mxu3 %v13562_v2  ;;  %14897 = vst [vmem:[#allocation68_spill] sm:$0xff] %v13578_v30 }
 0x754   : > { %v6400_v56 = vpop.f32.mrf.mxu2  ;;  %v6224_v49 = vpop.f32.mrf.mxu0 }
 0x755   : > { %v6401_v19 = vadd.f32 %v6400_v56, %v6312_v9  ;;  %v6489_v53 = vpop.f32.mrf.mxu3  ;;  %v6313_v3 = vpop.f32.mrf.mxu1 }
 0x756   : > { %v6314_v62 = vadd.f32 %v6313_v3, %v6224_v49  ;;  %v10828_v49 = vld [vmem:[#allocation6 + $0x764] sm:$0xf] }
 0x757   : > { %v13570_v36 = vadd.f32 %v6489_v53, %v6401_v19  ;;  %v10860_v19 = vld [vmem:[#allocation6 + $0x864] sm:$0xf]  ;;  %v10222_v53 = vld [vmem:[#allocation6 + $0x868] sm:$0xf0] }
 0x758   : > { %v10225_v3 = vor.u32 %v10860_v19, %v10222_v53  ;;  %v10844_v19 = vld [vmem:[#allocation6 + $0x7e4] sm:$0xf]  ;;  %v10158_v53 = vld [vmem:[#allocation6 + $0x7e8] sm:$0xf0] }
 0x75a   : > { %7069 = vmatpush.bf16.msra.mxu2 %v10225_v3 }
 0x75c   : > { %v6402_v17 = vpop.f32.mrf.mxu2  ;;  %v6227_v32 = vpop.f32.mrf.mxu0 }
 0x75d   : > { %v6403_v20 = vadd.f32 %v6402_v17, %v6314_v62  ;;  %v6491_v31 = vpop.f32.mrf.mxu3  ;;  %v6316_v2 = vpop.f32.mrf.mxu1  ;;  %v10094_v62 = vld [vmem:[#allocation6 + $0x768] sm:$0xf0] }
 0x75e   : > { %v6317_v56 = vadd.f32 %v6316_v2, %v6227_v32  ;;  %v10289_v32 = vor.u32 %v10876_v39, %v10286_v12 }
 0x75f   : > { %v13580_v9 = vadd.f32 %v6491_v31, %v6403_v20  ;;  %6542 = vmatmul.bf16.vlgmr.msrb.gmra.mxu0 %v13576_v57  ;;  %v10097_v31 = vor.u32 %v10828_v49, %v10094_v62  ;;  %v9572_v57 = vld [vmem:[%s11346_s6 + $0xa0] sm:$0xf]  ;;  %v9574_v49 = vld [vmem:[%s11346_s6 + $0xb8] sm:$0xf0] }
 0x760   : > { %6631 = vmatmul.bf16.vlgmr.msrb.gmra.mxu1 %v13578_v30  ;;  %7158 = vmatpush.bf16.msra.mxu3 %v10289_v32  ;;  %v10161_v30 = vor.u32 %v10844_v19, %v10158_v53  ;;  %v10705_v19 = vld [vmem:[%s11346_s6 + $0xe4] sm:$0xf0]  ;;  %v10702_v53 = vld [vmem:[%s11346_s6 + $0xd4] sm:$0xf] }
 0x761   : > { %14898 = vst [vmem:[#allocation37_spill] sm:$0xff] %v13580_v9  ;;  %6720 = vmatmul.bf16.vlgmr.msrb.gmra.mxu2 %v13163_v22  ;;  %6891 = vmatpush.bf16.msra.mxu0 %v10097_v31  ;;  %v10699_v9 = vld [vmem:[%s11346_s6 + $0xb4] sm:$0xf0] }
 0x762   : > { %6809 = vmatmul.bf16.vlgmr.msrb.gmra.mxu3 %v13165_v10  ;;  %6980 = vmatpush.bf16.msra.mxu1 %v10161_v30  ;;  %v13592_v39 = vor.u32 %v10699_v9, %v9572_v57 }
 0x764   : > { %v6405_v27 = vpop.f32.mrf.mxu2  ;;  %v6229_v17 = vpop.f32.mrf.mxu0 }
 0x765   : > { %v6406_v2 = vadd.f32 %v6405_v27, %v6317_v56  ;;  %v6494_v54 = vpop.f32.mrf.mxu3  ;;  %v6318_v22 = vpop.f32.mrf.mxu1  ;;  %v13594_v27 = vor.u32 %v10696_v28, %v9574_v49  ;;  %v9598_v49 = vld [vmem:[%s11346_s6 + $0xe8] sm:$0xf0] }
 0x766   : > { %v6319_v20 = vadd.f32 %v6318_v22, %v6229_v17 }
 0x767   : > { %v13586_v10 = vadd.f32 %v6494_v54, %v6406_v2  ;;  %14899 = vst [vmem:[#allocation40_spill] sm:$0xff] %v13594_v27 }
 0x76c   : > { %v6407_v62 = vpop.f32.mrf.mxu2  ;;  %v6232_v3 = vpop.f32.mrf.mxu0 }
 0x76d   : > { %v6408_v56 = vadd.f32 %v6407_v62, %v6319_v20  ;;  %v6496_v12 = vpop.f32.mrf.mxu3  ;;  %v6321_v31 = vpop.f32.mrf.mxu1  ;;  %v9596_v20 = vld [vmem:[%s11346_s6 + $0xd0] sm:$0xf] }
 0x76e   : > { %v6322_v2 = vadd.f32 %v6321_v31, %v6232_v3  ;;  %v13610_v31 = vor.u32 %v10702_v53, %v9598_v49 }
 0x76f   : > { %v13596_v32 = vadd.f32 %v6496_v12, %v6408_v56  ;;  %6547 = vmatmul.bf16.gmra.mxu0 %v13592_v39  ;;  %v13608_v56 = vor.u32 %v10705_v19, %v9596_v20  ;;  %v10874_v20 = vld [vmem:[#allocation6 + $0x8d4] sm:$0xf]  ;;  %v10278_v19 = vld [vmem:[#allocation6 + $0x8d8] sm:$0xf0] }
 0x770   : > { %6636 = vmatmul.bf16.gmra.mxu1 %v13594_v27  ;;  %14901 = vst [vmem:[#allocation44_spill] sm:$0xff] %v13610_v31  ;;  %v10708_v27 = vld [vmem:[%s11346_s6 + $0x104] sm:$0xf] }
 0x771   : > { %6725 = vmatmul.bf16.gmra.mxu2 %v13191_v63  ;;  %14900 = vst [vmem:[#allocation41_spill] sm:$0xff] %v13608_v56 }
 0x772   : > { %6814 = vmatmul.bf16.gmra.mxu3 %v13193_v43 }
 0x774   : > { %v6410_v30 = vpop.f32.mrf.mxu2  ;;  %v6234_v28 = vpop.f32.mrf.mxu0 }
 0x775   : > { %v6411_v57 = vadd.f32 %v6410_v30, %v6322_v2  ;;  %v6499_v9 = vpop.f32.mrf.mxu3  ;;  %v6323_v54 = vpop.f32.mrf.mxu1 }
 0x776   : > { %v6324_v22 = vadd.f32 %v6323_v54, %v6234_v28  ;;  %v10826_v28 = vld [vmem:[#allocation6 + $0x754] sm:$0xf] }
 0x777   : > { %v13602_v17 = vadd.f32 %v6499_v9, %v6411_v57  ;;  %v10858_v57 = vld [vmem:[#allocation6 + $0x854] sm:$0xf]  ;;  %v10214_v9 = vld [vmem:[#allocation6 + $0x858] sm:$0xf0] }
 0x778   : > { %v10217_v54 = vor.u32 %v10858_v57, %v10214_v9  ;;  %v10842_v57 = vld [vmem:[#allocation6 + $0x7d4] sm:$0xf]  ;;  %v10150_v9 = vld [vmem:[#allocation6 + $0x7d8] sm:$0xf0] }
 0x77a   : > { %7070 = vmatpush.bf16.msra.mxu2 %v10217_v54 }
 0x77c   : > { %v6412_v62 = vpop.f32.mrf.mxu2  ;;  %v6237_v63 = vpop.f32.mrf.mxu0 }
 0x77d   : > { %v6413_v12 = vadd.f32 %v6412_v62, %v6324_v22  ;;  %v6501_v3 = vpop.f32.mrf.mxu3  ;;  %v6326_v43 = vpop.f32.mrf.mxu1  ;;  %v10086_v22 = vld [vmem:[#allocation6 + $0x758] sm:$0xf0]  ;;  %v10281_v62 = vor.u32 %v10874_v20, %v10278_v19 }
 0x77e   : > { %v6327_v30 = vadd.f32 %v6326_v43, %v6237_v63  ;;  %v10089_v49 = vor.u32 %v10826_v28, %v10086_v22  ;;  %v9622_v28 = vld [vmem:[%s11346_s6 + $0x118] sm:$0xf0] }
 0x77f   : > { %v13612_v2 = vadd.f32 %v6501_v3, %v6413_v12  ;;  %6552 = vmatmul.bf16.gmra.mxu0 %v13608_v56  ;;  %7159 = vmatpush.bf16.msra.mxu3 %v10281_v62  ;;  %v9620_v56 = vld [vmem:[%s11346_s6 + $0x100] sm:$0xf] }
 0x780   : > { %6641 = vmatmul.bf16.gmra.mxu1 %v13610_v31  ;;  %6892 = vmatpush.bf16.msra.mxu0 %v10089_v49  ;;  %v10153_v31 = vor.u32 %v10842_v57, %v10150_v9  ;;  %v10717_v57 = vld [vmem:[%s11346_s6 + $0x144] sm:$0xf0]  ;;  %v10714_v9 = vld [vmem:[%s11346_s6 + $0x134] sm:$0xf] }
 0x781   : > { %14902 = vst [vmem:[#allocation45_spill] sm:$0xff] %v13612_v2  ;;  %6730 = vmatmul.bf16.gmra.mxu2 %v13219_v26  ;;  %v10711_v2 = vld [vmem:[%s11346_s6 + $0x114] sm:$0xf0] }
 0x782   : > { %6819 = vmatmul.bf16.gmra.mxu3 %v13221_v38  ;;  %6981 = vmatpush.bf16.msra.mxu1 %v10153_v31  ;;  %v13624_v20 = vor.u32 %v10711_v2, %v9620_v56 }
 0x784   : > { %v6415_v53 = vpop.f32.mrf.mxu2  ;;  %v6239_v63 = vpop.f32.mrf.mxu0 }
 0x785   : > { %v6416_v12 = vadd.f32 %v6415_v53, %v6327_v30  ;;  %v6504_v3 = vpop.f32.mrf.mxu3  ;;  %v6328_v26 = vpop.f32.mrf.mxu1  ;;  %v13626_v53 = vor.u32 %v10708_v27, %v9622_v28  ;;  %v9646_v28 = vld [vmem:[%s11346_s6 + $0x148] sm:$0xf0] }
 0x786   : > { %v6329_v43 = vadd.f32 %v6328_v26, %v6239_v63 }
 0x787   : > { %v13618_v38 = vadd.f32 %v6504_v3, %v6416_v12  ;;  %14903 = vst [vmem:[#allocation48_spill] sm:$0xff] %v13626_v53 }
 0x78c   : > { %v6417_v22 = vpop.f32.mrf.mxu2  ;;  %v6242_v54 = vpop.f32.mrf.mxu0 }
 0x78d   : > { %v6418_v30 = vadd.f32 %v6417_v22, %v6329_v43  ;;  %v6506_v19 = vpop.f32.mrf.mxu3  ;;  %v6331_v49 = vpop.f32.mrf.mxu1  ;;  %v9644_v43 = vld [vmem:[%s11346_s6 + $0x130] sm:$0xf] }
 0x78e   : > { %v6332_v12 = vadd.f32 %v6331_v49, %v6242_v54  ;;  %v13642_v49 = vor.u32 %v10714_v9, %v9646_v28 }
 0x78f   : > { %v13628_v62 = vadd.f32 %v6506_v19, %v6418_v30  ;;  %6557 = vmatmul.bf16.gmra.mxu0 %v13624_v20  ;;  %v13640_v30 = vor.u32 %v10717_v57, %v9644_v43  ;;  %v10872_v43 = vld [vmem:[#allocation6 + $0x8c4] sm:$0xf]  ;;  %v10270_v57 = vld [vmem:[#allocation6 + $0x8c8] sm:$0xf0] }
 0x790   : > { %6646 = vmatmul.bf16.gmra.mxu1 %v13626_v53  ;;  %14905 = vst [vmem:[#allocation84_spill] sm:$0xff] %v13642_v49  ;;  %v10720_v53 = vld [vmem:[%s11346_s6 + $0x164] sm:$0xf] }
 0x791   : > { %6735 = vmatmul.bf16.gmra.mxu2 %v13247_v8  ;;  %14904 = vst [vmem:[#allocation51_spill] sm:$0xff] %v13640_v30 }
 0x792   : > { %6824 = vmatmul.bf16.gmra.mxu3 %v13249_v50 }
 0x794   : > { %v6420_v56 = vpop.f32.mrf.mxu2  ;;  %v6244_v27 = vpop.f32.mrf.mxu0 }
 0x795   : > { %v6421_v31 = vadd.f32 %v6420_v56, %v6332_v12  ;;  %v6509_v2 = vpop.f32.mrf.mxu3  ;;  %v6333_v3 = vpop.f32.mrf.mxu1 }
 0x796   : > { %v6334_v26 = vadd.f32 %v6333_v3, %v6244_v27  ;;  %v10824_v27 = vld [vmem:[#allocation6 + $0x744] sm:$0xf] }
 0x797   : > { %v13634_v63 = vadd.f32 %v6509_v2, %v6421_v31  ;;  %v10856_v31 = vld [vmem:[#allocation6 + $0x844] sm:$0xf]  ;;  %v10206_v2 = vld [vmem:[#allocation6 + $0x848] sm:$0xf0] }
 0x798   : > { %v10209_v3 = vor.u32 %v10856_v31, %v10206_v2  ;;  %v10840_v31 = vld [vmem:[#allocation6 + $0x7c4] sm:$0xf]  ;;  %v10142_v2 = vld [vmem:[#allocation6 + $0x7c8] sm:$0xf0] }
 0x79a   : > { %7071 = vmatpush.bf16.msra.mxu2 %v10209_v3 }
 0x79c   : > { %v6422_v22 = vpop.f32.mrf.mxu2  ;;  %v6247_v8 = vpop.f32.mrf.mxu0 }
 0x79d   : > { %v6423_v19 = vadd.f32 %v6422_v22, %v6334_v26  ;;  %v6511_v54 = vpop.f32.mrf.mxu3  ;;  %v6336_v50 = vpop.f32.mrf.mxu1  ;;  %v10078_v26 = vld [vmem:[#allocation6 + $0x748] sm:$0xf0]  ;;  %v10273_v22 = vor.u32 %v10872_v43, %v10270_v57 }
 0x79e   : > { %v6337_v56 = vadd.f32 %v6336_v50, %v6247_v8  ;;  %v10081_v28 = vor.u32 %v10824_v27, %v10078_v26  ;;  %v9670_v27 = vld [vmem:[%s11346_s6 + $0x178] sm:$0xf0] }
 0x79f   : > { %v13644_v12 = vadd.f32 %v6511_v54, %v6423_v19  ;;  %6562 = vmatmul.bf16.gmra.mxu0 %v13640_v30  ;;  %7160 = vmatpush.bf16.msra.mxu3 %v10273_v22  ;;  %v9668_v30 = vld [vmem:[%s11346_s6 + $0x160] sm:$0xf] }
 0x7a0   : > { %6651 = vmatmul.bf16.gmra.mxu1 %v13642_v49  ;;  %6893 = vmatpush.bf16.msra.mxu0 %v10081_v28  ;;  %v10145_v49 = vor.u32 %v10840_v31, %v10142_v2  ;;  %v10729_v31 = vld [vmem:[%s11346_s6 + $0x1a4] sm:$0xf0]  ;;  %v10726_v2 = vld [vmem:[%s11346_s6 + $0x194] sm:$0xf] }
 0x7a1   : > { %14906 = vst [vmem:[#allocation50_spill] sm:$0xff] %v13644_v12  ;;  %6740 = vmatmul.bf16.gmra.mxu2 %v13275_v29  ;;  %v10723_v12 = vld [vmem:[%s11346_s6 + $0x174] sm:$0xf0] }
 0x7a2   : > { %6829 = vmatmul.bf16.gmra.mxu3 %v13277_v41  ;;  %6982 = vmatpush.bf16.msra.mxu1 %v10145_v49  ;;  %v13656_v43 = vor.u32 %v10723_v12, %v9668_v30 }
 0x7a4   : > { %v6425_v9 = vpop.f32.mrf.mxu2  ;;  %v6249_v8 = vpop.f32.mrf.mxu0  ;;  %14907 = vst [vmem:[#allocation88_spill] sm:$0xff] %v13656_v43 }
 0x7a5   : > { %v6426_v19 = vadd.f32 %v6425_v9, %v6337_v56  ;;  %v6514_v54 = vpop.f32.mrf.mxu3  ;;  %v6338_v29 = vpop.f32.mrf.mxu1  ;;  %v13658_v9 = vor.u32 %v10720_v53, %v9670_v27  ;;  %v9694_v27 = vld [vmem:[%s11346_s6 + $0x1a8] sm:$0xf0] }
 0x7a6   : > { %v6339_v50 = vadd.f32 %v6338_v29, %v6249_v8 }
 0x7a7   : > { %v13650_v41 = vadd.f32 %v6514_v54, %v6426_v19  ;;  %14908 = vst [vmem:[#allocation89_spill] sm:$0xff] %v13658_v9 }
 0x7ac   : > { %v6427_v26 = vpop.f32.mrf.mxu2  ;;  %v6252_v3 = vpop.f32.mrf.mxu0 }
 0x7ad   : > { %v6428_v56 = vadd.f32 %v6427_v26, %v6339_v50  ;;  %v6516_v57 = vpop.f32.mrf.mxu3  ;;  %v6341_v28 = vpop.f32.mrf.mxu1  ;;  %v9692_v50 = vld [vmem:[%s11346_s6 + $0x190] sm:$0xf] }
 0x7ae   : > { %v6342_v19 = vadd.f32 %v6341_v28, %v6252_v3 }
 0x7af   : > { %v13660_v22 = vadd.f32 %v6516_v57, %v6428_v56  ;;  %6567 = vmatmul.bf16.gmra.mxu0 %v13656_v43  ;;  %v13672_v56 = vor.u32 %v10729_v31, %v9692_v50  ;;  %v10838_v43 = vld [vmem:[#allocation6 + $0x7b4] sm:$0xf] }
 0x7b0   : > { %6656 = vmatmul.bf16.gmra.mxu1 %v13658_v9 }
 0x7b1   : > { %14909 = vst [vmem:[#allocation92_spill] sm:$0xff] %v13660_v22  ;;  %6745 = vmatmul.bf16.gmra.mxu2 %v13303_v13 }
 0x7b2   : > { %6834 = vmatmul.bf16.gmra.mxu3 %v13305_v33  ;;  %14911 = vst [vmem:[#allocation96_spill] sm:$0xff] %v13672_v56  ;;  %v13674_v33 = vor.u32 %v10726_v2, %v9694_v27  ;;  %v9716_v2 = vld [vmem:[%s11346_s6 + $0x1c0] sm:$0xf]  ;;  %v10735_v27 = vld [vmem:[%s11346_s6 + $0x1d4] sm:$0xf0] }
 0x7b3   : > { %v13688_v9 = vor.u32 %v10735_v27, %v9716_v2 }
 0x7b4   : > { %v6430_v30 = vpop.f32.mrf.mxu2  ;;  %v6254_v53 = vpop.f32.mrf.mxu0  ;;  %14912 = vst [vmem:[#allocation97_spill] sm:$0xff] %v13674_v33 }
 0x7b5   : > { %v6431_v49 = vadd.f32 %v6430_v30, %v6342_v19  ;;  %v6519_v12 = vpop.f32.mrf.mxu3  ;;  %v6343_v54 = vpop.f32.mrf.mxu1 }
 0x7b6   : > { %v6344_v29 = vadd.f32 %v6343_v54, %v6254_v53 }
 0x7b7   : > { %v13666_v8 = vadd.f32 %v6519_v12, %v6431_v49 }
 0x7b9   : > { %14910 = vst [vmem:[#allocation93_spill] sm:$0xff] %v13666_v8 }
 0x7bc   : > { %v6432_v26 = vpop.f32.mrf.mxu2  ;;  %v6257_v13 = vpop.f32.mrf.mxu0 }
 0x7bd   : > { %v6433_v57 = vadd.f32 %v6432_v26, %v6344_v29  ;;  %v6521_v3 = vpop.f32.mrf.mxu3  ;;  %v6346_v28 = vpop.f32.mrf.mxu1  ;;  %v10732_v26 = vld [vmem:[%s11346_s6 + $0x1c4] sm:$0xf] }
 0x7be   : > { %v6347_v30 = vadd.f32 %v6346_v28, %v6257_v13  ;;  %v10198_v13 = vld [vmem:[#allocation6 + $0x838] sm:$0xf0]  ;;  %v10822_v28 = vld [vmem:[#allocation6 + $0x734] sm:$0xf] }
 0x7bf   : > { %v13676_v19 = vadd.f32 %v6521_v3, %v6433_v57  ;;  %6572 = vmatmul.bf16.gmra.mxu0 %v13672_v56  ;;  %v9718_v57 = vld [vmem:[%s11346_s6 + $0x1d8] sm:$0xf0]  ;;  %v10854_v3 = vld [vmem:[#allocation6 + $0x834] sm:$0xf] }
 0x7c0   : > { %6661 = vmatmul.bf16.gmra.mxu1 %v13674_v33  ;;  %v10201_v33 = vor.u32 %v10854_v3, %v10198_v13  ;;  %v10070_v56 = vld [vmem:[#allocation6 + $0x738] sm:$0xf0]  ;;  %v9742_v13 = vld [vmem:[%s11346_s6 + $0x208] sm:$0xf0] }
 0x7c1   : > { %14913 = vst [vmem:[#allocation100_spill] sm:$0xff] %v13676_v19  ;;  %6750 = vmatmul.bf16.gmra.mxu2 %v13331_v46  ;;  %v10870_v46 = vld [vmem:[#allocation6 + $0x8b4] sm:$0xf]  ;;  %v10262_v19 = vld [vmem:[#allocation6 + $0x8b8] sm:$0xf0] }
 0x7c2   : > { %6839 = vmatmul.bf16.gmra.mxu3 %v13333_v16  ;;  %7072 = vmatpush.bf16.msra.mxu2 %v10201_v33 }
 0x7c4   : > { %v6435_v49 = vpop.f32.mrf.mxu2  ;;  %v6259_v54 = vpop.f32.mrf.mxu0 }
 0x7c5   : > { %v6436_v12 = vadd.f32 %v6435_v49, %v6347_v30  ;;  %v6524_v53 = vpop.f32.mrf.mxu3  ;;  %v6348_v29 = vpop.f32.mrf.mxu1  ;;  %v10073_v30 = vor.u32 %v10822_v28, %v10070_v56  ;;  %v10265_v49 = vor.u32 %v10870_v46, %v10262_v19 }
 0x7c6   : > { %v6349_v31 = vadd.f32 %v6348_v29, %v6259_v54 }
 0x7c7   : > { %v13682_v50 = vadd.f32 %v6524_v53, %v6436_v12  ;;  %v10134_v12 = vld [vmem:[#allocation6 + $0x7b8] sm:$0xf0]  ;;  %6894 = vmatpush.bf16.msra.mxu0 %v10073_v30  ;;  %7161 = vmatpush.bf16.msra.mxu3 %v10265_v49 }
 0x7c8   : > { %v10137_v8 = vor.u32 %v10838_v43, %v10134_v12 }
 0x7c9   : > { %14914 = vst [vmem:[#allocation135_spill] sm:$0xff] %v13682_v50  ;;  %v13690_v50 = vor.u32 %v10732_v26, %v9718_v57  ;;  %v9740_v57 = vld [vmem:[%s11346_s6 + $0x1f0] sm:$0xf] }
 0x7ca   : > { %6983 = vmatpush.bf16.msra.mxu1 %v10137_v8  ;;  %v10738_v8 = vld [vmem:[%s11346_s6 + $0x1f4] sm:$0xf] }
 0x7cc   : > { %v6437_v16 = vpop.f32.mrf.mxu2  ;;  %v6262_v29 = vpop.f32.mrf.mxu0 }
 0x7cd   : > { %v6438_v53 = vadd.f32 %v6437_v16, %v6349_v31  ;;  %v6526_v54 = vpop.f32.mrf.mxu3  ;;  %v6351_v22 = vpop.f32.mrf.mxu1 }
 0x7ce   : > { %v6352_v2 = vadd.f32 %v6351_v22, %v6262_v29  ;;  %v10741_v22 = vld [vmem:[%s11346_s6 + $0x204] sm:$0xf0] }
 0x7cf   : > { %v13692_v3 = vadd.f32 %v6526_v54, %v6438_v53  ;;  %6577 = vmatmul.bf16.gmra.mxu0 %v13688_v9  ;;  %v13704_v46 = vor.u32 %v10741_v22, %v9740_v57  ;;  %v7630_v54 = vld [vmem:[#allocation8] sm:$0x3] }
 0x7d0   : > { %6666 = vmatmul.bf16.gmra.mxu1 %v13690_v50 }
 0x7d1   : > { %6755 = vmatmul.bf16.gmra.mxu2 %v13359_v21  ;;  %14915 = vst [vmem:[#allocation136_spill] sm:$0xff] %v13704_v46 }
 0x7d2   : > { %6844 = vmatmul.bf16.gmra.mxu3 %v13361_v59  ;;  %v13706_v59 = vor.u32 %v10738_v8, %v9742_v13 }
 0x7d4   : > { %v6440_v43 = vpop.f32.mrf.mxu2  ;;  %v6264_v19 = vpop.f32.mrf.mxu0  ;;  %14916 = vst [vmem:[#allocation137_spill] sm:$0xff] %v13706_v59 }
 0x7d5   : > { %v6441_v56 = vadd.f32 %v6440_v43, %v6352_v2  ;;  %v6529_v33 = vpop.f32.mrf.mxu3  ;;  %v6353_v31 = vpop.f32.mrf.mxu1  ;;  %v7438_v2 = vld [vmem:[%s11360_s28] sm:$0xff]  ;;  %v14918_v43 = vld [vmem:[#allocation69_spill] sm:$0xff] }
 0x7d6   : > { %v6354_v26 = vadd.f32 %v6353_v31, %v6264_v19 }
 0x7d7   : > { %v13698_v27 = vadd.f32 %v6529_v33, %v6441_v56  ;;  %v13716_v33 = vperm.slane %v7630_v54, 0 }
 0x7dc   : > { %v6442_v28 = vpop.f32.mrf.mxu2  ;;  %v6543_v30 = vpop.f32.mrf.mxu0 }
 0x7dd   : > { %v6443_v16 = vadd.f32 %v6442_v28, %v6354_v26  ;;  %v6531_v21 = vpop.f32.mrf.mxu3  ;;  %v6544_v49 = vadd.f32 %v6543_v30, %v13402_v7  ;;  %v6632_v12 = vpop.f32.mrf.mxu1  ;;  %v10747_v30 = vld [vmem:[%s11346_s6 + $0x234] sm:$0xf0] }
 0x7df   : > { %v13709_v53 = vadd.f32 %v6531_v21, %v6443_v16  ;;  %v6633_v29 = vadd.f32 %v6632_v12, %v6544_v49  ;;  %6582 = vmatmul.bf16.gmra.mxu0 %v13704_v46  ;;  %v7440_v16 = vld [vmem:[%s11360_s28 + $0x10] sm:$0xff]  ;;  %v9764_v21 = vld [vmem:[%s11346_s6 + $0x220] sm:$0xf]  ;;  %v10744_v49 = vld [vmem:[%s11346_s6 + $0x224] sm:$0xf] }
 0x7e0   : > { %6671 = vmatmul.bf16.gmra.mxu1 %v13706_v59  ;;  %v9766_v12 = vld [vmem:[%s11346_s6 + $0x238] sm:$0xf0]  ;;  %v10836_v59 = vld [vmem:[#allocation6 + $0x7a4] sm:$0xf]  ;;  %v10126_v46 = vld [vmem:[#allocation6 + $0x7a8] sm:$0xf0] }
 0x7e1   : > { %14917 = vst [vmem:[#allocation138_spill] sm:$0xff] %v13709_v53  ;;  %6760 = vmatmul.bf16.gmra.mxu2 %v13387_v58  ;;  %v7310_v56 = vadd.f32 %v6633_v29, %v14918_v43  ;;  %v10852_v29 = vld [vmem:[#allocation6 + $0x824] sm:$0xf]  ;;  %v13736_v53 = vor.u32 %v10744_v49, %v9766_v12 }
 0x7e2   : > { %6849 = vmatmul.bf16.gmra.mxu3 %v13389_v45  ;;  %v14920_v45 = vld [vmem:[#allocation70_spill] sm:$0xff]  ;;  %v10820_v43 = vld [vmem:[#allocation6 + $0x724] sm:$0xf] }
 0x7e3   : > { %v7566_v7 = vadd.f32 %v7438_v2, %v7310_v56  ;;  %v10190_v2 = vld [vmem:[#allocation6 + $0x828] sm:$0xf0] }
 0x7e4   : > { %v6721_v19 = vpop.f32.mrf.mxu2  ;;  %v6545_v26 = vpop.f32.mrf.mxu0  ;;  %v10193_v56 = vor.u32 %v10852_v29, %v10190_v2  ;;  %v7442_v2 = vld [vmem:[%s11360_s28 + $0x20] sm:$0xff] }
 0x7e5   : > { %v6810_v31 = vpop.f32.mrf.mxu3  ;;  %v7636_v57 = vadd.f32 %v13716_v33, %v7566_v7  ;;  %v6546_v58 = vadd.f32 %v6545_v26, %v13420_v5  ;;  %v6634_v8 = vpop.f32.mrf.mxu1  ;;  %v10062_v5 = vld [vmem:[#allocation6 + $0x728] sm:$0xf0]  ;;  %v10868_v7 = vld [vmem:[#allocation6 + $0x8a4] sm:$0xf] }
 0x7e6   : > { %v13720_v22 = vadd.f32 %v6810_v31, %v6721_v19  ;;  %v10254_v19 = vld [vmem:[#allocation6 + $0x8a8] sm:$0xf0]  ;;  %7073 = vmatpush.bf16.msra.mxu2 %v10193_v56 }
 0x7e7   : > { %v7700_v13 = vmul.f32 3.0, %v7636_v57  ;;  %v6635_v28 = vadd.f32 %v6634_v8, %v6546_v58  ;;  %v13734_v57 = vor.u32 %v10747_v30, %v9764_v21  ;;  %v10065_v58 = vor.u32 %v10820_v43, %v10062_v5 }
 0x7e8   : > { %14919 = vst [vmem:[#allocation69_spill] sm:$0xff] %v13720_v22  ;;  %v10257_v8 = vor.u32 %v10868_v7, %v10254_v19 }
 0x7e9   : > { %7764 = vst [vmem:[%s13730_s23] sm:$0xff] %v7700_v13  ;;  %v7312_v54 = vadd.f32 %v6635_v28, %v14920_v45  ;;  %v10129_v28 = vor.u32 %v10836_v59, %v10126_v46  ;;  %6895 = vmatpush.bf16.msra.mxu0 %v10065_v58  ;;  %v14921_v46 = vld [vmem:[#allocation71_spill] sm:$0xff] }
 0x7ea   : > { %7162 = vmatpush.bf16.msra.mxu3 %v10257_v8  ;;  %v10753_v58 = vld [vmem:[%s11346_s6 + $0x264] sm:$0xf0] }
 0x7eb   : > { %v7568_v31 = vadd.f32 %v7440_v16, %v7312_v54  ;;  %6984 = vmatpush.bf16.msra.mxu1 %v10129_v28  ;;  %v9790_v28 = vld [vmem:[%s11346_s6 + $0x268] sm:$0xf0] }
 0x7ec   : > { %v6723_v26 = vpop.f32.mrf.mxu2  ;;  %v6548_v13 = vpop.f32.mrf.mxu0 }
 0x7ed   : > { %v6812_v22 = vpop.f32.mrf.mxu3  ;;  %v7638_v45 = vadd.f32 %v13716_v33, %v7568_v31  ;;  %v6549_v16 = vadd.f32 %v6548_v13, %v13426_v60  ;;  %v6637_v21 = vpop.f32.mrf.mxu1  ;;  %v7444_v31 = vld [vmem:[%s11360_s28 + $0x30] sm:$0xff] }
 0x7ee   : > { %v13739_v29 = vadd.f32 %v6812_v22, %v6723_v26  ;;  %v9788_v26 = vld [vmem:[%s11346_s6 + $0x250] sm:$0xf]  ;;  %v10750_v13 = vld [vmem:[%s11346_s6 + $0x254] sm:$0xf] }
 0x7ef   : > { %v7702_v30 = vmul.f32 3.0, %v7638_v45  ;;  %v6638_v54 = vadd.f32 %v6637_v21, %v6549_v16  ;;  %6587 = vmatmul.bf16.gmra.mxu0 %v13734_v57  ;;  %v13760_v21 = vor.u32 %v10753_v58, %v9788_v26 }
 0x7f0   : > { %6676 = vmatmul.bf16.gmra.mxu1 %v13736_v53 }
 0x7f1   : > { %6765 = vmatmul.bf16.gmra.mxu2 %v13412_v23  ;;  %7766 = vst [vmem:[%s13730_s23 + $0x10] sm:$0xff] %v7702_v30  ;;  %v7314_v60 = vadd.f32 %v6638_v54, %v14921_v46 }
 0x7f2   : > { %6854 = vmatmul.bf16.gmra.mxu3 %v13414_v6  ;;  %v14922_v6 = vld [vmem:[#allocation72_spill] sm:$0xff] }
 0x7f3   : > { %v7570_v59 = vadd.f32 %v7442_v2, %v7314_v60 }
 0x7f4   : > { %v6726_v22 = vpop.f32.mrf.mxu2  ;;  %v6550_v12 = vpop.f32.mrf.mxu0 }
 0x7f5   : > { %v6815_v49 = vpop.f32.mrf.mxu3  ;;  %v7640_v43 = vadd.f32 %v13716_v33, %v7570_v59  ;;  %v6551_v5 = vadd.f32 %v6550_v12, %v13444_v47  ;;  %v6639_v23 = vpop.f32.mrf.mxu1  ;;  %v13762_v47 = vor.u32 %v10750_v13, %v9790_v28  ;;  %v7446_v12 = vld [vmem:[%s11360_s28 + $0x40] sm:$0xff]  ;;  %v7448_v13 = vld [vmem:[%s11360_s28 + $0x50] sm:$0xff] }
 0x7f6   : > { %v13750_v56 = vadd.f32 %v6815_v49, %v6726_v22  ;;  %v9812_v28 = vld [vmem:[%s11346_s6 + $0x280] sm:$0xf] }
 0x7f7   : > { %v7704_v7 = vmul.f32 3.0, %v7640_v43  ;;  %v6640_v19 = vadd.f32 %v6639_v23, %v6551_v5  ;;  %v14923_v43 = vld [vmem:[#allocation73_spill] sm:$0xff] }
 0x7f9   : > { %7768 = vst [vmem:[%s13730_s23 + $0x20] sm:$0xff] %v7704_v7  ;;  %v7316_v8 = vadd.f32 %v6640_v19, %v14922_v6 }
 0x7fb   : > { %v7572_v45 = vadd.f32 %v7444_v31, %v7316_v8 }
 0x7fc   : > { %v6728_v16 = vpop.f32.mrf.mxu2  ;;  %v6553_v54 = vpop.f32.mrf.mxu0 }
 0x7fd   : > { %v6817_v30 = vpop.f32.mrf.mxu3  ;;  %v7642_v2 = vadd.f32 %v13716_v33, %v7572_v45  ;;  %v6554_v60 = vadd.f32 %v6553_v54, %v13450_v15  ;;  %v6642_v59 = vpop.f32.mrf.mxu1  ;;  %v10759_v45 = vld [vmem:[%s11346_s6 + $0x294] sm:$0xf0] }
 0x7fe   : > { %v13765_v46 = vadd.f32 %v6817_v30, %v6728_v16  ;;  %v10756_v16 = vld [vmem:[%s11346_s6 + $0x284] sm:$0xf]  ;;  %v9814_v30 = vld [vmem:[%s11346_s6 + $0x298] sm:$0xf0] }
 0x7ff   : > { %v7706_v22 = vmul.f32 3.0, %v7642_v2  ;;  %v6643_v49 = vadd.f32 %v6642_v59, %v6554_v60  ;;  %6592 = vmatmul.bf16.gmra.mxu0 %v13760_v21  ;;  %v10850_v2 = vld [vmem:[#allocation6 + $0x814] sm:$0xf]  ;;  %v10182_v60 = vld [vmem:[#allocation6 + $0x818] sm:$0xf0] }
 0x800   : > { %6681 = vmatmul.bf16.gmra.mxu1 %v13762_v47  ;;  %v10185_v59 = vor.u32 %v10850_v2, %v10182_v60 }
 0x801   : > { %6770 = vmatmul.bf16.gmra.mxu2 %v13436_v61  ;;  %7770 = vst [vmem:[%s13730_s23 + $0x30] sm:$0xff] %v7706_v22  ;;  %v7318_v5 = vadd.f32 %v6643_v49, %v14923_v43  ;;  %v10818_v22 = vld [vmem:[#allocation6 + $0x714] sm:$0xf]  ;;  %v10054_v49 = vld [vmem:[#allocation6 + $0x718] sm:$0xf0] }
 0x802   : > { %6859 = vmatmul.bf16.gmra.mxu3 %v13438_v11  ;;  %v14924_v11 = vld [vmem:[#allocation74_spill] sm:$0xff]  ;;  %7074 = vmatpush.bf16.msra.mxu2 %v10185_v59 }
 0x803   : > { %v7574_v15 = vadd.f32 %v7446_v12, %v7318_v5  ;;  %v10866_v12 = vld [vmem:[#allocation6 + $0x894] sm:$0xf] }
 0x804   : > { %v6731_v23 = vpop.f32.mrf.mxu2  ;;  %v6555_v19 = vpop.f32.mrf.mxu0 }
 0x805   : > { %v6820_v7 = vpop.f32.mrf.mxu3  ;;  %v7644_v31 = vadd.f32 %v13716_v33, %v7574_v15  ;;  %v6556_v58 = vadd.f32 %v6555_v19, %v13468_v42  ;;  %v6644_v61 = vpop.f32.mrf.mxu1  ;;  %v13786_v42 = vor.u32 %v10759_v45, %v9812_v28  ;;  %v10057_v15 = vor.u32 %v10818_v22, %v10054_v49  ;;  %v10118_v19 = vld [vmem:[#allocation6 + $0x798] sm:$0xf0] }
 0x806   : > { %v13776_v26 = vadd.f32 %v6820_v7, %v6731_v23  ;;  %v10246_v23 = vld [vmem:[#allocation6 + $0x898] sm:$0xf0]  ;;  %v10834_v7 = vld [vmem:[#allocation6 + $0x794] sm:$0xf] }
 0x807   : > { %v7708_v6 = vmul.f32 3.0, %v7644_v31  ;;  %v6645_v8 = vadd.f32 %v6644_v61, %v6556_v58  ;;  %v13788_v61 = vor.u32 %v10756_v16, %v9814_v30  ;;  %6896 = vmatpush.bf16.msra.mxu0 %v10057_v15  ;;  %v7450_v16 = vld [vmem:[%s11360_s28 + $0x60] sm:$0xff] }
 0x808   : > { %v14925_v30 = vld [vmem:[#allocation75_spill] sm:$0xff] }
 0x809   : > { %7772 = vst [vmem:[%s13730_s23 + $0x40] sm:$0xff] %v7708_v6  ;;  %v7320_v54 = vadd.f32 %v6645_v8, %v14924_v11  ;;  %v10249_v6 = vor.u32 %v10866_v12, %v10246_v23  ;;  %v10121_v8 = vor.u32 %v10834_v7, %v10118_v19  ;;  %v7452_v7 = vld [vmem:[%s11360_s28 + $0x70] sm:$0xff] }
 0x80a   : > { %v9836_v19 = vld [vmem:[%s11346_s6 + $0x2b0] sm:$0xf] }
 0x80b   : > { %v7576_v43 = vadd.f32 %v7448_v13, %v7320_v54  ;;  %7163 = vmatpush.bf16.msra.mxu3 %v10249_v6  ;;  %6985 = vmatpush.bf16.msra.mxu1 %v10121_v8  ;;  %v10762_v6 = vld [vmem:[%s11346_s6 + $0x2b4] sm:$0xf]  ;;  %v9838_v8 = vld [vmem:[%s11346_s6 + $0x2c8] sm:$0xf0] }
 0x80c   : > { %v6733_v5 = vpop.f32.mrf.mxu2  ;;  %v6558_v58 = vpop.f32.mrf.mxu0 }
 0x80d   : > { %v6822_v31 = vpop.f32.mrf.mxu3  ;;  %v7646_v11 = vadd.f32 %v13716_v33, %v7576_v43  ;;  %v6559_v13 = vadd.f32 %v6558_v58, %v13474_v48  ;;  %v6647_v28 = vpop.f32.mrf.mxu1 }
 0x80e   : > { %v13791_v2 = vadd.f32 %v6822_v31, %v6733_v5  ;;  %v10765_v31 = vld [vmem:[%s11346_s6 + $0x2c4] sm:$0xf0] }
 0x80f   : > { %v7710_v45 = vmul.f32 3.0, %v7646_v11  ;;  %v6648_v54 = vadd.f32 %v6647_v28, %v6559_v13  ;;  %6597 = vmatmul.bf16.gmra.mxu0 %v13786_v42  ;;  %v13812_v28 = vor.u32 %v10765_v31, %v9836_v19 }
 0x810   : > { %6686 = vmatmul.bf16.gmra.mxu1 %v13788_v61 }
 0x811   : > { %6775 = vmatmul.bf16.gmra.mxu2 %v13460_v37  ;;  %7774 = vst [vmem:[%s13730_s23 + $0x50] sm:$0xff] %v7710_v45  ;;  %v7322_v48 = vadd.f32 %v6648_v54, %v14925_v30 }
 0x812   : > { %6864 = vmatmul.bf16.gmra.mxu3 %v13462_v35  ;;  %v14926_v35 = vld [vmem:[#allocation76_spill] sm:$0xff] }
 0x813   : > { %v7578_v60 = vadd.f32 %v7450_v16, %v7322_v48 }
 0x814   : > { %v6736_v59 = vpop.f32.mrf.mxu2  ;;  %v6560_v49 = vpop.f32.mrf.mxu0 }
 0x815   : > { %v6825_v22 = vpop.f32.mrf.mxu3  ;;  %v7648_v12 = vadd.f32 %v13716_v33, %v7578_v60  ;;  %v6561_v5 = vadd.f32 %v6560_v49, %v13492_v44  ;;  %v6649_v37 = vpop.f32.mrf.mxu1  ;;  %v13814_v44 = vor.u32 %v10762_v6, %v9838_v8  ;;  %v7454_v49 = vld [vmem:[%s11360_s28 + $0x80] sm:$0xff]  ;;  %v7456_v6 = vld [vmem:[%s11360_s28 + $0x90] sm:$0xff] }
 0x816   : > { %v13802_v43 = vadd.f32 %v6825_v22, %v6736_v59  ;;  %v9860_v8 = vld [vmem:[%s11346_s6 + $0x2e0] sm:$0xf] }
 0x817   : > { %v7712_v15 = vmul.f32 3.0, %v7648_v12  ;;  %v6650_v23 = vadd.f32 %v6649_v37, %v6561_v5  ;;  %v14927_v12 = vld [vmem:[#allocation77_spill] sm:$0xff] }
 0x819   : > { %7776 = vst [vmem:[%s13730_s23 + $0x60] sm:$0xff] %v7712_v15  ;;  %v7324_v58 = vadd.f32 %v6650_v23, %v14926_v35 }
 0x81b   : > { %v7580_v11 = vadd.f32 %v7452_v7, %v7324_v58 }
 0x81c   : > { %v6738_v13 = vpop.f32.mrf.mxu2  ;;  %v6563_v54 = vpop.f32.mrf.mxu0 }
 0x81d   : > { %v6827_v45 = vpop.f32.mrf.mxu3  ;;  %v7650_v16 = vadd.f32 %v13716_v33, %v7580_v11  ;;  %v6564_v48 = vadd.f32 %v6563_v54, %v13498_v0  ;;  %v6652_v60 = vpop.f32.mrf.mxu1  ;;  %v10771_v11 = vld [vmem:[%s11346_s6 + $0x2f4] sm:$0xf0] }
 0x81e   : > { %v13817_v30 = vadd.f32 %v6827_v45, %v6738_v13  ;;  %v10768_v13 = vld [vmem:[%s11346_s6 + $0x2e4] sm:$0xf]  ;;  %v9862_v45 = vld [vmem:[%s11346_s6 + $0x2f8] sm:$0xf0] }
 0x81f   : > { %v7714_v59 = vmul.f32 3.0, %v7650_v16  ;;  %v6653_v22 = vadd.f32 %v6652_v60, %v6564_v48  ;;  %6602 = vmatmul.bf16.gmra.mxu0 %v13812_v28  ;;  %v10848_v16 = vld [vmem:[#allocation6 + $0x804] sm:$0xf]  ;;  %v10174_v48 = vld [vmem:[#allocation6 + $0x808] sm:$0xf0] }
 0x820   : > { %6691 = vmatmul.bf16.gmra.mxu1 %v13814_v44  ;;  %v10177_v60 = vor.u32 %v10848_v16, %v10174_v48 }
 0x821   : > { %6780 = vmatmul.bf16.gmra.mxu2 %v13484_v14  ;;  %7778 = vst [vmem:[%s13730_s23 + $0x70] sm:$0xff] %v7714_v59  ;;  %v7326_v5 = vadd.f32 %v6653_v22, %v14927_v12  ;;  %v10816_v59 = vld [vmem:[#allocation6 + $0x704] sm:$0xf]  ;;  %v10046_v22 = vld [vmem:[#allocation6 + $0x708] sm:$0xf0] }
 0x822   : > { %6869 = vmatmul.bf16.gmra.mxu3 %v13486_v52  ;;  %v14928_v52 = vld [vmem:[#allocation78_spill] sm:$0xff]  ;;  %7075 = vmatpush.bf16.msra.mxu2 %v10177_v60 }
 0x823   : > { %v7582_v0 = vadd.f32 %v7454_v49, %v7326_v5  ;;  %v10864_v49 = vld [vmem:[#allocation6 + $0x884] sm:$0xf] }
 0x824   : > { %v6741_v37 = vpop.f32.mrf.mxu2  ;;  %v6565_v23 = vpop.f32.mrf.mxu0 }
 0x825   : > { %v6830_v15 = vpop.f32.mrf.mxu3  ;;  %v7652_v7 = vadd.f32 %v13716_v33, %v7582_v0  ;;  %v6566_v31 = vadd.f32 %v6565_v23, %v13516_v51  ;;  %v6654_v14 = vpop.f32.mrf.mxu1  ;;  %v13838_v51 = vor.u32 %v10771_v11, %v9860_v8  ;;  %v10049_v0 = vor.u32 %v10816_v59, %v10046_v22  ;;  %v10110_v23 = vld [vmem:[#allocation6 + $0x788] sm:$0xf0] }
 0x826   : > { %v13828_v19 = vadd.f32 %v6830_v15, %v6741_v37  ;;  %v10238_v37 = vld [vmem:[#allocation6 + $0x888] sm:$0xf0]  ;;  %v10832_v15 = vld [vmem:[#allocation6 + $0x784] sm:$0xf] }
 0x827   : > { %v7716_v35 = vmul.f32 3.0, %v7652_v7  ;;  %v6655_v58 = vadd.f32 %v6654_v14, %v6566_v31  ;;  %v13840_v14 = vor.u32 %v10768_v13, %v9862_v45  ;;  %6897 = vmatpush.bf16.msra.mxu0 %v10049_v0  ;;  %v7458_v13 = vld [vmem:[%s11360_s28 + $0xa0] sm:$0xff] }
 0x828   : > { %v14929_v45 = vld [vmem:[#allocation79_spill] sm:$0xff] }
 0x829   : > { %7780 = vst [vmem:[%s13730_s23 + $0x80] sm:$0xff] %v7716_v35  ;;  %v7328_v54 = vadd.f32 %v6655_v58, %v14928_v52  ;;  %v10241_v35 = vor.u32 %v10864_v49, %v10238_v37  ;;  %v10113_v58 = vor.u32 %v10832_v15, %v10110_v23  ;;  %v7460_v15 = vld [vmem:[%s11360_s28 + $0xb0] sm:$0xff] }
 0x82a   : > { %v9884_v23 = vld [vmem:[%s11346_s6 + $0x310] sm:$0xf] }
 0x82b   : > { %v7584_v12 = vadd.f32 %v7456_v6, %v7328_v54  ;;  %7164 = vmatpush.bf16.msra.mxu3 %v10241_v35  ;;  %6986 = vmatpush.bf16.msra.mxu1 %v10113_v58  ;;  %v10774_v35 = vld [vmem:[%s11346_s6 + $0x314] sm:$0xf]  ;;  %v9886_v58 = vld [vmem:[%s11346_s6 + $0x328] sm:$0xf0] }
 0x82c   : > { %v6743_v5 = vpop.f32.mrf.mxu2  ;;  %v6568_v31 = vpop.f32.mrf.mxu0 }
 0x82d   : > { %v6832_v7 = vpop.f32.mrf.mxu3  ;;  %v7654_v52 = vadd.f32 %v13716_v33, %v7584_v12  ;;  %v6569_v6 = vadd.f32 %v6568_v31, %v13522_v34  ;;  %v6657_v8 = vpop.f32.mrf.mxu1 }
 0x82e   : > { %v13843_v16 = vadd.f32 %v6832_v7, %v6743_v5  ;;  %v10777_v7 = vld [vmem:[%s11346_s6 + $0x324] sm:$0xf0] }
 0x82f   : > { %v7718_v11 = vmul.f32 3.0, %v7654_v52  ;;  %v6658_v54 = vadd.f32 %v6657_v8, %v6569_v6  ;;  %6607 = vmatmul.bf16.gmra.mxu0 %v13838_v51  ;;  %v13864_v8 = vor.u32 %v10777_v7, %v9884_v23 }
 0x830   : > { %6696 = vmatmul.bf16.gmra.mxu1 %v13840_v14 }
 0x831   : > { %6785 = vmatmul.bf16.gmra.mxu2 %v13508_v25  ;;  %7782 = vst [vmem:[%s13730_s23 + $0x90] sm:$0xff] %v7718_v11  ;;  %v7330_v34 = vadd.f32 %v6658_v54, %v14929_v45 }
 0x832   : > { %6874 = vmatmul.bf16.gmra.mxu3 %v13510_v4  ;;  %v14930_v4 = vld [vmem:[#allocation80_spill] sm:$0xff] }
 0x833   : > { %v7586_v48 = vadd.f32 %v7458_v13, %v7330_v34 }
 0x834   : > { %v6746_v60 = vpop.f32.mrf.mxu2  ;;  %v6570_v22 = vpop.f32.mrf.mxu0 }
 0x835   : > { %v6835_v59 = vpop.f32.mrf.mxu3  ;;  %v7656_v49 = vadd.f32 %v13716_v33, %v7586_v48  ;;  %v6571_v5 = vadd.f32 %v6570_v22, %v13540_v18  ;;  %v6659_v25 = vpop.f32.mrf.mxu1  ;;  %v13866_v18 = vor.u32 %v10774_v35, %v9886_v58  ;;  %v7462_v22 = vld [vmem:[%s11360_s28 + $0xc0] sm:$0xff]  ;;  %v7464_v35 = vld [vmem:[%s11360_s28 + $0xd0] sm:$0xff] }
 0x836   : > { %v13854_v12 = vadd.f32 %v6835_v59, %v6746_v60  ;;  %v9908_v58 = vld [vmem:[%s11346_s6 + $0x340] sm:$0xf] }
 0x837   : > { %v7720_v0 = vmul.f32 3.0, %v7656_v49  ;;  %v6660_v37 = vadd.f32 %v6659_v25, %v6571_v5  ;;  %v14931_v49 = vld [vmem:[#allocation81_spill] sm:$0xff] }
 0x839   : > { %7784 = vst [vmem:[%s13730_s23 + $0xa0] sm:$0xff] %v7720_v0  ;;  %v7332_v31 = vadd.f32 %v6660_v37, %v14930_v4 }
 0x83b   : > { %v7588_v52 = vadd.f32 %v7460_v15, %v7332_v31 }
 0x83c   : > { %v6748_v6 = vpop.f32.mrf.mxu2  ;;  %v6573_v54 = vpop.f32.mrf.mxu0 }
 0x83d   : > { %v6837_v11 = vpop.f32.mrf.mxu3  ;;  %v7658_v13 = vadd.f32 %v13716_v33, %v7588_v52  ;;  %v6574_v34 = vadd.f32 %v6573_v54, %v13546_v55  ;;  %v6662_v48 = vpop.f32.mrf.mxu1  ;;  %v10783_v52 = vld [vmem:[%s11346_s6 + $0x354] sm:$0xf0]  ;;  %v9910_v54 = vld [vmem:[%s11346_s6 + $0x358] sm:$0xf0] }
 0x83e   : > { %v13869_v45 = vadd.f32 %v6837_v11, %v6748_v6  ;;  %v10780_v11 = vld [vmem:[%s11346_s6 + $0x344] sm:$0xf] }
 0x83f   : > { %v7722_v60 = vmul.f32 3.0, %v7658_v13  ;;  %v6663_v59 = vadd.f32 %v6662_v48, %v6574_v34  ;;  %6612 = vmatmul.bf16.gmra.mxu0 %v13864_v8  ;;  %v13890_v48 = vor.u32 %v10783_v52, %v9908_v58 }
 0x840   : > { %6701 = vmatmul.bf16.gmra.mxu1 %v13866_v18 }
 0x841   : > { %6790 = vmatmul.bf16.gmra.mxu2 %v13532_v40  ;;  %7786 = vst [vmem:[%s13730_s23 + $0xb0] sm:$0xff] %v7722_v60  ;;  %v7334_v5 = vadd.f32 %v6663_v59, %v14931_v49 }
 0x842   : > { %6879 = vmatmul.bf16.gmra.mxu3 %v13534_v1  ;;  %v14932_v1 = vld [vmem:[#allocation82_spill] sm:$0xff] }
 0x843   : > { %v7590_v55 = vadd.f32 %v7462_v22, %v7334_v5 }
 0x844   : > { %v6751_v25 = vpop.f32.mrf.mxu2  ;;  %v6575_v37 = vpop.f32.mrf.mxu0 }
 0x845   : > { %v6840_v0 = vpop.f32.mrf.mxu3  ;;  %v7660_v15 = vadd.f32 %v13716_v33, %v7590_v55  ;;  %v6576_v7 = vadd.f32 %v6575_v37, %v13564_v24  ;;  %v6664_v40 = vpop.f32.mrf.mxu1  ;;  %v13892_v24 = vor.u32 %v10780_v11, %v9910_v54  ;;  %v7466_v37 = vld [vmem:[%s11360_s28 + $0xe0] sm:$0xff] }
 0x846   : > { %v13880_v23 = vadd.f32 %v6840_v0, %v6751_v25 }
 0x847   : > { %v7724_v4 = vmul.f32 3.0, %v7660_v15  ;;  %v6665_v31 = vadd.f32 %v6664_v40, %v6576_v7  ;;  %v14933_v15 = vld [vmem:[#allocation116_spill] sm:$0xff]  ;;  %v14934_v7 = vld [vmem:[#allocation113_spill] sm:$0xff] }
 0x849   : > { %7788 = vst [vmem:[%s13730_s23 + $0xc0] sm:$0xff] %v7724_v4  ;;  %v7336_v6 = vadd.f32 %v6665_v31, %v14932_v1  ;;  %v14935_v4 = vld [vmem:[#allocation133_spill] sm:$0xff] }
 0x84b   : > { %v7592_v13 = vadd.f32 %v7464_v35, %v7336_v6  ;;  %v14936_v6 = vld [vmem:[#allocation37_spill] sm:$0xff] }
 0x84c   : > { %v6753_v34 = vpop.f32.mrf.mxu2  ;;  %v6578_v59 = vpop.f32.mrf.mxu0 }
 0x84d   : > { %v6842_v60 = vpop.f32.mrf.mxu3  ;;  %v7662_v22 = vadd.f32 %v13716_v33, %v7592_v13  ;;  %v6579_v5 = vadd.f32 %v6578_v59, %v13570_v36  ;;  %v6667_v55 = vpop.f32.mrf.mxu1  ;;  %v14937_v59 = vld [vmem:[#allocation85_spill] sm:$0xff] }
 0x84e   : > { %v13895_v49 = vadd.f32 %v6842_v60, %v6753_v34  ;;  %v7468_v60 = vld [vmem:[%s11360_s28 + $0xf0] sm:$0xff] }
 0x84f   : > { %v7726_v25 = vmul.f32 3.0, %v7662_v22  ;;  %v6668_v0 = vadd.f32 %v6667_v55, %v6579_v5  ;;  %6617 = vmatmul.bf16.gmra.mxu0 %v13890_v48 }
 0x850   : > { %6706 = vmatmul.bf16.gmra.mxu1 %v13892_v24 }
 0x851   : > { %6795 = vmatmul.bf16.gmra.mxu2 %v14933_v15  ;;  %7790 = vst [vmem:[%s13730_s23 + $0xd0] sm:$0xff] %v7726_v25  ;;  %v7338_v40 = vadd.f32 %v6668_v0, %v14934_v7 }
 0x852   : > { %6884 = vmatmul.bf16.gmra.mxu3 %v14935_v4 }
 0x853   : > { %v7594_v31 = vadd.f32 %v7466_v37, %v7338_v40 }
 0x854   : > { %v6756_v35 = vpop.f32.mrf.mxu2  ;;  %v6580_v58 = vpop.f32.mrf.mxu0 }
 0x855   : > { %v6845_v36 = vpop.f32.mrf.mxu3  ;;  %v7664_v52 = vadd.f32 %v13716_v33, %v7594_v31  ;;  %v6581_v11 = vadd.f32 %v6580_v58, %v14936_v6  ;;  %v6669_v54 = vpop.f32.mrf.mxu1  ;;  %v14939_v58 = vld [vmem:[#allocation86_spill] sm:$0xff]  ;;  %v14941_v6 = vld [vmem:[#allocation119_spill] sm:$0xff] }
 0x856   : > { %v13906_v1 = vadd.f32 %v6845_v36, %v6756_v35  ;;  %v14938_v35 = vld [vmem:[#allocation23_spill] sm:$0xff] }
 0x857   : > { %v7728_v13 = vmul.f32 3.0, %v7664_v52  ;;  %v6670_v34 = vadd.f32 %v6669_v54, %v6581_v11  ;;  %v7470_v36 = vld [vmem:[%s11360_s28 + $0x100] sm:$0xff]  ;;  %v14942_v54 = vld [vmem:[#allocation68_spill] sm:$0xff] }
 0x858   : > { %v14940_v52 = vld [vmem:[#allocation67_spill] sm:$0xff] }
 0x859   : > { %7792 = vst [vmem:[%s13730_s23 + $0xe0] sm:$0xff] %v7728_v13  ;;  %v7340_v22 = vadd.f32 %v6670_v34, %v14937_v59 }
 0x85b   : > { %v7596_v5 = vadd.f32 %v7468_v60, %v7340_v22 }
 0x85c   : > { %v6758_v55 = vpop.f32.mrf.mxu2  ;;  %v6583_v0 = vpop.f32.mrf.mxu0 }
 0x85d   : > { %v6847_v25 = vpop.f32.mrf.mxu3  ;;  %v7666_v37 = vadd.f32 %v13716_v33, %v7596_v5  ;;  %v6584_v7 = vadd.f32 %v6583_v0, %v13586_v10  ;;  %v6672_v40 = vpop.f32.mrf.mxu1 }
 0x85e   : > { %v13913_v15 = vadd.f32 %v6847_v25, %v6758_v55 }
 0x85f   : > { %v7730_v4 = vmul.f32 3.0, %v7666_v37  ;;  %v6673_v31 = vadd.f32 %v6672_v40, %v6584_v7  ;;  %6898 = vmatmul.bf16.vlgmr.msra.gmra.mxu0 %v14938_v35  ;;  %v7472_v37 = vld [vmem:[%s11360_s28 + $0x110] sm:$0xff] }
 0x860   : > { %6987 = vmatmul.bf16.vlgmr.msra.gmra.mxu1 %v14939_v58  ;;  %v14943_v7 = vld [vmem:[#allocation49_spill] sm:$0xff] }
 0x861   : > { %7076 = vmatmul.bf16.vlgmr.msra.gmra.mxu2 %v14940_v52  ;;  %7794 = vst [vmem:[%s13730_s23 + $0xf0] sm:$0xff] %v7730_v4  ;;  %v7342_v11 = vadd.f32 %v6673_v31, %v14941_v6 }
 0x862   : > { %7165 = vmatmul.bf16.vlgmr.msra.gmra.mxu3 %v14942_v54 }
 0x863   : > { %v7598_v13 = vadd.f32 %v7470_v36, %v7342_v11 }
 0x864   : > { %v6761_v34 = vpop.f32.mrf.mxu2  ;;  %v6585_v60 = vpop.f32.mrf.mxu0 }
 0x865   : > { %v6850_v10 = vpop.f32.mrf.mxu3  ;;  %v7668_v59 = vadd.f32 %v13716_v33, %v7598_v13  ;;  %v6586_v5 = vadd.f32 %v6585_v60, %v13596_v32  ;;  %v6674_v55 = vpop.f32.mrf.mxu1  ;;  %v14944_v13 = vld [vmem:[#allocation130_spill] sm:$0xff]  ;;  %v14946_v60 = vld [vmem:[#allocation35_spill] sm:$0xff] }
 0x866   : > { %v13924_v22 = vadd.f32 %v6850_v10, %v6761_v34  ;;  %v7474_v34 = vld [vmem:[%s11360_s28 + $0x120] sm:$0xff]  ;;  %v14945_v10 = vld [vmem:[#allocation57_spill] sm:$0xff] }
 0x867   : > { %v7732_v25 = vmul.f32 3.0, %v7668_v59  ;;  %v6675_v0 = vadd.f32 %v6674_v55, %v6586_v5  ;;  %v14947_v5 = vld [vmem:[#allocation40_spill] sm:$0xff] }
 0x869   : > { %7796 = vst [vmem:[%s13730_s23 + $0x100] sm:$0xff] %v7732_v25  ;;  %v7344_v40 = vadd.f32 %v6675_v0, %v14943_v7 }
 0x86b   : > { %v7600_v4 = vadd.f32 %v7472_v37, %v7344_v40  ;;  %v14948_v40 = vld [vmem:[#allocation45_spill] sm:$0xff] }
 0x86c   : > { %v6763_v31 = vpop.f32.mrf.mxu2  ;;  %v6588_v36 = vpop.f32.mrf.mxu0 }
 0x86d   : > { %v6852_v35 = vpop.f32.mrf.mxu3  ;;  %v7670_v58 = vadd.f32 %v13716_v33, %v7600_v4  ;;  %v6589_v6 = vadd.f32 %v6588_v36, %v13602_v17  ;;  %v6677_v32 = vpop.f32.mrf.mxu1 }
 0x86e   : > { %v13931_v52 = vadd.f32 %v6852_v35, %v6763_v31 }
 0x86f   : > { %v7734_v11 = vmul.f32 3.0, %v7670_v58  ;;  %v6678_v54 = vadd.f32 %v6677_v32, %v6589_v6  ;;  %6903 = vmatmul.bf16.gmra.mxu0 %v14944_v13  ;;  %v14949_v58 = vld [vmem:[#allocation36_spill] sm:$0xff] }
 0x870   : > { %6992 = vmatmul.bf16.gmra.mxu1 %v14945_v10 }
 0x871   : > { %7081 = vmatmul.bf16.gmra.mxu2 %v13592_v39  ;;  %7798 = vst [vmem:[%s13730_s23 + $0x110] sm:$0xff] %v7734_v11  ;;  %v7346_v59 = vadd.f32 %v6678_v54, %v14946_v60  ;;  %v7476_v39 = vld [vmem:[%s11360_s28 + $0x130] sm:$0xff] }
 0x872   : > { %7170 = vmatmul.bf16.gmra.mxu3 %v14947_v5 }
 0x873   : > { %v7602_v55 = vadd.f32 %v7474_v34, %v7346_v59 }
 0x874   : > { %v6766_v25 = vpop.f32.mrf.mxu2  ;;  %v6590_v0 = vpop.f32.mrf.mxu0 }
 0x875   : > { %v6855_v17 = vpop.f32.mrf.mxu3  ;;  %v7672_v37 = vadd.f32 %v13716_v33, %v7602_v55  ;;  %v6591_v4 = vadd.f32 %v6590_v0, %v14948_v40  ;;  %v6679_v31 = vpop.f32.mrf.mxu1  ;;  %v14951_v0 = vld [vmem:[#allocation58_spill] sm:$0xff]  ;;  %v14953_v40 = vld [vmem:[#allocation117_spill] sm:$0xff] }
 0x876   : > { %v13942_v7 = vadd.f32 %v6855_v17, %v6766_v25  ;;  %v14950_v25 = vld [vmem:[#allocation128_spill] sm:$0xff]  ;;  %v7478_v17 = vld [vmem:[%s11360_s28 + $0x140] sm:$0xff] }
 0x877   : > { %v7736_v35 = vmul.f32 3.0, %v7672_v37  ;;  %v6680_v36 = vadd.f32 %v6679_v31, %v6591_v4  ;;  %v14952_v37 = vld [vmem:[#allocation41_spill] sm:$0xff]  ;;  %v14954_v31 = vld [vmem:[#allocation44_spill] sm:$0xff] }
 0x879   : > { %7800 = vst [vmem:[%s13730_s23 + $0x120] sm:$0xff] %v7736_v35  ;;  %v7348_v6 = vadd.f32 %v6680_v36, %v14949_v58 }
 0x87b   : > { %v7604_v32 = vadd.f32 %v7476_v39, %v7348_v6 }
 0x87c   : > { %v6768_v11 = vpop.f32.mrf.mxu2  ;;  %v6593_v13 = vpop.f32.mrf.mxu0 }
 0x87d   : > { %v6857_v54 = vpop.f32.mrf.mxu3  ;;  %v7674_v34 = vadd.f32 %v13716_v33, %v7604_v32  ;;  %v6594_v60 = vadd.f32 %v6593_v13, %v13618_v38  ;;  %v6682_v59 = vpop.f32.mrf.mxu1 }
 0x87e   : > { %v13949_v10 = vadd.f32 %v6857_v54, %v6768_v11 }
 0x87f   : > { %v7738_v5 = vmul.f32 3.0, %v7674_v34  ;;  %v6683_v55 = vadd.f32 %v6682_v59, %v6594_v60  ;;  %6908 = vmatmul.bf16.gmra.mxu0 %v14950_v25  ;;  %v7480_v34 = vld [vmem:[%s11360_s28 + $0x150] sm:$0xff]  ;;  %v14955_v60 = vld [vmem:[#allocation55_spill] sm:$0xff] }
 0x880   : > { %6997 = vmatmul.bf16.gmra.mxu1 %v14951_v0 }
 0x881   : > { %7086 = vmatmul.bf16.gmra.mxu2 %v14952_v37  ;;  %7802 = vst [vmem:[%s13730_s23 + $0x130] sm:$0xff] %v7738_v5  ;;  %v7350_v4 = vadd.f32 %v6683_v55, %v14953_v40 }
 0x882   : > { %7175 = vmatmul.bf16.gmra.mxu3 %v14954_v31 }
 0x883   : > { %v7606_v35 = vadd.f32 %v7478_v17, %v7350_v4 }
 0x884   : > { %v6771_v36 = vpop.f32.mrf.mxu2  ;;  %v6595_v39 = vpop.f32.mrf.mxu0 }
 0x885   : > { %v6860_v38 = vpop.f32.mrf.mxu3  ;;  %v7676_v58 = vadd.f32 %v13716_v33, %v7606_v35  ;;  %v6596_v32 = vadd.f32 %v6595_v39, %v13628_v62  ;;  %v6684_v11 = vpop.f32.mrf.mxu1  ;;  %v14956_v35 = vld [vmem:[#allocation94_spill] sm:$0xff] }
 0x886   : > { %v13960_v6 = vadd.f32 %v6860_v38, %v6771_v36  ;;  %v7482_v36 = vld [vmem:[%s11360_s28 + $0x160] sm:$0xff]  ;;  %v14958_v39 = vld [vmem:[#allocation118_spill] sm:$0xff] }
 0x887   : > { %v7740_v54 = vmul.f32 3.0, %v7676_v58  ;;  %v6685_v13 = vadd.f32 %v6684_v11, %v6596_v32  ;;  %v14957_v38 = vld [vmem:[#allocation95_spill] sm:$0xff]  ;;  %v14959_v32 = vld [vmem:[#allocation48_spill] sm:$0xff] }
 0x889   : > { %7804 = vst [vmem:[%s13730_s23 + $0x140] sm:$0xff] %v7740_v54  ;;  %v7352_v59 = vadd.f32 %v6685_v13, %v14955_v60 }
 0x88b   : > { %v7608_v5 = vadd.f32 %v7480_v34, %v7352_v59  ;;  %v14960_v59 = vld [vmem:[#allocation50_spill] sm:$0xff] }
 0x88c   : > { %v6773_v55 = vpop.f32.mrf.mxu2  ;;  %v6598_v17 = vpop.f32.mrf.mxu0 }
 0x88d   : > { %v6862_v25 = vpop.f32.mrf.mxu3  ;;  %v7678_v0 = vadd.f32 %v13716_v33, %v7608_v5  ;;  %v6599_v40 = vadd.f32 %v6598_v17, %v13634_v63  ;;  %v6687_v62 = vpop.f32.mrf.mxu1 }
 0x88e   : > { %v13967_v37 = vadd.f32 %v6862_v25, %v6773_v55 }
 0x88f   : > { %v7742_v4 = vmul.f32 3.0, %v7678_v0  ;;  %v6688_v31 = vadd.f32 %v6687_v62, %v6599_v40  ;;  %6913 = vmatmul.bf16.gmra.mxu0 %v14956_v35  ;;  %v14961_v0 = vld [vmem:[#allocation19_spill] sm:$0xff] }
 0x890   : > { %7002 = vmatmul.bf16.gmra.mxu1 %v14957_v38 }
 0x891   : > { %7091 = vmatmul.bf16.gmra.mxu2 %v13624_v20  ;;  %7806 = vst [vmem:[%s13730_s23 + $0x150] sm:$0xff] %v7742_v4  ;;  %v7354_v58 = vadd.f32 %v6688_v31, %v14958_v39  ;;  %v7484_v20 = vld [vmem:[%s11360_s28 + $0x170] sm:$0xff] }
 0x892   : > { %7180 = vmatmul.bf16.gmra.mxu3 %v14959_v32 }
 0x893   : > { %v7610_v11 = vadd.f32 %v7482_v36, %v7354_v58 }
 0x894   : > { %v6776_v54 = vpop.f32.mrf.mxu2  ;;  %v6600_v13 = vpop.f32.mrf.mxu0 }
 0x895   : > { %v6865_v63 = vpop.f32.mrf.mxu3  ;;  %v7680_v34 = vadd.f32 %v13716_v33, %v7610_v11  ;;  %v6601_v5 = vadd.f32 %v6600_v13, %v14960_v59  ;;  %v6689_v55 = vpop.f32.mrf.mxu1  ;;  %v14963_v13 = vld [vmem:[#allocation98_spill] sm:$0xff] }
 0x896   : > { %v13978_v60 = vadd.f32 %v6865_v63, %v6776_v54  ;;  %v14962_v54 = vld [vmem:[#allocation60_spill] sm:$0xff]  ;;  %v7486_v63 = vld [vmem:[%s11360_s28 + $0x180] sm:$0xff]  ;;  %v14965_v59 = vld [vmem:[#allocation38_spill] sm:$0xff] }
 0x897   : > { %v7744_v25 = vmul.f32 3.0, %v7680_v34  ;;  %v6690_v17 = vadd.f32 %v6689_v55, %v6601_v5  ;;  %v14964_v34 = vld [vmem:[#allocation51_spill] sm:$0xff]  ;;  %v14966_v55 = vld [vmem:[#allocation84_spill] sm:$0xff] }
 0x899   : > { %7808 = vst [vmem:[%s13730_s23 + $0x160] sm:$0xff] %v7744_v25  ;;  %v7356_v40 = vadd.f32 %v6690_v17, %v14961_v0 }
 0x89b   : > { %v7612_v62 = vadd.f32 %v7484_v20, %v7356_v40 }
 0x89c   : > { %v6778_v4 = vpop.f32.mrf.mxu2  ;;  %v6603_v35 = vpop.f32.mrf.mxu0 }
 0x89d   : > { %v6867_v31 = vpop.f32.mrf.mxu3  ;;  %v7682_v36 = vadd.f32 %v13716_v33, %v7612_v62  ;;  %v6604_v39 = vadd.f32 %v6603_v35, %v13650_v41  ;;  %v6692_v58 = vpop.f32.mrf.mxu1  ;;  %v14967_v62 = vld [vmem:[#allocation92_spill] sm:$0xff] }
 0x89e   : > { %v13985_v38 = vadd.f32 %v6867_v31, %v6778_v4 }
 0x89f   : > { %v7746_v32 = vmul.f32 3.0, %v7682_v36  ;;  %v6693_v11 = vadd.f32 %v6692_v58, %v6604_v39  ;;  %6918 = vmatmul.bf16.gmra.mxu0 %v14962_v54  ;;  %v7488_v39 = vld [vmem:[%s11360_s28 + $0x190] sm:$0xff]  ;;  %v14968_v58 = vld [vmem:[#allocation39_spill] sm:$0xff] }
 0x8a0   : > { %7007 = vmatmul.bf16.gmra.mxu1 %v14963_v13 }
 0x8a1   : > { %7096 = vmatmul.bf16.gmra.mxu2 %v14964_v34  ;;  %7810 = vst [vmem:[%s13730_s23 + $0x170] sm:$0xff] %v7746_v32  ;;  %v7358_v5 = vadd.f32 %v6693_v11, %v14965_v59 }
 0x8a2   : > { %7185 = vmatmul.bf16.gmra.mxu3 %v14966_v55 }
 0x8a3   : > { %v7614_v25 = vadd.f32 %v7486_v63, %v7358_v5  ;;  %v14969_v5 = vld [vmem:[#allocation93_spill] sm:$0xff] }
 0x8a4   : > { %v6781_v17 = vpop.f32.mrf.mxu2  ;;  %v6605_v20 = vpop.f32.mrf.mxu0 }
 0x8a5   : > { %v6870_v41 = vpop.f32.mrf.mxu3  ;;  %v7684_v0 = vadd.f32 %v13716_v33, %v7614_v25  ;;  %v6606_v4 = vadd.f32 %v6605_v20, %v14967_v62  ;;  %v6694_v31 = vpop.f32.mrf.mxu1  ;;  %v14970_v20 = vld [vmem:[#allocation63_spill] sm:$0xff]  ;;  %v14971_v62 = vld [vmem:[#allocation101_spill] sm:$0xff] }
 0x8a6   : > { %v13996_v40 = vadd.f32 %v6870_v41, %v6781_v17 }
 0x8a7   : > { %v7748_v35 = vmul.f32 3.0, %v7684_v0  ;;  %v6695_v36 = vadd.f32 %v6694_v31, %v6606_v4  ;;  %v7490_v0 = vld [vmem:[%s11360_s28 + $0x1a0] sm:$0xff]  ;;  %v14972_v4 = vld [vmem:[#allocation88_spill] sm:$0xff] }
 0x8a8   : > { %v14973_v31 = vld [vmem:[#allocation20_spill] sm:$0xff] }
 0x8a9   : > { %7812 = vst [vmem:[%s13730_s23 + $0x180] sm:$0xff] %v7748_v35  ;;  %v7360_v32 = vadd.f32 %v6695_v36, %v14968_v58  ;;  %v14974_v36 = vld [vmem:[#allocation89_spill] sm:$0xff] }
 0x8ab   : > { %v7616_v11 = vadd.f32 %v7488_v39, %v7360_v32 }
 0x8ac   : > { %v6783_v54 = vpop.f32.mrf.mxu2  ;;  %v6608_v13 = vpop.f32.mrf.mxu0 }
 0x8ad   : > { %v6872_v63 = vpop.f32.mrf.mxu3  ;;  %v7686_v34 = vadd.f32 %v13716_v33, %v7616_v11  ;;  %v6609_v55 = vadd.f32 %v6608_v13, %v14969_v5  ;;  %v6697_v25 = vpop.f32.mrf.mxu1  ;;  %v14975_v13 = vld [vmem:[#allocation100_spill] sm:$0xff] }
 0x8ae   : > { %v14003_v59 = vadd.f32 %v6872_v63, %v6783_v54 }
 0x8af   : > { %v7750_v17 = vmul.f32 3.0, %v7686_v34  ;;  %v6698_v41 = vadd.f32 %v6697_v25, %v6609_v55  ;;  %6923 = vmatmul.bf16.gmra.mxu0 %v14970_v20  ;;  %v7492_v20 = vld [vmem:[%s11360_s28 + $0x1b0] sm:$0xff] }
 0x8b0   : > { %7012 = vmatmul.bf16.gmra.mxu1 %v14971_v62 }
 0x8b1   : > { %7101 = vmatmul.bf16.gmra.mxu2 %v14972_v4  ;;  %7814 = vst [vmem:[%s13730_s23 + $0x190] sm:$0xff] %v7750_v17  ;;  %v7362_v35 = vadd.f32 %v6698_v41, %v14973_v31  ;;  %v14976_v17 = vld [vmem:[#allocation120_spill] sm:$0xff] }
 0x8b2   : > { %7190 = vmatmul.bf16.gmra.mxu3 %v14974_v36 }
 0x8b3   : > { %v7618_v39 = vadd.f32 %v7490_v0, %v7362_v35 }
 0x8b4   : > { %v6786_v58 = vpop.f32.mrf.mxu2  ;;  %v6610_v11 = vpop.f32.mrf.mxu0 }
 0x8b5   : > { %v6875_v32 = vpop.f32.mrf.mxu3  ;;  %v7688_v54 = vadd.f32 %v13716_v33, %v7618_v39  ;;  %v6611_v34 = vadd.f32 %v6610_v11, %v14975_v13  ;;  %v6699_v5 = vpop.f32.mrf.mxu1  ;;  %v14977_v39 = vld [vmem:[#allocation135_spill] sm:$0xff]  ;;  %v14978_v13 = vld [vmem:[#allocation28_spill] sm:$0xff] }
 0x8b6   : > { %v14014_v63 = vadd.f32 %v6875_v32, %v6786_v58 }
 0x8b7   : > { %v7752_v55 = vmul.f32 3.0, %v7688_v54  ;;  %v6700_v25 = vadd.f32 %v6699_v5, %v6611_v34  ;;  %v7494_v34 = vld [vmem:[%s11360_s28 + $0x1c0] sm:$0xff] }
 0x8b8   : > { %v14979_v5 = vld [vmem:[#allocation103_spill] sm:$0xff] }
 0x8b9   : > { %7816 = vst [vmem:[%s13730_s23 + $0x1a0] sm:$0xff] %v7752_v55  ;;  %v7364_v41 = vadd.f32 %v6700_v25, %v14976_v17  ;;  %v14980_v55 = vld [vmem:[#allocation96_spill] sm:$0xff]  ;;  %v14981_v25 = vld [vmem:[#allocation123_spill] sm:$0xff]  ;;  %v14982_v17 = vld [vmem:[#allocation97_spill] sm:$0xff] }
 0x8bb   : > { %v7620_v62 = vadd.f32 %v7492_v20, %v7364_v41 }
 0x8bc   : > { %v6788_v0 = vpop.f32.mrf.mxu2  ;;  %v6613_v31 = vpop.f32.mrf.mxu0 }
 0x8bd   : > { %v6877_v4 = vpop.f32.mrf.mxu3  ;;  %v7690_v35 = vadd.f32 %v13716_v33, %v7620_v62  ;;  %v6614_v58 = vadd.f32 %v6613_v31, %v14977_v39  ;;  %v6702_v32 = vpop.f32.mrf.mxu1 }
 0x8be   : > { %v14021_v36 = vadd.f32 %v6877_v4, %v6788_v0 }
 0x8bf   : > { %v7754_v11 = vmul.f32 3.0, %v7690_v35  ;;  %v6703_v54 = vadd.f32 %v6702_v32, %v6614_v58  ;;  %6928 = vmatmul.bf16.gmra.mxu0 %v14978_v13 }
 0x8c0   : > { %7017 = vmatmul.bf16.gmra.mxu1 %v14979_v5  ;;  %v7496_v5 = vld [vmem:[%s11360_s28 + $0x1d0] sm:$0xff] }
 0x8c1   : > { %7106 = vmatmul.bf16.gmra.mxu2 %v14980_v55  ;;  %7818 = vst [vmem:[%s13730_s23 + $0x1b0] sm:$0xff] %v7754_v11  ;;  %v7366_v20 = vadd.f32 %v6703_v54, %v14981_v25  ;;  %v14983_v11 = vld [vmem:[#allocation53_spill] sm:$0xff] }
 0x8c2   : > { %7195 = vmatmul.bf16.gmra.mxu3 %v14982_v17 }
 0x8c3   : > { %v7622_v41 = vadd.f32 %v7494_v34, %v7366_v20 }
 0x8c4   : > { %v6791_v62 = vpop.f32.mrf.mxu2  ;;  %v6615_v4 = vpop.f32.mrf.mxu0 }
 0x8c5   : > { %v6880_v0 = vpop.f32.mrf.mxu3  ;;  %v7692_v31 = vadd.f32 %v13716_v33, %v7622_v41  ;;  %v6616_v39 = vadd.f32 %v6615_v4, %v13692_v3  ;;  %v6704_v58 = vpop.f32.mrf.mxu1 }
 0x8c6   : > { %v14032_v35 = vadd.f32 %v6880_v0, %v6791_v62 }
 0x8c7   : > { %v7756_v32 = vmul.f32 3.0, %v7692_v31  ;;  %v6705_v13 = vadd.f32 %v6704_v58, %v6616_v39  ;;  %v14984_v31 = vld [vmem:[#allocation62_spill] sm:$0xff]  ;;  %v7498_v39 = vld [vmem:[%s11360_s28 + $0x1e0] sm:$0xff]  ;;  %v14985_v58 = vld [vmem:[#allocation105_spill] sm:$0xff] }
 0x8c9   : > { %7820 = vst [vmem:[%s13730_s23 + $0x1c0] sm:$0xff] %v7756_v32  ;;  %v7368_v54 = vadd.f32 %v6705_v13, %v14983_v11  ;;  %v14986_v32 = vld [vmem:[#allocation42_spill] sm:$0xff] }
 0x8cb   : > { %v7624_v55 = vadd.f32 %v7496_v5, %v7368_v54 }
 0x8cc   : > { %v6793_v34 = vpop.f32.mrf.mxu2  ;;  %v6618_v20 = vpop.f32.mrf.mxu0 }
 0x8cd   : > { %v6882_v25 = vpop.f32.mrf.mxu3  ;;  %v7694_v17 = vadd.f32 %v13716_v33, %v7624_v55  ;;  %v6619_v62 = vadd.f32 %v6618_v20, %v13698_v27  ;;  %v6707_v3 = vpop.f32.mrf.mxu1 }
 0x8ce   : > { %v14039_v41 = vadd.f32 %v6882_v25, %v6793_v34  ;;  %v14987_v25 = vld [vmem:[#allocation138_spill] sm:$0xff] }
 0x8cf   : > { %v7758_v0 = vmul.f32 3.0, %v7694_v17  ;;  %v6708_v4 = vadd.f32 %v6707_v3, %v6619_v62  ;;  %6933 = vmatmul.bf16.gmra.mxu0 %v14984_v31 }
 0x8d0   : > { %7022 = vmatmul.bf16.gmra.mxu1 %v14985_v58 }
 0x8d1   : > { %7111 = vmatmul.bf16.gmra.mxu2 %v13688_v9  ;;  %7822 = vst [vmem:[%s13730_s23 + $0x1d0] sm:$0xff] %v7758_v0  ;;  %v7370_v13 = vadd.f32 %v6708_v4, %v14986_v32  ;;  %v7500_v9 = vld [vmem:[%s11360_s28 + $0x1f0] sm:$0xff]  ;;  %v14988_v0 = vld [vmem:[#allocation43_spill] sm:$0xff] }
 0x8d2   : > { %7200 = vmatmul.bf16.gmra.mxu3 %v13690_v50 }
 0x8d3   : > { %v7626_v5 = vadd.f32 %v7498_v39, %v7370_v13 }
 0x8d4   : > { %v6796_v11 = vpop.f32.mrf.mxu2  ;;  %v6620_v54 = vpop.f32.mrf.mxu0 }
 0x8d5   : > { %v6885_v27 = vpop.f32.mrf.mxu3  ;;  %v7696_v55 = vadd.f32 %v13716_v33, %v7626_v5  ;;  %v6621_v20 = vadd.f32 %v6620_v54, %v14987_v25  ;;  %v6709_v17 = vpop.f32.mrf.mxu1  ;;  %v14992_v25 = vld [vmem:[#allocation107_spill] sm:$0xff] }
 0x8d6   : > { %v14050_v34 = vadd.f32 %v6885_v27, %v6796_v11  ;;  %v14990_v11 = vld [vmem:[#allocation69_spill] sm:$0xff] }
 0x8d7   : > { %v7760_v62 = vmul.f32 3.0, %v7696_v55  ;;  %v6710_v3 = vadd.f32 %v6709_v17, %v6621_v20  ;;  %v14991_v55 = vld [vmem:[#allocation30_spill] sm:$0xff]  ;;  %v14993_v20 = vld [vmem:[#allocation136_spill] sm:$0xff]  ;;  %v14994_v17 = vld [vmem:[#allocation137_spill] sm:$0xff] }
 0x8d9   : > { %7824 = vst [vmem:[%s13730_s23 + $0x1e0] sm:$0xff] %v7760_v62  ;;  %v7372_v4 = vadd.f32 %v6710_v3, %v14988_v0 }
 0x8db   : > { %v7628_v31 = vadd.f32 %v7500_v9, %v7372_v4 }
 0x8dc   : > { %v6798_v50 = vpop.f32.mrf.mxu2  ;;  %v6899_v58 = vpop.f32.mrf.mxu0 }
 0x8dd   : > { %v6887_v39 = vpop.f32.mrf.mxu3  ;;  %v7698_v32 = vadd.f32 %v13716_v33, %v7628_v31  ;;  %v6988_v5 = vpop.f32.mrf.mxu1  ;;  %v6900_v27 = vadd.f32 %v6899_v58, %v14990_v11  ;;  %v14995_v58 = vld [vmem:[#allocation121_spill] sm:$0xff]  ;;  %v10980_v11 = vld [vmem:[#allocation8] sm:$0x3] }
 0x8de   : > { %v14057_v13 = vadd.f32 %v6887_v39, %v6798_v50  ;;  %v7439_v39 = vld [vmem:[%s11360_s28 + $0x8] sm:$0xff] }
 0x8df   : > { %v7762_v54 = vmul.f32 3.0, %v7698_v32  ;;  %6938 = vmatmul.bf16.gmra.mxu0 %v14991_v55  ;;  %v6989_v62 = vadd.f32 %v6988_v5, %v6900_v27  ;;  %v14068_v55 = vperm.slane %v10980_v11, 1 }
 0x8e0   : > { %14989 = vst [vmem:[#allocation70_spill] sm:$0xff] %v14057_v13  ;;  %7027 = vmatmul.bf16.gmra.mxu1 %v14992_v25  ;;  %v14996_v13 = vld [vmem:[#allocation108_spill] sm:$0xff] }
 0x8e1   : > { %7116 = vmatmul.bf16.gmra.mxu2 %v14993_v20  ;;  %7826 = vst [vmem:[%s13730_s23 + $0x1f0] sm:$0xff] %v7762_v54 }
 0x8e2   : > { %7205 = vmatmul.bf16.gmra.mxu3 %v14994_v17 }
 0x8e4   : > { %v7077_v3 = vpop.f32.mrf.mxu2  ;;  %v6901_v0 = vpop.f32.mrf.mxu0 }
 0x8e5   : > { %v7078_v9 = vadd.f32 %v7077_v3, %v6989_v62  ;;  %v7166_v33 = vpop.f32.mrf.mxu3  ;;  %v6990_v4 = vpop.f32.mrf.mxu1  ;;  %v6902_v50 = vadd.f32 %v6901_v0, %v13739_v29  ;;  %v7441_v0 = vld [vmem:[%s11360_s28 + $0x18] sm:$0xff] }
 0x8e7   : > { %v7167_v31 = vadd.f32 %v7166_v33, %v7078_v9  ;;  %v6991_v25 = vadd.f32 %v6990_v4, %v6902_v50 }
 0x8e9   : > { %v7311_v32 = vadd.f32 %v7167_v31, %v14995_v58  ;;  %v14997_v31 = vld [vmem:[#allocation54_spill] sm:$0xff] }
 0x8eb   : > { %v7567_v54 = vadd.f32 %v7439_v39, %v7311_v32  ;;  %v14998_v39 = vld [vmem:[#allocation31_spill] sm:$0xff] }
 0x8ec   : > { %v7079_v20 = vpop.f32.mrf.mxu2  ;;  %v6904_v62 = vpop.f32.mrf.mxu0 }
 0x8ed   : > { %v7637_v5 = vadd.f32 %v14068_v55, %v7567_v54  ;;  %v7080_v27 = vadd.f32 %v7079_v20, %v6991_v25  ;;  %v7168_v17 = vpop.f32.mrf.mxu3  ;;  %v6993_v3 = vpop.f32.mrf.mxu1  ;;  %v6905_v29 = vadd.f32 %v6904_v62, %v13750_v56 }
 0x8ef   : > { %v7701_v9 = vmul.f32 3.0, %v7637_v5  ;;  %v7169_v33 = vadd.f32 %v7168_v17, %v7080_v27  ;;  %6943 = vmatmul.bf16.gmra.mxu0 %v14996_v13  ;;  %v6994_v50 = vadd.f32 %v6993_v3, %v6905_v29  ;;  %v7443_v17 = vld [vmem:[%s11360_s28 + $0x28] sm:$0xff] }
 0x8f0   : > { %7032 = vmatmul.bf16.gmra.mxu1 %v14998_v39 }
 0x8f1   : > { %7765 = vst [vmem:[%s13730_s23 + $0x8] sm:$0xff] %v7701_v9  ;;  %v7313_v58 = vadd.f32 %v7169_v33, %v14997_v31  ;;  %7121 = vmatmul.bf16.gmra.mxu2 %v13734_v57  ;;  %v14999_v57 = vld [vmem:[#allocation122_spill] sm:$0xff] }
 0x8f2   : > { %7210 = vmatmul.bf16.gmra.mxu3 %v13736_v53 }
 0x8f3   : > { %v7569_v4 = vadd.f32 %v7441_v0, %v7313_v58 }
 0x8f4   : > { %v7082_v32 = vpop.f32.mrf.mxu2  ;;  %v6906_v25 = vpop.f32.mrf.mxu0 }
 0x8f5   : > { %v7639_v11 = vadd.f32 %v14068_v55, %v7569_v4  ;;  %v7083_v56 = vadd.f32 %v7082_v32, %v6994_v50  ;;  %v7171_v54 = vpop.f32.mrf.mxu3  ;;  %v6995_v13 = vpop.f32.mrf.mxu1  ;;  %v6907_v27 = vadd.f32 %v6906_v25, %v13765_v46  ;;  %v7445_v32 = vld [vmem:[%s11360_s28 + $0x38] sm:$0xff]  ;;  %v15000_v46 = vld [vmem:[#allocation109_spill] sm:$0xff] }
 0x8f7   : > { %v7703_v20 = vmul.f32 3.0, %v7639_v11  ;;  %v7172_v5 = vadd.f32 %v7171_v54, %v7083_v56  ;;  %v6996_v9 = vadd.f32 %v6995_v13, %v6907_v27  ;;  %v15001_v11 = vld [vmem:[#allocation21_spill] sm:$0xff]  ;;  %v15002_v54 = vld [vmem:[#allocation32_spill] sm:$0xff] }
 0x8f9   : > { %7767 = vst [vmem:[%s13730_s23 + $0x18] sm:$0xff] %v7703_v20  ;;  %v7315_v62 = vadd.f32 %v7172_v5, %v14999_v57 }
 0x8fb   : > { %v7571_v53 = vadd.f32 %v7443_v17, %v7315_v62 }
 0x8fc   : > { %v7084_v3 = vpop.f32.mrf.mxu2  ;;  %v6909_v31 = vpop.f32.mrf.mxu0 }
 0x8fd   : > { %v7641_v33 = vadd.f32 %v14068_v55, %v7571_v53  ;;  %v7085_v29 = vadd.f32 %v7084_v3, %v6996_v9  ;;  %v7173_v0 = vpop.f32.mrf.mxu3  ;;  %v6998_v58 = vpop.f32.mrf.mxu1  ;;  %v6910_v50 = vadd.f32 %v6909_v31, %v13776_v26  ;;  %v7447_v3 = vld [vmem:[%s11360_s28 + $0x48] sm:$0xff] }
 0x8ff   : > { %v7705_v39 = vmul.f32 3.0, %v7641_v33  ;;  %v7174_v4 = vadd.f32 %v7173_v0, %v7085_v29  ;;  %6948 = vmatmul.bf16.gmra.mxu0 %v15000_v46  ;;  %v6999_v13 = vadd.f32 %v6998_v58, %v6910_v50 }
 0x900   : > { %7037 = vmatmul.bf16.gmra.mxu1 %v15002_v54  ;;  %v15005_v54 = vld [vmem:[#allocation47_spill] sm:$0xff] }
 0x901   : > { %7769 = vst [vmem:[%s13730_s23 + $0x28] sm:$0xff] %v7705_v39  ;;  %v7317_v56 = vadd.f32 %v7174_v4, %v15001_v11  ;;  %7126 = vmatmul.bf16.gmra.mxu2 %v13760_v21  ;;  %v15003_v21 = vld [vmem:[#allocation46_spill] sm:$0xff] }
 0x902   : > { %7215 = vmatmul.bf16.gmra.mxu3 %v13762_v47 }
 0x903   : > { %v7573_v25 = vadd.f32 %v7445_v32, %v7317_v56  ;;  %v7449_v56 = vld [vmem:[%s11360_s28 + $0x58] sm:$0xff] }
 0x904   : > { %v7087_v20 = vpop.f32.mrf.mxu2  ;;  %v6911_v17 = vpop.f32.mrf.mxu0 }
 0x905   : > { %v7643_v5 = vadd.f32 %v14068_v55, %v7573_v25  ;;  %v7088_v26 = vadd.f32 %v7087_v20, %v6999_v13  ;;  %v7176_v27 = vpop.f32.mrf.mxu3  ;;  %v7000_v57 = vpop.f32.mrf.mxu1  ;;  %v6912_v9 = vadd.f32 %v6911_v17, %v13791_v2  ;;  %v15004_v2 = vld [vmem:[#allocation110_spill] sm:$0xff]  ;;  %v15006_v13 = vld [vmem:[#allocation64_spill] sm:$0xff] }
 0x907   : > { %v7707_v62 = vmul.f32 3.0, %v7643_v5  ;;  %v7177_v53 = vadd.f32 %v7176_v27, %v7088_v26  ;;  %v7001_v29 = vadd.f32 %v7000_v57, %v6912_v9 }
 0x909   : > { %7771 = vst [vmem:[%s13730_s23 + $0x38] sm:$0xff] %v7707_v62  ;;  %v7319_v33 = vadd.f32 %v7177_v53, %v15003_v21  ;;  %v7451_v21 = vld [vmem:[%s11360_s28 + $0x68] sm:$0xff] }
 0x90b   : > { %v7575_v47 = vadd.f32 %v7447_v3, %v7319_v33 }
 0x90c   : > { %v7089_v0 = vpop.f32.mrf.mxu2  ;;  %v6914_v4 = vpop.f32.mrf.mxu0 }
 0x90d   : > { %v7645_v31 = vadd.f32 %v14068_v55, %v7575_v47  ;;  %v7090_v58 = vadd.f32 %v7089_v0, %v7001_v29  ;;  %v7178_v39 = vpop.f32.mrf.mxu3  ;;  %v7003_v50 = vpop.f32.mrf.mxu1  ;;  %v6915_v11 = vadd.f32 %v6914_v4, %v13802_v43 }
 0x90f   : > { %v7709_v32 = vmul.f32 3.0, %v7645_v31  ;;  %v7179_v46 = vadd.f32 %v7178_v39, %v7090_v58  ;;  %6953 = vmatmul.bf16.gmra.mxu0 %v15004_v2  ;;  %v7004_v5 = vadd.f32 %v7003_v50, %v6915_v11  ;;  %v7453_v11 = vld [vmem:[%s11360_s28 + $0x78] sm:$0xff] }
 0x910   : > { %7042 = vmatmul.bf16.gmra.mxu1 %v15006_v13 }
 0x911   : > { %7773 = vst [vmem:[%s13730_s23 + $0x48] sm:$0xff] %v7709_v32  ;;  %v7321_v25 = vadd.f32 %v7179_v46, %v15005_v54  ;;  %7131 = vmatmul.bf16.gmra.mxu2 %v13786_v42  ;;  %v15007_v42 = vld [vmem:[#allocation22_spill] sm:$0xff]  ;;  %v15010_v54 = vld [vmem:[#allocation65_spill] sm:$0xff] }
 0x912   : > { %7220 = vmatmul.bf16.gmra.mxu3 %v13788_v61 }
 0x913   : > { %v7577_v20 = vadd.f32 %v7449_v56, %v7321_v25  ;;  %v15009_v56 = vld [vmem:[#allocation124_spill] sm:$0xff] }
 0x914   : > { %v7092_v26 = vpop.f32.mrf.mxu2  ;;  %v6916_v57 = vpop.f32.mrf.mxu0 }
 0x915   : > { %v7647_v27 = vadd.f32 %v14068_v55, %v7577_v20  ;;  %v7093_v43 = vadd.f32 %v7092_v26, %v7004_v5  ;;  %v7181_v17 = vpop.f32.mrf.mxu3  ;;  %v7005_v62 = vpop.f32.mrf.mxu1  ;;  %v6917_v3 = vadd.f32 %v6916_v57, %v13817_v30  ;;  %v15008_v30 = vld [vmem:[#allocation111_spill] sm:$0xff] }
 0x917   : > { %v7711_v53 = vmul.f32 3.0, %v7647_v27  ;;  %v7182_v9 = vadd.f32 %v7181_v17, %v7093_v43  ;;  %v7006_v47 = vadd.f32 %v7005_v62, %v6917_v3 }
 0x919   : > { %7775 = vst [vmem:[%s13730_s23 + $0x58] sm:$0xff] %v7711_v53  ;;  %v7323_v33 = vadd.f32 %v7182_v9, %v15007_v42  ;;  %v7455_v53 = vld [vmem:[%s11360_s28 + $0x88] sm:$0xff] }
 0x91b   : > { %v7579_v61 = vadd.f32 %v7451_v21, %v7323_v33 }
 0x91c   : > { %v7094_v29 = vpop.f32.mrf.mxu2  ;;  %v6919_v39 = vpop.f32.mrf.mxu0 }
 0x91d   : > { %v7649_v0 = vadd.f32 %v14068_v55, %v7579_v61  ;;  %v7095_v31 = vadd.f32 %v7094_v29, %v7006_v47  ;;  %v7183_v58 = vpop.f32.mrf.mxu3  ;;  %v7008_v4 = vpop.f32.mrf.mxu1  ;;  %v6920_v46 = vadd.f32 %v6919_v39, %v13828_v19  ;;  %v7457_v39 = vld [vmem:[%s11360_s28 + $0x98] sm:$0xff] }
 0x91f   : > { %v7713_v50 = vmul.f32 3.0, %v7649_v0  ;;  %v7184_v32 = vadd.f32 %v7183_v58, %v7095_v31  ;;  %6958 = vmatmul.bf16.gmra.mxu0 %v15008_v30  ;;  %v7009_v13 = vadd.f32 %v7008_v4, %v6920_v46  ;;  %v15013_v4 = vld [vmem:[#allocation56_spill] sm:$0xff] }
 0x920   : > { %7047 = vmatmul.bf16.gmra.mxu1 %v15010_v54 }
 0x921   : > { %7777 = vst [vmem:[%s13730_s23 + $0x68] sm:$0xff] %v7713_v50  ;;  %v7325_v2 = vadd.f32 %v7184_v32, %v15009_v56  ;;  %7136 = vmatmul.bf16.gmra.mxu2 %v13812_v28  ;;  %v15011_v28 = vld [vmem:[#allocation127_spill] sm:$0xff]  ;;  %v15014_v32 = vld [vmem:[#allocation33_spill] sm:$0xff] }
 0x922   : > { %7225 = vmatmul.bf16.gmra.mxu3 %v13814_v44 }
 0x923   : > { %v7581_v25 = vadd.f32 %v7453_v11, %v7325_v2 }
 0x924   : > { %v7097_v20 = vpop.f32.mrf.mxu2  ;;  %v6921_v27 = vpop.f32.mrf.mxu0 }
 0x925   : > { %v7651_v5 = vadd.f32 %v14068_v55, %v7581_v25  ;;  %v7098_v19 = vadd.f32 %v7097_v20, %v7009_v13  ;;  %v7186_v26 = vpop.f32.mrf.mxu3  ;;  %v7010_v43 = vpop.f32.mrf.mxu1  ;;  %v6922_v62 = vadd.f32 %v6921_v27, %v13843_v16  ;;  %v15012_v16 = vld [vmem:[#allocation112_spill] sm:$0xff] }
 0x927   : > { %v7715_v17 = vmul.f32 3.0, %v7651_v5  ;;  %v7187_v57 = vadd.f32 %v7186_v26, %v7098_v19  ;;  %v7011_v3 = vadd.f32 %v7010_v43, %v6922_v62  ;;  %v7459_v19 = vld [vmem:[%s11360_s28 + $0xa8] sm:$0xff] }
 0x929   : > { %7779 = vst [vmem:[%s13730_s23 + $0x78] sm:$0xff] %v7715_v17  ;;  %v7327_v9 = vadd.f32 %v7187_v57, %v15011_v28 }
 0x92b   : > { %v7583_v44 = vadd.f32 %v7455_v53, %v7327_v9 }
 0x92c   : > { %v7099_v21 = vpop.f32.mrf.mxu2  ;;  %v6924_v47 = vpop.f32.mrf.mxu0 }
 0x92d   : > { %v7653_v42 = vadd.f32 %v14068_v55, %v7583_v44  ;;  %v7100_v33 = vadd.f32 %v7099_v21, %v7011_v3  ;;  %v7188_v61 = vpop.f32.mrf.mxu3  ;;  %v7013_v29 = vpop.f32.mrf.mxu1  ;;  %v6925_v58 = vadd.f32 %v6924_v47, %v13854_v12  ;;  %v7461_v21 = vld [vmem:[%s11360_s28 + $0xb8] sm:$0xff] }
 0x92f   : > { %v7717_v0 = vmul.f32 3.0, %v7653_v42  ;;  %v7189_v31 = vadd.f32 %v7188_v61, %v7100_v33  ;;  %6963 = vmatmul.bf16.gmra.mxu0 %v15012_v16  ;;  %v7014_v11 = vadd.f32 %v7013_v29, %v6925_v58  ;;  %v15017_v42 = vld [vmem:[#allocation83_spill] sm:$0xff]  ;;  %v15018_v61 = vld [vmem:[#allocation34_spill] sm:$0xff] }
 0x930   : > { %7052 = vmatmul.bf16.gmra.mxu1 %v15014_v32 }
 0x931   : > { %7781 = vst [vmem:[%s13730_s23 + $0x88] sm:$0xff] %v7717_v0  ;;  %v7329_v50 = vadd.f32 %v7189_v31, %v15013_v4  ;;  %7141 = vmatmul.bf16.gmra.mxu2 %v13838_v51  ;;  %v15015_v51 = vld [vmem:[#allocation52_spill] sm:$0xff] }
 0x932   : > { %7230 = vmatmul.bf16.gmra.mxu3 %v13840_v14 }
 0x933   : > { %v7585_v46 = vadd.f32 %v7457_v39, %v7329_v50 }
 0x934   : > { %v7102_v30 = vpop.f32.mrf.mxu2  ;;  %v6926_v54 = vpop.f32.mrf.mxu0 }
 0x935   : > { %v7655_v56 = vadd.f32 %v14068_v55, %v7585_v46  ;;  %v7103_v12 = vadd.f32 %v7102_v30, %v7014_v11  ;;  %v7191_v2 = vpop.f32.mrf.mxu3  ;;  %v7015_v25 = vpop.f32.mrf.mxu1  ;;  %v6927_v5 = vadd.f32 %v6926_v54, %v13869_v45  ;;  %v15016_v45 = vld [vmem:[#allocation115_spill] sm:$0xff]  ;;  %v7463_v46 = vld [vmem:[%s11360_s28 + $0xc8] sm:$0xff] }
 0x937   : > { %v7719_v13 = vmul.f32 3.0, %v7655_v56  ;;  %v7192_v20 = vadd.f32 %v7191_v2, %v7103_v12  ;;  %v7016_v27 = vadd.f32 %v7015_v25, %v6927_v5 }
 0x939   : > { %7783 = vst [vmem:[%s13730_s23 + $0x98] sm:$0xff] %v7719_v13  ;;  %v7331_v26 = vadd.f32 %v7192_v20, %v15015_v51  ;;  %v7465_v51 = vld [vmem:[%s11360_s28 + $0xd8] sm:$0xff] }
 0x93b   : > { %v7587_v14 = vadd.f32 %v7459_v19, %v7331_v26  ;;  %v15021_v26 = vld [vmem:[#allocation59_spill] sm:$0xff] }
 0x93c   : > { %v7104_v43 = vpop.f32.mrf.mxu2  ;;  %v6929_v53 = vpop.f32.mrf.mxu0 }
 0x93d   : > { %v7657_v17 = vadd.f32 %v14068_v55, %v7587_v14  ;;  %v7105_v57 = vadd.f32 %v7104_v43, %v7016_v27  ;;  %v7193_v62 = vpop.f32.mrf.mxu3  ;;  %v7018_v28 = vpop.f32.mrf.mxu1  ;;  %v6930_v3 = vadd.f32 %v6929_v53, %v13880_v23  ;;  %v15022_v27 = vld [vmem:[#allocation114_spill] sm:$0xff] }
 0x93f   : > { %v7721_v9 = vmul.f32 3.0, %v7657_v17  ;;  %v7194_v44 = vadd.f32 %v7193_v62, %v7105_v57  ;;  %6968 = vmatmul.bf16.gmra.mxu0 %v15016_v45  ;;  %v7019_v29 = vadd.f32 %v7018_v28, %v6930_v3  ;;  %v7467_v45 = vld [vmem:[%s11360_s28 + $0xe8] sm:$0xff] }
 0x940   : > { %7057 = vmatmul.bf16.gmra.mxu1 %v15018_v61 }
 0x941   : > { %7785 = vst [vmem:[%s13730_s23 + $0xa8] sm:$0xff] %v7721_v9  ;;  %v7333_v33 = vadd.f32 %v7194_v44, %v15017_v42  ;;  %7146 = vmatmul.bf16.gmra.mxu2 %v13864_v8  ;;  %v15019_v8 = vld [vmem:[#allocation125_spill] sm:$0xff] }
 0x942   : > { %7235 = vmatmul.bf16.gmra.mxu3 %v13866_v18 }
 0x943   : > { %v7589_v47 = vadd.f32 %v7461_v21, %v7333_v33 }
 0x944   : > { %v7107_v0 = vpop.f32.mrf.mxu2  ;;  %v6931_v39 = vpop.f32.mrf.mxu0 }
 0x945   : > { %v7659_v31 = vadd.f32 %v14068_v55, %v7589_v47  ;;  %v7108_v23 = vadd.f32 %v7107_v0, %v7019_v29  ;;  %v7196_v58 = vpop.f32.mrf.mxu3  ;;  %v7020_v16 = vpop.f32.mrf.mxu1  ;;  %v6932_v32 = vadd.f32 %v6931_v39, %v13895_v49  ;;  %v15020_v49 = vld [vmem:[#allocation134_spill] sm:$0xff] }
 0x947   : > { %v7723_v4 = vmul.f32 3.0, %v7659_v31  ;;  %v7197_v50 = vadd.f32 %v7196_v58, %v7108_v23  ;;  %v7021_v30 = vadd.f32 %v7020_v16, %v6932_v32 }
 0x949   : > { %7787 = vst [vmem:[%s13730_s23 + $0xb8] sm:$0xff] %v7723_v4  ;;  %v7335_v11 = vadd.f32 %v7197_v50, %v15019_v8  ;;  %v15024_v4 = vld [vmem:[#allocation87_spill] sm:$0xff] }
 0x94b   : > { %v7591_v18 = vadd.f32 %v7463_v46, %v7335_v11 }
 0x94c   : > { %v7109_v56 = vpop.f32.mrf.mxu2  ;;  %v6934_v25 = vpop.f32.mrf.mxu0 }
 0x94d   : > { %v7661_v12 = vadd.f32 %v14068_v55, %v7591_v18  ;;  %v7110_v2 = vadd.f32 %v7109_v56, %v7021_v30  ;;  %v7198_v54 = vpop.f32.mrf.mxu3  ;;  %v7023_v13 = vpop.f32.mrf.mxu1  ;;  %v6935_v19 = vadd.f32 %v6934_v25, %v13906_v1 }
 0x94f   : > { %v7725_v20 = vmul.f32 3.0, %v7661_v12  ;;  %v7199_v5 = vadd.f32 %v7198_v54, %v7110_v2  ;;  %6973 = vmatmul.bf16.gmra.mxu0 %v15020_v49  ;;  %v7024_v17 = vadd.f32 %v7023_v13, %v6935_v19  ;;  %v15025_v13 = vld [vmem:[#allocation24_spill] sm:$0xff] }
 0x950   : > { %7062 = vmatmul.bf16.gmra.mxu1 %v15022_v27 }
 0x951   : > { %7789 = vst [vmem:[%s13730_s23 + $0xc8] sm:$0xff] %v7725_v20  ;;  %v7337_v14 = vadd.f32 %v7199_v5, %v15021_v26  ;;  %7151 = vmatmul.bf16.gmra.mxu2 %v13890_v48  ;;  %v15023_v48 = vld [vmem:[#allocation126_spill] sm:$0xff] }
 0x952   : > { %7240 = vmatmul.bf16.gmra.mxu3 %v13892_v24 }
 0x953   : > { %v7593_v43 = vadd.f32 %v7465_v51, %v7337_v14 }
 0x954   : > { %v7112_v57 = vpop.f32.mrf.mxu2  ;;  %v6936_v28 = vpop.f32.mrf.mxu0 }
 0x955   : > { %v7663_v62 = vadd.f32 %v14068_v55, %v7593_v43  ;;  %v7113_v1 = vadd.f32 %v7112_v57, %v7024_v17  ;;  %v7201_v53 = vpop.f32.mrf.mxu3  ;;  %v7025_v9 = vpop.f32.mrf.mxu1  ;;  %v6937_v21 = vadd.f32 %v6936_v28, %v13913_v15  ;;  %v7469_v15 = vld [vmem:[%s11360_s28 + $0xf8] sm:$0xff] }
 0x957   : > { %v7727_v44 = vmul.f32 3.0, %v7663_v62  ;;  %v7202_v3 = vadd.f32 %v7201_v53, %v7113_v1  ;;  %v7026_v33 = vadd.f32 %v7025_v9, %v6937_v21  ;;  %v15026_v1 = vld [vmem:[#allocation90_spill] sm:$0xff] }
 0x959   : > { %7791 = vst [vmem:[%s13730_s23 + $0xd8] sm:$0xff] %v7727_v44  ;;  %v7339_v42 = vadd.f32 %v7202_v3, %v15023_v48 }
 0x95b   : > { %v7595_v24 = vadd.f32 %v7467_v45, %v7339_v42 }
 0x95c   : > { %v7114_v61 = vpop.f32.mrf.mxu2  ;;  %v6939_v31 = vpop.f32.mrf.mxu0 }
 0x95d   : > { %v7665_v47 = vadd.f32 %v14068_v55, %v7595_v24  ;;  %v7115_v29 = vadd.f32 %v7114_v61, %v7026_v33  ;;  %v7203_v0 = vpop.f32.mrf.mxu3  ;;  %v7028_v23 = vpop.f32.mrf.mxu1  ;;  %v6940_v16 = vadd.f32 %v6939_v31, %v13924_v22  ;;  %v7471_v22 = vld [vmem:[%s11360_s28 + $0x108] sm:$0xff] }
 0x95f   : > { %v7729_v58 = vmul.f32 3.0, %v7665_v47  ;;  %v7204_v39 = vadd.f32 %v7203_v0, %v7115_v29  ;;  %v7029_v46 = vadd.f32 %v7028_v23, %v6940_v16  ;;  %v15027_v47 = vld [vmem:[#allocation91_spill] sm:$0xff] }
 0x961   : > { %7793 = vst [vmem:[%s13730_s23 + $0xe8] sm:$0xff] %v7729_v58  ;;  %v7341_v50 = vadd.f32 %v7204_v39, %v15024_v4 }
 0x963   : > { %v7597_v32 = vadd.f32 %v7469_v15, %v7341_v50 }
 0x964   : > { %v7117_v8 = vpop.f32.mrf.mxu2  ;;  %v6941_v56 = vpop.f32.mrf.mxu0 }
 0x965   : > { %v7667_v11 = vadd.f32 %v14068_v55, %v7597_v32  ;;  %v7118_v18 = vadd.f32 %v7117_v8, %v7029_v46  ;;  %v7206_v30 = vpop.f32.mrf.mxu3  ;;  %v7030_v12 = vpop.f32.mrf.mxu1  ;;  %v6942_v25 = vadd.f32 %v6941_v56, %v13931_v52  ;;  %v7473_v52 = vld [vmem:[%s11360_s28 + $0x118] sm:$0xff]  ;;  %v15028_v8 = vld [vmem:[#allocation129_spill] sm:$0xff] }
 0x967   : > { %v7731_v2 = vmul.f32 3.0, %v7667_v11  ;;  %v7207_v54 = vadd.f32 %v7206_v30, %v7118_v18  ;;  %v7031_v19 = vadd.f32 %v7030_v12, %v6942_v25 }
 0x969   : > { %7795 = vst [vmem:[%s13730_s23 + $0xf8] sm:$0xff] %v7731_v2  ;;  %v7343_v20 = vadd.f32 %v7207_v54, %v15025_v13 }
 0x96b   : > { %v7599_v5 = vadd.f32 %v7471_v22, %v7343_v20 }
 0x96c   : > { %v7119_v51 = vpop.f32.mrf.mxu2  ;;  %v6944_v27 = vpop.f32.mrf.mxu0 }
 0x96d   : > { %v7669_v49 = vadd.f32 %v14068_v55, %v7599_v5  ;;  %v7120_v26 = vadd.f32 %v7119_v51, %v7031_v19  ;;  %v7208_v14 = vpop.f32.mrf.mxu3  ;;  %v7033_v43 = vpop.f32.mrf.mxu1  ;;  %v6945_v62 = vadd.f32 %v6944_v27, %v13942_v7  ;;  %v7475_v7 = vld [vmem:[%s11360_s28 + $0x128] sm:$0xff]  ;;  %v15029_v19 = vld [vmem:[#allocation25_spill] sm:$0xff] }
 0x96f   : > { %v7733_v17 = vmul.f32 3.0, %v7669_v49  ;;  %v7209_v57 = vadd.f32 %v7208_v14, %v7120_v26  ;;  %v7034_v9 = vadd.f32 %v7033_v43, %v6945_v62 }
 0x971   : > { %7797 = vst [vmem:[%s13730_s23 + $0x108] sm:$0xff] %v7733_v17  ;;  %v7345_v53 = vadd.f32 %v7209_v57, %v15026_v1 }
 0x973   : > { %v7601_v28 = vadd.f32 %v7473_v52, %v7345_v53 }
 0x974   : > { %v7122_v44 = vpop.f32.mrf.mxu2  ;;  %v6946_v48 = vpop.f32.mrf.mxu0 }
 0x975   : > { %v7671_v3 = vadd.f32 %v14068_v55, %v7601_v28  ;;  %v7123_v21 = vadd.f32 %v7122_v44, %v7034_v9  ;;  %v7211_v45 = vpop.f32.mrf.mxu3  ;;  %v7035_v42 = vpop.f32.mrf.mxu1  ;;  %v6947_v61 = vadd.f32 %v6946_v48, %v13949_v10  ;;  %v7477_v10 = vld [vmem:[%s11360_s28 + $0x138] sm:$0xff] }
 0x976   : > { %v15030_v28 = vld [vmem:[#allocation26_spill] sm:$0xff] }
 0x977   : > { %v7735_v24 = vmul.f32 3.0, %v7671_v3  ;;  %v7212_v33 = vadd.f32 %v7211_v45, %v7123_v21  ;;  %v7036_v31 = vadd.f32 %v7035_v42, %v6947_v61 }
 0x979   : > { %7799 = vst [vmem:[%s13730_s23 + $0x118] sm:$0xff] %v7735_v24  ;;  %v7347_v29 = vadd.f32 %v7212_v33, %v15027_v47 }
 0x97b   : > { %v7603_v0 = vadd.f32 %v7475_v7, %v7347_v29  ;;  %v15031_v29 = vld [vmem:[#allocation131_spill] sm:$0xff] }
 0x97c   : > { %v7124_v23 = vpop.f32.mrf.mxu2  ;;  %v6949_v15 = vpop.f32.mrf.mxu0 }
 0x97d   : > { %v7673_v58 = vadd.f32 %v14068_v55, %v7603_v0  ;;  %v7125_v39 = vadd.f32 %v7124_v23, %v7036_v31  ;;  %v7213_v16 = vpop.f32.mrf.mxu3  ;;  %v7038_v4 = vpop.f32.mrf.mxu1  ;;  %v6950_v46 = vadd.f32 %v6949_v15, %v13960_v6  ;;  %v7479_v6 = vld [vmem:[%s11360_s28 + $0x148] sm:$0xff] }
 0x97f   : > { %v7737_v50 = vmul.f32 3.0, %v7673_v58  ;;  %v7214_v32 = vadd.f32 %v7213_v16, %v7125_v39  ;;  %v7039_v30 = vadd.f32 %v7038_v4, %v6950_v46 }
 0x981   : > { %7801 = vst [vmem:[%s13730_s23 + $0x128] sm:$0xff] %v7737_v50  ;;  %v7349_v11 = vadd.f32 %v7214_v32, %v15028_v8  ;;  %v15032_v8 = vld [vmem:[#allocation99_spill] sm:$0xff] }
 0x983   : > { %v7605_v18 = vadd.f32 %v7477_v10, %v7349_v11 }
 0x984   : > { %v7127_v56 = vpop.f32.mrf.mxu2  ;;  %v6951_v25 = vpop.f32.mrf.mxu0 }
 0x985   : > { %v7675_v12 = vadd.f32 %v14068_v55, %v7605_v18  ;;  %v7128_v2 = vadd.f32 %v7127_v56, %v7039_v30  ;;  %v7216_v54 = vpop.f32.mrf.mxu3  ;;  %v7040_v22 = vpop.f32.mrf.mxu1  ;;  %v6952_v5 = vadd.f32 %v6951_v25, %v13967_v37  ;;  %v7481_v37 = vld [vmem:[%s11360_s28 + $0x158] sm:$0xff] }
 0x987   : > { %v7739_v13 = vmul.f32 3.0, %v7675_v12  ;;  %v7217_v20 = vadd.f32 %v7216_v54, %v7128_v2  ;;  %v7041_v26 = vadd.f32 %v7040_v22, %v6952_v5 }
 0x989   : > { %7803 = vst [vmem:[%s13730_s23 + $0x138] sm:$0xff] %v7739_v13  ;;  %v7351_v51 = vadd.f32 %v7217_v20, %v15029_v19 }
 0x98b   : > { %v7607_v49 = vadd.f32 %v7479_v6, %v7351_v51  ;;  %v15033_v6 = vld [vmem:[#allocation132_spill] sm:$0xff] }
 0x98c   : > { %v7129_v14 = vpop.f32.mrf.mxu2  ;;  %v6954_v57 = vpop.f32.mrf.mxu0 }
 0x98d   : > { %v7677_v27 = vadd.f32 %v14068_v55, %v7607_v49  ;;  %v7130_v43 = vadd.f32 %v7129_v14, %v7041_v26  ;;  %v7218_v17 = vpop.f32.mrf.mxu3  ;;  %v7043_v62 = vpop.f32.mrf.mxu1  ;;  %v6955_v53 = vadd.f32 %v6954_v57, %v13978_v60  ;;  %v7483_v60 = vld [vmem:[%s11360_s28 + $0x168] sm:$0xff] }
 0x98f   : > { %v7741_v52 = vmul.f32 3.0, %v7677_v27  ;;  %v7219_v1 = vadd.f32 %v7218_v17, %v7130_v43  ;;  %v7044_v3 = vadd.f32 %v7043_v62, %v6955_v53  ;;  %v15034_v53 = vld [vmem:[#allocation27_spill] sm:$0xff] }
 0x991   : > { %7805 = vst [vmem:[%s13730_s23 + $0x148] sm:$0xff] %v7741_v52  ;;  %v7353_v9 = vadd.f32 %v7219_v1, %v15030_v28 }
 0x993   : > { %v7609_v44 = vadd.f32 %v7481_v37, %v7353_v9 }
 0x994   : > { %v7132_v21 = vpop.f32.mrf.mxu2  ;;  %v6956_v24 = vpop.f32.mrf.mxu0 }
 0x995   : > { %v7679_v45 = vadd.f32 %v14068_v55, %v7609_v44  ;;  %v7133_v48 = vadd.f32 %v7132_v21, %v7044_v3  ;;  %v7221_v42 = vpop.f32.mrf.mxu3  ;;  %v7045_v33 = vpop.f32.mrf.mxu1  ;;  %v6957_v47 = vadd.f32 %v6956_v24, %v13985_v38  ;;  %v7485_v38 = vld [vmem:[%s11360_s28 + $0x178] sm:$0xff] }
 0x997   : > { %v7743_v61 = vmul.f32 3.0, %v7679_v45  ;;  %v7222_v7 = vadd.f32 %v7221_v42, %v7133_v48  ;;  %v7046_v23 = vadd.f32 %v7045_v33, %v6957_v47 }
 0x999   : > { %7807 = vst [vmem:[%s13730_s23 + $0x158] sm:$0xff] %v7743_v61  ;;  %v7355_v0 = vadd.f32 %v7222_v7, %v15031_v29  ;;  %v15035_v7 = vld [vmem:[#allocation102_spill] sm:$0xff] }
 0x99b   : > { %v7611_v31 = vadd.f32 %v7483_v60, %v7355_v0 }
 0x99c   : > { %v7134_v58 = vpop.f32.mrf.mxu2  ;;  %v6959_v4 = vpop.f32.mrf.mxu0 }
 0x99d   : > { %v7681_v39 = vadd.f32 %v14068_v55, %v7611_v31  ;;  %v7135_v16 = vadd.f32 %v7134_v58, %v7046_v23  ;;  %v7223_v15 = vpop.f32.mrf.mxu3  ;;  %v7048_v50 = vpop.f32.mrf.mxu1  ;;  %v6960_v10 = vadd.f32 %v6959_v4, %v13996_v40  ;;  %v7487_v40 = vld [vmem:[%s11360_s28 + $0x188] sm:$0xff] }
 0x99f   : > { %v7745_v32 = vmul.f32 3.0, %v7681_v39  ;;  %v7224_v46 = vadd.f32 %v7223_v15, %v7135_v16  ;;  %v7049_v30 = vadd.f32 %v7048_v50, %v6960_v10 }
 0x9a1   : > { %7809 = vst [vmem:[%s13730_s23 + $0x168] sm:$0xff] %v7745_v32  ;;  %v7357_v11 = vadd.f32 %v7224_v46, %v15032_v8  ;;  %v15036_v32 = vld [vmem:[#allocation61_spill] sm:$0xff] }
 0x9a3   : > { %v7613_v18 = vadd.f32 %v7485_v38, %v7357_v11 }
 0x9a4   : > { %v7137_v56 = vpop.f32.mrf.mxu2  ;;  %v6961_v25 = vpop.f32.mrf.mxu0 }
 0x9a5   : > { %v7683_v12 = vadd.f32 %v14068_v55, %v7613_v18  ;;  %v7138_v2 = vadd.f32 %v7137_v56, %v7049_v30  ;;  %v7226_v54 = vpop.f32.mrf.mxu3  ;;  %v7050_v22 = vpop.f32.mrf.mxu1  ;;  %v6962_v5 = vadd.f32 %v6961_v25, %v14003_v59  ;;  %v7489_v59 = vld [vmem:[%s11360_s28 + $0x198] sm:$0xff] }
 0x9a7   : > { %v7747_v13 = vmul.f32 3.0, %v7683_v12  ;;  %v7227_v20 = vadd.f32 %v7226_v54, %v7138_v2  ;;  %v7051_v49 = vadd.f32 %v7050_v22, %v6962_v5  ;;  %v15037_v22 = vld [vmem:[#allocation104_spill] sm:$0xff] }
 0x9a9   : > { %7811 = vst [vmem:[%s13730_s23 + $0x178] sm:$0xff] %v7747_v13  ;;  %v7359_v19 = vadd.f32 %v7227_v20, %v15033_v6 }
 0x9ab   : > { %v7615_v51 = vadd.f32 %v7487_v40, %v7359_v19 }
 0x9ac   : > { %v7139_v26 = vpop.f32.mrf.mxu2  ;;  %v6964_v17 = vpop.f32.mrf.mxu0 }
 0x9ad   : > { %v7685_v14 = vadd.f32 %v14068_v55, %v7615_v51  ;;  %v7140_v27 = vadd.f32 %v7139_v26, %v7051_v49  ;;  %v7228_v43 = vpop.f32.mrf.mxu3  ;;  %v7053_v57 = vpop.f32.mrf.mxu1  ;;  %v6965_v1 = vadd.f32 %v6964_v17, %v14014_v63  ;;  %v7491_v63 = vld [vmem:[%s11360_s28 + $0x1a8] sm:$0xff]  ;;  %v15038_v17 = vld [vmem:[#allocation29_spill] sm:$0xff] }
 0x9af   : > { %v7749_v62 = vmul.f32 3.0, %v7685_v14  ;;  %v7229_v52 = vadd.f32 %v7228_v43, %v7140_v27  ;;  %v7054_v9 = vadd.f32 %v7053_v57, %v6965_v1 }
 0x9b1   : > { %7813 = vst [vmem:[%s13730_s23 + $0x188] sm:$0xff] %v7749_v62  ;;  %v7361_v37 = vadd.f32 %v7229_v52, %v15034_v53 }
 0x9b3   : > { %v7617_v28 = vadd.f32 %v7489_v59, %v7361_v37 }
 0x9b4   : > { %v7142_v44 = vpop.f32.mrf.mxu2  ;;  %v6966_v48 = vpop.f32.mrf.mxu0 }
 0x9b5   : > { %v7687_v3 = vadd.f32 %v14068_v55, %v7617_v28  ;;  %v7143_v21 = vadd.f32 %v7142_v44, %v7054_v9  ;;  %v7231_v45 = vpop.f32.mrf.mxu3  ;;  %v7055_v42 = vpop.f32.mrf.mxu1  ;;  %v6967_v61 = vadd.f32 %v6966_v48, %v14021_v36  ;;  %v7493_v36 = vld [vmem:[%s11360_s28 + $0x1b8] sm:$0xff] }
 0x9b7   : > { %v7751_v24 = vmul.f32 3.0, %v7687_v3  ;;  %v7232_v33 = vadd.f32 %v7231_v45, %v7143_v21  ;;  %v7056_v29 = vadd.f32 %v7055_v42, %v6967_v61  ;;  %v15039_v3 = vld [vmem:[#allocation70_spill] sm:$0xff]  ;;  %v7499_v21 = vld [vmem:[%s11360_s28 + $0x1e8] sm:$0xff] }
 0x9b8   : > { %v15040_v45 = vld [vmem:[#allocation106_spill] sm:$0xff] }
 0x9b9   : > { %7815 = vst [vmem:[%s13730_s23 + $0x198] sm:$0xff] %v7751_v24  ;;  %v7363_v47 = vadd.f32 %v7232_v33, %v15035_v7 }
 0x9bb   : > { %v7619_v60 = vadd.f32 %v7491_v63, %v7363_v47 }
 0x9bc   : > { %v7144_v0 = vpop.f32.mrf.mxu2  ;;  %v6969_v39 = vpop.f32.mrf.mxu0 }
 0x9bd   : > { %v7689_v31 = vadd.f32 %v14068_v55, %v7619_v60  ;;  %v7145_v23 = vadd.f32 %v7144_v0, %v7056_v29  ;;  %v7233_v58 = vpop.f32.mrf.mxu3  ;;  %v7058_v16 = vpop.f32.mrf.mxu1  ;;  %v6970_v50 = vadd.f32 %v6969_v39, %v14032_v35  ;;  %v7495_v35 = vld [vmem:[%s11360_s28 + $0x1c8] sm:$0xff]  ;;  %v7501_v0 = vld [vmem:[%s11360_s28 + $0x1f8] sm:$0xff] }
 0x9bf   : > { %v7753_v15 = vmul.f32 3.0, %v7689_v31  ;;  %v7234_v4 = vadd.f32 %v7233_v58, %v7145_v23  ;;  %v7059_v38 = vadd.f32 %v7058_v16, %v6970_v50  ;;  %v15041_v31 = vld [vmem:[#allocation66_spill] sm:$0xff] }
 0x9c1   : > { %7817 = vst [vmem:[%s13730_s23 + $0x1a8] sm:$0xff] %v7753_v15  ;;  %v7365_v46 = vadd.f32 %v7234_v4, %v15036_v32 }
 0x9c3   : > { %v7621_v10 = vadd.f32 %v7493_v36, %v7365_v46 }
 0x9c4   : > { %v7147_v8 = vpop.f32.mrf.mxu2  ;;  %v6971_v56 = vpop.f32.mrf.mxu0 }
 0x9c5   : > { %v7691_v11 = vadd.f32 %v14068_v55, %v7621_v10  ;;  %v7148_v18 = vadd.f32 %v7147_v8, %v7059_v38  ;;  %v7236_v30 = vpop.f32.mrf.mxu3  ;;  %v7060_v12 = vpop.f32.mrf.mxu1  ;;  %v6972_v25 = vadd.f32 %v6971_v56, %v14039_v41  ;;  %v7497_v41 = vld [vmem:[%s11360_s28 + $0x1d8] sm:$0xff] }
 0x9c7   : > { %v7755_v2 = vmul.f32 3.0, %v7691_v11  ;;  %v7237_v54 = vadd.f32 %v7236_v30, %v7148_v18  ;;  %v7061_v5 = vadd.f32 %v7060_v12, %v6972_v25 }
 0x9c9   : > { %7819 = vst [vmem:[%s13730_s23 + $0x1b8] sm:$0xff] %v7755_v2  ;;  %v7367_v13 = vadd.f32 %v7237_v54, %v15037_v22 }
 0x9cb   : > { %v7623_v20 = vadd.f32 %v7495_v35, %v7367_v13 }
 0x9cc   : > { %v7149_v40 = vpop.f32.mrf.mxu2  ;;  %v6974_v49 = vpop.f32.mrf.mxu0 }
 0x9cd   : > { %v7693_v6 = vadd.f32 %v14068_v55, %v7623_v20  ;;  %v7150_v19 = vadd.f32 %v7149_v40, %v7061_v5  ;;  %v7238_v51 = vpop.f32.mrf.mxu3  ;;  %v6975_v27 = vadd.f32 %v6974_v49, %v14050_v34  ;;  %v7063_v43 = vpop.f32.mrf.mxu1 }
 0x9cf   : > { %v7757_v26 = vmul.f32 3.0, %v7693_v6  ;;  %v7239_v14 = vadd.f32 %v7238_v51, %v7150_v19  ;;  %v7064_v52 = vadd.f32 %v7063_v43, %v6975_v27 }
 0x9d1   : > { %7821 = vst [vmem:[%s13730_s23 + $0x1c8] sm:$0xff] %v7757_v26  ;;  %v7369_v57 = vadd.f32 %v7239_v14, %v15038_v17 }
 0x9d3   : > { %v7625_v62 = vadd.f32 %v7497_v41, %v7369_v57 }
 0x9d4   : > { %v7152_v1 = vpop.f32.mrf.mxu2  ;;  %v6976_v28 = vpop.f32.mrf.mxu0 }
 0x9d5   : > { %v7695_v59 = vadd.f32 %v14068_v55, %v7625_v62  ;;  %v7153_v53 = vadd.f32 %v7152_v1, %v7064_v52  ;;  %v7241_v37 = vpop.f32.mrf.mxu3  ;;  %v6977_v34 = vadd.f32 %v6976_v28, %v15039_v3  ;;  %v7065_v42 = vpop.f32.mrf.mxu1 }
 0x9d7   : > { %v7759_v9 = vmul.f32 3.0, %v7695_v59  ;;  %v7242_v44 = vadd.f32 %v7241_v37, %v7153_v53  ;;  %v7066_v33 = vadd.f32 %v7065_v42, %v6977_v34 }
 0x9d9   : > { %7823 = vst [vmem:[%s13730_s23 + $0x1d8] sm:$0xff] %v7759_v9  ;;  %v7371_v48 = vadd.f32 %v7242_v44, %v15040_v45 }
 0x9db   : > { %v7627_v24 = vadd.f32 %v7499_v21, %v7371_v48 }
 0x9dc   : > { %v7154_v61 = vpop.f32.mrf.mxu2 }
 0x9dd   : > { %v7697_v63 = vadd.f32 %v14068_v55, %v7627_v24  ;;  %v7155_v7 = vadd.f32 %v7154_v61, %v7066_v33  ;;  %v7243_v47 = vpop.f32.mrf.mxu3 }
 0x9df   : > { %v7761_v60 = vmul.f32 3.0, %v7697_v63  ;;  %v7244_v29 = vadd.f32 %v7243_v47, %v7155_v7 }
 0x9e1   : > { %7825 = vst [vmem:[%s13730_s23 + $0x1e8] sm:$0xff] %v7761_v60  ;;  %v7373_v23 = vadd.f32 %v7244_v29, %v15041_v31 }
 0x9e3   : > { %v7629_v58 = vadd.f32 %v7501_v0, %v7373_v23 }
 0x9e5   : > { %v7699_v39 = vadd.f32 %v14068_v55, %v7629_v58 }
 0x9e7   : > { %v7763_v16 = vmul.f32 3.0, %v7699_v39 }
 0x9e9   : > { %7827 = vst [vmem:[%s13730_s23 + $0x1f8] sm:$0xff] %v7763_v16 }
 0x9ea   : > { %11128 = shalt.err (!%p11125_p0)
}
 0x9eb   : > { %s11201_s1 = smov 256   ;;  %s11202_s14 = smov 16  }
 0x9ec   : > { %10896 = dma.vmem_to_hbm [thread:$0]  (%p11307_p7), %s7844_s13, 8192, %s7846_s27, %s7829_s18, %s11201_s1, %s11201_s1, %s11202_s14  }
 0x9ed PF: > { %s7860_s2 = sand.u32 1, %s11171_s15   ;;  %p10913_p3 = pnand %p7984_p11, %p11277_p6 }
 0x9ee   : > { %s7861_s6 = scalar_lea.sflag [#allocation5], %s7860_s2 }
 0x9ef   : > { %p10914_p5 = pneg %p10913_p3 }
 0x9f1   : > { %11166 = dma.done.wait (%p10914_p5), %s7861_s6, 8192  }
 0x9f2   : > { %11168 = vsyncadd (%p10914_p5), %s7861_s6, 4294959104  ;;  %s24_s20 = sadd.s32 1, %s11191_s20   ;;  %s15042_s17 = sld [smem:[#allocation16_spill]] }
 0x9f3   : > { %p21_p9 = scmp.ge.s32.totalorder %s24_s20, 4   ;;  %s15043_s30 = sld [smem:[#allocation18_spill]] }
 0x9f4   : > { %s15044_s22 = sld [smem:[#allocation17_spill]]  ;;  %s15045_s15 = smov %s11175_s16 }
 0x9f5   : > { %s15048_s18 = smov %s11187_s19 }
 0x9f6   :  { %23 = sbr.rel (!%p21_p9) target bundleno = 12 (0xc), region = 106 }
 0x9f8   : > { %s15046_s16 = smov %s15042_s17 }
 0x9f9   : > { %s15047_s17 = smov %s15043_s30 }
 0x9fa   : > { %s15049_s19 = smov %s15044_s22 }
 0x9fb   :  { %7867 = vsyncpa [#allocation4], 1 }
 0x9fc   :  { %7869 = vsyncpa [#allocation4 + $0x1], 1 }
 0x9fd   :  { %7870 = vsyncpa [#allocation7], 1 }
 0x9fe   :  { %7871 = vsyncpa [#allocation10], 1 }
 0x9ff   :  { %7873 = vsyncpa [#allocation10 + $0x1], 1 }
 0xa00   :  { %7874 = vsyncpa [#allocation5], 1 }
 0xa01   :  { %7876 = vsyncpa [#allocation5 + $0x1], 1 }

</bundles_post_ra>
